<compile_context>
chip_gen: v7x
topology: tpu7x:2x2x1
jax: 0.10.0
libtpu: 0.0.40
codegen_flags: <defaults>
</compile_context>

<pallas_src>
from functools import partial

import jax
import jax.numpy as jnp
from jax.experimental import pallas as pl
from jax.experimental.pallas import tpu as pltpu

EPS = 1e-5

# Set to jnp.bfloat16 on v6e/v7x at real channel counts for ~2x+ MXU throughput
# (accumulation, BN statistics and the residual path stay f32).  Kept f32 here so the
# toy test holds 1e-4 tolerance; on v5e keep all elementwise math f32 regardless.
MXU_DTYPE = jnp.float32


# ----------------------------------------------------------------- kernel ---

def resblock_kernel(x_ref, w1_ref, g1_ref, be1_ref, w2_ref, g2_ref, be2_ref, o_ref):
    N, H, W, C = x_ref.shape
    NHW = N * H * W
    inv_nhw = 1.0 / NHW

    x = x_ref[...].astype(jnp.float32)                        # (N, H, W, C)

    def pad_hw(a):
        """Zero-pad H and W by 1 via value-level concats (no scratch round-trip)."""
        zw = jnp.zeros((N, H, 1, C), jnp.float32)
        a = jnp.concatenate([zw, a, zw], axis=2)               # (N, H, W+2, C)
        zh = jnp.zeros((N, 1, W + 2, C), jnp.float32)
        return jnp.concatenate([zh, a, zh], axis=1)            # (N, H+2, W+2, C)

    def conv3x3(apad, w_ref):
        """3x3 conv as 3 MXU matmuls (one per kernel row dy), K = 3*C, f32 accumulation.

        Only one (NHW, 3C) per-dy patch is live at a time (3x activation, not 9x).
        The conv bias is intentionally omitted: training-mode BN right after the conv
        subtracts the batch mean, so a per-channel bias cancels exactly.
        """
        acc = None
        for dy in range(3):
            cols = [apad[:, dy:dy + H, dx:dx + W, :].reshape(NHW, C)
                    for dx in range(3)]
            patch = jnp.concatenate(cols, axis=1).astype(MXU_DTYPE)   # (NHW, 3C)
            part = jnp.dot(patch, w_ref[dy].astype(MXU_DTYPE),
                           preferred_element_type=jnp.float32)        # (NHW, C)
            acc = part if acc is None else acc + part
        return acc

    def bn_scale_shift(t, g_ref, be_ref):
        """Training-mode BN folded to per-channel (scale, shift): bn(t) = t*scale + shift.

        Single pass over t: sum and sum-of-squares together, biased variance
        (PyTorch BatchNorm2d right after __init__), eps inside the rsqrt.
        """
        s = jnp.sum(t, axis=0, keepdims=True)                  # (1, C)
        ss = jnp.sum(t * t, axis=0, keepdims=True)             # (1, C)
        mean = s * inv_nhw
        var = jnp.maximum(ss * inv_nhw - mean * mean, 0.0)     # biased, train mode
        scale = g_ref[...] * jax.lax.rsqrt(var + EPS)
        shift = be_ref[...] - mean * scale
        return scale, shift

    # ---- conv1 -> bn1 -> relu (flat (rows, channels) view) -------------------
    t1 = conv3x3(pad_hw(x), w1_ref)                            # (NHW, C)
    s1, h1 = bn_scale_shift(t1, g1_ref, be1_ref)
    y = jnp.maximum(t1 * s1 + h1, 0.0)                         # (NHW, C)

    # ---- conv2 -> bn2 ---------------------------------------------------------
    t2 = conv3x3(pad_hw(y.reshape(N, H, W, C)), w2_ref)        # (NHW, C)
    s2, h2 = bn_scale_shift(t2, g2_ref, be2_ref)

    # ---- bn2 + residual add entirely in the flat (NHW, C) view, then a single
    #      relayout to the lane-dense output slab for an unmasked writeback. ----
    z = t2 * s2 + h2 + x.reshape(NHW, C)                       # (NHW, C)
    o_ref[...] = z.reshape(o_ref.shape).astype(o_ref.dtype)


# ----------------------------------------------------------------- wrapper --

def _perdy_weights(w, C):
    """PyTorch conv weight (Cout, Cin, 3, 3) -> (3, 3*Cin, Cout).

    w_out[dy, dx*Cin + ci, co] = w[co, ci, dy, dx], matching the kernel's per-dy
    patch column order (dx, ci).
    """
    return jnp.transpose(w, (2, 3, 1, 0)).reshape(3, 3 * C, C).astype(jnp.float32)


@partial(jax.jit, static_argnames=("lane_dense",))
def residual_block(x_nchw, params, lane_dense=True):
    """x_nchw: (N, C, H, W) float32. params as produced by init_params()."""
    w1, b1, g1, be1, w2, b2, g2, be2 = params   # b1/b2 unused by the kernel (BN cancels them)
    del b1, b2
    N, C, H, W = x_nchw.shape
    x = jnp.transpose(x_nchw, (0, 2, 3, 1)).astype(jnp.float32)   # -> NHWC (channels on lanes)

    total = N * H * W * C
    if lane_dense and total % 128 == 0:
        out_shape2d = (total // 128, 128)    # lane dim = 128 multiple -> unmasked vst
    else:
        out_shape2d = (N * H * W, C)         # natural flat layout (fallback)

    as_row = lambda v: v.reshape(1, C).astype(jnp.float32)
    vmem = pl.BlockSpec(memory_space=pltpu.MemorySpace.VMEM)   # whole array resident in VMEM

    out2d = pl.pallas_call(
        resblock_kernel,
        out_shape=jax.ShapeDtypeStruct(out_shape2d, jnp.float32),
        in_specs=[vmem] * 7,
        out_specs=vmem,
    )(x,
      _perdy_weights(w1, C), as_row(g1), as_row(be1),
      _perdy_weights(w2, C), as_row(g2), as_row(be2))

    out = out2d.reshape(N, H, W, C)                               # free row-major reshape
    return jnp.transpose(out, (0, 3, 1, 2)).astype(x_nchw.dtype)  # -> NCHW


# ------------------------------------------------------------ param init ----

def init_params(key, channels):
    k1, k2, k3, k4 = jax.random.split(key, 4)
    w1 = 0.1 * jax.random.normal(k1, (channels, channels, 3, 3), jnp.float32)
    b1 = 0.05 * jax.random.normal(k2, (channels,), jnp.float32)
    w2 = 0.1 * jax.random.normal(k3, (channels, channels, 3, 3), jnp.float32)
    b2 = 0.05 * jax.random.normal(k4, (channels,), jnp.float32)
    # BatchNorm2d default init: weight=1, bias=0
    g1 = jnp.ones((channels,), jnp.float32)
    be1 = jnp.zeros((channels,), jnp.float32)
    g2 = jnp.ones((channels,), jnp.float32)
    be2 = jnp.zeros((channels,), jnp.float32)
    return (w1, b1, g1, be1, w2, b2, g2, be2)


# ------------------------------------------------------------ reference -----

def reference(x_nchw, params):
    w1, b1, g1, be1, w2, b2, g2, be2 = params

    def conv(x, w, b):
        y = jax.lax.conv_general_dilated(
            x, w, window_strides=(1, 1), padding=((1, 1), (1, 1)),
            dimension_numbers=('NCHW', 'OIHW', 'NCHW'))
        return y + b[None, :, None, None]

    def bn(x, g, be):
        mean = jnp.mean(x, axis=(0, 2, 3), keepdims=True)
        var = jnp.mean((x - mean) ** 2, axis=(0, 2, 3), keepdims=True)
        return (x - mean) / jnp.sqrt(var + EPS) * g[None, :, None, None] \
            + be[None, :, None, None]

    y = jnp.maximum(bn(conv(x_nchw, w1, b1), g1, be1), 0.0)
    z = bn(conv(y, w2, b2), g2, be2)
    return z + x_nchw


# ------------------------------------------------------------------ main ----

if __name__ == "__main__":
    key = jax.random.PRNGKey(0)
    kx, kp = jax.random.split(key)

    N, C, H, W = 2, 4, 16, 16
    x = jax.random.normal(kx, (N, C, H, W), jnp.float32)
    params = init_params(kp, C)

    try:
        out = jax.block_until_ready(residual_block(x, params))
    except Exception:
        # Defensive fallback: if this Mosaic build rejects the (NHW,C)->(rows,128)
        # lane-densifying shape cast, rerun with the natural flat output layout.
        out = jax.block_until_ready(residual_block(x, params, lane_dense=False))

    ref = jax.block_until_ready(reference(x, params))

    assert out.shape == (N, C, H, W)
    err = jnp.max(jnp.abs(out - ref))
    assert jnp.allclose(out, ref, atol=1e-4, rtol=1e-4), f"max abs err {err}"

    print("KERNEL_OK")
</pallas_src>

<mosaic_0001>
module attributes {stable_mosaic.version = 11 : i64} {
  func.func @resblock_kernel(%arg0: memref<2x16x16x4xf32, #tpu.memory_space<vmem>>, %arg1: memref<3x12x4xf32, #tpu.memory_space<vmem>>, %arg2: memref<1x4xf32, #tpu.memory_space<vmem>>, %arg3: memref<1x4xf32, #tpu.memory_space<vmem>>, %arg4: memref<3x12x4xf32, #tpu.memory_space<vmem>>, %arg5: memref<1x4xf32, #tpu.memory_space<vmem>>, %arg6: memref<1x4xf32, #tpu.memory_space<vmem>>, %arg7: memref<16x128xf32, #tpu.memory_space<vmem>>) attributes {dimension_semantics = [], scalar_prefetch = 0 : i64, scratch_operands = 0 : i64, tpu.core_type = #tpu.core_type<tc>} {
    %c0 = arith.constant 0 : index
    %c0_0 = arith.constant 0 : index
    %c0_1 = arith.constant 0 : index
    %c0_2 = arith.constant 0 : index
    %0 = vector.load %arg0[%c0, %c0_0, %c0_1, %c0_2] : memref<2x16x16x4xf32, #tpu.memory_space<vmem>>, vector<2x16x16x4xf32>
    %cst = arith.constant 0.000000e+00 : f32
    %1 = vector.broadcast %cst : f32 to vector<2x16x1x4xf32>
    %2 = tpu.concatenate %1, %0, %1 in 2 : vector<2x16x1x4xf32>, vector<2x16x16x4xf32>, vector<2x16x1x4xf32> -> vector<2x16x18x4xf32>
    %cst_3 = arith.constant 0.000000e+00 : f32
    %3 = vector.broadcast %cst_3 : f32 to vector<2x1x18x4xf32>
    %4 = tpu.concatenate %3, %2, %3 in 1 : vector<2x1x18x4xf32>, vector<2x16x18x4xf32>, vector<2x1x18x4xf32> -> vector<2x18x18x4xf32>
    %5 = vector.extract_strided_slice %4 {offsets = [0, 0, 0, 0], sizes = [2, 16, 16, 4], strides = [1, 1, 1, 1]} : vector<2x18x18x4xf32> to vector<2x16x16x4xf32>
    %6 = vector.shape_cast %5 : vector<2x16x16x4xf32> to vector<512x4xf32>
    %7 = vector.extract_strided_slice %4 {offsets = [0, 0, 1, 0], sizes = [2, 16, 16, 4], strides = [1, 1, 1, 1]} : vector<2x18x18x4xf32> to vector<2x16x16x4xf32>
    %8 = vector.shape_cast %7 : vector<2x16x16x4xf32> to vector<512x4xf32>
    %9 = vector.extract_strided_slice %4 {offsets = [0, 0, 2, 0], sizes = [2, 16, 16, 4], strides = [1, 1, 1, 1]} : vector<2x18x18x4xf32> to vector<2x16x16x4xf32>
    %10 = vector.shape_cast %9 : vector<2x16x16x4xf32> to vector<512x4xf32>
    %11 = tpu.concatenate %6, %8, %10 in 1 : vector<512x4xf32>, vector<512x4xf32>, vector<512x4xf32> -> vector<512x12xf32>
    %c0_4 = arith.constant 0 : index
    %c0_5 = arith.constant 0 : index
    %c0_6 = arith.constant 0 : index
    %12 = vector.load %arg1[%c0_4, %c0_5, %c0_6] : memref<3x12x4xf32, #tpu.memory_space<vmem>>, vector<1x12x4xf32>
    %13 = vector.shape_cast %12 : vector<1x12x4xf32> to vector<12x4xf32>
    %cst_7 = arith.constant dense<0.000000e+00> : vector<512x4xf32>
    %14 = tpu.matmul %11, %13, %cst_7 {dimension_numbers = #tpu.dot_dimension_numbers<[1], [0], [0], [1], [0, 0, 1, 1], [], []>} : vector<512x12xf32>, vector<12x4xf32>, vector<512x4xf32> -> vector<512x4xf32>
    %15 = vector.extract_strided_slice %4 {offsets = [0, 1, 0, 0], sizes = [2, 16, 16, 4], strides = [1, 1, 1, 1]} : vector<2x18x18x4xf32> to vector<2x16x16x4xf32>
    %16 = vector.shape_cast %15 : vector<2x16x16x4xf32> to vector<512x4xf32>
    %17 = vector.extract_strided_slice %4 {offsets = [0, 1, 1, 0], sizes = [2, 16, 16, 4], strides = [1, 1, 1, 1]} : vector<2x18x18x4xf32> to vector<2x16x16x4xf32>
    %18 = vector.shape_cast %17 : vector<2x16x16x4xf32> to vector<512x4xf32>
    %19 = vector.extract_strided_slice %4 {offsets = [0, 1, 2, 0], sizes = [2, 16, 16, 4], strides = [1, 1, 1, 1]} : vector<2x18x18x4xf32> to vector<2x16x16x4xf32>
    %20 = vector.shape_cast %19 : vector<2x16x16x4xf32> to vector<512x4xf32>
    %21 = tpu.concatenate %16, %18, %20 in 1 : vector<512x4xf32>, vector<512x4xf32>, vector<512x4xf32> -> vector<512x12xf32>
    %c1 = arith.constant 1 : index
    %c0_8 = arith.constant 0 : index
    %c0_9 = arith.constant 0 : index
    %22 = vector.load %arg1[%c1, %c0_8, %c0_9] : memref<3x12x4xf32, #tpu.memory_space<vmem>>, vector<1x12x4xf32>
    %23 = vector.shape_cast %22 : vector<1x12x4xf32> to vector<12x4xf32>
    %cst_10 = arith.constant dense<0.000000e+00> : vector<512x4xf32>
    %24 = tpu.matmul %21, %23, %cst_10 {dimension_numbers = #tpu.dot_dimension_numbers<[1], [0], [0], [1], [0, 0, 1, 1], [], []>} : vector<512x12xf32>, vector<12x4xf32>, vector<512x4xf32> -> vector<512x4xf32>
    %25 = arith.addf %14, %24 : vector<512x4xf32>
    %26 = vector.extract_strided_slice %4 {offsets = [0, 2, 0, 0], sizes = [2, 16, 16, 4], strides = [1, 1, 1, 1]} : vector<2x18x18x4xf32> to vector<2x16x16x4xf32>
    %27 = vector.shape_cast %26 : vector<2x16x16x4xf32> to vector<512x4xf32>
    %28 = vector.extract_strided_slice %4 {offsets = [0, 2, 1, 0], sizes = [2, 16, 16, 4], strides = [1, 1, 1, 1]} : vector<2x18x18x4xf32> to vector<2x16x16x4xf32>
    %29 = vector.shape_cast %28 : vector<2x16x16x4xf32> to vector<512x4xf32>
    %30 = vector.extract_strided_slice %4 {offsets = [0, 2, 2, 0], sizes = [2, 16, 16, 4], strides = [1, 1, 1, 1]} : vector<2x18x18x4xf32> to vector<2x16x16x4xf32>
    %31 = vector.shape_cast %30 : vector<2x16x16x4xf32> to vector<512x4xf32>
    %32 = tpu.concatenate %27, %29, %31 in 1 : vector<512x4xf32>, vector<512x4xf32>, vector<512x4xf32> -> vector<512x12xf32>
    %c2 = arith.constant 2 : index
    %c0_11 = arith.constant 0 : index
    %c0_12 = arith.constant 0 : index
    %33 = vector.load %arg1[%c2, %c0_11, %c0_12] : memref<3x12x4xf32, #tpu.memory_space<vmem>>, vector<1x12x4xf32>
    %34 = vector.shape_cast %33 : vector<1x12x4xf32> to vector<12x4xf32>
    %cst_13 = arith.constant dense<0.000000e+00> : vector<512x4xf32>
    %35 = tpu.matmul %32, %34, %cst_13 {dimension_numbers = #tpu.dot_dimension_numbers<[1], [0], [0], [1], [0, 0, 1, 1], [], []>} : vector<512x12xf32>, vector<12x4xf32>, vector<512x4xf32> -> vector<512x4xf32>
    %36 = arith.addf %25, %35 : vector<512x4xf32>
    %cst_14 = arith.constant dense<0.000000e+00> : vector<4xf32>
    %37 = vector.multi_reduction <add>, %36, %cst_14 [0] : vector<512x4xf32> to vector<4xf32>
    %38 = vector.shape_cast %37 : vector<4xf32> to vector<1x4xf32>
    %39 = arith.mulf %36, %36 : vector<512x4xf32>
    %cst_15 = arith.constant dense<0.000000e+00> : vector<4xf32>
    %40 = vector.multi_reduction <add>, %39, %cst_15 [0] : vector<512x4xf32> to vector<4xf32>
    %41 = vector.shape_cast %40 : vector<4xf32> to vector<1x4xf32>
    %cst_16 = arith.constant 0.001953125 : f32
    %42 = vector.broadcast %cst_16 : f32 to vector<1x4xf32>
    %43 = arith.mulf %38, %42 : vector<1x4xf32>
    %cst_17 = arith.constant 0.001953125 : f32
    %44 = vector.broadcast %cst_17 : f32 to vector<1x4xf32>
    %45 = arith.mulf %41, %44 : vector<1x4xf32>
    %46 = arith.mulf %43, %43 : vector<1x4xf32>
    %47 = arith.subf %45, %46 : vector<1x4xf32>
    %cst_18 = arith.constant 0.000000e+00 : f32
    %48 = vector.broadcast %cst_18 : f32 to vector<1x4xf32>
    %49 = arith.maximumf %47, %48 : vector<1x4xf32>
    %c0_19 = arith.constant 0 : index
    %c0_20 = arith.constant 0 : index
    %50 = vector.load %arg2[%c0_19, %c0_20] : memref<1x4xf32, #tpu.memory_space<vmem>>, vector<1x4xf32>
    %cst_21 = arith.constant 9.99999974E-6 : f32
    %51 = vector.broadcast %cst_21 : f32 to vector<1x4xf32>
    %52 = arith.addf %49, %51 : vector<1x4xf32>
    %53 = math.rsqrt %52 : vector<1x4xf32>
    %54 = arith.mulf %50, %53 : vector<1x4xf32>
    %c0_22 = arith.constant 0 : index
    %c0_23 = arith.constant 0 : index
    %55 = vector.load %arg3[%c0_22, %c0_23] : memref<1x4xf32, #tpu.memory_space<vmem>>, vector<1x4xf32>
    %56 = arith.mulf %43, %54 : vector<1x4xf32>
    %57 = arith.subf %55, %56 : vector<1x4xf32>
    %58 = vector.broadcast %54 : vector<1x4xf32> to vector<512x4xf32>
    %59 = arith.mulf %36, %58 : vector<512x4xf32>
    %60 = vector.broadcast %57 : vector<1x4xf32> to vector<512x4xf32>
    %61 = arith.addf %59, %60 : vector<512x4xf32>
    %cst_24 = arith.constant 0.000000e+00 : f32
    %62 = vector.broadcast %cst_24 : f32 to vector<512x4xf32>
    %63 = arith.maximumf %61, %62 : vector<512x4xf32>
    %64 = vector.shape_cast %63 : vector<512x4xf32> to vector<2x16x16x4xf32>
    %cst_25 = arith.constant 0.000000e+00 : f32
    %65 = vector.broadcast %cst_25 : f32 to vector<2x16x1x4xf32>
    %66 = tpu.concatenate %65, %64, %65 in 2 : vector<2x16x1x4xf32>, vector<2x16x16x4xf32>, vector<2x16x1x4xf32> -> vector<2x16x18x4xf32>
    %cst_26 = arith.constant 0.000000e+00 : f32
    %67 = vector.broadcast %cst_26 : f32 to vector<2x1x18x4xf32>
    %68 = tpu.concatenate %67, %66, %67 in 1 : vector<2x1x18x4xf32>, vector<2x16x18x4xf32>, vector<2x1x18x4xf32> -> vector<2x18x18x4xf32>
    %69 = vector.extract_strided_slice %68 {offsets = [0, 0, 0, 0], sizes = [2, 16, 16, 4], strides = [1, 1, 1, 1]} : vector<2x18x18x4xf32> to vector<2x16x16x4xf32>
    %70 = vector.shape_cast %69 : vector<2x16x16x4xf32> to vector<512x4xf32>
    %71 = vector.extract_strided_slice %68 {offsets = [0, 0, 1, 0], sizes = [2, 16, 16, 4], strides = [1, 1, 1, 1]} : vector<2x18x18x4xf32> to vector<2x16x16x4xf32>
    %72 = vector.shape_cast %71 : vector<2x16x16x4xf32> to vector<512x4xf32>
    %73 = vector.extract_strided_slice %68 {offsets = [0, 0, 2, 0], sizes = [2, 16, 16, 4], strides = [1, 1, 1, 1]} : vector<2x18x18x4xf32> to vector<2x16x16x4xf32>
    %74 = vector.shape_cast %73 : vector<2x16x16x4xf32> to vector<512x4xf32>
    %75 = tpu.concatenate %70, %72, %74 in 1 : vector<512x4xf32>, vector<512x4xf32>, vector<512x4xf32> -> vector<512x12xf32>
    %c0_27 = arith.constant 0 : index
    %c0_28 = arith.constant 0 : index
    %c0_29 = arith.constant 0 : index
    %76 = vector.load %arg4[%c0_27, %c0_28, %c0_29] : memref<3x12x4xf32, #tpu.memory_space<vmem>>, vector<1x12x4xf32>
    %77 = vector.shape_cast %76 : vector<1x12x4xf32> to vector<12x4xf32>
    %cst_30 = arith.constant dense<0.000000e+00> : vector<512x4xf32>
    %78 = tpu.matmul %75, %77, %cst_30 {dimension_numbers = #tpu.dot_dimension_numbers<[1], [0], [0], [1], [0, 0, 1, 1], [], []>} : vector<512x12xf32>, vector<12x4xf32>, vector<512x4xf32> -> vector<512x4xf32>
    %79 = vector.extract_strided_slice %68 {offsets = [0, 1, 0, 0], sizes = [2, 16, 16, 4], strides = [1, 1, 1, 1]} : vector<2x18x18x4xf32> to vector<2x16x16x4xf32>
    %80 = vector.shape_cast %79 : vector<2x16x16x4xf32> to vector<512x4xf32>
    %81 = vector.extract_strided_slice %68 {offsets = [0, 1, 1, 0], sizes = [2, 16, 16, 4], strides = [1, 1, 1, 1]} : vector<2x18x18x4xf32> to vector<2x16x16x4xf32>
    %82 = vector.shape_cast %81 : vector<2x16x16x4xf32> to vector<512x4xf32>
    %83 = vector.extract_strided_slice %68 {offsets = [0, 1, 2, 0], sizes = [2, 16, 16, 4], strides = [1, 1, 1, 1]} : vector<2x18x18x4xf32> to vector<2x16x16x4xf32>
    %84 = vector.shape_cast %83 : vector<2x16x16x4xf32> to vector<512x4xf32>
    %85 = tpu.concatenate %80, %82, %84 in 1 : vector<512x4xf32>, vector<512x4xf32>, vector<512x4xf32> -> vector<512x12xf32>
    %c1_31 = arith.constant 1 : index
    %c0_32 = arith.constant 0 : index
    %c0_33 = arith.constant 0 : index
    %86 = vector.load %arg4[%c1_31, %c0_32, %c0_33] : memref<3x12x4xf32, #tpu.memory_space<vmem>>, vector<1x12x4xf32>
    %87 = vector.shape_cast %86 : vector<1x12x4xf32> to vector<12x4xf32>
    %cst_34 = arith.constant dense<0.000000e+00> : vector<512x4xf32>
    %88 = tpu.matmul %85, %87, %cst_34 {dimension_numbers = #tpu.dot_dimension_numbers<[1], [0], [0], [1], [0, 0, 1, 1], [], []>} : vector<512x12xf32>, vector<12x4xf32>, vector<512x4xf32> -> vector<512x4xf32>
    %89 = arith.addf %78, %88 : vector<512x4xf32>
    %90 = vector.extract_strided_slice %68 {offsets = [0, 2, 0, 0], sizes = [2, 16, 16, 4], strides = [1, 1, 1, 1]} : vector<2x18x18x4xf32> to vector<2x16x16x4xf32>
    %91 = vector.shape_cast %90 : vector<2x16x16x4xf32> to vector<512x4xf32>
    %92 = vector.extract_strided_slice %68 {offsets = [0, 2, 1, 0], sizes = [2, 16, 16, 4], strides = [1, 1, 1, 1]} : vector<2x18x18x4xf32> to vector<2x16x16x4xf32>
    %93 = vector.shape_cast %92 : vector<2x16x16x4xf32> to vector<512x4xf32>
    %94 = vector.extract_strided_slice %68 {offsets = [0, 2, 2, 0], sizes = [2, 16, 16, 4], strides = [1, 1, 1, 1]} : vector<2x18x18x4xf32> to vector<2x16x16x4xf32>
    %95 = vector.shape_cast %94 : vector<2x16x16x4xf32> to vector<512x4xf32>
    %96 = tpu.concatenate %91, %93, %95 in 1 : vector<512x4xf32>, vector<512x4xf32>, vector<512x4xf32> -> vector<512x12xf32>
    %c2_35 = arith.constant 2 : index
    %c0_36 = arith.constant 0 : index
    %c0_37 = arith.constant 0 : index
    %97 = vector.load %arg4[%c2_35, %c0_36, %c0_37] : memref<3x12x4xf32, #tpu.memory_space<vmem>>, vector<1x12x4xf32>
    %98 = vector.shape_cast %97 : vector<1x12x4xf32> to vector<12x4xf32>
    %cst_38 = arith.constant dense<0.000000e+00> : vector<512x4xf32>
    %99 = tpu.matmul %96, %98, %cst_38 {dimension_numbers = #tpu.dot_dimension_numbers<[1], [0], [0], [1], [0, 0, 1, 1], [], []>} : vector<512x12xf32>, vector<12x4xf32>, vector<512x4xf32> -> vector<512x4xf32>
    %100 = arith.addf %89, %99 : vector<512x4xf32>
    %cst_39 = arith.constant dense<0.000000e+00> : vector<4xf32>
    %101 = vector.multi_reduction <add>, %100, %cst_39 [0] : vector<512x4xf32> to vector<4xf32>
    %102 = vector.shape_cast %101 : vector<4xf32> to vector<1x4xf32>
    %103 = arith.mulf %100, %100 : vector<512x4xf32>
    %cst_40 = arith.constant dense<0.000000e+00> : vector<4xf32>
    %104 = vector.multi_reduction <add>, %103, %cst_40 [0] : vector<512x4xf32> to vector<4xf32>
    %105 = vector.shape_cast %104 : vector<4xf32> to vector<1x4xf32>
    %cst_41 = arith.constant 0.001953125 : f32
    %106 = vector.broadcast %cst_41 : f32 to vector<1x4xf32>
    %107 = arith.mulf %102, %106 : vector<1x4xf32>
    %cst_42 = arith.constant 0.001953125 : f32
    %108 = vector.broadcast %cst_42 : f32 to vector<1x4xf32>
    %109 = arith.mulf %105, %108 : vector<1x4xf32>
    %110 = arith.mulf %107, %107 : vector<1x4xf32>
    %111 = arith.subf %109, %110 : vector<1x4xf32>
    %cst_43 = arith.constant 0.000000e+00 : f32
    %112 = vector.broadcast %cst_43 : f32 to vector<1x4xf32>
    %113 = arith.maximumf %111, %112 : vector<1x4xf32>
    %c0_44 = arith.constant 0 : index
    %c0_45 = arith.constant 0 : index
    %114 = vector.load %arg5[%c0_44, %c0_45] : memref<1x4xf32, #tpu.memory_space<vmem>>, vector<1x4xf32>
    %cst_46 = arith.constant 9.99999974E-6 : f32
    %115 = vector.broadcast %cst_46 : f32 to vector<1x4xf32>
    %116 = arith.addf %113, %115 : vector<1x4xf32>
    %117 = math.rsqrt %116 : vector<1x4xf32>
    %118 = arith.mulf %114, %117 : vector<1x4xf32>
    %c0_47 = arith.constant 0 : index
    %c0_48 = arith.constant 0 : index
    %119 = vector.load %arg6[%c0_47, %c0_48] : memref<1x4xf32, #tpu.memory_space<vmem>>, vector<1x4xf32>
    %120 = arith.mulf %107, %118 : vector<1x4xf32>
    %121 = arith.subf %119, %120 : vector<1x4xf32>
    %122 = vector.broadcast %118 : vector<1x4xf32> to vector<512x4xf32>
    %123 = arith.mulf %100, %122 : vector<512x4xf32>
    %124 = vector.broadcast %121 : vector<1x4xf32> to vector<512x4xf32>
    %125 = arith.addf %123, %124 : vector<512x4xf32>
    %126 = vector.shape_cast %0 : vector<2x16x16x4xf32> to vector<512x4xf32>
    %127 = arith.addf %125, %126 : vector<512x4xf32>
    %128 = vector.shape_cast %127 : vector<512x4xf32> to vector<16x128xf32>
    %c0_49 = arith.constant 0 : index
    %c0_50 = arith.constant 0 : index
    %129 = vector.load %arg7[%c0_49, %c0_50] : memref<16x128xf32, #tpu.memory_space<vmem>>, vector<16x128xf32>
    tpu.vector_store %arg7[%c0_49, %c0_50], %128 {strides = array<i32>} : memref<16x128xf32, #tpu.memory_space<vmem>>, vector<16x128xf32>,
    return
  }
}

module attributes {stable_mosaic.version = 11 : i64} {
  func.func @resblock_kernel(%arg0: memref<2x16x16x4xf32, #tpu.memory_space<vmem>>, %arg1: memref<3x12x4xf32, #tpu.memory_space<vmem>>, %arg2: memref<1x4xf32, #tpu.memory_space<vmem>>, %arg3: memref<1x4xf32, #tpu.memory_space<vmem>>, %arg4: memref<3x12x4xf32, #tpu.memory_space<vmem>>, %arg5: memref<1x4xf32, #tpu.memory_space<vmem>>, %arg6: memref<1x4xf32, #tpu.memory_space<vmem>>, %arg7: memref<512x4xf32, #tpu.memory_space<vmem>>) attributes {dimension_semantics = [], scalar_prefetch = 0 : i64, scratch_operands = 0 : i64, tpu.core_type = #tpu.core_type<tc>} {
    %c0 = arith.constant 0 : index
    %c0_0 = arith.constant 0 : index
    %c0_1 = arith.constant 0 : index
    %c0_2 = arith.constant 0 : index
    %0 = vector.load %arg0[%c0, %c0_0, %c0_1, %c0_2] : memref<2x16x16x4xf32, #tpu.memory_space<vmem>>, vector<2x16x16x4xf32>
    %cst = arith.constant 0.000000e+00 : f32
    %1 = vector.broadcast %cst : f32 to vector<2x16x1x4xf32>
    %2 = tpu.concatenate %1, %0, %1 in 2 : vector<2x16x1x4xf32>, vector<2x16x16x4xf32>, vector<2x16x1x4xf32> -> vector<2x16x18x4xf32>
    %cst_3 = arith.constant 0.000000e+00 : f32
    %3 = vector.broadcast %cst_3 : f32 to vector<2x1x18x4xf32>
    %4 = tpu.concatenate %3, %2, %3 in 1 : vector<2x1x18x4xf32>, vector<2x16x18x4xf32>, vector<2x1x18x4xf32> -> vector<2x18x18x4xf32>
    %5 = vector.extract_strided_slice %4 {offsets = [0, 0, 0, 0], sizes = [2, 16, 16, 4], strides = [1, 1, 1, 1]} : vector<2x18x18x4xf32> to vector<2x16x16x4xf32>
    %6 = vector.shape_cast %5 : vector<2x16x16x4xf32> to vector<512x4xf32>
    %7 = vector.extract_strided_slice %4 {offsets = [0, 0, 1, 0], sizes = [2, 16, 16, 4], strides = [1, 1, 1, 1]} : vector<2x18x18x4xf32> to vector<2x16x16x4xf32>
    %8 = vector.shape_cast %7 : vector<2x16x16x4xf32> to vector<512x4xf32>
    %9 = vector.extract_strided_slice %4 {offsets = [0, 0, 2, 0], sizes = [2, 16, 16, 4], strides = [1, 1, 1, 1]} : vector<2x18x18x4xf32> to vector<2x16x16x4xf32>
    %10 = vector.shape_cast %9 : vector<2x16x16x4xf32> to vector<512x4xf32>
    %11 = tpu.concatenate %6, %8, %10 in 1 : vector<512x4xf32>, vector<512x4xf32>, vector<512x4xf32> -> vector<512x12xf32>
    %c0_4 = arith.constant 0 : index
    %c0_5 = arith.constant 0 : index
    %c0_6 = arith.constant 0 : index
    %12 = vector.load %arg1[%c0_4, %c0_5, %c0_6] : memref<3x12x4xf32, #tpu.memory_space<vmem>>, vector<1x12x4xf32>
    %13 = vector.shape_cast %12 : vector<1x12x4xf32> to vector<12x4xf32>
    %cst_7 = arith.constant dense<0.000000e+00> : vector<512x4xf32>
    %14 = tpu.matmul %11, %13, %cst_7 {dimension_numbers = #tpu.dot_dimension_numbers<[1], [0], [0], [1], [0, 0, 1, 1], [], []>} : vector<512x12xf32>, vector<12x4xf32>, vector<512x4xf32> -> vector<512x4xf32>
    %15 = vector.extract_strided_slice %4 {offsets = [0, 1, 0, 0], sizes = [2, 16, 16, 4], strides = [1, 1, 1, 1]} : vector<2x18x18x4xf32> to vector<2x16x16x4xf32>
    %16 = vector.shape_cast %15 : vector<2x16x16x4xf32> to vector<512x4xf32>
    %17 = vector.extract_strided_slice %4 {offsets = [0, 1, 1, 0], sizes = [2, 16, 16, 4], strides = [1, 1, 1, 1]} : vector<2x18x18x4xf32> to vector<2x16x16x4xf32>
    %18 = vector.shape_cast %17 : vector<2x16x16x4xf32> to vector<512x4xf32>
    %19 = vector.extract_strided_slice %4 {offsets = [0, 1, 2, 0], sizes = [2, 16, 16, 4], strides = [1, 1, 1, 1]} : vector<2x18x18x4xf32> to vector<2x16x16x4xf32>
    %20 = vector.shape_cast %19 : vector<2x16x16x4xf32> to vector<512x4xf32>
    %21 = tpu.concatenate %16, %18, %20 in 1 : vector<512x4xf32>, vector<512x4xf32>, vector<512x4xf32> -> vector<512x12xf32>
    %c1 = arith.constant 1 : index
    %c0_8 = arith.constant 0 : index
    %c0_9 = arith.constant 0 : index
    %22 = vector.load %arg1[%c1, %c0_8, %c0_9] : memref<3x12x4xf32, #tpu.memory_space<vmem>>, vector<1x12x4xf32>
    %23 = vector.shape_cast %22 : vector<1x12x4xf32> to vector<12x4xf32>
    %cst_10 = arith.constant dense<0.000000e+00> : vector<512x4xf32>
    %24 = tpu.matmul %21, %23, %cst_10 {dimension_numbers = #tpu.dot_dimension_numbers<[1], [0], [0], [1], [0, 0, 1, 1], [], []>} : vector<512x12xf32>, vector<12x4xf32>, vector<512x4xf32> -> vector<512x4xf32>
    %25 = arith.addf %14, %24 : vector<512x4xf32>
    %26 = vector.extract_strided_slice %4 {offsets = [0, 2, 0, 0], sizes = [2, 16, 16, 4], strides = [1, 1, 1, 1]} : vector<2x18x18x4xf32> to vector<2x16x16x4xf32>
    %27 = vector.shape_cast %26 : vector<2x16x16x4xf32> to vector<512x4xf32>
    %28 = vector.extract_strided_slice %4 {offsets = [0, 2, 1, 0], sizes = [2, 16, 16, 4], strides = [1, 1, 1, 1]} : vector<2x18x18x4xf32> to vector<2x16x16x4xf32>
    %29 = vector.shape_cast %28 : vector<2x16x16x4xf32> to vector<512x4xf32>
    %30 = vector.extract_strided_slice %4 {offsets = [0, 2, 2, 0], sizes = [2, 16, 16, 4], strides = [1, 1, 1, 1]} : vector<2x18x18x4xf32> to vector<2x16x16x4xf32>
    %31 = vector.shape_cast %30 : vector<2x16x16x4xf32> to vector<512x4xf32>
    %32 = tpu.concatenate %27, %29, %31 in 1 : vector<512x4xf32>, vector<512x4xf32>, vector<512x4xf32> -> vector<512x12xf32>
    %c2 = arith.constant 2 : index
    %c0_11 = arith.constant 0 : index
    %c0_12 = arith.constant 0 : index
    %33 = vector.load %arg1[%c2, %c0_11, %c0_12] : memref<3x12x4xf32, #tpu.memory_space<vmem>>, vector<1x12x4xf32>
    %34 = vector.shape_cast %33 : vector<1x12x4xf32> to vector<12x4xf32>
    %cst_13 = arith.constant dense<0.000000e+00> : vector<512x4xf32>
    %35 = tpu.matmul %32, %34, %cst_13 {dimension_numbers = #tpu.dot_dimension_numbers<[1], [0], [0], [1], [0, 0, 1, 1], [], []>} : vector<512x12xf32>, vector<12x4xf32>, vector<512x4xf32> -> vector<512x4xf32>
    %36 = arith.addf %25, %35 : vector<512x4xf32>
    %cst_14 = arith.constant dense<0.000000e+00> : vector<4xf32>
    %37 = vector.multi_reduction <add>, %36, %cst_14 [0] : vector<512x4xf32> to vector<4xf32>
    %38 = vector.shape_cast %37 : vector<4xf32> to vector<1x4xf32>
    %39 = arith.mulf %36, %36 : vector<512x4xf32>
    %cst_15 = arith.constant dense<0.000000e+00> : vector<4xf32>
    %40 = vector.multi_reduction <add>, %39, %cst_15 [0] : vector<512x4xf32> to vector<4xf32>
    %41 = vector.shape_cast %40 : vector<4xf32> to vector<1x4xf32>
    %cst_16 = arith.constant 0.001953125 : f32
    %42 = vector.broadcast %cst_16 : f32 to vector<1x4xf32>
    %43 = arith.mulf %38, %42 : vector<1x4xf32>
    %cst_17 = arith.constant 0.001953125 : f32
    %44 = vector.broadcast %cst_17 : f32 to vector<1x4xf32>
    %45 = arith.mulf %41, %44 : vector<1x4xf32>
    %46 = arith.mulf %43, %43 : vector<1x4xf32>
    %47 = arith.subf %45, %46 : vector<1x4xf32>
    %cst_18 = arith.constant 0.000000e+00 : f32
    %48 = vector.broadcast %cst_18 : f32 to vector<1x4xf32>
    %49 = arith.maximumf %47, %48 : vector<1x4xf32>
    %c0_19 = arith.constant 0 : index
    %c0_20 = arith.constant 0 : index
    %50 = vector.load %arg2[%c0_19, %c0_20] : memref<1x4xf32, #tpu.memory_space<vmem>>, vector<1x4xf32>
    %cst_21 = arith.constant 9.99999974E-6 : f32
    %51 = vector.broadcast %cst_21 : f32 to vector<1x4xf32>
    %52 = arith.addf %49, %51 : vector<1x4xf32>
    %53 = math.rsqrt %52 : vector<1x4xf32>
    %54 = arith.mulf %50, %53 : vector<1x4xf32>
    %c0_22 = arith.constant 0 : index
    %c0_23 = arith.constant 0 : index
    %55 = vector.load %arg3[%c0_22, %c0_23] : memref<1x4xf32, #tpu.memory_space<vmem>>, vector<1x4xf32>
    %56 = arith.mulf %43, %54 : vector<1x4xf32>
    %57 = arith.subf %55, %56 : vector<1x4xf32>
    %58 = vector.broadcast %54 : vector<1x4xf32> to vector<512x4xf32>
    %59 = arith.mulf %36, %58 : vector<512x4xf32>
    %60 = vector.broadcast %57 : vector<1x4xf32> to vector<512x4xf32>
    %61 = arith.addf %59, %60 : vector<512x4xf32>
    %cst_24 = arith.constant 0.000000e+00 : f32
    %62 = vector.broadcast %cst_24 : f32 to vector<512x4xf32>
    %63 = arith.maximumf %61, %62 : vector<512x4xf32>
    %64 = vector.shape_cast %63 : vector<512x4xf32> to vector<2x16x16x4xf32>
    %cst_25 = arith.constant 0.000000e+00 : f32
    %65 = vector.broadcast %cst_25 : f32 to vector<2x16x1x4xf32>
    %66 = tpu.concatenate %65, %64, %65 in 2 : vector<2x16x1x4xf32>, vector<2x16x16x4xf32>, vector<2x16x1x4xf32> -> vector<2x16x18x4xf32>
    %cst_26 = arith.constant 0.000000e+00 : f32
    %67 = vector.broadcast %cst_26 : f32 to vector<2x1x18x4xf32>
    %68 = tpu.concatenate %67, %66, %67 in 1 : vector<2x1x18x4xf32>, vector<2x16x18x4xf32>, vector<2x1x18x4xf32> -> vector<2x18x18x4xf32>
    %69 = vector.extract_strided_slice %68 {offsets = [0, 0, 0, 0], sizes = [2, 16, 16, 4], strides = [1, 1, 1, 1]} : vector<2x18x18x4xf32> to vector<2x16x16x4xf32>
    %70 = vector.shape_cast %69 : vector<2x16x16x4xf32> to vector<512x4xf32>
    %71 = vector.extract_strided_slice %68 {offsets = [0, 0, 1, 0], sizes = [2, 16, 16, 4], strides = [1, 1, 1, 1]} : vector<2x18x18x4xf32> to vector<2x16x16x4xf32>
    %72 = vector.shape_cast %71 : vector<2x16x16x4xf32> to vector<512x4xf32>
    %73 = vector.extract_strided_slice %68 {offsets = [0, 0, 2, 0], sizes = [2, 16, 16, 4], strides = [1, 1, 1, 1]} : vector<2x18x18x4xf32> to vector<2x16x16x4xf32>
    %74 = vector.shape_cast %73 : vector<2x16x16x4xf32> to vector<512x4xf32>
    %75 = tpu.concatenate %70, %72, %74 in 1 : vector<512x4xf32>, vector<512x4xf32>, vector<512x4xf32> -> vector<512x12xf32>
    %c0_27 = arith.constant 0 : index
    %c0_28 = arith.constant 0 : index
    %c0_29 = arith.constant 0 : index
    %76 = vector.load %arg4[%c0_27, %c0_28, %c0_29] : memref<3x12x4xf32, #tpu.memory_space<vmem>>, vector<1x12x4xf32>
    %77 = vector.shape_cast %76 : vector<1x12x4xf32> to vector<12x4xf32>
    %cst_30 = arith.constant dense<0.000000e+00> : vector<512x4xf32>
    %78 = tpu.matmul %75, %77, %cst_30 {dimension_numbers = #tpu.dot_dimension_numbers<[1], [0], [0], [1], [0, 0, 1, 1], [], []>} : vector<512x12xf32>, vector<12x4xf32>, vector<512x4xf32> -> vector<512x4xf32>
    %79 = vector.extract_strided_slice %68 {offsets = [0, 1, 0, 0], sizes = [2, 16, 16, 4], strides = [1, 1, 1, 1]} : vector<2x18x18x4xf32> to vector<2x16x16x4xf32>
    %80 = vector.shape_cast %79 : vector<2x16x16x4xf32> to vector<512x4xf32>
    %81 = vector.extract_strided_slice %68 {offsets = [0, 1, 1, 0], sizes = [2, 16, 16, 4], strides = [1, 1, 1, 1]} : vector<2x18x18x4xf32> to vector<2x16x16x4xf32>
    %82 = vector.shape_cast %81 : vector<2x16x16x4xf32> to vector<512x4xf32>
    %83 = vector.extract_strided_slice %68 {offsets = [0, 1, 2, 0], sizes = [2, 16, 16, 4], strides = [1, 1, 1, 1]} : vector<2x18x18x4xf32> to vector<2x16x16x4xf32>
    %84 = vector.shape_cast %83 : vector<2x16x16x4xf32> to vector<512x4xf32>
    %85 = tpu.concatenate %80, %82, %84 in 1 : vector<512x4xf32>, vector<512x4xf32>, vector<512x4xf32> -> vector<512x12xf32>
    %c1_31 = arith.constant 1 : index
    %c0_32 = arith.constant 0 : index
    %c0_33 = arith.constant 0 : index
    %86 = vector.load %arg4[%c1_31, %c0_32, %c0_33] : memref<3x12x4xf32, #tpu.memory_space<vmem>>, vector<1x12x4xf32>
    %87 = vector.shape_cast %86 : vector<1x12x4xf32> to vector<12x4xf32>
    %cst_34 = arith.constant dense<0.000000e+00> : vector<512x4xf32>
    %88 = tpu.matmul %85, %87, %cst_34 {dimension_numbers = #tpu.dot_dimension_numbers<[1], [0], [0], [1], [0, 0, 1, 1], [], []>} : vector<512x12xf32>, vector<12x4xf32>, vector<512x4xf32> -> vector<512x4xf32>
    %89 = arith.addf %78, %88 : vector<512x4xf32>
    %90 = vector.extract_strided_slice %68 {offsets = [0, 2, 0, 0], sizes = [2, 16, 16, 4], strides = [1, 1, 1, 1]} : vector<2x18x18x4xf32> to vector<2x16x16x4xf32>
    %91 = vector.shape_cast %90 : vector<2x16x16x4xf32> to vector<512x4xf32>
    %92 = vector.extract_strided_slice %68 {offsets = [0, 2, 1, 0], sizes = [2, 16, 16, 4], strides = [1, 1, 1, 1]} : vector<2x18x18x4xf32> to vector<2x16x16x4xf32>
    %93 = vector.shape_cast %92 : vector<2x16x16x4xf32> to vector<512x4xf32>
    %94 = vector.extract_strided_slice %68 {offsets = [0, 2, 2, 0], sizes = [2, 16, 16, 4], strides = [1, 1, 1, 1]} : vector<2x18x18x4xf32> to vector<2x16x16x4xf32>
    %95 = vector.shape_cast %94 : vector<2x16x16x4xf32> to vector<512x4xf32>
    %96 = tpu.concatenate %91, %93, %95 in 1 : vector<512x4xf32>, vector<512x4xf32>, vector<512x4xf32> -> vector<512x12xf32>
    %c2_35 = arith.constant 2 : index
    %c0_36 = arith.constant 0 : index
    %c0_37 = arith.constant 0 : index
    %97 = vector.load %arg4[%c2_35, %c0_36, %c0_37] : memref<3x12x4xf32, #tpu.memory_space<vmem>>, vector<1x12x4xf32>
    %98 = vector.shape_cast %97 : vector<1x12x4xf32> to vector<12x4xf32>
    %cst_38 = arith.constant dense<0.000000e+00> : vector<512x4xf32>
    %99 = tpu.matmul %96, %98, %cst_38 {dimension_numbers = #tpu.dot_dimension_numbers<[1], [0], [0], [1], [0, 0, 1, 1], [], []>} : vector<512x12xf32>, vector<12x4xf32>, vector<512x4xf32> -> vector<512x4xf32>
    %100 = arith.addf %89, %99 : vector<512x4xf32>
    %cst_39 = arith.constant dense<0.000000e+00> : vector<4xf32>
    %101 = vector.multi_reduction <add>, %100, %cst_39 [0] : vector<512x4xf32> to vector<4xf32>
    %102 = vector.shape_cast %101 : vector<4xf32> to vector<1x4xf32>
    %103 = arith.mulf %100, %100 : vector<512x4xf32>
    %cst_40 = arith.constant dense<0.000000e+00> : vector<4xf32>
    %104 = vector.multi_reduction <add>, %103, %cst_40 [0] : vector<512x4xf32> to vector<4xf32>
    %105 = vector.shape_cast %104 : vector<4xf32> to vector<1x4xf32>
    %cst_41 = arith.constant 0.001953125 : f32
    %106 = vector.broadcast %cst_41 : f32 to vector<1x4xf32>
    %107 = arith.mulf %102, %106 : vector<1x4xf32>
    %cst_42 = arith.constant 0.001953125 : f32
    %108 = vector.broadcast %cst_42 : f32 to vector<1x4xf32>
    %109 = arith.mulf %105, %108 : vector<1x4xf32>
    %110 = arith.mulf %107, %107 : vector<1x4xf32>
    %111 = arith.subf %109, %110 : vector<1x4xf32>
    %cst_43 = arith.constant 0.000000e+00 : f32
    %112 = vector.broadcast %cst_43 : f32 to vector<1x4xf32>
    %113 = arith.maximumf %111, %112 : vector<1x4xf32>
    %c0_44 = arith.constant 0 : index
    %c0_45 = arith.constant 0 : index
    %114 = vector.load %arg5[%c0_44, %c0_45] : memref<1x4xf32, #tpu.memory_space<vmem>>, vector<1x4xf32>
    %cst_46 = arith.constant 9.99999974E-6 : f32
    %115 = vector.broadcast %cst_46 : f32 to vector<1x4xf32>
    %116 = arith.addf %113, %115 : vector<1x4xf32>
    %117 = math.rsqrt %116 : vector<1x4xf32>
    %118 = arith.mulf %114, %117 : vector<1x4xf32>
    %c0_47 = arith.constant 0 : index
    %c0_48 = arith.constant 0 : index
    %119 = vector.load %arg6[%c0_47, %c0_48] : memref<1x4xf32, #tpu.memory_space<vmem>>, vector<1x4xf32>
    %120 = arith.mulf %107, %118 : vector<1x4xf32>
    %121 = arith.subf %119, %120 : vector<1x4xf32>
    %122 = vector.broadcast %118 : vector<1x4xf32> to vector<512x4xf32>
    %123 = arith.mulf %100, %122 : vector<512x4xf32>
    %124 = vector.broadcast %121 : vector<1x4xf32> to vector<512x4xf32>
    %125 = arith.addf %123, %124 : vector<512x4xf32>
    %126 = vector.shape_cast %0 : vector<2x16x16x4xf32> to vector<512x4xf32>
    %127 = arith.addf %125, %126 : vector<512x4xf32>
    %c0_49 = arith.constant 0 : index
    %c0_50 = arith.constant 0 : index
    %128 = vector.load %arg7[%c0_49, %c0_50] : memref<512x4xf32, #tpu.memory_space<vmem>>, vector<512x4xf32>
    tpu.vector_store %arg7[%c0_49, %c0_50], %127 {strides = array<i32>} : memref<512x4xf32, #tpu.memory_space<vmem>>, vector<512x4xf32>,
    return
  }
}

</mosaic_0001>

<bundles_post_ra>
// kernel: residual_block.1
= control target key start
LH: loop header
LB: loop body
LE: loop exit
PB: predicated region body
PF: predicated region fallthrough
CT: control target
= control target key end

     0   :  { %vm154_vm0 = vcmask 1040384   ;;  %vm625_vm1 = vcmask 1045504   ;;  %vm472_vm2 = vcmask 1046528   ;;  %s8319_s13 = smov 8   ;;  %s8320_s14 = smov 4   ;;  %vm1522_vm3 = vcmask 1043456   ;;  %s13982_s0 = inlined_call_operand.vmem [shape: f32[2,16,16,4], index: 0, kind: input, shape index: {}]   ;;  %s13983_s1 = inlined_call_operand.vmem [shape: f32[3,12,4], index: 1, kind: input, shape index: {}]   ;;  %s13984_s2 = inlined_call_operand.vmem [shape: f32[1,4], index: 2, kind: input, shape index: {}]   ;;  %s13985_s3 = inlined_call_operand.vmem [shape: f32[1,4], index: 3, kind: input, shape index: {}]   ;;  %s13986_s4 = inlined_call_operand.vmem [shape: f32[3,12,4], index: 4, kind: input, shape index: {}]   ;;  %s13987_s5 = inlined_call_operand.vmem [shape: f32[1,4], index: 5, kind: input, shape index: {}]   ;;  %s13988_s6 = inlined_call_operand.vmem [shape: f32[1,4], index: 6, kind: input, shape index: {}]   ;;  %s13989_s7 = inlined_call_operand.vmem [shape: f32[512,4], index: 7, kind: output, shape index: {}]  }
   0x1   :  { %v26_v0 = vld [vmem:[%s13982_s0] sm:$0xff]  ;;  %v27_v1 = vld [vmem:[%s13982_s0 + $0x8] sm:$0xff]  ;;  %v28_v2 = vld [vmem:[%s13982_s0 + $0x10] sm:$0xff]  ;;  %vm8321_vm4 = vmmov 1   ;;  %vm1144_vm6 = vcmask 31744   ;;  %vm1206_vm7 = vcmask 64512  }
   0x2   :  { %v155_v3 = vrot.slane %v26_v0, 7  ;;  %v156_v4 = vrot.slane %v27_v1, 7  ;;  %v29_v5 = vld [vmem:[%s13982_s0 + $0x18] sm:$0xff]  ;;  %v158_v6 = vrot.slane %v28_v2, 7  ;;  %v30_v16 = vld [vmem:[%s13982_s0 + $0x20] sm:$0xff]  ;;  %v31_v21 = vld [vmem:[%s13982_s0 + $0x28] sm:$0xff] }
   0x3   :  { %v159_v7 = vrot.slane %v29_v5, 7  ;;  %v161_v26 = vrot.slane %v30_v16, 7  ;;  %v162_v30 = vrot.slane %v31_v21, 7  ;;  %v32_v39 = vld [vmem:[%s13982_s0 + $0x30] sm:$0xff]  ;;  %v33_v40 = vld [vmem:[%s13982_s0 + $0x38] sm:$0xff]  ;;  %v34_v56 = vld [vmem:[%s13982_s0 + $0x40] sm:$0xff] }
   0x4   :  { %v8376_v8 = vsel %vm154_vm0, %v155_v3, %v156_v4  ;;  %v8379_v9 = vsel %vm154_vm0, 0.0, %v155_v3  ;;  %v379_v10 = vsel %vm154_vm0, %v156_v4, 0.0  ;;  %v8383_v11 = vsel %vm154_vm0, 0.0, %v158_v6  ;;  %v35_v57 = vld [vmem:[%s13982_s0 + $0x48] sm:$0xff]  ;;  %vm8563_vm5 = vmpackc.low %vm1522_vm3, %vm8321_vm4 }
   0x5   :  { %v628_v12 = vrot.slane %v8379_v9, 2  ;;  %v629_v13 = vrot.slane %v8376_v8, 2  ;;  %v475_v14 = vrot.slane %v8379_v9, 1  ;;  %v476_v15 = vrot.slane %v8376_v8, 1 }
   0x6   :  { %v631_v17 = vrot.slane %v379_v10, 2  ;;  %v478_v18 = vrot.slane %v379_v10, 1  ;;  %v8393_v19 = vsel %vm154_vm0, %v158_v6, %v159_v7  ;;  %v380_v20 = vsel %vm154_vm0, %v159_v7, 0.0  ;;  %v36_v6 = vld [vmem:[%s13982_s0 + $0x50] sm:$0xff] }
   0x7   :  { %v630_v22 = vsel %vm625_vm1, %v628_v12, %v629_v13  ;;  %v477_v23 = vsel %vm472_vm2, %v475_v14, %v476_v15  ;;  %v481_v24 = vrot.slane %v8393_v19, 1  ;;  %v483_v25 = vrot.slane %v380_v20, 1 }
   0x8   :  { %963 = vrot.lane.b32.xlu1 %v630_v22, %s8319_s13  ;;  %780 = vrot.lane.b32.xlu0 %v477_v23, %s8320_s14  ;;  %v632_v27 = vsel %vm625_vm1, %v629_v13, %v631_v17  ;;  %v479_v28 = vsel %vm472_vm2, %v476_v15, %v478_v18  ;;  %v480_v29 = vrot.slane %v8383_v11, 1  ;;  %v634_v32 = vrot.slane %v8393_v19, 2  ;;  %v37_v13 = vld [vmem:[%s13982_s0 + $0x58] sm:$0xff] }
   0x9   :  { %v484_v31 = vsel %vm472_vm2, %v481_v24, %v483_v25  ;;  %v636_v34 = vrot.slane %v380_v20, 2  ;;  %v633_v35 = vrot.slane %v8383_v11, 2  ;;  %v8414_v36 = vsel %vm154_vm0, %v161_v26, %v162_v30 }
   0xa   :  { %v482_v33 = vsel %vm472_vm2, %v480_v29, %v481_v24  ;;  %v381_v37 = vsel %vm154_vm0, %v162_v30, 0.0  ;;  %v8418_v38 = vsel %vm154_vm0, 0.0, %v161_v26  ;;  %v486_v41 = vrot.slane %v8414_v36, 1  ;;  %v38_v30 = vld [vmem:[%s13982_s0 + $0x60] sm:$0xff] }
   0xb   :  { %v637_v42 = vsel %vm625_vm1, %v634_v32, %v636_v34  ;;  %v635_v43 = vsel %vm625_vm1, %v633_v35, %v634_v32  ;;  %v488_v44 = vrot.slane %v381_v37, 1  ;;  %v485_v45 = vrot.slane %v8418_v38, 1 }
   0xc   :  { %965 = vrot.lane.b32.xlu1 %v632_v27, %s8319_s13  ;;  %782 = vrot.lane.b32.xlu0 %v479_v28, %s8320_s14  ;;  %v164_v46 = vrot.slane %v32_v39, 7  ;;  %v165_v47 = vrot.slane %v33_v40, 7  ;;  %v639_v48 = vrot.slane %v8414_v36, 2  ;;  %v641_v49 = vrot.slane %v381_v37, 2 }
   0xd   :  { %v489_v50 = vsel %vm472_vm2, %v486_v41, %v488_v44  ;;  %v487_v51 = vsel %vm472_vm2, %v485_v45, %v486_v41  ;;  %v638_v52 = vrot.slane %v8418_v38, 2  ;;  %v167_v63 = vrot.slane %v34_v56, 7 }
   0xe   :  { %v8439_v53 = vsel %vm154_vm0, %v164_v46, %v165_v47  ;;  %v382_v54 = vsel %vm154_vm0, %v165_v47, 0.0  ;;  %v8443_v55 = vsel %vm154_vm0, 0.0, %v164_v46  ;;  %v642_v58 = vsel %vm625_vm1, %v639_v48, %v641_v49  ;;  %v40_v46 = vld [vmem:[%s13982_s0 + $0x70] sm:$0xff]  ;;  %v41_v47 = vld [vmem:[%s13982_s0 + $0x78] sm:$0xff] }
   0xf   :  { %v640_v59 = vsel %vm625_vm1, %v638_v52, %v639_v48  ;;  %v491_v60 = vrot.slane %v8439_v53, 1  ;;  %v493_v61 = vrot.slane %v382_v54, 1  ;;  %v490_v62 = vrot.slane %v8443_v55, 1 }
  0x10   :  { %786 = vrot.lane.b32.xlu1 %v484_v31, %s8320_s14  ;;  %784 = vrot.lane.b32.xlu0 %v482_v33, %s8320_s14  ;;  %v168_v0 = vrot.slane %v35_v57, 7  ;;  %v644_v1 = vrot.slane %v8439_v53, 2  ;;  %v646_v2 = vrot.slane %v382_v54, 2  ;;  %v643_v5 = vrot.slane %v8443_v55, 2  ;;  %v39_v31 = vld [vmem:[%s13982_s0 + $0x68] sm:$0xff] }
  0x11   :  { %v494_v3 = vsel %vm472_vm2, %v491_v60, %v493_v61  ;;  %v492_v4 = vsel %vm472_vm2, %v490_v62, %v491_v60  ;;  %v8471_v12 = vsel %vm154_vm0, 0.0, %v167_v63  ;;  %v170_v15 = vrot.slane %v36_v6, 7  ;;  %v6561_v6 = vld [vmem:[%s13983_s1 + $0x10] sm:$0xff] }
  0x12   :  { %v8467_v7 = vsel %vm154_vm0, %v167_v63, %v168_v0  ;;  %v383_v10 = vsel %vm154_vm0, %v168_v0, 0.0  ;;  %v647_v14 = vsel %vm625_vm1, %v644_v1, %v646_v2  ;;  %v645_v16 = vsel %vm625_vm1, %v643_v5, %v644_v1  ;;  %v43_v5 = vld [vmem:[%s13982_s0 + $0x88] sm:$0xff] }
  0x13   :  { %v496_v17 = vrot.slane %v8467_v7, 1  ;;  %v498_v18 = vrot.slane %v383_v10, 1  ;;  %v495_v20 = vrot.slane %v8471_v12, 1  ;;  %v171_v21 = vrot.slane %v37_v13, 7 }
  0x14   :  { %969 = vrot.lane.b32.xlu1 %v637_v42, %s8319_s13  ;;  %967 = vrot.lane.b32.xlu0 %v635_v43, %s8319_s13  ;;  %v649_v22 = vrot.slane %v8467_v7, 2  ;;  %v651_v23 = vrot.slane %v383_v10, 2  ;;  %v648_v26 = vrot.slane %v8471_v12, 2  ;;  %v8489_v27 = vsel %vm154_vm0, 0.0, %v170_v15  ;;  %v6562_v10 = vld [vmem:[%s13983_s1 + $0x18] sm:$0xf] }
  0x15   :  { %v499_v24 = vsel %vm472_vm2, %v496_v17, %v498_v18  ;;  %v497_v25 = vsel %vm472_vm2, %v495_v20, %v496_v17  ;;  %v8492_v28 = vsel %vm154_vm0, %v170_v15, %v171_v21  ;;  %v384_v29 = vsel %vm154_vm0, %v171_v21, 0.0 }
  0x16   :  { %v500_v32 = vrot.slane %v8489_v27, 1  ;;  %v652_v33 = vsel %vm625_vm1, %v649_v22, %v651_v23  ;;  %v650_v34 = vsel %vm625_vm1, %v648_v26, %v649_v22  ;;  %v501_v35 = vrot.slane %v8492_v28, 1 }
  0x17   :  { %v503_v37 = vrot.slane %v384_v29, 1  ;;  %v173_v39 = vrot.slane %v38_v30, 7  ;;  %v174_v40 = vrot.slane %v39_v31, 7  ;;  %v654_v41 = vrot.slane %v8492_v28, 2 }
  0x18   :  { %790 = vrot.lane.b32.xlu1 %v489_v50, %s8320_s14  ;;  %788 = vrot.lane.b32.xlu0 %v487_v51, %s8320_s14  ;;  %v656_v42 = vrot.slane %v384_v29, 2  ;;  %v502_v44 = vsel %vm472_vm2, %v500_v32, %v501_v35  ;;  %v653_v45 = vrot.slane %v8489_v27, 2  ;;  %v176_v52 = vrot.slane %v40_v46, 7 }
  0x19   :  { %v504_v43 = vsel %vm472_vm2, %v501_v35, %v503_v37  ;;  %v8520_v48 = vsel %vm154_vm0, %v173_v39, %v174_v40  ;;  %v385_v49 = vsel %vm154_vm0, %v174_v40, 0.0  ;;  %v8524_v50 = vsel %vm154_vm0, 0.0, %v173_v39 }
  0x1a   :  { %v657_v51 = vsel %vm625_vm1, %v654_v41, %v656_v42  ;;  %v177_v54 = vrot.slane %v41_v47, 7  ;;  %v655_v56 = vsel %vm625_vm1, %v653_v45, %v654_v41  ;;  %v506_v57 = vrot.slane %v8520_v48, 1 }
  0x1b   :  { %v659_v60 = vrot.slane %v8520_v48, 2  ;;  %v661_v0 = vrot.slane %v385_v49, 2  ;;  %v658_v1 = vrot.slane %v8524_v50, 2  ;;  %v180_v20 = vrot.slane %v43_v5, 7 }
  0x1c   :  { %973 = vrot.lane.b32.xlu1 %v642_v58, %s8319_s13  ;;  %971 = vrot.lane.b32.xlu0 %v640_v59, %s8319_s13  ;;  %v508_v58 = vrot.slane %v385_v49, 1  ;;  %v505_v59 = vrot.slane %v8524_v50, 1  ;;  %v8536_v61 = vsel %vm154_vm0, %v176_v52, %v177_v54  ;;  %v386_v2 = vsel %vm154_vm0, %v177_v54, 0.0 }
  0x1d   :  { %v511_v13 = vrot.slane %v8536_v61, 1  ;;  %v660_v15 = vsel %vm625_vm1, %v658_v1, %v659_v60  ;;  %v7955_v21 = vpack.c.bf16 %v6562_v10, %v6561_v6  ;;  %v14154_v22 = vmov 0 }
  0x1e   :  { %v509_v62 = vsel %vm472_vm2, %v506_v57, %v508_v58  ;;  %v507_v63 = vsel %vm472_vm2, %v505_v59, %v506_v57  ;;  %v14155_v22 = vsel %vm8563_vm5, 4294967295, %v14154_v22  ;;  %v664_v23 = vrot.slane %v8536_v61, 2 }
  0x1f   :  { %14156 = vst [vmem:[#allocation2_spill] sm:$0xff] %v14155_v22  ;;  %7957 = vmatprep.subr.msk.bf16.mxu0 %vm8563_vm5, %v7955_v21  ;;  %v387_v31 = vsel %vm154_vm0, %v180_v20, 0.0  ;;  %vm1329_vm8 = vcmask 97280  }
  0x20   :  { %794 = vrot.lane.b32.xlu1 %v494_v3, %s8320_s14  ;;  %792 = vrot.lane.b32.xlu0 %v492_v4, %s8320_s14  ;;  %v8543_v3 = vsel %vm154_vm0, 0.0, %v176_v52  ;;  %v42_v4 = vld [vmem:[%s13982_s0 + $0x80] sm:$0xff]  ;;  %v518_v40 = vrot.slane %v387_v31, 1  ;;  %v671_v45 = vrot.slane %v387_v31, 2  ;;  %v47_v52 = vld [vmem:[%s13982_s0 + $0xa8] sm:$0xff] }
  0x21   :  { %v510_v17 = vrot.slane %v8543_v3, 1  ;;  %v179_v18 = vrot.slane %v42_v4, 7  ;;  %v663_v29 = vrot.slane %v8543_v3, 2  ;;  %7960 = vmatpush3.bf16.msk.msra.mxu0 %vm8563_vm5, %v7955_v21 }
  0x23   :  { %v512_v26 = vsel %vm472_vm2, %v510_v17, %v511_v13  ;;  %v8576_v30 = vsel %vm154_vm0, %v179_v18, %v180_v20  ;;  %v8580_v32 = vsel %vm154_vm0, 0.0, %v179_v18  ;;  %v665_v37 = vsel %vm625_vm1, %v663_v29, %v664_v23  ;;  %v49_v17 = vld [vmem:[%s13982_s0 + $0xb8] sm:$0xff] }
  0x24   :  { %977 = vrot.lane.b32.xlu1 %v647_v14, %s8319_s13  ;;  %975 = vrot.lane.b32.xlu0 %v645_v16, %s8319_s13  ;;  %v662_v14 = vsel %vm625_vm1, %v659_v60, %v661_v0  ;;  %v513_v16 = vrot.slane %v386_v2, 1  ;;  %v516_v39 = vrot.slane %v8576_v30, 1  ;;  %v515_v41 = vrot.slane %v8580_v32, 1 }
  0x25   :  { %v668_v49 = vrot.slane %v8580_v32, 2  ;;  %v186_v60 = vrot.slane %v47_v52, 7 }
  0x26   :  { %v519_v46 = vsel %vm472_vm2, %v516_v39, %v518_v40  ;;  %v517_v47 = vsel %vm472_vm2, %v515_v41, %v516_v39  ;;  %v51_v39 = vld [vmem:[%s13982_s0 + $0xc8] sm:$0xff] }
  0x28   :  { %798 = vrot.lane.b32.xlu1 %v499_v24, %s8320_s14  ;;  %796 = vrot.lane.b32.xlu0 %v497_v25, %s8320_s14  ;;  %v666_v24 = vrot.slane %v386_v2, 2  ;;  %v514_v25 = vsel %vm472_vm2, %v511_v13, %v513_v16  ;;  %v48_v16 = vld [vmem:[%s13982_s0 + $0xb0] sm:$0xff] }
  0x2a   :  { %v667_v35 = vsel %vm625_vm1, %v664_v23, %v666_v24 }
  0x2c   :  { %981 = vrot.lane.b32.xlu1 %v652_v33, %s8319_s13  ;;  %979 = vrot.lane.b32.xlu0 %v650_v34, %s8319_s13  ;;  %v44_v33 = vld [vmem:[%s13982_s0 + $0x90] sm:$0xff]  ;;  %v45_v34 = vld [vmem:[%s13982_s0 + $0x98] sm:$0xff] }
  0x2d   :  { %v182_v42 = vrot.slane %v44_v33, 7 }
  0x2f   :  { %v8613_v57 = vsel %vm154_vm0, 0.0, %v182_v42 }
  0x30   :  { %802 = vrot.lane.b32.xlu1 %v504_v43, %s8320_s14  ;;  %800 = vrot.lane.b32.xlu0 %v502_v44, %s8320_s14  ;;  %v183_v43 = vrot.slane %v45_v34, 7  ;;  %v669_v44 = vrot.slane %v8576_v30, 2  ;;  %v520_v1 = vrot.slane %v8613_v57, 1  ;;  %v673_v10 = vrot.slane %v8613_v57, 2 }
  0x32   :  { %v8609_v54 = vsel %vm154_vm0, %v182_v42, %v183_v43  ;;  %v672_v58 = vsel %vm625_vm1, %v669_v44, %v671_v45  ;;  %v192_v45 = vrot.slane %v51_v39, 7 }
  0x33   :  { %v674_v2 = vrot.slane %v8609_v54, 2 }
  0x34   :  { %985 = vrot.lane.b32.xlu1 %v657_v51, %s8319_s13  ;;  %983 = vrot.lane.b32.xlu0 %v655_v56, %s8319_s13  ;;  %v46_v51 = vld [vmem:[%s13982_s0 + $0xa0] sm:$0xff]  ;;  %v388_v56 = vsel %vm154_vm0, %v183_v43, 0.0 }
  0x35   :  { %v185_v59 = vrot.slane %v46_v51, 7  ;;  %v523_v0 = vrot.slane %v388_v56, 1  ;;  %v676_v4 = vrot.slane %v388_v56, 2  ;;  %v675_v21 = vsel %vm625_vm1, %v673_v10, %v674_v2 }
  0x37   :  { %v8628_v13 = vsel %vm154_vm0, %v185_v59, %v186_v60  ;;  %v677_v20 = vsel %vm625_vm1, %v674_v2, %v676_v4  ;;  %v53_v2 = vld [vmem:[%s13982_s0 + $0xd8] sm:$0xff] }
  0x38   :  { %806 = vrot.lane.b32.xlu1 %v509_v62, %s8320_s14  ;;  %804 = vrot.lane.b32.xlu0 %v507_v63, %s8320_s14  ;;  %v670_v62 = vsel %vm625_vm1, %v668_v49, %v669_v44  ;;  %v521_v63 = vrot.slane %v8609_v54, 1  ;;  %v526_v18 = vrot.slane %v8628_v13, 1  ;;  %v679_v29 = vrot.slane %v8628_v13, 2 }
  0x3a   :  { %v524_v5 = vsel %vm472_vm2, %v521_v63, %v523_v0  ;;  %v522_v6 = vsel %vm472_vm2, %v520_v1, %v521_v63  ;;  %v391_v63 = vsel %vm154_vm0, %v192_v45, 0.0  ;;  %v52_v1 = vld [vmem:[%s13982_s0 + $0xd0] sm:$0xff] }
  0x3b   :  { %v538_v10 = vrot.slane %v391_v63, 1 }
  0x3c   :  { %989 = vrot.lane.b32.xlu1 %v662_v14, %s8319_s13  ;;  %987 = vrot.lane.b32.xlu0 %v660_v15, %s8319_s13  ;;  %v389_v14 = vsel %vm154_vm0, %v186_v60, 0.0  ;;  %v8632_v15 = vsel %vm154_vm0, 0.0, %v185_v59 }
  0x3d   :  { %v528_v23 = vrot.slane %v389_v14, 1  ;;  %v525_v24 = vrot.slane %v8632_v15, 1  ;;  %v681_v31 = vrot.slane %v389_v14, 2 }
  0x3f   :  { %v529_v33 = vsel %vm472_vm2, %v526_v18, %v528_v23  ;;  %v527_v34 = vsel %vm472_vm2, %v525_v24, %v526_v18  ;;  %v682_v43 = vsel %vm625_vm1, %v679_v29, %v681_v31 }
  0x40   :  { %810 = vrot.lane.b32.xlu1 %v514_v25, %s8320_s14  ;;  %808 = vrot.lane.b32.xlu0 %v512_v26, %s8320_s14  ;;  %v188_v25 = vrot.slane %v48_v16, 7  ;;  %v189_v26 = vrot.slane %v49_v17, 7  ;;  %v194_v16 = vrot.slane %v52_v1, 7  ;;  %v195_v17 = vrot.slane %v53_v2, 7 }
  0x42   :  { %v8659_v40 = vsel %vm154_vm0, %v188_v25, %v189_v26  ;;  %v390_v41 = vsel %vm154_vm0, %v189_v26, 0.0  ;;  %v8663_v42 = vsel %vm154_vm0, 0.0, %v188_v25  ;;  %v54_v25 = vld [vmem:[%s13982_s0 + $0xe0] sm:$0xff]  ;;  %v55_v26 = vld [vmem:[%s13982_s0 + $0xe8] sm:$0xff]  ;;  %v392_v31 = vsel %vm154_vm0, %v195_v17, 0.0 }
  0x43   :  { %v533_v49 = vrot.slane %v390_v41, 1  ;;  %v530_v51 = vrot.slane %v8663_v42, 1  ;;  %v684_v52 = vrot.slane %v8659_v40, 2  ;;  %v686_v60 = vrot.slane %v390_v41, 2 }
  0x44   :  { %993 = vrot.lane.b32.xlu1 %v667_v35, %s8319_s13  ;;  %991 = vrot.lane.b32.xlu0 %v665_v37, %s8319_s13  ;;  %v678_v35 = vrot.slane %v8632_v15, 2  ;;  %v50_v37 = vld [vmem:[%s13982_s0 + $0xc0] sm:$0xff] }
  0x45   :  { %v191_v44 = vrot.slane %v50_v37, 7  ;;  %v198_v37 = vrot.slane %v55_v26, 7 }
  0x47   :  { %v8675_v56 = vsel %vm154_vm0, %v191_v44, %v192_v45  ;;  %v8682_v0 = vsel %vm154_vm0, 0.0, %v191_v44 }
  0x48   :  { %814 = vrot.lane.b32.xlu1 %v519_v46, %s8320_s14  ;;  %812 = vrot.lane.b32.xlu0 %v517_v47, %s8320_s14  ;;  %v680_v46 = vsel %vm625_vm1, %v678_v35, %v679_v29  ;;  %v531_v47 = vrot.slane %v8659_v40, 1  ;;  %v536_v4 = vrot.slane %v8675_v56, 1  ;;  %v535_v14 = vrot.slane %v8682_v0, 1 }
  0x49   :  { %v689_v18 = vrot.slane %v8675_v56, 2  ;;  %v688_v24 = vrot.slane %v8682_v0, 2  ;;  %v8709_v29 = vsel %vm154_vm0, %v194_v16, %v195_v17  ;;  %v197_v35 = vrot.slane %v54_v25, 7 }
  0x4a   :  { %v532_v59 = vsel %vm472_vm2, %v530_v51, %v531_v47  ;;  %v537_v23 = vsel %vm472_vm2, %v535_v14, %v536_v4  ;;  %v541_v41 = vrot.slane %v8709_v29, 1  ;;  %v694_v45 = vrot.slane %v8709_v29, 2 }
  0x4b   :  { %v690_v39 = vsel %vm625_vm1, %v688_v24, %v689_v18 }
  0x4c   :  { %997 = vrot.lane.b32.xlu1 %v672_v58, %s8319_s13  ;;  %995 = vrot.lane.b32.xlu0 %v670_v62, %s8319_s13  ;;  %v534_v58 = vsel %vm472_vm2, %v531_v47, %v533_v49  ;;  %v683_v62 = vrot.slane %v8663_v42, 2 }
  0x50   :  { %818 = vrot.lane.b32.xlu1 %v524_v5, %s8320_s14  ;;  %816 = vrot.lane.b32.xlu0 %v522_v6, %s8320_s14  ;;  %v687_v5 = vsel %vm625_vm1, %v684_v52, %v686_v60  ;;  %v685_v6 = vsel %vm625_vm1, %v683_v62, %v684_v52  ;;  %v8728_v52 = vsel %vm154_vm0, %v197_v35, %v198_v37  ;;  %v56_v60 = vld [vmem:[%s13982_s0 + $0xf0] sm:$0xff]  ;;  %v57_v62 = vld [vmem:[%s13982_s0 + $0xf8] sm:$0xff] }
  0x51   :  { %v699_v14 = vrot.slane %v8728_v52, 2 }
  0x54   :  { %1001 = vrot.lane.b32.xlu1 %v677_v20, %s8319_s13  ;;  %999 = vrot.lane.b32.xlu0 %v675_v21, %s8319_s13  ;;  %v691_v20 = vrot.slane %v391_v63, 2  ;;  %v539_v21 = vsel %vm472_vm2, %v536_v4, %v538_v10  ;;  %v546_v63 = vrot.slane %v8728_v52, 1  ;;  %v201_v10 = vrot.slane %v57_v62, 7  ;;  %v1268_v62 = vld [vmem:[%s13983_s1] sm:$0xff] }
  0x56   :  { %v394_v25 = vsel %vm154_vm0, %v201_v10, 0.0 }
  0x58   :  { %822 = vrot.lane.b32.xlu1 %v529_v33, %s8320_s14  ;;  %820 = vrot.lane.b32.xlu0 %v527_v34, %s8320_s14  ;;  %v8713_v33 = vsel %vm154_vm0, 0.0, %v194_v16  ;;  %v692_v34 = vsel %vm625_vm1, %v689_v18, %v691_v20 }
  0x59   :  { %v540_v44 = vrot.slane %v8713_v33, 1  ;;  %v693_v51 = vrot.slane %v8713_v33, 2 }
  0x5b   :  { %v542_v49 = vsel %vm472_vm2, %v540_v44, %v541_v41  ;;  %v695_v2 = vsel %vm625_vm1, %v693_v51, %v694_v45  ;;  %v1287_v51 = vrot.slane %v394_v25, 2 }
  0x5c   :  { %1005 = vrot.lane.b32.xlu1 %v682_v43, %s8319_s13  ;;  %1003 = vrot.lane.b32.xlu0 %v680_v46, %s8319_s13  ;;  %v543_v43 = vrot.slane %v392_v31, 1  ;;  %v696_v46 = vrot.slane %v392_v31, 2 }
  0x5e   :  { %v544_v47 = vsel %vm472_vm2, %v541_v41, %v543_v43  ;;  %v697_v1 = vsel %vm625_vm1, %v694_v45, %v696_v46  ;;  %v1277_v41 = vrot.slane %v394_v25, 1 }
  0x60   :  { %826 = vrot.lane.b32.xlu1 %v534_v58, %s8320_s14  ;;  %824 = vrot.lane.b32.xlu0 %v532_v59, %s8320_s14  ;;  %v393_v58 = vsel %vm154_vm0, %v198_v37, 0.0  ;;  %v8732_v59 = vsel %vm154_vm0, 0.0, %v197_v35 }
  0x61   :  { %v548_v4 = vrot.slane %v393_v58, 1  ;;  %v701_v16 = vrot.slane %v393_v58, 2  ;;  %v698_v20 = vrot.slane %v8732_v59, 2 }
  0x63   :  { %v549_v17 = vsel %vm472_vm2, %v546_v63, %v548_v4  ;;  %v702_v31 = vsel %vm625_vm1, %v699_v14, %v701_v16  ;;  %v700_v37 = vsel %vm625_vm1, %v698_v20, %v699_v14  ;;  %v60_v14 = vld [vmem:[%s13982_s0 + $0x110] sm:$0xff]  ;;  %v61_v16 = vld [vmem:[%s13982_s0 + $0x118] sm:$0xff] }
  0x64   :  { %1009 = vrot.lane.b32.xlu1 %v687_v5, %s8319_s13  ;;  %1007 = vrot.lane.b32.xlu0 %v685_v6, %s8319_s13  ;;  %v545_v5 = vrot.slane %v8732_v59, 1  ;;  %v200_v6 = vrot.slane %v56_v60, 7 }
  0x66   :  { %v547_v18 = vsel %vm472_vm2, %v545_v5, %v546_v63  ;;  %v8759_v24 = vsel %vm154_vm0, %v200_v6, %v201_v10  ;;  %v8763_v26 = vsel %vm154_vm0, 0.0, %v200_v6 }
  0x67   :  { %v1274_v43 = vrot.slane %v8763_v26, 1  ;;  %v1284_v58 = vrot.slane %v8763_v26, 2 }
  0x68   :  { %830 = vrot.lane.b32.xlu1 %v539_v21, %s8320_s14  ;;  %828 = vrot.lane.b32.xlu0 %v537_v23, %s8320_s14  ;;  %v58_v21 = vld [vmem:[%s13982_s0 + $0x100] sm:$0xff]  ;;  %v59_v23 = vld [vmem:[%s13982_s0 + $0x108] sm:$0xff] }
  0x69   :  { %v204_v35 = vrot.slane %v59_v23, 7 }
  0x6c   :  { %1013 = vrot.lane.b32.xlu1 %v692_v34, %s8319_s13  ;;  %1011 = vrot.lane.b32.xlu0 %v690_v39, %s8319_s13  ;;  %v203_v34 = vrot.slane %v58_v21, 7  ;;  %v1275_v39 = vrot.slane %v8759_v24, 1 }
  0x6e   :  { %v8781_v60 = vsel %vm154_vm0, %v203_v34, %v204_v35  ;;  %v1278_v63 = vsel %vm472_vm2, %v1275_v39, %v1277_v41  ;;  %v8795_v10 = vsel %vm154_vm0, 0.0, %v203_v34  ;;  %v207_v34 = vrot.slane %v61_v16, 7 }
  0x6f   :  { %v551_v21 = vrot.slane %v8781_v60, 1  ;;  %v550_v25 = vrot.slane %v8795_v10, 1 }
  0x70   :  { %834 = vrot.lane.b32.xlu1 %v544_v47, %s8320_s14  ;;  %832 = vrot.lane.b32.xlu0 %v542_v49, %s8320_s14  ;;  %v1285_v47 = vrot.slane %v8759_v24, 2 }
  0x72   :  { %v1288_v20 = vsel %vm625_vm1, %v1285_v47, %v1287_v51  ;;  %v63_v51 = vld [vmem:[%s13982_s0 + $0x128] sm:$0xff] }
  0x74   :  { %1017 = vrot.lane.b32.xlu1 %v697_v1, %s8319_s13  ;;  %1015 = vrot.lane.b32.xlu0 %v695_v2, %s8319_s13  ;;  %v1276_v1 = vsel %vm472_vm2, %v1274_v43, %v1275_v39  ;;  %v395_v2 = vsel %vm154_vm0, %v204_v35, 0.0  ;;  %v704_v39 = vrot.slane %v8781_v60, 2 }
  0x75   :  { %v553_v23 = vrot.slane %v395_v2, 1  ;;  %v706_v41 = vrot.slane %v395_v2, 2 }
  0x77   :  { %v554_v43 = vsel %vm472_vm2, %v551_v21, %v553_v23 }
  0x78   :  { %838 = vrot.lane.b32.xlu1 %v549_v17, %s8320_s14  ;;  %836 = vrot.lane.b32.xlu0 %v547_v18, %s8320_s14 }
  0x7a   :  { %v964_v44 = vpop.permute.xlu1 %963  ;;  %v781_v45 = vpop.permute.xlu0 %780 }
  0x7b   :  { %v1146_v46 = vsel %vm1144_vm6, %v8379_v9, %v781_v45  ;;  %v1269_v9 = vld [vmem:[%s13983_s1 + $0x8] sm:$0xf]  ;;  %v703_v45 = vrot.slane %v8795_v10, 2 }
  0x7c   :  { %1021 = vrot.lane.b32.xlu1 %v702_v31, %s8319_s13  ;;  %1019 = vrot.lane.b32.xlu0 %v700_v37, %s8319_s13  ;;  %v8777_v49 = vsel %vm1206_vm7, %v1146_v46, %v964_v44  ;;  %v7961_v4 = vpack.c.bf16 %v1269_v9, %v1268_v62  ;;  %v206_v31 = vrot.slane %v60_v14, 7  ;;  %v552_v44 = vsel %vm472_vm2, %v550_v25, %v551_v21 }
  0x7d   :  { %7359 = vmatprep.mubr.msk.f32.mxu0 %vm1329_vm8, %v8777_v49  ;;  %v705_v14 = vsel %vm625_vm1, %v703_v45, %v704_v39 }
  0x7e   :  { %v966_v5 = vpop.permute.xlu1 %965  ;;  %v783_v6 = vpop.permute.xlu0 %782  ;;  %7963 = vmatprep.subr.msk.bf16.mxu0 %vm8563_vm5, %v7961_v4  ;;  %v8827_v46 = vsel %vm154_vm0, %v206_v31, %v207_v34  ;;  %v8841_v2 = vsel %vm154_vm0, 0.0, %v206_v31 }
  0x7f   :  { %v1147_v17 = vsel %vm1144_vm6, %v8376_v8, %v783_v6  ;;  %v1286_v8 = vsel %vm625_vm1, %v1284_v58, %v1285_v47  ;;  %v62_v47 = vld [vmem:[%s13982_s0 + $0x120] sm:$0xff]  ;;  %v210_v6 = vrot.slane %v63_v51, 7  ;;  %v556_v16 = vrot.slane %v8827_v46, 1 }
  0x80   :  { %1296 = vrot.lane.b32.xlu1 %v1278_v63, %s8320_s14  ;;  %1294 = vrot.lane.b32.xlu0 %v1276_v1, %s8320_s14  ;;  %v8810_v18 = vsel %vm1206_vm7, %v1147_v17, %v966_v5  ;;  %v396_v1 = vsel %vm154_vm0, %v207_v34, 0.0 }
  0x81   :  { %7360 = vmatmul.mubr.msk.f32.vlgmr.msra.gmra.mrb[0].mxu0 %vm1329_vm8, %v8810_v18  ;;  %v558_v17 = vrot.slane %v396_v1, 1 }
  0x82   :  { %v787_v35 = vpop.permute.xlu1 %786  ;;  %v785_v37 = vpop.permute.xlu0 %784  ;;  %7966 = vmatpush3.bf16.msk.msra.mxu0 %vm8563_vm5, %v7961_v4 }
  0x83   :  { %v1149_v58 = vsel %vm1144_vm6, %v8393_v19, %v787_v35  ;;  %v1148_v62 = vsel %vm1144_vm6, %v8383_v11, %v785_v37  ;;  %v707_v19 = vsel %vm625_vm1, %v704_v39, %v706_v41  ;;  %v209_v11 = vrot.slane %v62_v47, 7  ;;  %v64_v39 = vld [vmem:[%s13982_s0 + $0x130] sm:$0xff] }
  0x84   :  { %1308 = vrot.lane.b32.xlu1 %v1288_v20, %s8319_s13  ;;  %1306 = vrot.lane.b32.xlu0 %v1286_v8, %s8319_s13  ;;  %v555_v20 = vrot.slane %v8841_v2, 1  ;;  %v709_v8 = vrot.slane %v8827_v46, 2  ;;  %v559_v31 = vsel %vm472_vm2, %v556_v16, %v558_v17  ;;  %v711_v35 = vrot.slane %v396_v1, 2 }
  0x85   :  { %v8863_v25 = vsel %vm154_vm0, %v209_v11, %v210_v6  ;;  %v708_v37 = vrot.slane %v8841_v2, 2  ;;  %v397_v47 = vsel %vm154_vm0, %v210_v6, 0.0  ;;  %v8877_v51 = vsel %vm154_vm0, 0.0, %v209_v11 }
  0x86   :  { %v970_v9 = vpop.permute.xlu1 %969  ;;  %v968_v63 = vpop.permute.xlu0 %967  ;;  %v557_v34 = vsel %vm472_vm2, %v555_v20, %v556_v16  ;;  %v560_v11 = vrot.slane %v8877_v51, 1  ;;  %v714_v17 = vrot.slane %v8863_v25, 2  ;;  %v716_v20 = vrot.slane %v397_v47, 2 }
  0x87   :  { %v8844_v4 = vsel %vm1206_vm7, %v1149_v58, %v970_v9  ;;  %v8847_v5 = vsel %vm1206_vm7, %v1148_v62, %v968_v63  ;;  %v212_v9 = vrot.slane %v64_v39, 7  ;;  %v712_v63 = vsel %vm625_vm1, %v709_v8, %v711_v35  ;;  %v67_v35 = vld [vmem:[%s13982_s0 + $0x148] sm:$0xff] }
  0x88   :  { %842 = vrot.lane.b32.xlu1 %v554_v43, %s8320_s14  ;;  %840 = vrot.lane.b32.xlu0 %v552_v44, %s8320_s14  ;;  %v710_v1 = vsel %vm625_vm1, %v708_v37, %v709_v8  ;;  %v713_v8 = vrot.slane %v8877_v51, 2 }
  0x89   :  { %7362 = vmatprep.mubr.msk.f32.mxu0 %vm1329_vm8, %v8847_v5 }
  0x8a   :  { %7363 = vmatmul.mubr.msk.f32.gmra.mrb[2].mxu0 %vm1329_vm8, %v8844_v4  ;;  %v791_v21 = vpop.permute.xlu1 %790  ;;  %v789_v23 = vpop.permute.xlu0 %788 }
  0x8b   :  { %v1151_v41 = vsel %vm1144_vm6, %v8414_v36, %v791_v21  ;;  %v1150_v43 = vsel %vm1144_vm6, %v8418_v38, %v789_v23  ;;  %v65_v36 = vld [vmem:[%s13982_s0 + $0x138] sm:$0xff]  ;;  %v561_v38 = vrot.slane %v8863_v25, 1 }
  0x8c   :  { %1025 = vrot.lane.b32.xlu1 %v707_v19, %s8319_s13  ;;  %1023 = vrot.lane.b32.xlu0 %v705_v14, %s8319_s13  ;;  %v563_v19 = vrot.slane %v397_v47, 1  ;;  %v213_v16 = vrot.slane %v65_v36, 7 }
  0x8d   :  { %v562_v23 = vsel %vm472_vm2, %v560_v11, %v561_v38 }
  0x8e   :  { %v974_v44 = vpop.permute.xlu1 %973  ;;  %v972_v45 = vpop.permute.xlu0 %971  ;;  %v564_v21 = vsel %vm472_vm2, %v561_v38, %v563_v19  ;;  %v216_v38 = vrot.slane %v67_v35, 7 }
  0x8f   :  { %v8880_v58 = vsel %vm1206_vm7, %v1151_v41, %v974_v44  ;;  %v8883_v62 = vsel %vm1206_vm7, %v1150_v43, %v972_v45  ;;  %v8918_v44 = vsel %vm154_vm0, %v212_v9, %v213_v16  ;;  %v398_v45 = vsel %vm154_vm0, %v213_v16, 0.0 }
  0x90   :  { %846 = vrot.lane.b32.xlu1 %v559_v31, %s8320_s14  ;;  %844 = vrot.lane.b32.xlu0 %v557_v34, %s8320_s14  ;;  %v8905_v31 = vsel %vm154_vm0, 0.0, %v212_v9  ;;  %v66_v34 = vld [vmem:[%s13982_s0 + $0x140] sm:$0xff]  ;;  %v715_v9 = vsel %vm625_vm1, %v713_v8, %v714_v17  ;;  %v721_v16 = vrot.slane %v398_v45, 2  ;;  %v399_v8 = vsel %vm154_vm0, %v216_v38, 0.0 }
  0x91   :  { %7365 = vmatprep.mubr.msk.f32.mxu0 %vm1329_vm8, %v8883_v62  ;;  %v565_v19 = vrot.slane %v8905_v31, 1 }
  0x92   :  { %7366 = vmatmul.mubr.msk.f32.gmra.mrb[4].mxu0 %vm1329_vm8, %v8880_v58  ;;  %v795_v6 = vpop.permute.xlu1 %794  ;;  %v793_v14 = vpop.permute.xlu0 %792 }
  0x93   :  { %v1153_v37 = vsel %vm1144_vm6, %v8439_v53, %v795_v6  ;;  %v1152_v39 = vsel %vm1144_vm6, %v8443_v55, %v793_v14  ;;  %v717_v53 = vsel %vm625_vm1, %v714_v17, %v716_v20  ;;  %v215_v55 = vrot.slane %v66_v34, 7 }
  0x94   :  { %1029 = vrot.lane.b32.xlu1 %v712_v63, %s8319_s13  ;;  %1027 = vrot.lane.b32.xlu0 %v710_v1, %s8319_s13  ;;  %v566_v63 = vrot.slane %v8918_v44, 1  ;;  %v568_v1 = vrot.slane %v398_v45, 1  ;;  %v719_v14 = vrot.slane %v8918_v44, 2  ;;  %v718_v20 = vrot.slane %v8905_v31, 2  ;;  %v69_v45 = vld [vmem:[%s13982_s0 + $0x158] sm:$0xff] }
  0x96   :  { %v978_v41 = vpop.permute.xlu1 %977  ;;  %v976_v43 = vpop.permute.xlu0 %975  ;;  %v569_v17 = vsel %vm472_vm2, %v566_v63, %v568_v1 }
  0x97   :  { %v8922_v47 = vsel %vm1206_vm7, %v1153_v37, %v978_v41  ;;  %v8925_v36 = vsel %vm1206_vm7, %v1152_v39, %v976_v43  ;;  %v8952_v41 = vsel %vm154_vm0, 0.0, %v215_v55  ;;  %v68_v43 = vld [vmem:[%s13982_s0 + $0x150] sm:$0xff] }
  0x98   :  { %850 = vrot.lane.b32.xlu1 %v564_v21, %s8320_s14  ;;  %848 = vrot.lane.b32.xlu0 %v562_v23, %s8320_s14  ;;  %v567_v21 = vsel %vm472_vm2, %v565_v19, %v566_v63  ;;  %v8944_v23 = vsel %vm154_vm0, %v215_v55, %v216_v38  ;;  %v573_v38 = vrot.slane %v399_v8, 1  ;;  %v570_v63 = vrot.slane %v8952_v41, 1 }
  0x99   :  { %7368 = vmatprep.mubr.msk.f32.mxu0 %vm1329_vm8, %v8925_v36  ;;  %v571_v55 = vrot.slane %v8944_v23, 1  ;;  %v218_v1 = vrot.slane %v68_v43, 7  ;;  %v219_v19 = vrot.slane %v69_v45, 7 }
  0x9a   :  { %7369 = vmatmul.mubr.msk.f32.gmra.mrb[6].mxu0 %vm1329_vm8, %v8922_v47  ;;  %v799_v11 = vpop.permute.xlu1 %798  ;;  %v797_v6 = vpop.permute.xlu0 %796 }
  0x9b   :  { %v1155_v34 = vsel %vm1144_vm6, %v8467_v7, %v799_v11  ;;  %v1154_v35 = vsel %vm1144_vm6, %v8471_v12, %v797_v6  ;;  %v722_v12 = vsel %vm625_vm1, %v719_v14, %v721_v16  ;;  %v724_v16 = vrot.slane %v8944_v23, 2 }
  0x9c   :  { %1033 = vrot.lane.b32.xlu1 %v717_v53, %s8319_s13  ;;  %1031 = vrot.lane.b32.xlu0 %v715_v9, %s8319_s13  ;;  %v720_v9 = vsel %vm625_vm1, %v718_v20, %v719_v14  ;;  %v572_v14 = vsel %vm472_vm2, %v570_v63, %v571_v55  ;;  %v723_v20 = vrot.slane %v8952_v41, 2 }
  0x9e   :  { %v982_v37 = vpop.permute.xlu1 %981  ;;  %v980_v39 = vpop.permute.xlu0 %979 }
  0x9f   :  { %v8961_v53 = vsel %vm1206_vm7, %v1155_v34, %v982_v37  ;;  %v8964_v7 = vsel %vm1206_vm7, %v1154_v35, %v980_v39  ;;  %v8983_v34 = vsel %vm154_vm0, %v218_v1, %v219_v19  ;;  %v70_v35 = vld [vmem:[%s13982_s0 + $0x160] sm:$0xff]  ;;  %v71_v37 = vld [vmem:[%s13982_s0 + $0x168] sm:$0xff] }
  0xa0   :  { %854 = vrot.lane.b32.xlu1 %v569_v17, %s8320_s14  ;;  %852 = vrot.lane.b32.xlu0 %v567_v21, %s8320_s14  ;;  %v726_v17 = vrot.slane %v399_v8, 2  ;;  %v574_v21 = vsel %vm472_vm2, %v571_v55, %v573_v38  ;;  %v8997_v55 = vsel %vm154_vm0, 0.0, %v218_v1  ;;  %v222_v63 = vrot.slane %v71_v37, 7 }
  0xa1   :  { %7371 = vmatprep.mubr.msk.f32.mxu0 %vm1329_vm8, %v8964_v7  ;;  %v725_v1 = vsel %vm625_vm1, %v723_v20, %v724_v16  ;;  %v728_v37 = vrot.slane %v8997_v55, 2 }
  0xa2   :  { %7372 = vmatmul.mubr.msk.f32.gmra.mrb[8].mxu0 %vm1329_vm8, %v8961_v53  ;;  %v803_v11 = vpop.permute.xlu1 %802  ;;  %v801_v6 = vpop.permute.xlu0 %800 }
  0xa3   :  { %v1157_v8 = vsel %vm1144_vm6, %v8492_v28, %v803_v11  ;;  %v1156_v39 = vsel %vm1144_vm6, %v8489_v27, %v801_v6  ;;  %v727_v28 = vsel %vm625_vm1, %v724_v16, %v726_v17  ;;  %v221_v27 = vrot.slane %v70_v35, 7 }
  0xa4   :  { %1037 = vrot.lane.b32.xlu1 %v722_v12, %s8319_s13  ;;  %1035 = vrot.lane.b32.xlu0 %v720_v9, %s8319_s13  ;;  %v400_v12 = vsel %vm154_vm0, %v219_v19, 0.0  ;;  %v576_v19 = vrot.slane %v8983_v34, 1  ;;  %v575_v6 = vrot.slane %v8997_v55, 1  ;;  %v729_v17 = vrot.slane %v8983_v34, 2 }
  0xa5   :  { %v578_v11 = vrot.slane %v400_v12, 1  ;;  %v731_v35 = vrot.slane %v400_v12, 2 }
  0xa6   :  { %v986_v43 = vpop.permute.xlu1 %985  ;;  %v984_v45 = vpop.permute.xlu0 %983  ;;  %v577_v20 = vsel %vm472_vm2, %v575_v6, %v576_v19  ;;  %v730_v6 = vsel %vm625_vm1, %v728_v37, %v729_v17 }
  0xa7   :  { %v9000_v38 = vsel %vm1206_vm7, %v1157_v8, %v986_v43  ;;  %v9003_v9 = vsel %vm1206_vm7, %v1156_v39, %v984_v45  ;;  %v579_v16 = vsel %vm472_vm2, %v576_v19, %v578_v11  ;;  %v72_v39 = vld [vmem:[%s13982_s0 + $0x170] sm:$0xff]  ;;  %v9033_v11 = vsel %vm154_vm0, 0.0, %v221_v27 }
  0xa8   :  { %14157 = vst [vmem:[#allocation3_spill] sm:$0xff] %v9000_v38  ;;  %858 = vrot.lane.b32.xlu1 %v574_v21, %s8320_s14  ;;  %856 = vrot.lane.b32.xlu0 %v572_v14, %s8320_s14  ;;  %v9019_v14 = vsel %vm154_vm0, %v221_v27, %v222_v63  ;;  %v732_v27 = vsel %vm625_vm1, %v729_v17, %v731_v35  ;;  %v733_v37 = vrot.slane %v9033_v11, 2 }
  0xa9   :  { %7374 = vmatprep.mubr.msk.f32.mxu0 %vm1329_vm8, %v9003_v9 }
  0xaa   :  { %7375 = vmatmul.mubr.msk.f32.gmra.mrb[10].mxu0 %vm1329_vm8, %v9000_v38  ;;  %v807_v21 = vpop.permute.xlu1 %806  ;;  %v805_v8 = vpop.permute.xlu0 %804  ;;  %v401_v38 = vsel %vm154_vm0, %v222_v63, 0.0  ;;  %v224_v63 = vrot.slane %v72_v39, 7 }
  0xab   :  { %v1159_v43 = vsel %vm1144_vm6, %v8520_v48, %v807_v21  ;;  %v1158_v45 = vsel %vm1144_vm6, %v8524_v50, %v805_v8  ;;  %v73_v48 = vld [vmem:[%s13982_s0 + $0x178] sm:$0xff]  ;;  %v581_v50 = vrot.slane %v9019_v14, 1  ;;  %v583_v21 = vrot.slane %v401_v38, 1 }
  0xac   :  { %1041 = vrot.lane.b32.xlu1 %v727_v28, %s8319_s13  ;;  %1039 = vrot.lane.b32.xlu0 %v725_v1, %s8319_s13  ;;  %v580_v8 = vrot.slane %v9033_v11, 1  ;;  %v736_v39 = vrot.slane %v401_v38, 2 }
  0xad   :  { %v584_v35 = vsel %vm472_vm2, %v581_v50, %v583_v21 }
  0xae   :  { %v990_v28 = vpop.permute.xlu1 %989  ;;  %v988_v1 = vpop.permute.xlu0 %987  ;;  %v582_v17 = vsel %vm472_vm2, %v580_v8, %v581_v50 }
  0xaf   :  { %v9036_v12 = vsel %vm1206_vm7, %v1159_v43, %v990_v28  ;;  %v9039_v19 = vsel %vm1206_vm7, %v1158_v45, %v988_v1  ;;  %v225_v45 = vrot.slane %v73_v48, 7  ;;  %v9061_v28 = vsel %vm154_vm0, 0.0, %v224_v63  ;;  %v74_v1 = vld [vmem:[%s13982_s0 + $0x180] sm:$0xff]  ;;  %v75_v48 = vld [vmem:[%s13982_s0 + $0x188] sm:$0xff] }
  0xb0   :  { %14158 = vst [vmem:[#allocation4_spill] sm:$0xff] %v9036_v12  ;;  %14159 = vst [vmem:[#allocation5_spill] sm:$0xff] %v9039_v19  ;;  %862 = vrot.lane.b32.xlu1 %v579_v16, %s8320_s14  ;;  %860 = vrot.lane.b32.xlu0 %v577_v20, %s8320_s14  ;;  %v734_v20 = vrot.slane %v9019_v14, 2 }
  0xb1   :  { %7377 = vmatprep.mubr.msk.f32.mxu0 %vm1329_vm8, %v9039_v19  ;;  %v9074_v21 = vsel %vm154_vm0, %v224_v63, %v225_v45  ;;  %v402_v8 = vsel %vm154_vm0, %v225_v45, 0.0 }
  0xb2   :  { %7378 = vmatmul.mubr.msk.f32.gmra.mrb[12].mxu0 %vm1329_vm8, %v9036_v12  ;;  %v811_v43 = vpop.permute.xlu1 %810  ;;  %v809_v16 = vpop.permute.xlu0 %808  ;;  %v735_v63 = vsel %vm625_vm1, %v733_v37, %v734_v20  ;;  %v588_v45 = vrot.slane %v402_v8, 1 }
  0xb3   :  { %v1161_v38 = vsel %vm1144_vm6, %v8536_v61, %v811_v43  ;;  %v737_v61 = vsel %vm625_vm1, %v734_v20, %v736_v39  ;;  %v228_v43 = vrot.slane %v75_v48, 7  ;;  %v739_v39 = vrot.slane %v9074_v21, 2 }
  0xb4   :  { %1045 = vrot.lane.b32.xlu1 %v732_v27, %s8319_s13  ;;  %1043 = vrot.lane.b32.xlu0 %v730_v6, %s8319_s13  ;;  %v1160_v27 = vsel %vm1144_vm6, %v8543_v3, %v809_v16  ;;  %v227_v3 = vrot.slane %v74_v1, 7  ;;  %v586_v16 = vrot.slane %v9074_v21, 1  ;;  %v738_v1 = vrot.slane %v9061_v28, 2 }
  0xb6   :  { %v994_v50 = vpop.permute.xlu1 %993  ;;  %v992_v6 = vpop.permute.xlu0 %991  ;;  %v589_v20 = vsel %vm472_vm2, %v586_v16, %v588_v45  ;;  %v9100_v48 = vsel %vm154_vm0, %v227_v3, %v228_v43  ;;  %v77_v45 = vld [vmem:[%s13982_s0 + $0x198] sm:$0xff] }
  0xb7   :  { %v9078_v12 = vsel %vm1206_vm7, %v1161_v38, %v994_v50  ;;  %v9081_v19 = vsel %vm1206_vm7, %v1160_v27, %v992_v6  ;;  %v585_v38 = vrot.slane %v9061_v28, 1  ;;  %v403_v50 = vsel %vm154_vm0, %v228_v43, 0.0 }
  0xb8   :  { %14160 = vst [vmem:[#allocation6_spill] sm:$0xff] %v9078_v12  ;;  %14161 = vst [vmem:[#allocation7_spill] sm:$0xff] %v9081_v19  ;;  %866 = vrot.lane.b32.xlu1 %v584_v35, %s8320_s14  ;;  %864 = vrot.lane.b32.xlu0 %v582_v17, %s8320_s14  ;;  %v741_v17 = vrot.slane %v402_v8, 2  ;;  %v9108_v8 = vsel %vm154_vm0, 0.0, %v227_v3  ;;  %v591_v3 = vrot.slane %v9100_v48, 1 }
  0xb9   :  { %7380 = vmatprep.mubr.msk.f32.mxu0 %vm1329_vm8, %v9081_v19  ;;  %v587_v37 = vsel %vm472_vm2, %v585_v38, %v586_v16  ;;  %v76_v16 = vld [vmem:[%s13982_s0 + $0x190] sm:$0xff]  ;;  %v593_v38 = vrot.slane %v403_v50, 1 }
  0xba   :  { %7381 = vmatmul.mubr.msk.f32.gmra.mrb[14].mxu0 %vm1329_vm8, %v9078_v12  ;;  %v815_v35 = vpop.permute.xlu1 %814  ;;  %v813_v27 = vpop.permute.xlu0 %812 }
  0xbb   :  { %v1163_v6 = vsel %vm1144_vm6, %v8576_v30, %v815_v35  ;;  %v740_v35 = vsel %vm625_vm1, %v738_v1, %v739_v39  ;;  %v743_v1 = vrot.slane %v9108_v8, 2 }
  0xbc   :  { %1049 = vrot.lane.b32.xlu1 %v737_v61, %s8319_s13  ;;  %1047 = vrot.lane.b32.xlu0 %v735_v63, %s8319_s13  ;;  %v1162_v61 = vsel %vm1144_vm6, %v8580_v32, %v813_v27  ;;  %v742_v32 = vsel %vm625_vm1, %v739_v39, %v741_v17  ;;  %v590_v27 = vrot.slane %v9108_v8, 1  ;;  %v744_v17 = vrot.slane %v9100_v48, 2 }
  0xbe   :  { %v998_v63 = vpop.permute.xlu1 %997  ;;  %v996_v12 = vpop.permute.xlu0 %995  ;;  %v592_v39 = vsel %vm472_vm2, %v590_v27, %v591_v3 }
  0xbf   :  { %v9117_v43 = vsel %vm1206_vm7, %v1163_v6, %v998_v63  ;;  %v9120_v30 = vsel %vm1206_vm7, %v1162_v61, %v996_v12  ;;  %v230_v6 = vrot.slane %v76_v16, 7  ;;  %v231_v63 = vrot.slane %v77_v45, 7  ;;  %v78_v45 = vld [vmem:[%s13982_s0 + $0x1a0] sm:$0xff] }
  0xc0   :  { %14162 = vst [vmem:[#allocation8_spill] sm:$0xff] %v9117_v43  ;;  %14163 = vst [vmem:[#allocation9_spill] sm:$0xff] %v9120_v30  ;;  %870 = vrot.lane.b32.xlu1 %v589_v20, %s8320_s14  ;;  %868 = vrot.lane.b32.xlu0 %v587_v37, %s8320_s14  ;;  %v746_v37 = vrot.slane %v403_v50, 2  ;;  %v594_v61 = vsel %vm472_vm2, %v591_v3, %v593_v38 }
  0xc1   :  { %7383 = vmatprep.mubr.msk.f32.mxu0 %vm1329_vm8, %v9120_v30  ;;  %v9139_v16 = vsel %vm154_vm0, %v230_v6, %v231_v63  ;;  %v404_v27 = vsel %vm154_vm0, %v231_v63, 0.0 }
  0xc2   :  { %7384 = vmatmul.mubr.msk.f32.gmra.mrb[16].mxu0 %vm1329_vm8, %v9117_v43  ;;  %v819_v12 = vpop.permute.xlu1 %818  ;;  %v817_v20 = vpop.permute.xlu0 %816  ;;  %v9153_v43 = vsel %vm154_vm0, 0.0, %v230_v6  ;;  %v745_v6 = vsel %vm625_vm1, %v743_v1, %v744_v17  ;;  %v596_v63 = vrot.slane %v9139_v16, 1 }
  0xc3   :  { %v1165_v50 = vsel %vm1144_vm6, %v8609_v54, %v819_v12  ;;  %v1164_v38 = vsel %vm1144_vm6, %v8613_v57, %v817_v20  ;;  %v747_v54 = vsel %vm625_vm1, %v744_v17, %v746_v37  ;;  %v233_v57 = vrot.slane %v78_v45, 7 }
  0xc4   :  { %1053 = vrot.lane.b32.xlu1 %v742_v32, %s8319_s13  ;;  %1051 = vrot.lane.b32.xlu0 %v740_v35, %s8319_s13  ;;  %v79_v32 = vld [vmem:[%s13982_s0 + $0x1a8] sm:$0xff]  ;;  %v598_v20 = vrot.slane %v404_v27, 1  ;;  %v749_v37 = vrot.slane %v9139_v16, 2  ;;  %v751_v45 = vrot.slane %v404_v27, 2 }
  0xc5   :  { %v234_v12 = vrot.slane %v79_v32, 7  ;;  %v748_v32 = vrot.slane %v9153_v43, 2 }
  0xc6   :  { %v1002_v3 = vpop.permute.xlu1 %1001  ;;  %v1000_v35 = vpop.permute.xlu0 %999  ;;  %v599_v17 = vsel %vm472_vm2, %v596_v63, %v598_v20  ;;  %v9189_v20 = vsel %vm154_vm0, 0.0, %v233_v57 }
  0xc7   :  { %v9156_v30 = vsel %vm1206_vm7, %v1165_v50, %v1002_v3  ;;  %v9159_v19 = vsel %vm1206_vm7, %v1164_v38, %v1000_v35  ;;  %v595_v50 = vrot.slane %v9153_v43, 1  ;;  %v80_v3 = vld [vmem:[%s13982_s0 + $0x1b0] sm:$0xff] }
  0xc8   :  { %14164 = vst [vmem:[#allocation10_spill] sm:$0xff] %v9156_v30  ;;  %14165 = vst [vmem:[#allocation11_spill] sm:$0xff] %v9159_v19  ;;  %874 = vrot.lane.b32.xlu1 %v594_v61, %s8320_s14  ;;  %872 = vrot.lane.b32.xlu0 %v592_v39, %s8320_s14  ;;  %v9175_v39 = vsel %vm154_vm0, %v233_v57, %v234_v12  ;;  %v752_v57 = vsel %vm625_vm1, %v749_v37, %v751_v45 }
  0xc9   :  { %7386 = vmatprep.mubr.msk.f32.mxu0 %vm1329_vm8, %v9159_v19  ;;  %v597_v1 = vsel %vm472_vm2, %v595_v50, %v596_v63  ;;  %v405_v19 = vsel %vm154_vm0, %v234_v12, 0.0  ;;  %v236_v12 = vrot.slane %v80_v3, 7  ;;  %v750_v50 = vsel %vm625_vm1, %v748_v32, %v749_v37 }
  0xca   :  { %7387 = vmatmul.mubr.msk.f32.gmra.mrb[18].mxu0 %vm1329_vm8, %v9156_v30  ;;  %v823_v61 = vpop.permute.xlu1 %822  ;;  %v821_v38 = vpop.permute.xlu0 %820  ;;  %v756_v3 = vrot.slane %v405_v19, 2  ;;  %v753_v32 = vrot.slane %v9189_v20, 2 }
  0xcb   :  { %v1167_v35 = vsel %vm1144_vm6, %v8628_v13, %v823_v61  ;;  %v81_v13 = vld [vmem:[%s13982_s0 + $0x1b8] sm:$0xff]  ;;  %v600_v61 = vrot.slane %v9189_v20, 1 }
  0xcc   :  { %1057 = vrot.lane.b32.xlu1 %v747_v54, %s8319_s13  ;;  %1055 = vrot.lane.b32.xlu0 %v745_v6, %s8319_s13  ;;  %v1166_v54 = vsel %vm1144_vm6, %v8632_v15, %v821_v38  ;;  %v601_v15 = vrot.slane %v9175_v39, 1 }
  0xce   :  { %v1006_v6 = vpop.permute.xlu1 %1005  ;;  %v1004_v30 = vpop.permute.xlu0 %1003  ;;  %v602_v37 = vsel %vm472_vm2, %v600_v61, %v601_v15 }
  0xcf   :  { %v9192_v27 = vsel %vm1206_vm7, %v1167_v35, %v1006_v6  ;;  %v9195_v63 = vsel %vm1206_vm7, %v1166_v54, %v1004_v30  ;;  %v603_v30 = vrot.slane %v405_v19, 1  ;;  %v237_v35 = vrot.slane %v81_v13, 7  ;;  %v82_v6 = vld [vmem:[%s13982_s0 + $0x1c0] sm:$0xff]  ;;  %v83_v13 = vld [vmem:[%s13982_s0 + $0x1c8] sm:$0xff] }
  0xd0   :  { %14166 = vst [vmem:[#allocation12_spill] sm:$0xff] %v9192_v27  ;;  %14167 = vst [vmem:[#allocation13_spill] sm:$0xff] %v9195_v63  ;;  %878 = vrot.lane.b32.xlu1 %v599_v17, %s8320_s14  ;;  %876 = vrot.lane.b32.xlu0 %v597_v1, %s8320_s14  ;;  %v754_v1 = vrot.slane %v9175_v39, 2  ;;  %v9217_v54 = vsel %vm154_vm0, 0.0, %v236_v12 }
  0xd1   :  { %7389 = vmatprep.mubr.msk.f32.mxu0 %vm1329_vm8, %v9195_v63  ;;  %v604_v45 = vsel %vm472_vm2, %v601_v15, %v603_v30  ;;  %v9230_v30 = vsel %vm154_vm0, %v236_v12, %v237_v35  ;;  %v406_v61 = vsel %vm154_vm0, %v237_v35, 0.0 }
  0xd2   :  { %7390 = vmatmul.mubr.msk.f32.gmra.mrb[20].mxu0 %vm1329_vm8, %v9192_v27  ;;  %v827_v38 = vpop.permute.xlu1 %826  ;;  %v825_v17 = vpop.permute.xlu0 %824  ;;  %v755_v12 = vsel %vm625_vm1, %v753_v32, %v754_v1  ;;  %v608_v35 = vrot.slane %v406_v61, 1 }
  0xd3   :  { %v1169_v19 = vsel %vm1144_vm6, %v8659_v40, %v827_v38  ;;  %v757_v40 = vsel %vm625_vm1, %v754_v1, %v756_v3  ;;  %v240_v38 = vrot.slane %v83_v13, 7  ;;  %v759_v3 = vrot.slane %v9230_v30, 2 }
  0xd4   :  { %1061 = vrot.lane.b32.xlu1 %v752_v57, %s8319_s13  ;;  %1059 = vrot.lane.b32.xlu0 %v750_v50, %s8319_s13  ;;  %v1168_v57 = vsel %vm1144_vm6, %v8663_v42, %v825_v17  ;;  %v239_v42 = vrot.slane %v82_v6, 7  ;;  %v606_v17 = vrot.slane %v9230_v30, 1  ;;  %v758_v6 = vrot.slane %v9217_v54, 2 }
  0xd6   :  { %v1010_v15 = vpop.permute.xlu1 %1009  ;;  %v1008_v50 = vpop.permute.xlu0 %1007  ;;  %v609_v1 = vsel %vm472_vm2, %v606_v17, %v608_v35  ;;  %v9256_v13 = vsel %vm154_vm0, %v239_v42, %v240_v38  ;;  %v85_v35 = vld [vmem:[%s13982_s0 + $0x1d8] sm:$0xff] }
  0xd7   :  { %v9234_v27 = vsel %vm1206_vm7, %v1169_v19, %v1010_v15  ;;  %v9237_v63 = vsel %vm1206_vm7, %v1168_v57, %v1008_v50  ;;  %v605_v19 = vrot.slane %v9217_v54, 1  ;;  %v407_v15 = vsel %vm154_vm0, %v240_v38, 0.0 }
  0xd8   :  { %14168 = vst [vmem:[#allocation14_spill] sm:$0xff] %v9234_v27  ;;  %882 = vrot.lane.b32.xlu1 %v604_v45, %s8320_s14  ;;  %880 = vrot.lane.b32.xlu0 %v602_v37, %s8320_s14  ;;  %v761_v37 = vrot.slane %v406_v61, 2  ;;  %v9264_v61 = vsel %vm154_vm0, 0.0, %v239_v42  ;;  %v611_v42 = vrot.slane %v9256_v13, 1 }
  0xd9   :  { %7392 = vmatprep.mubr.msk.f32.mxu0 %vm1329_vm8, %v9237_v63  ;;  %v607_v32 = vsel %vm472_vm2, %v605_v19, %v606_v17  ;;  %v84_v17 = vld [vmem:[%s13982_s0 + $0x1d0] sm:$0xff]  ;;  %v613_v19 = vrot.slane %v407_v15, 1 }
  0xda   :  { %7393 = vmatmul.mubr.msk.f32.gmra.mrb[22].mxu0 %vm1329_vm8, %v9234_v27  ;;  %v831_v45 = vpop.permute.xlu1 %830  ;;  %v829_v57 = vpop.permute.xlu0 %828 }
  0xdb   :  { %v1171_v50 = vsel %vm1144_vm6, %v8675_v56, %v831_v45  ;;  %v760_v45 = vsel %vm625_vm1, %v758_v6, %v759_v3  ;;  %v763_v6 = vrot.slane %v9264_v61, 2 }
  0xdc   :  { %1065 = vrot.lane.b32.xlu1 %v757_v40, %s8319_s13  ;;  %1063 = vrot.lane.b32.xlu0 %v755_v12, %s8319_s13  ;;  %v1170_v40 = vsel %vm1144_vm6, %v8682_v0, %v829_v57  ;;  %v762_v0 = vsel %vm625_vm1, %v759_v3, %v761_v37  ;;  %v610_v57 = vrot.slane %v9264_v61, 1  ;;  %v614_v37 = vsel %vm472_vm2, %v611_v42, %v613_v19 }
  0xde   :  { %v1014_v12 = vpop.permute.xlu1 %1013  ;;  %v1012_v27 = vpop.permute.xlu0 %1011  ;;  %v612_v3 = vsel %vm472_vm2, %v610_v57, %v611_v42  ;;  %v87_v42 = vld [vmem:[%s13982_s0 + $0x1e8] sm:$0xff] }
  0xdf   :  { %v9273_v38 = vsel %vm1206_vm7, %v1171_v50, %v1014_v12  ;;  %v9276_v56 = vsel %vm1206_vm7, %v1170_v40, %v1012_v27  ;;  %v242_v50 = vrot.slane %v84_v17, 7  ;;  %v243_v12 = vrot.slane %v85_v35, 7 }
  0xe0   :  { %14169 = vst [vmem:[#allocation15_spill] sm:$0xff] %v9273_v38  ;;  %14170 = vst [vmem:[#allocation16_spill] sm:$0xff] %v9276_v56  ;;  %886 = vrot.lane.b32.xlu1 %v609_v1, %s8320_s14  ;;  %884 = vrot.lane.b32.xlu0 %v607_v32, %s8320_s14  ;;  %v764_v32 = vrot.slane %v9256_v13, 2  ;;  %v766_v40 = vrot.slane %v407_v15, 2  ;;  %v86_v15 = vld [vmem:[%s13982_s0 + $0x1e0] sm:$0xff] }
  0xe1   :  { %7395 = vmatprep.mubr.msk.f32.mxu0 %vm1329_vm8, %v9276_v56  ;;  %v9295_v17 = vsel %vm154_vm0, %v242_v50, %v243_v12  ;;  %v408_v35 = vsel %vm154_vm0, %v243_v12, 0.0  ;;  %v9303_v56 = vsel %vm154_vm0, 0.0, %v242_v50 }
  0xe2   :  { %7396 = vmatmul.mubr.msk.f32.gmra.mrb[24].mxu0 %vm1329_vm8, %v9273_v38  ;;  %v835_v27 = vpop.permute.xlu1 %834  ;;  %v833_v1 = vpop.permute.xlu0 %832  ;;  %v616_v50 = vrot.slane %v9295_v17, 1  ;;  %v618_v12 = vrot.slane %v408_v35, 1 }
  0xe3   :  { %v1173_v38 = vsel %vm1144_vm6, %v8709_v29, %v835_v27  ;;  %v765_v27 = vsel %vm625_vm1, %v763_v6, %v764_v32 }
  0xe4   :  { %1069 = vrot.lane.b32.xlu1 %v762_v0, %s8319_s13  ;;  %1067 = vrot.lane.b32.xlu0 %v760_v45, %s8319_s13  ;;  %v1172_v0 = vsel %vm1144_vm6, %v8713_v33, %v833_v1  ;;  %v767_v33 = vsel %vm625_vm1, %v764_v32, %v766_v40  ;;  %v245_v1 = vrot.slane %v86_v15, 7  ;;  %v619_v40 = vsel %vm472_vm2, %v616_v50, %v618_v12 }
  0xe5   :  { %v768_v32 = vrot.slane %v9303_v56, 2 }
  0xe6   :  { %v1018_v45 = vpop.permute.xlu1 %1017  ;;  %v1016_v19 = vpop.permute.xlu0 %1015 }
  0xe7   :  { %v9312_v57 = vsel %vm1206_vm7, %v1173_v38, %v1018_v45  ;;  %v9315_v29 = vsel %vm1206_vm7, %v1172_v0, %v1016_v19  ;;  %v615_v38 = vrot.slane %v9303_v56, 1  ;;  %v246_v45 = vrot.slane %v87_v42, 7 }
  0xe8   :  { %14171 = vst [vmem:[#allocation17_spill] sm:$0xff] %v9312_v57  ;;  %14172 = vst [vmem:[#allocation18_spill] sm:$0xff] %v9315_v29  ;;  %890 = vrot.lane.b32.xlu1 %v614_v37, %s8320_s14  ;;  %888 = vrot.lane.b32.xlu0 %v612_v3, %s8320_s14  ;;  %v769_v3 = vrot.slane %v9295_v17, 2  ;;  %v771_v19 = vrot.slane %v408_v35, 2 }
  0xe9   :  { %7398 = vmatprep.mubr.msk.f32.mxu0 %vm1329_vm8, %v9315_v29  ;;  %v617_v6 = vsel %vm472_vm2, %v615_v38, %v616_v50  ;;  %v9334_v15 = vsel %vm154_vm0, %v245_v1, %v246_v45  ;;  %v409_v42 = vsel %vm154_vm0, %v246_v45, 0.0  ;;  %v88_v50 = vld [vmem:[%s13982_s0 + $0x1f0] sm:$0xff]  ;;  %v89_v38 = vld [vmem:[%s13982_s0 + $0x1f8] sm:$0xff] }
  0xea   :  { %7399 = vmatmul.mubr.msk.f32.gmra.mrb[26].mxu0 %vm1329_vm8, %v9312_v57  ;;  %v839_v37 = vpop.permute.xlu1 %838  ;;  %v837_v0 = vpop.permute.xlu0 %836  ;;  %v9338_v57 = vsel %vm154_vm0, 0.0, %v245_v1  ;;  %v249_v29 = vrot.slane %v89_v38, 7 }
  0xeb   :  { %v1174_v12 = vsel %vm1144_vm6, %v8732_v59, %v837_v0  ;;  %v623_v59 = vrot.slane %v409_v42, 1  ;;  %v772_v0 = vsel %vm625_vm1, %v769_v3, %v771_v19  ;;  %v776_v19 = vrot.slane %v409_v42, 2 }
  0xec   :  { %1073 = vrot.lane.b32.xlu1 %v767_v33, %s8319_s13  ;;  %1071 = vrot.lane.b32.xlu0 %v765_v27, %s8319_s13  ;;  %v1175_v33 = vsel %vm1144_vm6, %v8728_v52, %v839_v37  ;;  %v621_v52 = vrot.slane %v9334_v15, 1  ;;  %v620_v37 = vrot.slane %v9338_v57, 1 }
  0xee   :  { %v1022_v27 = vpop.permute.xlu1 %1021  ;;  %v1020_v35 = vpop.permute.xlu0 %1019 }
  0xef   :  { %v9351_v45 = vsel %vm1206_vm7, %v1175_v33, %v1022_v27  ;;  %v9354_v1 = vsel %vm1206_vm7, %v1174_v12, %v1020_v35  ;;  %v770_v33 = vsel %vm625_vm1, %v768_v32, %v769_v3  ;;  %v248_v27 = vrot.slane %v88_v50, 7 }
  0xf0   :  { %14173 = vst [vmem:[#allocation19_spill] sm:$0xff] %v9354_v1  ;;  %894 = vrot.lane.b32.xlu1 %v619_v40, %s8320_s14  ;;  %892 = vrot.lane.b32.xlu0 %v617_v6, %s8320_s14  ;;  %v624_v6 = vsel %vm472_vm2, %v621_v52, %v623_v59  ;;  %v622_v35 = vsel %vm472_vm2, %v620_v37, %v621_v52  ;;  %v773_v3 = vrot.slane %v9338_v57, 2  ;;  %v410_v50 = vsel %vm154_vm0, %v249_v29, 0.0 }
  0xf1   :  { %7401 = vmatprep.mubr.msk.f32.mxu0 %vm1329_vm8, %v9354_v1  ;;  %v774_v1 = vrot.slane %v9334_v15, 2  ;;  %v9373_v32 = vsel %vm154_vm0, %v248_v27, %v249_v29  ;;  %v9381_v52 = vsel %vm154_vm0, 0.0, %v248_v27  ;;  %v1282_v29 = vrot.slane %v410_v50, 1 }
  0xf2   :  { %7402 = vmatmul.mubr.msk.f32.gmra.mrb[28].mxu0 %vm1329_vm8, %v9351_v45  ;;  %v1297_v40 = vpop.permute.xlu1 %1296  ;;  %v1295_v12 = vpop.permute.xlu0 %1294 }
  0xf3   :  { %v1319_v38 = vsel %vm1144_vm6, %v8759_v24, %v1297_v40  ;;  %v1280_v24 = vrot.slane %v9373_v32, 1  ;;  %v775_v27 = vsel %vm625_vm1, %v773_v3, %v774_v1  ;;  %v1279_v40 = vrot.slane %v9381_v52, 1  ;;  %v6693_v3 = vld [vmem:[%s13983_s1 + $0x20] sm:$0xff] }
  0xf4   :  { %1077 = vrot.lane.b32.xlu1 %v772_v0, %s8319_s13  ;;  %1075 = vrot.lane.b32.xlu0 %v770_v33, %s8319_s13  ;;  %v1318_v0 = vsel %vm1144_vm6, %v8763_v26, %v1295_v12  ;;  %v777_v26 = vsel %vm625_vm1, %v774_v1, %v776_v19  ;;  %v1292_v19 = vrot.slane %v410_v50, 2  ;;  %v1289_v1 = vrot.slane %v9381_v52, 2 }
  0xf6   :  { %v1309_v33 = vpop.permute.xlu1 %1308  ;;  %v1307_v59 = vpop.permute.xlu0 %1306 }
  0xf7   :  { %v9384_v42 = vsel %vm1206_vm7, %v1319_v38, %v1309_v33  ;;  %v9387_v37 = vsel %vm1206_vm7, %v1318_v0, %v1307_v59  ;;  %v1290_v0 = vrot.slane %v9373_v32, 2  ;;  %v6694_v33 = vld [vmem:[%s13983_s1 + $0x28] sm:$0xf] }
  0xf8   :  { %898 = vrot.lane.b32.xlu1 %v624_v6, %s8320_s14  ;;  %896 = vrot.lane.b32.xlu0 %v622_v35, %s8320_s14  ;;  %v1283_v6 = vsel %vm472_vm2, %v1280_v24, %v1282_v29  ;;  %v1281_v35 = vsel %vm472_vm2, %v1279_v40, %v1280_v24 }
  0xf9   :  { %7404 = vmatprep.mubr.msk.f32.mxu0 %vm1329_vm8, %v9387_v37 }
  0xfa   :  { %7405 = vmatmul.mubr.msk.f32.gmra.mrb[30].mxu0 %vm1329_vm8, %v9384_v42  ;;  %v843_v12 = vpop.permute.xlu1 %842  ;;  %v841_v38 = vpop.permute.xlu0 %840 }
  0xfb   :  { %v1177_v59 = vsel %vm1144_vm6, %v8781_v60, %v843_v12  ;;  %v1176_v29 = vsel %vm1144_vm6, %v8795_v10, %v841_v38  ;;  %v1293_v60 = vsel %vm625_vm1, %v1290_v0, %v1292_v19  ;;  %v1291_v10 = vsel %vm625_vm1, %v1289_v1, %v1290_v0 }
  0xfc   :  { %1081 = vrot.lane.b32.xlu1 %v777_v26, %s8319_s13  ;;  %1079 = vrot.lane.b32.xlu0 %v775_v27, %s8319_s13  ;;  %v9415_v27 = vpack.c.bf16 %v6694_v33, %v6693_v3 }
  0xfe   :  { %v1026_v24 = vpop.permute.xlu1 %1025  ;;  %v1024_v26 = vpop.permute.xlu0 %1023  ;;  %7969 = vmatprep.subr.msk.bf16.mxu0 %vm8563_vm5, %v9415_v27 }
  0xff   :  { %v9418_v50 = vsel %vm1206_vm7, %v1177_v59, %v1026_v24  ;;  %v9421_v40 = vsel %vm1206_vm7, %v1176_v29, %v1024_v26 }
 0x100   :  { %1300 = vrot.lane.b32.xlu1 %v1283_v6, %s8320_s14  ;;  %1298 = vrot.lane.b32.xlu0 %v1281_v35, %s8320_s14  ;;  %v8322_v6 = vmov 0.0  }
 0x101   :  { %7407 = vmatprep.mubr.msk.f32.mxu0 %vm1329_vm8, %v9421_v40  ;;  %v473_v35 = vrot.slane %v8322_v6, 1  ;;  %v626_v3 = vrot.slane %v8322_v6, 2 }
 0x102   :  { %7408 = vmatmul.mubr.msk.f32.gmra.mrb[32].mxu0 %vm1329_vm8, %v9418_v50  ;;  %v847_v12 = vpop.permute.xlu1 %846  ;;  %v845_v38 = vpop.permute.xlu0 %844 }
 0x103   :  { %v1179_v19 = vsel %vm1144_vm6, %v8827_v46, %v847_v12  ;;  %v1178_v0 = vsel %vm1144_vm6, %v8841_v2, %v845_v38 }
 0x104   :  { %1312 = vrot.lane.b32.xlu1 %v1293_v60, %s8319_s13  ;;  %1310 = vrot.lane.b32.xlu0 %v1291_v10, %s8319_s13 }
 0x106   :  { %v1030_v1 = vpop.permute.xlu1 %1029  ;;  %v1028_v33 = vpop.permute.xlu0 %1027 }
 0x107   :  { %v9441_v59 = vsel %vm1206_vm7, %v1179_v19, %v1030_v1  ;;  %v9444_v29 = vsel %vm1206_vm7, %v1178_v0, %v1028_v33 }
 0x108   :  { %778 = vrot.lane.b32.xlu0 %v473_v35, %s8320_s14  ;;  %7410 = vmatprep.mubr.msk.f32.mxu0 %vm1329_vm8, %v9444_v29 }
 0x109   :  { %961 = vrot.lane.b32.xlu1 %v626_v3, %s8319_s13  ;;  %7411 = vmatmul.mubr.msk.f32.gmra.mrb[34].mxu0 %vm1329_vm8, %v9441_v59 }
 0x10a   :  { %v851_v46 = vpop.permute.xlu1 %850  ;;  %v849_v2 = vpop.permute.xlu0 %848 }
 0x10b   :  { %v1181_v24 = vsel %vm1144_vm6, %v8863_v25, %v851_v46  ;;  %v1180_v26 = vsel %vm1144_vm6, %v8877_v51, %v849_v2 }
 0x10e   :  { %v1034_v60 = vpop.permute.xlu1 %1033  ;;  %v1032_v10 = vpop.permute.xlu0 %1031 }
 0x10f   :  { %v9457_v12 = vsel %vm1206_vm7, %v1181_v24, %v1034_v60  ;;  %v9460_v38 = vsel %vm1206_vm7, %v1180_v26, %v1032_v10 }
 0x110   :  { %7413 = vmatprep.mubr.msk.f32.mxu0 %vm1329_vm8, %v9460_v38 }
 0x111   :  { %7414 = vmatmul.mubr.msk.f32.gmra.mrb[36].mxu0 %vm1329_vm8, %v9457_v12 }
 0x112   :  { %v855_v6 = vpop.permute.xlu1 %854  ;;  %v853_v35 = vpop.permute.xlu0 %852 }
 0x113   :  { %v1183_v25 = vsel %vm1144_vm6, %v8918_v44, %v855_v6  ;;  %v1182_v51 = vsel %vm1144_vm6, %v8905_v31, %v853_v35 }
 0x116   :  { %v1038_v3 = vpop.permute.xlu1 %1037  ;;  %v1036_v19 = vpop.permute.xlu0 %1035 }
 0x117   :  { %v9471_v0 = vsel %vm1206_vm7, %v1183_v25, %v1038_v3  ;;  %v9474_v1 = vsel %vm1206_vm7, %v1182_v51, %v1036_v19 }
 0x118   :  { %7416 = vmatprep.mubr.msk.f32.mxu0 %vm1329_vm8, %v9474_v1 }
 0x119   :  { %7417 = vmatmul.mubr.msk.f32.gmra.mrb[38].mxu0 %vm1329_vm8, %v9471_v0 }
 0x11a   :  { %v859_v33 = vpop.permute.xlu1 %858  ;;  %v857_v46 = vpop.permute.xlu0 %856 }
 0x11b   :  { %v1185_v44 = vsel %vm1144_vm6, %v8944_v23, %v859_v33  ;;  %v1184_v31 = vsel %vm1144_vm6, %v8952_v41, %v857_v46 }
 0x11e   :  { %v1042_v2 = vpop.permute.xlu1 %1041  ;;  %v1040_v24 = vpop.permute.xlu0 %1039 }
 0x11f   :  { %v9485_v26 = vsel %vm1206_vm7, %v1185_v44, %v1042_v2  ;;  %v9488_v60 = vsel %vm1206_vm7, %v1184_v31, %v1040_v24 }
 0x120   :  { %7419 = vmatprep.mubr.msk.f32.mxu0 %vm1329_vm8, %v9488_v60 }
 0x121   :  { %7420 = vmatmul.mubr.msk.f32.gmra.mrb[40].mxu0 %vm1329_vm8, %v9485_v26 }
 0x122   :  { %v863_v10 = vpop.permute.xlu1 %862  ;;  %v861_v6 = vpop.permute.xlu0 %860 }
 0x123   :  { %v1187_v23 = vsel %vm1144_vm6, %v8983_v34, %v863_v10  ;;  %v1186_v41 = vsel %vm1144_vm6, %v8997_v55, %v861_v6 }
 0x126   :  { %v1046_v35 = vpop.permute.xlu1 %1045  ;;  %v1044_v25 = vpop.permute.xlu0 %1043 }
 0x127   :  { %v9499_v51 = vsel %vm1206_vm7, %v1187_v23, %v1046_v35  ;;  %v9502_v3 = vsel %vm1206_vm7, %v1186_v41, %v1044_v25 }
 0x128   :  { %7422 = vmatprep.mubr.msk.f32.mxu0 %vm1329_vm8, %v9502_v3 }
 0x129   :  { %7423 = vmatmul.mubr.msk.f32.gmra.mrb[42].mxu0 %vm1329_vm8, %v9499_v51 }
 0x12a   :  { %v867_v19 = vpop.permute.xlu1 %866  ;;  %v865_v33 = vpop.permute.xlu0 %864 }
 0x12b   :  { %v1189_v34 = vsel %vm1144_vm6, %v9019_v14, %v867_v19  ;;  %v1188_v55 = vsel %vm1144_vm6, %v9033_v11, %v865_v33 }
 0x12e   :  { %v1050_v46 = vpop.permute.xlu1 %1049  ;;  %v1048_v44 = vpop.permute.xlu0 %1047 }
 0x12f   :  { %v9513_v31 = vsel %vm1206_vm7, %v1189_v34, %v1050_v46  ;;  %v9516_v2 = vsel %vm1206_vm7, %v1188_v55, %v1048_v44 }
 0x130   :  { %7425 = vmatprep.mubr.msk.f32.mxu0 %vm1329_vm8, %v9516_v2 }
 0x131   :  { %7426 = vmatmul.mubr.msk.f32.gmra.mrb[44].mxu0 %vm1329_vm8, %v9513_v31 }
 0x132   :  { %v871_v24 = vpop.permute.xlu1 %870  ;;  %v869_v10 = vpop.permute.xlu0 %868 }
 0x133   :  { %v1191_v14 = vsel %vm1144_vm6, %v9074_v21, %v871_v24  ;;  %v1190_v11 = vsel %vm1144_vm6, %v9061_v28, %v869_v10 }
 0x136   :  { %v1054_v6 = vpop.permute.xlu1 %1053  ;;  %v1052_v23 = vpop.permute.xlu0 %1051 }
 0x137   :  { %v9527_v41 = vsel %vm1206_vm7, %v1191_v14, %v1054_v6  ;;  %v9530_v35 = vsel %vm1206_vm7, %v1190_v11, %v1052_v23 }
 0x138   :  { %7428 = vmatprep.mubr.msk.f32.mxu0 %vm1329_vm8, %v9530_v35 }
 0x139   :  { %7429 = vmatmul.mubr.msk.f32.gmra.mrb[46].mxu0 %vm1329_vm8, %v9527_v41 }
 0x13a   :  { %v875_v25 = vpop.permute.xlu1 %874  ;;  %v873_v19 = vpop.permute.xlu0 %872 }
 0x13b   :  { %v1193_v21 = vsel %vm1144_vm6, %v9100_v48, %v875_v25  ;;  %v1192_v28 = vsel %vm1144_vm6, %v9108_v8, %v873_v19 }
 0x13e   :  { %v1058_v33 = vpop.permute.xlu1 %1057  ;;  %v1056_v34 = vpop.permute.xlu0 %1055 }
 0x13f   :  { %v9541_v55 = vsel %vm1206_vm7, %v1193_v21, %v1058_v33  ;;  %v9544_v46 = vsel %vm1206_vm7, %v1192_v28, %v1056_v34 }
 0x140   :  { %7431 = vmatprep.mubr.msk.f32.mxu0 %vm1329_vm8, %v9544_v46 }
 0x141   :  { %7432 = vmatmul.mubr.msk.f32.gmra.mrb[48].mxu0 %vm1329_vm8, %v9541_v55 }
 0x142   :  { %v879_v44 = vpop.permute.xlu1 %878  ;;  %v877_v24 = vpop.permute.xlu0 %876 }
 0x143   :  { %v1195_v48 = vsel %vm1144_vm6, %v9139_v16, %v879_v44  ;;  %v1194_v8 = vsel %vm1144_vm6, %v9153_v43, %v877_v24 }
 0x146   :  { %v1062_v10 = vpop.permute.xlu1 %1061  ;;  %v1060_v14 = vpop.permute.xlu0 %1059 }
 0x147   :  { %v9555_v11 = vsel %vm1206_vm7, %v1195_v48, %v1062_v10  ;;  %v9558_v6 = vsel %vm1206_vm7, %v1194_v8, %v1060_v14 }
 0x148   :  { %7434 = vmatprep.mubr.msk.f32.mxu0 %vm1329_vm8, %v9558_v6 }
 0x149   :  { %7435 = vmatmul.mubr.msk.f32.gmra.mrb[50].mxu0 %vm1329_vm8, %v9555_v11 }
 0x14a   :  { %v883_v23 = vpop.permute.xlu1 %882  ;;  %v881_v25 = vpop.permute.xlu0 %880 }
 0x14b   :  { %v1197_v16 = vsel %vm1144_vm6, %v9175_v39, %v883_v23  ;;  %v1196_v43 = vsel %vm1144_vm6, %v9189_v20, %v881_v25 }
 0x14e   :  { %v1066_v19 = vpop.permute.xlu1 %1065  ;;  %v1064_v21 = vpop.permute.xlu0 %1063 }
 0x14f   :  { %v9569_v28 = vsel %vm1206_vm7, %v1197_v16, %v1066_v19  ;;  %v9572_v33 = vsel %vm1206_vm7, %v1196_v43, %v1064_v21 }
 0x150   :  { %7437 = vmatprep.mubr.msk.f32.mxu0 %vm1329_vm8, %v9572_v33 }
 0x151   :  { %7438 = vmatmul.mubr.msk.f32.gmra.mrb[52].mxu0 %vm1329_vm8, %v9569_v28 }
 0x152   :  { %v887_v34 = vpop.permute.xlu1 %886  ;;  %v885_v44 = vpop.permute.xlu0 %884 }
 0x153   :  { %v1199_v39 = vsel %vm1144_vm6, %v9230_v30, %v887_v34  ;;  %v1198_v20 = vsel %vm1144_vm6, %v9217_v54, %v885_v44 }
 0x156   :  { %v1070_v24 = vpop.permute.xlu1 %1069  ;;  %v1068_v48 = vpop.permute.xlu0 %1067 }
 0x157   :  { %v9583_v8 = vsel %vm1206_vm7, %v1199_v39, %v1070_v24  ;;  %v9586_v10 = vsel %vm1206_vm7, %v1198_v20, %v1068_v48 }
 0x158   :  { %7440 = vmatprep.mubr.msk.f32.mxu0 %vm1329_vm8, %v9586_v10 }
 0x159   :  { %7441 = vmatmul.mubr.msk.f32.gmra.mrb[54].mxu0 %vm1329_vm8, %v9583_v8 }
 0x15a   :  { %v891_v14 = vpop.permute.xlu1 %890  ;;  %v889_v23 = vpop.permute.xlu0 %888 }
 0x15b   :  { %v1201_v30 = vsel %vm1144_vm6, %v9256_v13, %v891_v14  ;;  %v1200_v54 = vsel %vm1144_vm6, %v9264_v61, %v889_v23 }
 0x15e   :  { %v1074_v25 = vpop.permute.xlu1 %1073  ;;  %v1072_v16 = vpop.permute.xlu0 %1071 }
 0x15f   :  { %v9597_v43 = vsel %vm1206_vm7, %v1201_v30, %v1074_v25  ;;  %v9600_v19 = vsel %vm1206_vm7, %v1200_v54, %v1072_v16 }
 0x160   :  { %7443 = vmatprep.mubr.msk.f32.mxu0 %vm1329_vm8, %v9600_v19 }
 0x161   :  { %7444 = vmatmul.mubr.msk.f32.gmra.mrb[56].mxu0 %vm1329_vm8, %v9597_v43 }
 0x162   :  { %v895_v21 = vpop.permute.xlu1 %894  ;;  %v893_v34 = vpop.permute.xlu0 %892 }
 0x163   :  { %v1203_v13 = vsel %vm1144_vm6, %v9295_v17, %v895_v21  ;;  %v1202_v61 = vsel %vm1144_vm6, %v9303_v56, %v893_v34 }
 0x166   :  { %v1078_v44 = vpop.permute.xlu1 %1077  ;;  %v1076_v39 = vpop.permute.xlu0 %1075 }
 0x167   :  { %v9611_v20 = vsel %vm1206_vm7, %v1203_v13, %v1078_v44  ;;  %v9614_v24 = vsel %vm1206_vm7, %v1202_v61, %v1076_v39 }
 0x168   :  { %7446 = vmatprep.mubr.msk.f32.mxu0 %vm1329_vm8, %v9614_v24 }
 0x169   :  { %7447 = vmatmul.mubr.msk.f32.gmra.mrb[58].mxu0 %vm1329_vm8, %v9611_v20 }
 0x16a   :  { %v899_v48 = vpop.permute.xlu1 %898  ;;  %v897_v14 = vpop.permute.xlu0 %896 }
 0x16b   :  { %v1205_v17 = vsel %vm1144_vm6, %v9334_v15, %v899_v48  ;;  %v1204_v56 = vsel %vm1144_vm6, %v9338_v57, %v897_v14  ;;  %v14178_v14 = vld [vmem:[#allocation7_spill] sm:$0xff] }
 0x16e   :  { %v1082_v23 = vpop.permute.xlu1 %1081  ;;  %v1080_v30 = vpop.permute.xlu0 %1079 }
 0x16f   :  { %v9625_v54 = vsel %vm1206_vm7, %v1205_v17, %v1082_v23  ;;  %v9628_v25 = vsel %vm1206_vm7, %v1204_v56, %v1080_v30  ;;  %v14179_v17 = vld [vmem:[#allocation6_spill] sm:$0xff]  ;;  %v14180_v56 = vld [vmem:[#allocation9_spill] sm:$0xff]  ;;  %v14181_v23 = vld [vmem:[#allocation8_spill] sm:$0xff] }
 0x170   :  { %7449 = vmatprep.mubr.msk.f32.mxu0 %vm1329_vm8, %v9628_v25  ;;  %v14182_v30 = vld [vmem:[#allocation11_spill] sm:$0xff] }
 0x171   :  { %7450 = vmatmul.mubr.msk.f32.gmra.mrb[60].mxu0 %vm1329_vm8, %v9625_v54 }
 0x172   :  { %v1301_v16 = vpop.permute.xlu1 %1300  ;;  %v1299_v21 = vpop.permute.xlu0 %1298 }
 0x173   :  { %v1321_v15 = vsel %vm1144_vm6, %v9373_v32, %v1301_v16  ;;  %v1320_v57 = vsel %vm1144_vm6, %v9381_v52, %v1299_v21  ;;  %v14183_v16 = vld [vmem:[#allocation10_spill] sm:$0xff]  ;;  %v14184_v21 = vld [vmem:[#allocation13_spill] sm:$0xff] }
 0x176   :  { %v1313_v34 = vpop.permute.xlu1 %1312  ;;  %v1311_v13 = vpop.permute.xlu0 %1310 }
 0x177   :  { %v9639_v61 = vsel %vm1206_vm7, %v1321_v15, %v1313_v34  ;;  %v9642_v44 = vsel %vm1206_vm7, %v1320_v57, %v1311_v13  ;;  %v14185_v15 = vld [vmem:[#allocation12_spill] sm:$0xff]  ;;  %v14186_v57 = vld [vmem:[#allocation14_spill] sm:$0xff]  ;;  %v14188_v13 = vld [vmem:[#allocation15_spill] sm:$0xff] }
 0x178   :  { %7452 = vmatprep.mubr.msk.f32.mxu0 %vm1329_vm8, %v9642_v44  ;;  %v14187_v34 = vld [vmem:[#allocation16_spill] sm:$0xff] }
 0x179   :  { %7453 = vmatmul.mubr.msk.f32.gmra.mrb[62].mxu0 %vm1329_vm8, %v9639_v61 }
 0x17a   :  { %v779_v39 = vpop.permute.xlu0 %778 }
 0x17b   :  { %v1145_v32 = vsel %vm1144_vm6, 0.0, %v779_v39  ;;  %v962_v48 = vpop.permute.xlu1 %961  ;;  %v14189_v39 = vld [vmem:[#allocation18_spill] sm:$0xff] }
 0x17c   :  { %v9650_v52 = vsel %vm1206_vm7, %v1145_v32, %v962_v48  ;;  %v14190_v32 = vld [vmem:[#allocation17_spill] sm:$0xff]  ;;  %v14191_v48 = vld [vmem:[#allocation19_spill] sm:$0xff] }
 0x17d   :  { %14174 = vst [vmem:[#allocation20_spill] sm:$0xff] %v9650_v52  ;;  %7459 = vmatprep.mubr.msk.f32.mxu0 %vm1329_vm8, %v9650_v52 }
 0x17e   :  { %7460 = vmatmul.mubr.msk.f32.vlgmr.msra.gmra.mrb[0].mxu0 %vm1329_vm8, %v9650_v52 }
 0x17f   :  { %7972 = vmatpush3.bf16.msk.msra.mxu0 %vm8563_vm5, %v9415_v27  ;;  %7462 = vmatprep.mubr.msk.f32.mxu0 %vm1329_vm8, %v8777_v49  ;;  %v14175_v49 = vld [vmem:[#allocation3_spill] sm:$0xff]  ;;  %v14177_v27 = vld [vmem:[#allocation4_spill] sm:$0xff] }
 0x182   :  { %7463 = vmatmul.mubr.msk.f32.gmra.mrb[2].mxu0 %vm1329_vm8, %v8810_v18  ;;  %v14176_v18 = vld [vmem:[#allocation5_spill] sm:$0xff] }
 0x183   :  { %7465 = vmatprep.mubr.msk.f32.mxu0 %vm1329_vm8, %v8847_v5 }
 0x186   :  { %7466 = vmatmul.mubr.msk.f32.gmra.mrb[4].mxu0 %vm1329_vm8, %v8844_v4 }
 0x187   :  { %7468 = vmatprep.mubr.msk.f32.mxu0 %vm1329_vm8, %v8883_v62 }
 0x18a   :  { %7469 = vmatmul.mubr.msk.f32.gmra.mrb[6].mxu0 %vm1329_vm8, %v8880_v58 }
 0x18b   :  { %7471 = vmatprep.mubr.msk.f32.mxu0 %vm1329_vm8, %v8925_v36 }
 0x18e   :  { %7472 = vmatmul.mubr.msk.f32.gmra.mrb[8].mxu0 %vm1329_vm8, %v8922_v47 }
 0x18f   :  { %7474 = vmatprep.mubr.msk.f32.mxu0 %vm1329_vm8, %v8964_v7 }
 0x192   :  { %7475 = vmatmul.mubr.msk.f32.gmra.mrb[10].mxu0 %vm1329_vm8, %v8961_v53 }
 0x193   :  { %7477 = vmatprep.mubr.msk.f32.mxu0 %vm1329_vm8, %v9003_v9 }
 0x196   :  { %7478 = vmatmul.mubr.msk.f32.gmra.mrb[12].mxu0 %vm1329_vm8, %v14175_v49 }
 0x197   :  { %7480 = vmatprep.mubr.msk.f32.mxu0 %vm1329_vm8, %v14176_v18 }
 0x19a   :  { %7481 = vmatmul.mubr.msk.f32.gmra.mrb[14].mxu0 %vm1329_vm8, %v14177_v27 }
 0x19b   :  { %7483 = vmatprep.mubr.msk.f32.mxu0 %vm1329_vm8, %v14178_v14 }
 0x19e   :  { %7484 = vmatmul.mubr.msk.f32.gmra.mrb[16].mxu0 %vm1329_vm8, %v14179_v17 }
 0x19f   :  { %7486 = vmatprep.mubr.msk.f32.mxu0 %vm1329_vm8, %v14180_v56 }
 0x1a2   :  { %7487 = vmatmul.mubr.msk.f32.gmra.mrb[18].mxu0 %vm1329_vm8, %v14181_v23 }
 0x1a3   :  { %7489 = vmatprep.mubr.msk.f32.mxu0 %vm1329_vm8, %v14182_v30 }
 0x1a6   :  { %7490 = vmatmul.mubr.msk.f32.gmra.mrb[20].mxu0 %vm1329_vm8, %v14183_v16 }
 0x1a7   :  { %7492 = vmatprep.mubr.msk.f32.mxu0 %vm1329_vm8, %v14184_v21 }
 0x1aa   :  { %7493 = vmatmul.mubr.msk.f32.gmra.mrb[22].mxu0 %vm1329_vm8, %v14185_v15 }
 0x1ab   :  { %7495 = vmatprep.mubr.msk.f32.mxu0 %vm1329_vm8, %v9237_v63 }
 0x1ae   :  { %7496 = vmatmul.mubr.msk.f32.gmra.mrb[24].mxu0 %vm1329_vm8, %v14186_v57 }
 0x1af   :  { %7498 = vmatprep.mubr.msk.f32.mxu0 %vm1329_vm8, %v14187_v34 }
 0x1b2   :  { %7499 = vmatmul.mubr.msk.f32.gmra.mrb[26].mxu0 %vm1329_vm8, %v14188_v13 }
 0x1b3   :  { %7501 = vmatprep.mubr.msk.f32.mxu0 %vm1329_vm8, %v14189_v39 }
 0x1b6   :  { %7502 = vmatmul.mubr.msk.f32.gmra.mrb[28].mxu0 %vm1329_vm8, %v14190_v32 }
 0x1b7   :  { %7504 = vmatprep.mubr.msk.f32.mxu0 %vm1329_vm8, %v14191_v48 }
 0x1ba   :  { %7505 = vmatmul.mubr.msk.f32.gmra.mrb[30].mxu0 %vm1329_vm8, %v9351_v45 }
 0x1bb   :  { %7507 = vmatprep.mubr.msk.f32.mxu0 %vm1329_vm8, %v9650_v52 }
 0x1be   :  { %7508 = vmatmul.mubr.msk.f32.gmra.mrb[32].mxu0 %vm1329_vm8, %v9650_v52 }
 0x1bf   :  { %7510 = vmatprep.mubr.msk.f32.mxu0 %vm1329_vm8, %v9421_v40 }
 0x1c2   :  { %7511 = vmatmul.mubr.msk.f32.gmra.mrb[34].mxu0 %vm1329_vm8, %v9418_v50 }
 0x1c3   :  { %7513 = vmatprep.mubr.msk.f32.mxu0 %vm1329_vm8, %v9444_v29 }
 0x1c6   :  { %7514 = vmatmul.mubr.msk.f32.gmra.mrb[36].mxu0 %vm1329_vm8, %v9441_v59 }
 0x1c7   :  { %7516 = vmatprep.mubr.msk.f32.mxu0 %vm1329_vm8, %v9460_v38 }
 0x1ca   :  { %7517 = vmatmul.mubr.msk.f32.gmra.mrb[38].mxu0 %vm1329_vm8, %v9457_v12 }
 0x1cb   :  { %7519 = vmatprep.mubr.msk.f32.mxu0 %vm1329_vm8, %v9474_v1 }
 0x1ce   :  { %7520 = vmatmul.mubr.msk.f32.gmra.mrb[40].mxu0 %vm1329_vm8, %v9471_v0 }
 0x1cf   :  { %7522 = vmatprep.mubr.msk.f32.mxu0 %vm1329_vm8, %v9488_v60 }
 0x1d2   :  { %7523 = vmatmul.mubr.msk.f32.gmra.mrb[42].mxu0 %vm1329_vm8, %v9485_v26 }
 0x1d3   :  { %7525 = vmatprep.mubr.msk.f32.mxu0 %vm1329_vm8, %v9502_v3 }
 0x1d6   :  { %7526 = vmatmul.mubr.msk.f32.gmra.mrb[44].mxu0 %vm1329_vm8, %v9499_v51 }
 0x1d7   :  { %7528 = vmatprep.mubr.msk.f32.mxu0 %vm1329_vm8, %v9516_v2 }
 0x1da   :  { %7529 = vmatmul.mubr.msk.f32.gmra.mrb[46].mxu0 %vm1329_vm8, %v9513_v31 }
 0x1db   :  { %7531 = vmatprep.mubr.msk.f32.mxu0 %vm1329_vm8, %v9530_v35 }
 0x1de   :  { %7532 = vmatmul.mubr.msk.f32.gmra.mrb[48].mxu0 %vm1329_vm8, %v9527_v41 }
 0x1df   :  { %7534 = vmatprep.mubr.msk.f32.mxu0 %vm1329_vm8, %v9544_v46 }
 0x1e2   :  { %7535 = vmatmul.mubr.msk.f32.gmra.mrb[50].mxu0 %vm1329_vm8, %v9541_v55 }
 0x1e3   :  { %7537 = vmatprep.mubr.msk.f32.mxu0 %vm1329_vm8, %v9558_v6 }
 0x1e6   :  { %7538 = vmatmul.mubr.msk.f32.gmra.mrb[52].mxu0 %vm1329_vm8, %v9555_v11 }
 0x1e7   :  { %7540 = vmatprep.mubr.msk.f32.mxu0 %vm1329_vm8, %v9572_v33 }
 0x1ea   :  { %7541 = vmatmul.mubr.msk.f32.gmra.mrb[54].mxu0 %vm1329_vm8, %v9569_v28 }
 0x1eb   :  { %7543 = vmatprep.mubr.msk.f32.mxu0 %vm1329_vm8, %v9586_v10 }
 0x1ee   :  { %7544 = vmatmul.mubr.msk.f32.gmra.mrb[56].mxu0 %vm1329_vm8, %v9583_v8 }
 0x1ef   :  { %7546 = vmatprep.mubr.msk.f32.mxu0 %vm1329_vm8, %v9600_v19 }
 0x1f2   :  { %7547 = vmatmul.mubr.msk.f32.gmra.mrb[58].mxu0 %vm1329_vm8, %v9597_v43 }
 0x1f3   :  { %7549 = vmatprep.mubr.msk.f32.mxu0 %vm1329_vm8, %v9614_v24 }
 0x1f6   :  { %7550 = vmatmul.mubr.msk.f32.gmra.mrb[60].mxu0 %vm1329_vm8, %v9611_v20 }
 0x1f7   :  { %7552 = vmatprep.mubr.msk.f32.mxu0 %vm1329_vm8, %v9628_v25 }
 0x1fa   :  { %7553 = vmatmul.mubr.msk.f32.gmra.mrb[62].mxu0 %vm1329_vm8, %v9625_v54 }
 0x1fb   :  { %7559 = vmatprep.mubr.msk.f32.mxu0 %vm1329_vm8, %v8847_v5 }
 0x1fe   :  { %7560 = vmatmul.mubr.msk.f32.vlgmr.msra.gmra.mrb[0].mxu0 %vm1329_vm8, %v8844_v4 }
 0x1ff   :  { %7562 = vmatprep.mubr.msk.f32.mxu0 %vm1329_vm8, %v8883_v62 }
 0x202   :  { %7563 = vmatmul.mubr.msk.f32.gmra.mrb[2].mxu0 %vm1329_vm8, %v8880_v58 }
 0x203   :  { %7565 = vmatprep.mubr.msk.f32.mxu0 %vm1329_vm8, %v8925_v36 }
 0x206   :  { %7566 = vmatmul.mubr.msk.f32.gmra.mrb[4].mxu0 %vm1329_vm8, %v8922_v47 }
 0x207   :  { %7568 = vmatprep.mubr.msk.f32.mxu0 %vm1329_vm8, %v8964_v7 }
 0x20a   :  { %7569 = vmatmul.mubr.msk.f32.gmra.mrb[6].mxu0 %vm1329_vm8, %v8961_v53 }
 0x20b   :  { %7571 = vmatprep.mubr.msk.f32.mxu0 %vm1329_vm8, %v9003_v9 }
 0x20e   :  { %7572 = vmatmul.mubr.msk.f32.gmra.mrb[8].mxu0 %vm1329_vm8, %v14175_v49 }
 0x20f   :  { %7574 = vmatprep.mubr.msk.f32.mxu0 %vm1329_vm8, %v14176_v18 }
 0x212   :  { %7575 = vmatmul.mubr.msk.f32.gmra.mrb[10].mxu0 %vm1329_vm8, %v14177_v27 }
 0x213   :  { %7577 = vmatprep.mubr.msk.f32.mxu0 %vm1329_vm8, %v14178_v14 }
 0x216   :  { %7578 = vmatmul.mubr.msk.f32.gmra.mrb[12].mxu0 %vm1329_vm8, %v14179_v17 }
 0x217   :  { %7580 = vmatprep.mubr.msk.f32.mxu0 %vm1329_vm8, %v14180_v56 }
 0x21a   :  { %7581 = vmatmul.mubr.msk.f32.gmra.mrb[14].mxu0 %vm1329_vm8, %v14181_v23 }
 0x21b   :  { %7583 = vmatprep.mubr.msk.f32.mxu0 %vm1329_vm8, %v14182_v30 }
 0x21e   :  { %7584 = vmatmul.mubr.msk.f32.gmra.mrb[16].mxu0 %vm1329_vm8, %v14183_v16 }
 0x21f   :  { %7586 = vmatprep.mubr.msk.f32.mxu0 %vm1329_vm8, %v14184_v21 }
 0x222   :  { %7587 = vmatmul.mubr.msk.f32.gmra.mrb[18].mxu0 %vm1329_vm8, %v14185_v15 }
 0x223   :  { %7589 = vmatprep.mubr.msk.f32.mxu0 %vm1329_vm8, %v9237_v63 }
 0x226   :  { %7590 = vmatmul.mubr.msk.f32.gmra.mrb[20].mxu0 %vm1329_vm8, %v14186_v57 }
 0x227   :  { %7592 = vmatprep.mubr.msk.f32.mxu0 %vm1329_vm8, %v14187_v34 }
 0x22a   :  { %7593 = vmatmul.mubr.msk.f32.gmra.mrb[22].mxu0 %vm1329_vm8, %v14188_v13 }
 0x22b   :  { %7595 = vmatprep.mubr.msk.f32.mxu0 %vm1329_vm8, %v14189_v39 }
 0x22e   :  { %7596 = vmatmul.mubr.msk.f32.gmra.mrb[24].mxu0 %vm1329_vm8, %v14190_v32 }
 0x22f   :  { %7598 = vmatprep.mubr.msk.f32.mxu0 %vm1329_vm8, %v14191_v48 }
 0x232   :  { %7599 = vmatmul.mubr.msk.f32.gmra.mrb[26].mxu0 %vm1329_vm8, %v9351_v45 }
 0x233   :  { %7601 = vmatprep.mubr.msk.f32.mxu0 %vm1329_vm8, %v9387_v37 }
 0x236   :  { %7602 = vmatmul.mubr.msk.f32.gmra.mrb[28].mxu0 %vm1329_vm8, %v9384_v42 }
 0x237   :  { %7604 = vmatprep.mubr.msk.f32.mxu0 %vm1329_vm8, %v9650_v52 }
 0x23a   :  { %7605 = vmatmul.mubr.msk.f32.gmra.mrb[30].mxu0 %vm1329_vm8, %v9650_v52 }
 0x23b   :  { %7607 = vmatprep.mubr.msk.f32.mxu0 %vm1329_vm8, %v9444_v29 }
 0x23e   :  { %7608 = vmatmul.mubr.msk.f32.gmra.mrb[32].mxu0 %vm1329_vm8, %v9441_v59 }
 0x23f   :  { %7610 = vmatprep.mubr.msk.f32.mxu0 %vm1329_vm8, %v9460_v38 }
 0x242   :  { %7611 = vmatmul.mubr.msk.f32.gmra.mrb[34].mxu0 %vm1329_vm8, %v9457_v12 }
 0x243   :  { %7613 = vmatprep.mubr.msk.f32.mxu0 %vm1329_vm8, %v9474_v1 }
 0x246   :  { %7614 = vmatmul.mubr.msk.f32.gmra.mrb[36].mxu0 %vm1329_vm8, %v9471_v0 }
 0x247   :  { %7616 = vmatprep.mubr.msk.f32.mxu0 %vm1329_vm8, %v9488_v60 }
 0x24a   :  { %7617 = vmatmul.mubr.msk.f32.gmra.mrb[38].mxu0 %vm1329_vm8, %v9485_v26 }
 0x24b   :  { %7619 = vmatprep.mubr.msk.f32.mxu0 %vm1329_vm8, %v9502_v3 }
 0x24e   :  { %7620 = vmatmul.mubr.msk.f32.gmra.mrb[40].mxu0 %vm1329_vm8, %v9499_v51 }
 0x24f   :  { %7622 = vmatprep.mubr.msk.f32.mxu0 %vm1329_vm8, %v9516_v2 }
 0x252   :  { %7623 = vmatmul.mubr.msk.f32.gmra.mrb[42].mxu0 %vm1329_vm8, %v9513_v31 }
 0x253   :  { %7625 = vmatprep.mubr.msk.f32.mxu0 %vm1329_vm8, %v9530_v35 }
 0x256   :  { %7626 = vmatmul.mubr.msk.f32.gmra.mrb[44].mxu0 %vm1329_vm8, %v9527_v41 }
 0x257   :  { %7628 = vmatprep.mubr.msk.f32.mxu0 %vm1329_vm8, %v9544_v46 }
 0x25a   :  { %7629 = vmatmul.mubr.msk.f32.gmra.mrb[46].mxu0 %vm1329_vm8, %v9541_v55 }
 0x25b   :  { %7631 = vmatprep.mubr.msk.f32.mxu0 %vm1329_vm8, %v9558_v6 }
 0x25e   :  { %7632 = vmatmul.mubr.msk.f32.gmra.mrb[48].mxu0 %vm1329_vm8, %v9555_v11 }
 0x25f   :  { %7634 = vmatprep.mubr.msk.f32.mxu0 %vm1329_vm8, %v9572_v33 }
 0x262   :  { %7635 = vmatmul.mubr.msk.f32.gmra.mrb[50].mxu0 %vm1329_vm8, %v9569_v28 }
 0x263   :  { %7637 = vmatprep.mubr.msk.f32.mxu0 %vm1329_vm8, %v9586_v10 }
 0x266   :  { %7638 = vmatmul.mubr.msk.f32.gmra.mrb[52].mxu0 %vm1329_vm8, %v9583_v8 }
 0x267   :  { %7640 = vmatprep.mubr.msk.f32.mxu0 %vm1329_vm8, %v9600_v19 }
 0x26a   :  { %7641 = vmatmul.mubr.msk.f32.gmra.mrb[54].mxu0 %vm1329_vm8, %v9597_v43 }
 0x26b   :  { %7643 = vmatprep.mubr.msk.f32.mxu0 %vm1329_vm8, %v9614_v24 }
 0x26e   :  { %7644 = vmatmul.mubr.msk.f32.gmra.mrb[56].mxu0 %vm1329_vm8, %v9611_v20 }
 0x26f   :  { %7646 = vmatprep.mubr.msk.f32.mxu0 %vm1329_vm8, %v9628_v25 }
 0x272   :  { %7647 = vmatmul.mubr.msk.f32.gmra.mrb[58].mxu0 %vm1329_vm8, %v9625_v54 }
 0x273   :  { %7649 = vmatprep.mubr.msk.f32.mxu0 %vm1329_vm8, %v9642_v44 }
 0x276   :  { %7650 = vmatmul.mubr.msk.f32.gmra.mrb[60].mxu0 %vm1329_vm8, %v9639_v61 }
 0x277   :  { %7652 = vmatprep.mubr.msk.f32.mxu0 %vm1329_vm8, %v9650_v52 }
 0x27a   :  { %7653 = vmatmul.mubr.msk.f32.gmra.mrb[62].mxu0 %vm1329_vm8, %v9650_v52 }
 0x2d1   :  { %v9911_v4 = vpop.f32.mrb[0].mxu0 }
 0x2d2   :  { %v2758_v5 = vsel %vm1144_vm6, %v9911_v4, 0.0  ;;  %v2891_v58 = vmul.f32 %v9911_v4, %v9911_v4  ;;  %v9917_v62 = vpop.f32.mrb[1].mxu0 }
 0x2d3   :  { %v2757_v47 = vsel %vm1144_vm6, %v9917_v62, 0.0  ;;  %v2890_v36 = vmul.f32 %v9917_v62, %v9917_v62 }
 0x2d4   :  { %v2955_v53 = vsel %vm1144_vm6, %v2891_v58, 0.0  ;;  %v2759_v7 = vadd.f32 %v2758_v5, %v2757_v47 }
 0x2d5   :  { %v2954_v9 = vsel %vm1144_vm6, %v2890_v36, 0.0  ;;  %v9925_v63 = vpop.f32.mrb[2].mxu0 }
 0x2d6   :  { %v2956_v45 = vadd.f32 %v2955_v53, %v2954_v9  ;;  %v9927_v42 = vpop.f32.mrb[3].mxu0  ;;  %v2893_v37 = vmul.f32 %v9925_v63, %v9925_v63  ;;  %v2762_v29 = vsel %vm1144_vm6, %v9925_v63, 0.0 }
 0x2d7   :  { %v2760_v50 = vsel %vm1144_vm6, %v9927_v42, 0.0  ;;  %v2892_v40 = vmul.f32 %v9927_v42, %v9927_v42 }
 0x2d8   :  { %v2761_v59 = vadd.f32 %v2760_v50, %v2759_v7  ;;  %v2959_v60 = vsel %vm1144_vm6, %v2893_v37, 0.0 }
 0x2d9   :  { %v2957_v12 = vsel %vm1144_vm6, %v2892_v40, 0.0  ;;  %v9938_v38 = vpop.f32.mrb[4].mxu0 }
 0x2da   :  { %v2763_v0 = vadd.f32 %v2762_v29, %v2761_v59  ;;  %v2958_v1 = vadd.f32 %v2957_v12, %v2956_v45  ;;  %v9940_v26 = vpop.f32.mrb[5].mxu0  ;;  %v2895_v51 = vmul.f32 %v9938_v38, %v9938_v38  ;;  %v2766_v35 = vsel %vm1144_vm6, %v9938_v38, 0.0 }
 0x2db   :  { %v2764_v3 = vsel %vm1144_vm6, %v9940_v26, 0.0  ;;  %v2894_v31 = vmul.f32 %v9940_v26, %v9940_v26 }
 0x2dc   :  { %v2960_v2 = vadd.f32 %v2959_v60, %v2958_v1  ;;  %v2765_v41 = vadd.f32 %v2764_v3, %v2763_v0  ;;  %v2963_v33 = vsel %vm1144_vm6, %v2895_v51, 0.0 }
 0x2dd   :  { %v2961_v55 = vsel %vm1144_vm6, %v2894_v31, 0.0  ;;  %v9952_v46 = vpop.f32.mrb[6].mxu0 }
 0x2de   :  { %v2962_v11 = vadd.f32 %v2961_v55, %v2960_v2  ;;  %v9954_v6 = vpop.f32.mrb[7].mxu0  ;;  %v2767_v28 = vadd.f32 %v2766_v35, %v2765_v41  ;;  %v2897_v8 = vmul.f32 %v9952_v46, %v9952_v46  ;;  %v2770_v24 = vsel %vm1144_vm6, %v9952_v46, 0.0 }
 0x2df   :  { %v2768_v10 = vsel %vm1144_vm6, %v9954_v6, 0.0  ;;  %v2896_v43 = vmul.f32 %v9954_v6, %v9954_v6 }
 0x2e0   :  { %v2769_v19 = vadd.f32 %v2768_v10, %v2767_v28  ;;  %v2964_v20 = vadd.f32 %v2963_v33, %v2962_v11  ;;  %v2967_v18 = vsel %vm1144_vm6, %v2897_v8, 0.0 }
 0x2e1   :  { %v2965_v54 = vsel %vm1144_vm6, %v2896_v43, 0.0  ;;  %v9966_v25 = vpop.f32.mrb[8].mxu0 }
 0x2e2   :  { %v2966_v61 = vadd.f32 %v2965_v54, %v2964_v20  ;;  %v9968_v44 = vpop.f32.mrb[9].mxu0  ;;  %v2771_v49 = vadd.f32 %v2770_v24, %v2769_v19  ;;  %v2899_v27 = vmul.f32 %v9966_v25, %v9966_v25  ;;  %v2774_v30 = vsel %vm1144_vm6, %v9966_v25, 0.0 }
 0x2e3   :  { %v2772_v14 = vsel %vm1144_vm6, %v9968_v44, 0.0  ;;  %v2898_v17 = vmul.f32 %v9968_v44, %v9968_v44 }
 0x2e4   :  { %v2773_v56 = vadd.f32 %v2772_v14, %v2771_v49  ;;  %v2968_v23 = vadd.f32 %v2967_v18, %v2966_v61  ;;  %v2971_v13 = vsel %vm1144_vm6, %v2899_v27, 0.0 }
 0x2e5   :  { %v2969_v16 = vsel %vm1144_vm6, %v2898_v17, 0.0  ;;  %v9980_v21 = vpop.f32.mrb[10].mxu0 }
 0x2e6   :  { %v2970_v15 = vadd.f32 %v2969_v16, %v2968_v23  ;;  %v9982_v57 = vpop.f32.mrb[11].mxu0  ;;  %v2775_v34 = vadd.f32 %v2774_v30, %v2773_v56  ;;  %v2901_v39 = vmul.f32 %v9980_v21, %v9980_v21  ;;  %v2778_v47 = vsel %vm1144_vm6, %v9980_v21, 0.0 }
 0x2e7   :  { %v2776_v32 = vsel %vm1144_vm6, %v9982_v57, 0.0  ;;  %v2900_v48 = vmul.f32 %v9982_v57, %v9982_v57 }
 0x2e8   :  { %v2777_v5 = vadd.f32 %v2776_v32, %v2775_v34  ;;  %v2972_v58 = vadd.f32 %v2971_v13, %v2970_v15  ;;  %v2975_v37 = vsel %vm1144_vm6, %v2901_v39, 0.0 }
 0x2e9   :  { %v2973_v36 = vsel %vm1144_vm6, %v2900_v48, 0.0  ;;  %v9994_v53 = vpop.f32.mrb[12].mxu0 }
 0x2ea   :  { %v2974_v7 = vadd.f32 %v2973_v36, %v2972_v58  ;;  %v9996_v9 = vpop.f32.mrb[13].mxu0  ;;  %v2779_v45 = vadd.f32 %v2778_v47, %v2777_v5  ;;  %v2903_v50 = vmul.f32 %v9994_v53, %v9994_v53  ;;  %v2782_v0 = vsel %vm1144_vm6, %v9994_v53, 0.0 }
 0x2eb   :  { %v2780_v40 = vsel %vm1144_vm6, %v9996_v9, 0.0  ;;  %v2902_v59 = vmul.f32 %v9996_v9, %v9996_v9 }
 0x2ec   :  { %v2781_v29 = vadd.f32 %v2780_v40, %v2779_v45  ;;  %v2976_v12 = vadd.f32 %v2975_v37, %v2974_v7  ;;  %v2979_v2 = vsel %vm1144_vm6, %v2903_v50, 0.0 }
 0x2ed   :  { %v2977_v1 = vsel %vm1144_vm6, %v2902_v59, 0.0  ;;  %v10008_v60 = vpop.f32.mrb[14].mxu0 }
 0x2ee   :  { %v2978_v51 = vadd.f32 %v2977_v1, %v2976_v12  ;;  %v10010_v3 = vpop.f32.mrb[15].mxu0  ;;  %v2783_v31 = vadd.f32 %v2782_v0, %v2781_v29  ;;  %v2905_v41 = vmul.f32 %v10008_v60, %v10008_v60  ;;  %v2786_v33 = vsel %vm1144_vm6, %v10008_v60, 0.0 }
 0x2ef   :  { %v2784_v35 = vsel %vm1144_vm6, %v10010_v3, 0.0  ;;  %v2904_v55 = vmul.f32 %v10010_v3, %v10010_v3 }
 0x2f0   :  { %v2785_v11 = vadd.f32 %v2784_v35, %v2783_v31  ;;  %v2980_v28 = vadd.f32 %v2979_v2, %v2978_v51  ;;  %v2983_v24 = vsel %vm1144_vm6, %v2905_v41, 0.0 }
 0x2f1   :  { %v2981_v8 = vsel %vm1144_vm6, %v2904_v55, 0.0  ;;  %v10022_v10 = vpop.f32.mrb[16].mxu0 }
 0x2f2   :  { %v2982_v43 = vadd.f32 %v2981_v8, %v2980_v28  ;;  %v10024_v19 = vpop.f32.mrb[17].mxu0  ;;  %v2787_v20 = vadd.f32 %v2786_v33, %v2785_v11  ;;  %v2907_v54 = vmul.f32 %v10022_v10, %v10022_v10  ;;  %v2790_v14 = vsel %vm1144_vm6, %v10022_v10, 0.0 }
 0x2f3   :  { %v2788_v61 = vsel %vm1144_vm6, %v10024_v19, 0.0  ;;  %v2906_v49 = vmul.f32 %v10024_v19, %v10024_v19 }
 0x2f4   :  { %v2789_v18 = vadd.f32 %v2788_v61, %v2787_v20  ;;  %v2984_v27 = vadd.f32 %v2983_v24, %v2982_v43  ;;  %v2987_v15 = vsel %vm1144_vm6, %v2907_v54, 0.0 }
 0x2f5   :  { %v2985_v17 = vsel %vm1144_vm6, %v2906_v49, 0.0  ;;  %v10036_v56 = vpop.f32.mrb[18].mxu0 }
 0x2f6   :  { %v2986_v23 = vadd.f32 %v2985_v17, %v2984_v27  ;;  %v10038_v30 = vpop.f32.mrb[19].mxu0  ;;  %v2791_v16 = vadd.f32 %v2790_v14, %v2789_v18  ;;  %v2909_v34 = vmul.f32 %v10036_v56, %v10036_v56  ;;  %v2794_v5 = vsel %vm1144_vm6, %v10036_v56, 0.0 }
 0x2f7   :  { %v2792_v13 = vsel %vm1144_vm6, %v10038_v30, 0.0  ;;  %v2908_v39 = vmul.f32 %v10038_v30, %v10038_v30 }
 0x2f8   :  { %v2793_v32 = vadd.f32 %v2792_v13, %v2791_v16  ;;  %v2988_v48 = vadd.f32 %v2987_v15, %v2986_v23  ;;  %v2991_v37 = vsel %vm1144_vm6, %v2909_v34, 0.0 }
 0x2f9   :  { %v2989_v58 = vsel %vm1144_vm6, %v2908_v39, 0.0  ;;  %v10050_v47 = vpop.f32.mrb[20].mxu0 }
 0x2fa   :  { %v2990_v36 = vadd.f32 %v2989_v58, %v2988_v48  ;;  %v10052_v7 = vpop.f32.mrb[21].mxu0  ;;  %v2795_v45 = vadd.f32 %v2794_v5, %v2793_v32  ;;  %v2911_v50 = vmul.f32 %v10050_v47, %v10050_v47  ;;  %v2798_v0 = vsel %vm1144_vm6, %v10050_v47, 0.0 }
 0x2fb   :  { %v2796_v40 = vsel %vm1144_vm6, %v10052_v7, 0.0  ;;  %v2910_v59 = vmul.f32 %v10052_v7, %v10052_v7 }
 0x2fc   :  { %v2797_v29 = vadd.f32 %v2796_v40, %v2795_v45  ;;  %v2992_v12 = vadd.f32 %v2991_v37, %v2990_v36  ;;  %v2995_v35 = vsel %vm1144_vm6, %v2911_v50, 0.0 }
 0x2fd   :  { %v2993_v1 = vsel %vm1144_vm6, %v2910_v59, 0.0  ;;  %v10064_v51 = vpop.f32.mrb[22].mxu0 }
 0x2fe   :  { %v2994_v31 = vadd.f32 %v2993_v1, %v2992_v12  ;;  %v10066_v2 = vpop.f32.mrb[23].mxu0  ;;  %v2799_v41 = vadd.f32 %v2798_v0, %v2797_v29  ;;  %v2913_v55 = vmul.f32 %v10064_v51, %v10064_v51  ;;  %v2802_v43 = vsel %vm1144_vm6, %v10064_v51, 0.0 }
 0x2ff   :  { %v2800_v11 = vsel %vm1144_vm6, %v10066_v2, 0.0  ;;  %v2912_v28 = vmul.f32 %v10066_v2, %v10066_v2 }
 0x300   :  { %v2801_v33 = vadd.f32 %v2800_v11, %v2799_v41  ;;  %v2996_v8 = vadd.f32 %v2995_v35, %v2994_v31  ;;  %v2999_v18 = vsel %vm1144_vm6, %v2913_v55, 0.0 }
 0x301   :  { %v2997_v20 = vsel %vm1144_vm6, %v2912_v28, 0.0  ;;  %v10078_v24 = vpop.f32.mrb[24].mxu0 }
 0x302   :  { %v2998_v54 = vadd.f32 %v2997_v20, %v2996_v8  ;;  %v10080_v61 = vpop.f32.mrb[25].mxu0  ;;  %v2803_v49 = vadd.f32 %v2802_v43, %v2801_v33  ;;  %v2915_v27 = vmul.f32 %v10078_v24, %v10078_v24  ;;  %v2806_v15 = vsel %vm1144_vm6, %v10078_v24, 0.0 }
 0x303   :  { %v2804_v14 = vsel %vm1144_vm6, %v10080_v61, 0.0  ;;  %v2914_v17 = vmul.f32 %v10080_v61, %v10080_v61 }
 0x304   :  { %v2805_v23 = vadd.f32 %v2804_v14, %v2803_v49  ;;  %v3000_v16 = vadd.f32 %v2999_v18, %v2998_v54  ;;  %v3003_v5 = vsel %vm1144_vm6, %v2915_v27, 0.0 }
 0x305   :  { %v3001_v34 = vsel %vm1144_vm6, %v2914_v17, 0.0  ;;  %v10092_v13 = vpop.f32.mrb[26].mxu0 }
 0x306   :  { %v3002_v39 = vadd.f32 %v3001_v34, %v3000_v16  ;;  %v10094_v32 = vpop.f32.mrb[27].mxu0  ;;  %v2807_v48 = vadd.f32 %v2806_v15, %v2805_v23  ;;  %v2917_v58 = vmul.f32 %v10092_v13, %v10092_v13  ;;  %v2810_v40 = vsel %vm1144_vm6, %v10092_v13, 0.0 }
 0x307   :  { %v2808_v36 = vsel %vm1144_vm6, %v10094_v32, 0.0  ;;  %v2916_v45 = vmul.f32 %v10094_v32, %v10094_v32 }
 0x308   :  { %v2809_v37 = vadd.f32 %v2808_v36, %v2807_v48  ;;  %v3004_v50 = vadd.f32 %v3003_v5, %v3002_v39  ;;  %v3007_v31 = vsel %vm1144_vm6, %v2917_v58, 0.0 }
 0x309   :  { %v3005_v59 = vsel %vm1144_vm6, %v2916_v45, 0.0  ;;  %v10106_v29 = vpop.f32.mrb[28].mxu0 }
 0x30a   :  { %v3006_v12 = vadd.f32 %v3005_v59, %v3004_v50  ;;  %v10108_v0 = vpop.f32.mrb[29].mxu0  ;;  %v2811_v1 = vadd.f32 %v2810_v40, %v2809_v37  ;;  %v2919_v41 = vmul.f32 %v10106_v29, %v10106_v29  ;;  %v2814_v33 = vsel %vm1144_vm6, %v10106_v29, 0.0 }
 0x30b   :  { %v2812_v35 = vsel %vm1144_vm6, %v10108_v0, 0.0  ;;  %v2918_v55 = vmul.f32 %v10108_v0, %v10108_v0 }
 0x30c   :  { %v2813_v11 = vadd.f32 %v2812_v35, %v2811_v1  ;;  %v3008_v28 = vadd.f32 %v3007_v31, %v3006_v12  ;;  %v3011_v18 = vsel %vm1144_vm6, %v2919_v41, 0.0 }
 0x30d   :  { %v3009_v8 = vsel %vm1144_vm6, %v2918_v55, 0.0  ;;  %v10120_v43 = vpop.f32.mrb[30].mxu0 }
 0x30e   :  { %v3010_v20 = vadd.f32 %v3009_v8, %v3008_v28  ;;  %v10122_v54 = vpop.f32.mrb[31].mxu0  ;;  %v2815_v49 = vadd.f32 %v2814_v33, %v2813_v11  ;;  %v2921_v27 = vmul.f32 %v10120_v43, %v10120_v43  ;;  %v2818_v15 = vsel %vm1144_vm6, %v10120_v43, 0.0 }
 0x30f   :  { %v2816_v14 = vsel %vm1144_vm6, %v10122_v54, 0.0  ;;  %v2920_v17 = vmul.f32 %v10122_v54, %v10122_v54 }
 0x310   :  { %v2817_v23 = vadd.f32 %v2816_v14, %v2815_v49  ;;  %v3012_v16 = vadd.f32 %v3011_v18, %v3010_v20  ;;  %v3015_v36 = vsel %vm1144_vm6, %v2921_v27, 0.0 }
 0x311   :  { %v3013_v34 = vsel %vm1144_vm6, %v2920_v17, 0.0  ;;  %v10134_v39 = vpop.f32.mrb[32].mxu0 }
 0x312   :  { %v3014_v48 = vadd.f32 %v3013_v34, %v3012_v16  ;;  %v10136_v5 = vpop.f32.mrb[33].mxu0  ;;  %v2819_v58 = vadd.f32 %v2818_v15, %v2817_v23  ;;  %v2923_v45 = vmul.f32 %v10134_v39, %v10134_v39  ;;  %v2822_v12 = vsel %vm1144_vm6, %v10134_v39, 0.0 }
 0x313   :  { %v2820_v37 = vsel %vm1144_vm6, %v10136_v5, 0.0  ;;  %v2922_v50 = vmul.f32 %v10136_v5, %v10136_v5 }
 0x314   :  { %v2821_v40 = vadd.f32 %v2820_v37, %v2819_v58  ;;  %v3016_v59 = vadd.f32 %v3015_v36, %v3014_v48  ;;  %v3019_v11 = vsel %vm1144_vm6, %v2923_v45, 0.0 }
 0x315   :  { %v3017_v1 = vsel %vm1144_vm6, %v2922_v50, 0.0  ;;  %v10148_v31 = vpop.f32.mrb[34].mxu0 }
 0x316   :  { %v3018_v41 = vadd.f32 %v3017_v1, %v3016_v59  ;;  %v10150_v35 = vpop.f32.mrb[35].mxu0  ;;  %v2823_v55 = vadd.f32 %v2822_v12, %v2821_v40  ;;  %v2925_v28 = vmul.f32 %v10148_v31, %v10148_v31  ;;  %v2826_v18 = vsel %vm1144_vm6, %v10148_v31, 0.0 }
 0x317   :  { %v2824_v33 = vsel %vm1144_vm6, %v10150_v35, 0.0  ;;  %v2924_v8 = vmul.f32 %v10150_v35, %v10150_v35 }
 0x318   :  { %v2825_v20 = vadd.f32 %v2824_v33, %v2823_v55  ;;  %v3020_v49 = vadd.f32 %v3019_v11, %v3018_v41  ;;  %v3023_v15 = vsel %vm1144_vm6, %v2925_v28, 0.0 }
 0x319   :  { %v3021_v27 = vsel %vm1144_vm6, %v2924_v8, 0.0  ;;  %v10162_v14 = vpop.f32.mrb[36].mxu0 }
 0x31a   :  { %v3022_v17 = vadd.f32 %v3021_v27, %v3020_v49  ;;  %v10164_v23 = vpop.f32.mrb[37].mxu0  ;;  %v2827_v16 = vadd.f32 %v2826_v18, %v2825_v20  ;;  %v2927_v34 = vmul.f32 %v10162_v14, %v10162_v14  ;;  %v2830_v37 = vsel %vm1144_vm6, %v10162_v14, 0.0 }
 0x31b   :  { %v2828_v48 = vsel %vm1144_vm6, %v10164_v23, 0.0  ;;  %v2926_v58 = vmul.f32 %v10164_v23, %v10164_v23 }
 0x31c   :  { %v2829_v36 = vadd.f32 %v2828_v48, %v2827_v16  ;;  %v3024_v45 = vadd.f32 %v3023_v15, %v3022_v17  ;;  %v3027_v41 = vsel %vm1144_vm6, %v2927_v34, 0.0 }
 0x31d   :  { %v3025_v50 = vsel %vm1144_vm6, %v2926_v58, 0.0  ;;  %v10176_v40 = vpop.f32.mrb[38].mxu0 }
 0x31e   :  { %14192 = vst [vmem:[#allocation3_spill] sm:$0xff] %v10176_v40  ;;  %v3026_v59 = vadd.f32 %v3025_v50, %v3024_v45  ;;  %v10178_v12 = vpop.f32.mrb[39].mxu0  ;;  %v2831_v1 = vadd.f32 %v2830_v37, %v2829_v36  ;;  %v2929_v55 = vmul.f32 %v10176_v40, %v10176_v40  ;;  %v2834_v20 = vsel %vm1144_vm6, %v10176_v40, 0.0 }
 0x31f   :  { %14193 = vst [vmem:[#allocation5_spill] sm:$0xff] %v10178_v12  ;;  %v2832_v11 = vsel %vm1144_vm6, %v10178_v12, 0.0  ;;  %v2928_v28 = vmul.f32 %v10178_v12, %v10178_v12 }
 0x320   :  { %v2833_v33 = vadd.f32 %v2832_v11, %v2831_v1  ;;  %v3028_v8 = vadd.f32 %v3027_v41, %v3026_v59  ;;  %v3031_v15 = vsel %vm1144_vm6, %v2929_v55, 0.0 }
 0x321   :  { %v3029_v49 = vsel %vm1144_vm6, %v2928_v28, 0.0  ;;  %v10190_v18 = vpop.f32.mrb[40].mxu0 }
 0x322   :  { %14194 = vst [vmem:[#allocation4_spill] sm:$0xff] %v10190_v18  ;;  %v3030_v27 = vadd.f32 %v3029_v49, %v3028_v8  ;;  %v10192_v17 = vpop.f32.mrb[41].mxu0  ;;  %v2835_v16 = vadd.f32 %v2834_v20, %v2833_v33  ;;  %v2931_v34 = vmul.f32 %v10190_v18, %v10190_v18  ;;  %v2838_v37 = vsel %vm1144_vm6, %v10190_v18, 0.0 }
 0x323   :  { %14195 = vst [vmem:[#allocation7_spill] sm:$0xff] %v10192_v17  ;;  %v2836_v48 = vsel %vm1144_vm6, %v10192_v17, 0.0  ;;  %v2930_v58 = vmul.f32 %v10192_v17, %v10192_v17 }
 0x324   :  { %v2837_v36 = vadd.f32 %v2836_v48, %v2835_v16  ;;  %v3032_v45 = vadd.f32 %v3031_v15, %v3030_v27  ;;  %v3035_v11 = vsel %vm1144_vm6, %v2931_v34, 0.0 }
 0x325   :  { %v3033_v50 = vsel %vm1144_vm6, %v2930_v58, 0.0  ;;  %v10204_v59 = vpop.f32.mrb[42].mxu0 }
 0x326   :  { %14196 = vst [vmem:[#allocation6_spill] sm:$0xff] %v10204_v59  ;;  %v3034_v1 = vadd.f32 %v3033_v50, %v3032_v45  ;;  %v10206_v41 = vpop.f32.mrb[43].mxu0  ;;  %v2839_v55 = vadd.f32 %v2838_v37, %v2837_v36  ;;  %v2933_v28 = vmul.f32 %v10204_v59, %v10204_v59  ;;  %v2842_v27 = vsel %vm1144_vm6, %v10204_v59, 0.0 }
 0x327   :  { %14197 = vst [vmem:[#allocation9_spill] sm:$0xff] %v10206_v41  ;;  %v2840_v33 = vsel %vm1144_vm6, %v10206_v41, 0.0  ;;  %v2932_v8 = vmul.f32 %v10206_v41, %v10206_v41 }
 0x328   :  { %v2841_v20 = vadd.f32 %v2840_v33, %v2839_v55  ;;  %v3036_v49 = vadd.f32 %v3035_v11, %v3034_v1  ;;  %v3039_v36 = vsel %vm1144_vm6, %v2933_v28, 0.0 }
 0x329   :  { %v3037_v16 = vsel %vm1144_vm6, %v2932_v8, 0.0  ;;  %v10218_v15 = vpop.f32.mrb[44].mxu0 }
 0x32a   :  { %14198 = vst [vmem:[#allocation8_spill] sm:$0xff] %v10218_v15  ;;  %v3038_v48 = vadd.f32 %v3037_v16, %v3036_v49  ;;  %v10220_v34 = vpop.f32.mrb[45].mxu0  ;;  %v2843_v58 = vadd.f32 %v2842_v27, %v2841_v20  ;;  %v2935_v45 = vmul.f32 %v10218_v15, %v10218_v15  ;;  %v2846_v11 = vsel %vm1144_vm6, %v10218_v15, 0.0 }
 0x32b   :  { %14199 = vst [vmem:[#allocation11_spill] sm:$0xff] %v10220_v34  ;;  %v2844_v37 = vsel %vm1144_vm6, %v10220_v34, 0.0  ;;  %v2934_v50 = vmul.f32 %v10220_v34, %v10220_v34 }
 0x32c   :  { %v2845_v1 = vadd.f32 %v2844_v37, %v2843_v58  ;;  %v3040_v55 = vadd.f32 %v3039_v36, %v3038_v48  ;;  %v3043_v27 = vsel %vm1144_vm6, %v2935_v45, 0.0 }
 0x32d   :  { %v3041_v33 = vsel %vm1144_vm6, %v2934_v50, 0.0  ;;  %v10232_v8 = vpop.f32.mrb[46].mxu0 }
 0x32e   :  { %14200 = vst [vmem:[#allocation10_spill] sm:$0xff] %v10232_v8  ;;  %v3042_v20 = vadd.f32 %v3041_v33, %v3040_v55  ;;  %v10234_v28 = vpop.f32.mrb[47].mxu0  ;;  %v2847_v49 = vadd.f32 %v2846_v11, %v2845_v1  ;;  %v2937_v16 = vmul.f32 %v10232_v8, %v10232_v8  ;;  %v2850_v50 = vsel %vm1144_vm6, %v10232_v8, 0.0 }
 0x32f   :  { %14201 = vst [vmem:[#allocation13_spill] sm:$0xff] %v10234_v28  ;;  %v2848_v58 = vsel %vm1144_vm6, %v10234_v28, 0.0  ;;  %v2936_v48 = vmul.f32 %v10234_v28, %v10234_v28 }
 0x330   :  { %v2849_v36 = vadd.f32 %v2848_v58, %v2847_v49  ;;  %v3044_v37 = vadd.f32 %v3043_v27, %v3042_v20  ;;  %v3047_v52 = vsel %vm1144_vm6, %v2937_v16, 0.0 }
 0x331   :  { %v3045_v55 = vsel %vm1144_vm6, %v2936_v48, 0.0  ;;  %v10246_v33 = vpop.f32.mrb[48].mxu0 }
 0x332   :  { %14202 = vst [vmem:[#allocation12_spill] sm:$0xff] %v10246_v33  ;;  %v3046_v1 = vadd.f32 %v3045_v55, %v3044_v37  ;;  %v10248_v45 = vpop.f32.mrb[49].mxu0  ;;  %v2851_v11 = vadd.f32 %v2850_v50, %v2849_v36  ;;  %v2939_v22 = vmul.f32 %v10246_v33, %v10246_v33  ;;  %v2854_v48 = vsel %vm1144_vm6, %v10246_v33, 0.0 }
 0x333   :  { %14203 = vst [vmem:[#allocation14_spill] sm:$0xff] %v10248_v45  ;;  %v2852_v49 = vsel %vm1144_vm6, %v10248_v45, 0.0  ;;  %v2938_v20 = vmul.f32 %v10248_v45, %v10248_v45 }
 0x334   :  { %v2853_v27 = vadd.f32 %v2852_v49, %v2851_v11  ;;  %v3048_v58 = vadd.f32 %v3047_v52, %v3046_v1  ;;  %v3051_v8 = vsel %vm1144_vm6, %v2939_v22, 0.0 }
 0x335   :  { %v3049_v37 = vsel %vm1144_vm6, %v2938_v20, 0.0  ;;  %v10260_v55 = vpop.f32.mrb[50].mxu0 }
 0x336   :  { %14204 = vst [vmem:[#allocation16_spill] sm:$0xff] %v10260_v55  ;;  %v3050_v36 = vadd.f32 %v3049_v37, %v3048_v58  ;;  %v10262_v16 = vpop.f32.mrb[51].mxu0  ;;  %v2855_v50 = vadd.f32 %v2854_v48, %v2853_v27  ;;  %v2941_v28 = vmul.f32 %v10260_v55, %v10260_v55  ;;  %v2858_v20 = vsel %vm1144_vm6, %v10260_v55, 0.0 }
 0x337   :  { %14205 = vst [vmem:[#allocation15_spill] sm:$0xff] %v10262_v16  ;;  %v2856_v11 = vsel %vm1144_vm6, %v10262_v16, 0.0  ;;  %v2940_v52 = vmul.f32 %v10262_v16, %v10262_v16 }
 0x338   :  { %v2857_v1 = vadd.f32 %v2856_v11, %v2855_v50  ;;  %v3052_v49 = vadd.f32 %v3051_v8, %v3050_v36  ;;  %v3055_v33 = vsel %vm1144_vm6, %v2941_v28, 0.0 }
 0x339   :  { %v3053_v58 = vsel %vm1144_vm6, %v2940_v52, 0.0  ;;  %v10274_v37 = vpop.f32.mrb[52].mxu0 }
 0x33a   :  { %14206 = vst [vmem:[#allocation18_spill] sm:$0xff] %v10274_v37  ;;  %v3054_v27 = vadd.f32 %v3053_v58, %v3052_v49  ;;  %v10276_v22 = vpop.f32.mrb[53].mxu0  ;;  %v2859_v48 = vadd.f32 %v2858_v20, %v2857_v1  ;;  %v2943_v45 = vmul.f32 %v10274_v37, %v10274_v37  ;;  %v2862_v52 = vsel %vm1144_vm6, %v10274_v37, 0.0 }
 0x33b   :  { %14207 = vst [vmem:[#allocation17_spill] sm:$0xff] %v10276_v22  ;;  %v2860_v50 = vsel %vm1144_vm6, %v10276_v22, 0.0  ;;  %v2942_v8 = vmul.f32 %v10276_v22, %v10276_v22 }
 0x33c   :  { %v2861_v36 = vadd.f32 %v2860_v50, %v2859_v48  ;;  %v3056_v11 = vadd.f32 %v3055_v33, %v3054_v27  ;;  %v3059_v55 = vsel %vm1144_vm6, %v2943_v45, 0.0 }
 0x33d   :  { %v3057_v49 = vsel %vm1144_vm6, %v2942_v8, 0.0  ;;  %v10288_v58 = vpop.f32.mrb[54].mxu0 }
 0x33e   :  { %14208 = vst [vmem:[#allocation19_spill] sm:$0xff] %v10288_v58  ;;  %v3058_v1 = vadd.f32 %v3057_v49, %v3056_v11  ;;  %v10290_v28 = vpop.f32.mrb[55].mxu0  ;;  %v2863_v20 = vadd.f32 %v2862_v52, %v2861_v36  ;;  %v2945_v16 = vmul.f32 %v10288_v58, %v10288_v58  ;;  %v2866_v8 = vsel %vm1144_vm6, %v10288_v58, 0.0 }
 0x33f   :  { %14209 = vst [vmem:[#allocation21_spill] sm:$0xff] %v10290_v28  ;;  %v2864_v48 = vsel %vm1144_vm6, %v10290_v28, 0.0  ;;  %v2944_v33 = vmul.f32 %v10290_v28, %v10290_v28 }
 0x340   :  { %v2865_v27 = vadd.f32 %v2864_v48, %v2863_v20  ;;  %v3060_v50 = vadd.f32 %v3059_v55, %v3058_v1  ;;  %v3063_v37 = vsel %vm1144_vm6, %v2945_v16, 0.0 }
 0x341   :  { %v3061_v11 = vsel %vm1144_vm6, %v2944_v33, 0.0  ;;  %v10302_v49 = vpop.f32.mrb[56].mxu0 }
 0x342   :  { %14210 = vst [vmem:[#allocation22_spill] sm:$0xff] %v10302_v49  ;;  %v3062_v36 = vadd.f32 %v3061_v11, %v3060_v50  ;;  %v10304_v45 = vpop.f32.mrb[57].mxu0  ;;  %v2867_v52 = vadd.f32 %v2866_v8, %v2865_v27  ;;  %v2947_v22 = vmul.f32 %v10302_v49, %v10302_v49  ;;  %v2870_v33 = vsel %vm1144_vm6, %v10302_v49, 0.0 }
 0x343   :  { %14211 = vst [vmem:[#allocation23_spill] sm:$0xff] %v10304_v45  ;;  %v2868_v20 = vsel %vm1144_vm6, %v10304_v45, 0.0  ;;  %v2946_v55 = vmul.f32 %v10304_v45, %v10304_v45 }
 0x344   :  { %v2869_v1 = vadd.f32 %v2868_v20, %v2867_v52  ;;  %v3064_v48 = vadd.f32 %v3063_v37, %v3062_v36  ;;  %v3067_v58 = vsel %vm1144_vm6, %v2947_v22, 0.0 }
 0x345   :  { %v3065_v50 = vsel %vm1144_vm6, %v2946_v55, 0.0  ;;  %v10316_v11 = vpop.f32.mrb[58].mxu0 }
 0x346   :  { %14212 = vst [vmem:[#allocation24_spill] sm:$0xff] %v10316_v11  ;;  %v3066_v27 = vadd.f32 %v3065_v50, %v3064_v48  ;;  %v10318_v16 = vpop.f32.mrb[59].mxu0  ;;  %v2871_v8 = vadd.f32 %v2870_v33, %v2869_v1  ;;  %v2949_v28 = vmul.f32 %v10316_v11, %v10316_v11  ;;  %v2874_v55 = vsel %vm1144_vm6, %v10316_v11, 0.0 }
 0x347   :  { %14213 = vst [vmem:[#allocation25_spill] sm:$0xff] %v10318_v16  ;;  %v2872_v52 = vsel %vm1144_vm6, %v10318_v16, 0.0  ;;  %v2948_v37 = vmul.f32 %v10318_v16, %v10318_v16 }
 0x348   :  { %v2873_v36 = vadd.f32 %v2872_v52, %v2871_v8  ;;  %v3068_v20 = vadd.f32 %v3067_v58, %v3066_v27  ;;  %v3071_v49 = vsel %vm1144_vm6, %v2949_v28, 0.0 }
 0x349   :  { %v3069_v48 = vsel %vm1144_vm6, %v2948_v37, 0.0  ;;  %v10330_v50 = vpop.f32.mrb[60].mxu0 }
 0x34a   :  { %14214 = vst [vmem:[#allocation26_spill] sm:$0xff] %v10330_v50  ;;  %v3070_v1 = vadd.f32 %v3069_v48, %v3068_v20  ;;  %v10332_v22 = vpop.f32.mrb[61].mxu0  ;;  %v2875_v33 = vadd.f32 %v2874_v55, %v2873_v36  ;;  %v2951_v45 = vmul.f32 %v10330_v50, %v10330_v50  ;;  %v2878_v37 = vsel %vm1144_vm6, %v10330_v50, 0.0 }
 0x34b   :  { %14215 = vst [vmem:[#allocation27_spill] sm:$0xff] %v10332_v22  ;;  %v2876_v8 = vsel %vm1144_vm6, %v10332_v22, 0.0  ;;  %v2950_v58 = vmul.f32 %v10332_v22, %v10332_v22 }
 0x34c   :  { %v2877_v27 = vadd.f32 %v2876_v8, %v2875_v33  ;;  %v3072_v52 = vadd.f32 %v3071_v49, %v3070_v1  ;;  %v3075_v11 = vsel %vm1144_vm6, %v2951_v45, 0.0 }
 0x34d   :  { %v3073_v20 = vsel %vm1144_vm6, %v2950_v58, 0.0  ;;  %v7654_v48 = vpop.f32.mrb[62].mxu0 }
 0x34e   :  { %v3074_v36 = vadd.f32 %v3073_v20, %v3072_v52  ;;  %v2684_v55 = vpop.f32.mrb[63].mxu0  ;;  %v2879_v28 = vadd.f32 %v2878_v37, %v2877_v27  ;;  %v2953_v16 = vmul.f32 %v7654_v48, %v7654_v48  ;;  %v2882_v33 = vsel %vm1144_vm6, %v7654_v48, 0.0 }
 0x34f   :  { %v2880_v15 = vsel %vm1144_vm6, %v2684_v55, 0.0  ;;  %v2952_v34 = vmul.f32 %v2684_v55, %v2684_v55 }
 0x350   :  { %v2881_v59 = vadd.f32 %v2880_v15, %v2879_v28  ;;  %v3076_v41 = vadd.f32 %v3075_v11, %v3074_v36  ;;  %v3079_v58 = vsel %vm1144_vm6, %v2953_v16, 0.0  ;;  %v3100_v16 = vlaneseq }
 0x351   :  { %v3077_v49 = vsel %vm1144_vm6, %v2952_v34, 0.0 }
 0x352   :  { %v2883_v1 = vadd.f32 %v2882_v33, %v2881_v59  ;;  %v3078_v8 = vadd.f32 %v3077_v49, %v3076_v41  ;;  %v3101_v49 = vshrl.u32 %v3100_v16, 7  ;;  %v14221_v16 = vld [vmem:[#allocation3_spill] sm:$0xff] }
 0x354   :  { %v2884_v50 = vrot.slane %v2883_v1, 4  ;;  %v3080_v52 = vadd.f32 %v3079_v58, %v3078_v8 }
 0x356   :  { %v2885_v20 = vadd.f32 %v2884_v50, %v2883_v1  ;;  %v3081_v27 = vrot.slane %v3080_v52, 4  ;;  %v3092_v50 = vld [vmem:[%s13984_s2] sm:$0x1]  ;;  %v10352_v1 = vsub.s32 0, %v3101_v49  ;;  %v14222_v49 = vld [vmem:[#allocation7_spill] sm:$0xff] }
 0x358   :  { %v2886_v37 = vrot.slane %v2885_v20, 2  ;;  %v3082_v45 = vadd.f32 %v3081_v27, %v3080_v52  ;;  %14216 = vst [vmem:[#allocation28_spill] sm:$0xff] %v10352_v1 }
 0x35a   :  { %v2887_v22 = vadd.f32 %v2886_v37, %v2885_v20  ;;  %v3083_v18 = vrot.slane %v3082_v45, 2 }
 0x35c   :  { %v2888_v17 = vrot.slane %v2887_v22, 1  ;;  %v3084_v40 = vadd.f32 %v3083_v18, %v3082_v45 }
 0x35e   :  { %v2889_v15 = vadd.f32 %v2888_v17, %v2887_v22  ;;  %v3085_v11 = vrot.slane %v3084_v40, 1 }
 0x360   :  { %v3086_v36 = vadd.f32 %v3085_v11, %v3084_v40  ;;  %v3087_v28 = vmul.f32 0.001953125, %v2889_v15  ;;  %v3096_v40 = vld [vmem:[%s13985_s3] sm:$0x1] }
 0x362   :  { %v3088_v12 = vmul.f32 0.001953125, %v3086_v36  ;;  %v3089_v34 = vmul.f32 %v3087_v28, %v3087_v28 }
 0x364   :  { %v3090_v59 = vsub.f32 %v3088_v12, %v3089_v34 }
 0x366   :  { %v3091_v41 = vmax.f32 %v3090_v59, 0.0 }
 0x368   :  { %v3093_v33 = vadd.f32 1e-05, %v3091_v41 }
 0x36a   :  { %8251 = vrsqrt.f32 %v3093_v33  ;;  %v14220_v33 = vld [vmem:[#allocation5_spill] sm:$0xff] }
 0x374   :  { %v8252_v8 = vpop.eup %8251 }
 0x375   :  { %v3095_v18 = vmul.f32 %v8252_v8, %v3092_v50  ;;  %v14223_v50 = vld [vmem:[#allocation4_spill] sm:$0xff]  ;;  %v14224_v8 = vld [vmem:[#allocation9_spill] sm:$0xff] }
 0x377   :  { %v3097_v17 = vmul.f32 %v3095_v18, %v3087_v28  ;;  %v10358_v12 = vrot.slane %v3095_v18, %v10352_v1  ;;  %v14225_v18 = vld [vmem:[#allocation6_spill] sm:$0xff] }
 0x379   :  { %v3098_v22 = vsub.f32 %v3096_v40, %v3097_v17  ;;  %v3167_v58 = vmul.f32 %v10358_v12, %v2684_v55  ;;  %v3168_v52 = vmul.f32 %v7654_v48, %v10358_v12  ;;  %v10364_v20 = vmul.f32 %v10358_v12, %v9917_v62  ;;  %v14226_v17 = vld [vmem:[#allocation11_spill] sm:$0xff] }
 0x37a   :  { %v10368_v27 = vmul.f32 %v9911_v4, %v10358_v12  ;;  %v10372_v37 = vmul.f32 %v10358_v12, %v9927_v42  ;;  %v10376_v45 = vmul.f32 %v9925_v63, %v10358_v12  ;;  %v10380_v55 = vmul.f32 %v10358_v12, %v9940_v26 }
 0x37b   :  { %v10383_v48 = vrot.slane %v3098_v22, %v10352_v1  ;;  %v10387_v62 = vmul.f32 %v9938_v38, %v10358_v12  ;;  %v10391_v4 = vmul.f32 %v10358_v12, %v9954_v6  ;;  %v10395_v42 = vmul.f32 %v9952_v46, %v10358_v12  ;;  %v14237_v1 = vld [vmem:[#allocation18_spill] sm:$0xff] }
 0x37c   :  { %v10399_v63 = vmul.f32 %v10358_v12, %v9968_v44  ;;  %v10403_v26 = vmul.f32 %v9966_v25, %v10358_v12  ;;  %v10407_v38 = vmul.f32 %v10358_v12, %v9982_v57  ;;  %v10411_v6 = vmul.f32 %v9980_v21, %v10358_v12 }
 0x37d   :  { %v3237_v15 = vadd.f32 %v10383_v48, %v3167_v58  ;;  %v3238_v46 = vadd.f32 %v10383_v48, %v3168_v52  ;;  %v10417_v44 = vmul.f32 %v10358_v12, %v9996_v9  ;;  %v10421_v25 = vmul.f32 %v9994_v53, %v10358_v12  ;;  %v14227_v58 = vld [vmem:[#allocation8_spill] sm:$0xff] }
 0x37e   :  { %v10425_v57 = vmul.f32 %v10358_v12, %v10010_v3  ;;  %v10429_v21 = vmul.f32 %v10008_v60, %v10358_v12  ;;  %v10433_v11 = vmul.f32 %v10358_v12, %v10024_v19  ;;  %v10437_v9 = vmul.f32 %v10022_v10, %v10358_v12 }
 0x37f   :  { %v3301_v36 = vmax.f32 %v3237_v15, 0.0  ;;  %v3302_v28 = vmax.f32 %v3238_v46, 0.0  ;;  %v10441_v53 = vmul.f32 %v10358_v12, %v10038_v30  ;;  %v10445_v3 = vmul.f32 %v10036_v56, %v10358_v12  ;;  %v14228_v15 = vld [vmem:[#allocation13_spill] sm:$0xff] }
 0x380   :  { %v10449_v60 = vmul.f32 %v10358_v12, %v10052_v7  ;;  %v10453_v19 = vmul.f32 %v10050_v47, %v10358_v12  ;;  %v10457_v10 = vmul.f32 %v10358_v12, %v10066_v2  ;;  %v10461_v30 = vmul.f32 %v10064_v51, %v10358_v12 }
 0x381   :  { %v10463_v34 = vrot.slane %v3301_v36, 7  ;;  %v10465_v56 = vrot.slane %v3302_v28, 7  ;;  %v10469_v7 = vmul.f32 %v10358_v12, %v10080_v61  ;;  %v10473_v47 = vmul.f32 %v10078_v24, %v10358_v12  ;;  %v14229_v36 = vld [vmem:[#allocation10_spill] sm:$0xff] }
 0x382   :  { %v10477_v2 = vmul.f32 %v10358_v12, %v10094_v32  ;;  %v10481_v51 = vmul.f32 %v10092_v13, %v10358_v12  ;;  %v10485_v59 = vmul.f32 %v10358_v12, %v10108_v0  ;;  %v10489_v61 = vmul.f32 %v10106_v29, %v10358_v12 }
 0x383   :  { %14217 = vst [vmem:[#allocation29_spill] sm:$0xff] %v10463_v34  ;;  %14218 = vst [vmem:[#allocation30_spill] sm:$0xff] %v10465_v56  ;;  %v10494_v24 = vsel %vm154_vm0, %v10463_v34, %v10465_v56  ;;  %v10498_v32 = vmul.f32 %v10358_v12, %v10122_v54  ;;  %v10502_v13 = vmul.f32 %v10120_v43, %v10358_v12  ;;  %v14241_v34 = vld [vmem:[#allocation19_spill] sm:$0xff] }
 0x384   :  { %14219 = vst [vmem:[#allocation31_spill] sm:$0xff] %v10494_v24  ;;  %v10506_v0 = vmul.f32 %v10358_v12, %v10136_v5  ;;  %v10510_v29 = vmul.f32 %v10134_v39, %v10358_v12  ;;  %v10514_v41 = vmul.f32 %v10358_v12, %v10150_v35  ;;  %v10518_v54 = vmul.f32 %v10148_v31, %v10358_v12  ;;  %v14239_v24 = vld [vmem:[#allocation21_spill] sm:$0xff]  ;;  %v14243_v56 = vld [vmem:[#allocation23_spill] sm:$0xff] }
 0x385   :  { %v10522_v43 = vmul.f32 %v10358_v12, %v10164_v23  ;;  %v10526_v5 = vmul.f32 %v10162_v14, %v10358_v12  ;;  %v10530_v39 = vmul.f32 %v10358_v12, %v14220_v33  ;;  %v10534_v35 = vmul.f32 %v14221_v16, %v10358_v12  ;;  %v14230_v33 = vld [vmem:[#allocation14_spill] sm:$0xff] }
 0x386   :  { %v10538_v31 = vmul.f32 %v10358_v12, %v14222_v49  ;;  %v10542_v23 = vmul.f32 %v14223_v50, %v10358_v12  ;;  %v10546_v14 = vmul.f32 %v10358_v12, %v14224_v8  ;;  %v10550_v40 = vmul.f32 %v14225_v18, %v10358_v12  ;;  %v14231_v49 = vld [vmem:[#allocation12_spill] sm:$0xff]  ;;  %v14232_v8 = vld [vmem:[#allocation15_spill] sm:$0xff] }
 0x387   :  { %v10554_v22 = vmul.f32 %v10358_v12, %v14226_v17  ;;  %v10558_v52 = vmul.f32 %v14227_v58, %v10358_v12  ;;  %v10562_v46 = vmul.f32 %v10358_v12, %v14228_v15  ;;  %v10566_v28 = vmul.f32 %v14229_v36, %v10358_v12  ;;  %v14233_v17 = vld [vmem:[#allocation16_spill] sm:$0xff]  ;;  %v14235_v15 = vld [vmem:[#allocation17_spill] sm:$0xff] }
 0x388   :  { %v10570_v16 = vmul.f32 %v10358_v12, %v14230_v33  ;;  %v10574_v50 = vmul.f32 %v14231_v49, %v10358_v12  ;;  %v10578_v18 = vmul.f32 %v10358_v12, %v14232_v8  ;;  %v10582_v58 = vmul.f32 %v14233_v17, %v10358_v12 }
 0x389   :  { %v10586_v36 = vmul.f32 %v10358_v12, %v14235_v15  ;;  %v10590_v33 = vmul.f32 %v14237_v1, %v10358_v12  ;;  %v10594_v49 = vmul.f32 %v10358_v12, %v14239_v24  ;;  %v10598_v8 = vmul.f32 %v14241_v34, %v10358_v12 }
 0x38a   :  { %14234 = vst [vmem:[#allocation5_spill] sm:$0xff] %v10582_v58  ;;  %v10602_v17 = vmul.f32 %v10358_v12, %v14243_v56  ;;  %v14244_v58 = vld [vmem:[#allocation22_spill] sm:$0xff] }
 0x38b   :  { %14236 = vst [vmem:[#allocation3_spill] sm:$0xff] %v10586_v36  ;;  %14238 = vst [vmem:[#allocation7_spill] sm:$0xff] %v10590_v33  ;;  %v10606_v15 = vmul.f32 %v14244_v58, %v10358_v12  ;;  %v14246_v36 = vld [vmem:[#allocation25_spill] sm:$0xff]  ;;  %v14247_v33 = vld [vmem:[#allocation24_spill] sm:$0xff]  ;;  %v3175_v58 = vadd.f32 %v10383_v48, %v10364_v20  ;;  %v10646_v20 = vadd.f32 %v10383_v48, %v10391_v4 }
 0x38c   :  { %14240 = vst [vmem:[#allocation4_spill] sm:$0xff] %v10594_v49  ;;  %14242 = vst [vmem:[#allocation9_spill] sm:$0xff] %v10598_v8  ;;  %v10610_v1 = vmul.f32 %v10358_v12, %v14246_v36  ;;  %v10614_v24 = vmul.f32 %v14247_v33, %v10358_v12  ;;  %v14248_v49 = vld [vmem:[#allocation27_spill] sm:$0xff]  ;;  %v14249_v8 = vld [vmem:[#allocation26_spill] sm:$0xff]  ;;  %v10630_v36 = vadd.f32 %v10383_v48, %v10372_v37 }
 0x38d   :  { %14245 = vst [vmem:[#allocation6_spill] sm:$0xff] %v10606_v15  ;;  %v10618_v34 = vmul.f32 %v10358_v12, %v14248_v49  ;;  %v10622_v56 = vmul.f32 %v14249_v8, %v10358_v12  ;;  %v3176_v15 = vadd.f32 %v10383_v48, %v10368_v27  ;;  %v10634_v33 = vadd.f32 %v10383_v48, %v10376_v45 }
 0x38e   :  { %v10638_v49 = vadd.f32 %v10383_v48, %v10380_v55  ;;  %v3239_v12 = vmax.f32 %v3175_v58, 0.0  ;;  %v10642_v8 = vadd.f32 %v10383_v48, %v10387_v62  ;;  %v10650_v27 = vadd.f32 %v10383_v48, %v10395_v42 }
 0x38f   :  { %v3240_v37 = vmax.f32 %v3176_v15, 0.0  ;;  %v10654_v45 = vadd.f32 %v10383_v48, %v10399_v63  ;;  %v10658_v55 = vadd.f32 %v10383_v48, %v10403_v26  ;;  %v10662_v62 = vadd.f32 %v10383_v48, %v10407_v38 }
 0x390   :  { %v3367_v58 = vrot.slane %v3239_v12, 7  ;;  %v10666_v4 = vadd.f32 %v10383_v48, %v10411_v6  ;;  %v10670_v42 = vadd.f32 %v10383_v48, %v10417_v44  ;;  %v10674_v63 = vadd.f32 %v10383_v48, %v10421_v25 }
 0x391   :  { %v3368_v15 = vrot.slane %v3240_v37, 7  ;;  %v10678_v26 = vadd.f32 %v10383_v48, %v10425_v57  ;;  %v10682_v38 = vadd.f32 %v10383_v48, %v10429_v21  ;;  %v10686_v6 = vadd.f32 %v10383_v48, %v10433_v11 }
 0x392   :  { %v10690_v44 = vadd.f32 %v10383_v48, %v10437_v9  ;;  %v10694_v25 = vadd.f32 %v10383_v48, %v10441_v53  ;;  %v10698_v57 = vadd.f32 %v10383_v48, %v10445_v3  ;;  %v10702_v21 = vadd.f32 %v10383_v48, %v10449_v60 }
 0x393   :  { %v10705_v12 = vsel %vm154_vm0, %v3367_v58, %v3368_v15  ;;  %v3591_v11 = vsel %vm154_vm0, %v3368_v15, 0.0  ;;  %v10710_v9 = vadd.f32 %v10383_v48, %v10453_v19  ;;  %v10714_v53 = vadd.f32 %v10383_v48, %v10457_v10 }
 0x394   :  { %14250 = vst [vmem:[#allocation11_spill] sm:$0xff] %v10702_v21  ;;  %14251 = vst [vmem:[#allocation8_spill] sm:$0xff] %v10705_v12  ;;  %v3684_v3 = vrot.slane %v10705_v12, 1  ;;  %v3686_v37 = vrot.slane %v3591_v11, 1  ;;  %v10719_v60 = vadd.f32 %v10383_v48, %v10461_v30  ;;  %v10723_v21 = vadd.f32 %v10383_v48, %v10469_v7 }
 0x395   :  { %v10727_v15 = vadd.f32 %v10383_v48, %v10473_v47  ;;  %v10731_v19 = vadd.f32 %v10383_v48, %v10477_v2  ;;  %v10735_v10 = vadd.f32 %v10383_v48, %v10481_v51  ;;  %v10739_v30 = vadd.f32 %v10383_v48, %v10485_v59 }
 0x396   :  { %14252 = vst [vmem:[#allocation13_spill] sm:$0xff] %v10719_v60  ;;  %v3687_v60 = vsel %vm472_vm2, %v3684_v3, %v3686_v37  ;;  %v10744_v7 = vadd.f32 %v10383_v48, %v10489_v61  ;;  %v10748_v47 = vadd.f32 %v10383_v48, %v10498_v32  ;;  %v10752_v2 = vadd.f32 %v10383_v48, %v10502_v13  ;;  %v14256_v37 = vld [vmem:[#allocation5_spill] sm:$0xff] }
 0x397   :  { %3985 = vrot.lane.b32.xlu1 %v3687_v60, %s8320_s14  ;;  %v10757_v51 = vadd.f32 %v10383_v48, %v10506_v0  ;;  %v10761_v59 = vadd.f32 %v10383_v48, %v10510_v29  ;;  %v10765_v61 = vadd.f32 %v10383_v48, %v10514_v41  ;;  %v10769_v32 = vadd.f32 %v10383_v48, %v10518_v54  ;;  %v14258_v60 = vld [vmem:[#allocation3_spill] sm:$0xff] }
 0x398   :  { %v10773_v13 = vadd.f32 %v10383_v48, %v10522_v43  ;;  %v10777_v0 = vadd.f32 %v10383_v48, %v10526_v5  ;;  %v10781_v29 = vadd.f32 %v10383_v48, %v10530_v39  ;;  %v10785_v41 = vadd.f32 %v10383_v48, %v10534_v35 }
 0x399   :  { %v10789_v54 = vadd.f32 %v10383_v48, %v10538_v31  ;;  %v10793_v43 = vadd.f32 %v10383_v48, %v10542_v23  ;;  %v10797_v5 = vadd.f32 %v10383_v48, %v10546_v14  ;;  %v10801_v39 = vadd.f32 %v10383_v48, %v10550_v40 }
 0x39a   :  { %v10805_v35 = vadd.f32 %v10383_v48, %v10554_v22  ;;  %v10809_v31 = vadd.f32 %v10383_v48, %v10558_v52  ;;  %v10813_v23 = vadd.f32 %v10383_v48, %v10562_v46  ;;  %v10817_v14 = vadd.f32 %v10383_v48, %v10566_v28 }
 0x39b   :  { %v10821_v40 = vadd.f32 %v10383_v48, %v10570_v16  ;;  %v10825_v22 = vadd.f32 %v10383_v48, %v10574_v50  ;;  %v10829_v52 = vadd.f32 %v10383_v48, %v10578_v18  ;;  %v10833_v46 = vadd.f32 %v10383_v48, %v14256_v37 }
 0x39c   :  { %14253 = vst [vmem:[#allocation10_spill] sm:$0xff] %v10817_v14  ;;  %v10837_v28 = vadd.f32 %v10383_v48, %v14258_v60  ;;  %v14259_v14 = vld [vmem:[#allocation7_spill] sm:$0xff]  ;;  %v10853_v37 = vadd.f32 %v10383_v48, %v10602_v17  ;;  %v10873_v17 = vadd.f32 %v10383_v48, %v10622_v56  ;;  %v3242_v56 = vmax.f32 %v10634_v33, 0.0 }
 0x39d   :  { %14254 = vst [vmem:[#allocation14_spill] sm:$0xff] %v10821_v40  ;;  %14255 = vst [vmem:[#allocation12_spill] sm:$0xff] %v10825_v22  ;;  %v10841_v16 = vadd.f32 %v10383_v48, %v14259_v14  ;;  %v14260_v40 = vld [vmem:[#allocation4_spill] sm:$0xff]  ;;  %v14261_v22 = vld [vmem:[#allocation9_spill] sm:$0xff]  ;;  %v10861_v14 = vadd.f32 %v10383_v48, %v10610_v1 }
 0x39e   :  { %14257 = vst [vmem:[#allocation15_spill] sm:$0xff] %v10833_v46  ;;  %v10845_v50 = vadd.f32 %v10383_v48, %v14260_v40  ;;  %v10849_v18 = vadd.f32 %v10383_v48, %v14261_v22  ;;  %14262 = vst [vmem:[#allocation16_spill] sm:$0xff] %v10853_v37  ;;  %v14263_v46 = vld [vmem:[#allocation6_spill] sm:$0xff]  ;;  %v10865_v40 = vadd.f32 %v10383_v48, %v10614_v24  ;;  %v10876_v37 = vsel %vm154_vm0, 0.0, %v3367_v58 }
 0x39f   :  { %v10857_v60 = vadd.f32 %v10383_v48, %v14263_v46  ;;  %14264 = vst [vmem:[#allocation17_spill] sm:$0xff] %v10861_v14  ;;  %v10869_v22 = vadd.f32 %v10383_v48, %v10618_v34  ;;  %14267 = vst [vmem:[#allocation19_spill] sm:$0xff] %v10873_v17  ;;  %v3683_v46 = vrot.slane %v10876_v37, 1  ;;  %v3834_v24 = vrot.slane %v10705_v12, 2 }
 0x3a0   :  { %14265 = vst [vmem:[#allocation18_spill] sm:$0xff] %v10865_v40  ;;  %14268 = vst [vmem:[#allocation23_spill] sm:$0xff] %v10876_v37  ;;  %v3836_v40 = vrot.slane %v3591_v11, 2  ;;  %v3833_v34 = vrot.slane %v10876_v37, 2  ;;  %v3241_v58 = vmax.f32 %v10630_v36, 0.0  ;;  %v3247_v37 = vmax.f32 %v10654_v45, 0.0 }
 0x3a1   :  { %14266 = vst [vmem:[#allocation21_spill] sm:$0xff] %v10869_v22  ;;  %v3685_v1 = vsel %vm472_vm2, %v3683_v46, %v3684_v3  ;;  %v3371_v3 = vrot.slane %v3242_v56, 7  ;;  %v3243_v46 = vmax.f32 %v10638_v49, 0.0  ;;  %v3249_v49 = vmax.f32 %v10662_v62, 0.0 }
 0x3a2   :  { %3983 = vrot.lane.b32.xlu0 %v3685_v1, %s8320_s14  ;;  %v3837_v14 = vsel %vm625_vm1, %v3834_v24, %v3836_v40  ;;  %v3835_v48 = vsel %vm625_vm1, %v3833_v34, %v3834_v24  ;;  %v3244_v1 = vmax.f32 %v10642_v8, 0.0  ;;  %v3370_v11 = vrot.slane %v3241_v58, 7 }
 0x3a3   :  { %4165 = vrot.lane.b32.xlu1 %v3837_v14, %s8319_s13  ;;  %v3245_v40 = vmax.f32 %v10646_v20, 0.0  ;;  %v3246_v14 = vmax.f32 %v10650_v27, 0.0  ;;  %v3248_v24 = vmax.f32 %v10658_v55, 0.0  ;;  %v3592_v34 = vsel %vm154_vm0, %v3371_v3, 0.0 }
 0x3a4   :  { %v3374_v33 = vrot.slane %v3244_v1, 7  ;;  %v10897_v36 = vsel %vm154_vm0, 0.0, %v3370_v11  ;;  %v3250_v8 = vmax.f32 %v10666_v4, 0.0  ;;  %v10902_v20 = vsel %vm154_vm0, %v3370_v11, %v3371_v3 }
 0x3a5   :  { %14269 = vst [vmem:[#allocation22_spill] sm:$0xff] %v10897_v36  ;;  %v3376_v56 = vrot.slane %v3245_v40, 7  ;;  %v3377_v58 = vrot.slane %v3246_v14, 7  ;;  %14270 = vst [vmem:[#allocation25_spill] sm:$0xff] %v10902_v20  ;;  %v3691_v27 = vrot.slane %v3592_v34, 1  ;;  %v10904_v45 = vrot.slane %v3247_v37, 7 }
 0x3a6   :  { %4163 = vrot.lane.b32.xlu0 %v3835_v48, %s8319_s13  ;;  %v3373_v48 = vrot.slane %v3243_v46, 7  ;;  %v10906_v55 = vrot.slane %v3248_v24, 7  ;;  %v3689_v46 = vrot.slane %v10902_v20, 1  ;;  %v3688_v1 = vrot.slane %v10897_v36, 1 }
 0x3a7   :  { %v3593_v62 = vsel %vm154_vm0, %v3374_v33, 0.0  ;;  %v3839_v4 = vrot.slane %v10902_v20, 2  ;;  %v3841_v11 = vrot.slane %v3592_v34, 2  ;;  %v3838_v14 = vrot.slane %v10897_v36, 2 }
 0x3a8   :  { %v10911_v12 = vsel %vm154_vm0, 0.0, %v3373_v48  ;;  %v10916_v40 = vsel %vm154_vm0, %v3373_v48, %v3374_v33  ;;  %v3692_v3 = vsel %vm472_vm2, %v3689_v46, %v3691_v27  ;;  %v3690_v37 = vsel %vm472_vm2, %v3688_v1, %v3689_v46 }
 0x3a9   :  { %14271 = vst [vmem:[#allocation24_spill] sm:$0xff] %v10911_v12  ;;  %14272 = vst [vmem:[#allocation27_spill] sm:$0xff] %v10916_v40  ;;  %3989 = vrot.lane.b32.xlu1 %v3692_v3, %s8320_s14  ;;  %v3251_v24 = vmax.f32 %v10670_v42, 0.0  ;;  %v3252_v17 = vmax.f32 %v10674_v63, 0.0  ;;  %v10926_v20 = vsel %vm154_vm0, %v3376_v56, %v3377_v58  ;;  %v10928_v48 = vrot.slane %v3249_v49, 7 }
 0x3aa   :  { %3987 = vrot.lane.b32.xlu0 %v3690_v37, %s8320_s14  ;;  %14273 = vst [vmem:[#allocation26_spill] sm:$0xff] %v10926_v20  ;;  %v10930_v33 = vrot.slane %v3250_v8, 7  ;;  %v3696_v27 = vrot.slane %v3593_v62, 1  ;;  %v3693_v34 = vrot.slane %v10911_v12, 1  ;;  %v3842_v46 = vsel %vm625_vm1, %v3839_v4, %v3841_v11 }
 0x3ab   :  { %v3840_v1 = vsel %vm625_vm1, %v3838_v14, %v3839_v4  ;;  %v3694_v3 = vrot.slane %v10916_v40, 1  ;;  %v10939_v42 = vsel %vm154_vm0, %v10904_v45, %v10906_v55  ;;  %v3253_v63 = vmax.f32 %v10678_v26, 0.0 }
 0x3ac   :  { %14274 = vst [vmem:[#allocation5_spill] sm:$0xff] %v10939_v42  ;;  %v3254_v49 = vmax.f32 %v10682_v38, 0.0  ;;  %v3255_v8 = vmax.f32 %v10686_v6, 0.0  ;;  %v10946_v37 = vrot.slane %v3251_v24, 7  ;;  %v10948_v4 = vrot.slane %v3252_v17, 7 }
 0x3ad   :  { %4169 = vrot.lane.b32.xlu1 %v3842_v46, %s8319_s13  ;;  %v3256_v11 = vmax.f32 %v10690_v44, 0.0  ;;  %v3594_v14 = vsel %vm154_vm0, %v3377_v58, 0.0  ;;  %v3844_v36 = vrot.slane %v10916_v40, 2  ;;  %v10956_v26 = vsel %vm154_vm0, %v10928_v48, %v10930_v33 }
 0x3ae   :  { %4167 = vrot.lane.b32.xlu0 %v3840_v1, %s8319_s13  ;;  %14275 = vst [vmem:[#allocation3_spill] sm:$0xff] %v10956_v26  ;;  %v3697_v38 = vsel %vm472_vm2, %v3694_v3, %v3696_v27  ;;  %v3695_v46 = vsel %vm472_vm2, %v3693_v34, %v3694_v3  ;;  %v3846_v6 = vrot.slane %v3593_v62, 2  ;;  %v3843_v24 = vrot.slane %v10911_v12, 2 }
 0x3af   :  { %v10961_v17 = vrot.slane %v3253_v63, 7  ;;  %v10963_v1 = vrot.slane %v3254_v49, 7  ;;  %v10966_v44 = vsel %vm154_vm0, 0.0, %v3376_v56  ;;  %v3257_v58 = vmax.f32 %v10694_v25, 0.0 }
 0x3b0   :  { %14276 = vst [vmem:[#allocation7_spill] sm:$0xff] %v10966_v44  ;;  %v3258_v27 = vmax.f32 %v10698_v57, 0.0  ;;  %v10975_v62 = vsel %vm154_vm0, %v10946_v37, %v10948_v4  ;;  %v10977_v34 = vrot.slane %v3255_v8, 7  ;;  %v10979_v3 = vrot.slane %v3256_v11, 7 }
 0x3b1   :  { %3993 = vrot.lane.b32.xlu1 %v3697_v38, %s8320_s14  ;;  %14277 = vst [vmem:[#allocation4_spill] sm:$0xff] %v10975_v62  ;;  %v3701_v63 = vrot.slane %v3594_v14, 1  ;;  %v3847_v56 = vsel %vm625_vm1, %v3844_v36, %v3846_v6  ;;  %v3845_v49 = vsel %vm625_vm1, %v3843_v24, %v3844_v36  ;;  %v3699_v38 = vrot.slane %v10926_v20, 1  ;;  %v14280_v24 = vld [vmem:[#allocation13_spill] sm:$0xff] }
 0x3b2   :  { %3991 = vrot.lane.b32.xlu0 %v3695_v46, %s8320_s14  ;;  %v3698_v25 = vrot.slane %v10966_v44, 1  ;;  %v14278_v46 = vld [vmem:[#allocation11_spill] sm:$0xff]  ;;  %v3260_v12 = vmax.f32 %v10710_v9, 0.0  ;;  %v10992_v8 = vsel %vm154_vm0, %v10961_v17, %v10963_v1  ;;  %v3261_v11 = vmax.f32 %v10714_v53, 0.0 }
 0x3b3   :  { %v3259_v57 = vmax.f32 %v14278_v46, 0.0  ;;  %14279 = vst [vmem:[#allocation9_spill] sm:$0xff] %v10992_v8  ;;  %v10995_v36 = vrot.slane %v3257_v58, 7  ;;  %v10997_v6 = vrot.slane %v3258_v27, 7  ;;  %v3262_v40 = vmax.f32 %v14280_v24, 0.0 }
 0x3b4   :  { %v3595_v9 = vsel %vm154_vm0, %v10906_v55, 0.0  ;;  %v3702_v46 = vsel %vm472_vm2, %v3699_v38, %v3701_v63  ;;  %v3700_v53 = vsel %vm472_vm2, %v3698_v25, %v3699_v38  ;;  %v3851_v58 = vrot.slane %v3594_v14, 2 }
 0x3b5   :  { %4173 = vrot.lane.b32.xlu1 %v3847_v56, %s8319_s13  ;;  %v3849_v56 = vrot.slane %v10926_v20, 2  ;;  %v3848_v27 = vrot.slane %v10966_v44, 2  ;;  %v11011_v22 = vrot.slane %v3259_v57, 7  ;;  %v11013_v24 = vrot.slane %v3260_v12, 7 }
 0x3b6   :  { %4171 = vrot.lane.b32.xlu0 %v3845_v49, %s8319_s13  ;;  %v11006_v49 = vsel %vm154_vm0, %v10977_v34, %v10979_v3  ;;  %v11017_v55 = vsel %vm154_vm0, 0.0, %v10904_v45  ;;  %v3263_v20 = vmax.f32 %v10723_v21, 0.0  ;;  %v3264_v63 = vmax.f32 %v10727_v15, 0.0 }
 0x3b7   :  { %14281 = vst [vmem:[#allocation6_spill] sm:$0xff] %v11017_v55  ;;  %v11026_v14 = vsel %vm154_vm0, %v10995_v36, %v10997_v6  ;;  %v11028_v38 = vrot.slane %v3261_v11, 7  ;;  %v3704_v12 = vrot.slane %v10939_v42, 1  ;;  %v3706_v25 = vrot.slane %v3595_v9, 1 }
 0x3b8   :  { %14282 = vst [vmem:[#allocation11_spill] sm:$0xff] %v11026_v14  ;;  %v11031_v45 = vrot.slane %v3262_v40, 7  ;;  %v3852_v57 = vsel %vm625_vm1, %v3849_v56, %v3851_v58  ;;  %v3703_v21 = vrot.slane %v11017_v55, 1  ;;  %v3265_v15 = vmax.f32 %v10731_v19, 0.0 }
 0x3b9   :  { %3997 = vrot.lane.b32.xlu1 %v3702_v46, %s8320_s14  ;;  %v3850_v46 = vsel %vm625_vm1, %v3848_v27, %v3849_v56  ;;  %v11043_v11 = vsel %vm154_vm0, %v11011_v22, %v11013_v24  ;;  %v11045_v40 = vrot.slane %v3263_v20, 7  ;;  %v11047_v58 = vrot.slane %v3264_v63, 7 }
 0x3ba   :  { %3995 = vrot.lane.b32.xlu0 %v3700_v53, %s8320_s14  ;;  %v3266_v53 = vmax.f32 %v10735_v10, 0.0  ;;  %14283 = vst [vmem:[#allocation13_spill] sm:$0xff] %v11043_v11  ;;  %v3267_v56 = vmax.f32 %v10739_v30, 0.0  ;;  %v3268_v27 = vmax.f32 %v10744_v7, 0.0  ;;  %v3707_v19 = vsel %vm472_vm2, %v3704_v12, %v3706_v25 }
 0x3bb   :  { %v3854_v10 = vrot.slane %v10939_v42, 2  ;;  %v3853_v44 = vrot.slane %v11017_v55, 2  ;;  %v11058_v20 = vsel %vm154_vm0, %v11028_v38, %v11031_v45  ;;  %v11060_v63 = vrot.slane %v3265_v15, 7 }
 0x3bc   :  { %v11062_v11 = vrot.slane %v3266_v53, 7  ;;  %v11066_v30 = vsel %vm154_vm0, 0.0, %v10928_v48  ;;  %v3596_v7 = vsel %vm154_vm0, %v10930_v33, 0.0  ;;  %v3270_v25 = vmax.f32 %v10752_v2, 0.0 }
 0x3bd   :  { %4177 = vrot.lane.b32.xlu1 %v3852_v57, %s8319_s13  ;;  %v3705_v57 = vsel %vm472_vm2, %v3703_v21, %v3704_v12  ;;  %14284 = vst [vmem:[#allocation32_spill] sm:$0xff] %v11066_v30  ;;  %v11076_v12 = vsel %vm154_vm0, %v11045_v40, %v11047_v58  ;;  %v11079_v21 = vrot.slane %v3267_v56, 7  ;;  %v11081_v48 = vrot.slane %v3268_v27, 7 }
 0x3be   :  { %4175 = vrot.lane.b32.xlu0 %v3850_v46, %s8319_s13  ;;  %v3856_v46 = vrot.slane %v3595_v9, 2  ;;  %v3269_v9 = vmax.f32 %v10748_v47, 0.0  ;;  %v3709_v15 = vrot.slane %v10956_v26, 1  ;;  %v3855_v53 = vsel %vm625_vm1, %v3853_v44, %v3854_v10 }
 0x3bf   :  { %v3708_v47 = vrot.slane %v11066_v30, 1  ;;  %v11092_v2 = vsel %vm154_vm0, %v11060_v63, %v11062_v11  ;;  %v3271_v56 = vmax.f32 %v10757_v51, 0.0  ;;  %v3272_v27 = vmax.f32 %v10761_v59, 0.0  ;;  %v6760_v59 = vld [vmem:[%s13986_s4 + $0x10] sm:$0xff] }
 0x3c0   :  { %v3857_v33 = vsel %vm625_vm1, %v3854_v10, %v3856_v46  ;;  %14285 = vst [vmem:[#allocation33_spill] sm:$0xff] %v11092_v2  ;;  %v3274_v44 = vmax.f32 %v10769_v32, 0.0  ;;  %v11098_v10 = vrot.slane %v3269_v9, 7  ;;  %v11100_v46 = vrot.slane %v3270_v25, 7 }
 0x3c1   :  { %4001 = vrot.lane.b32.xlu1 %v3707_v19, %s8320_s14  ;;  %v3711_v19 = vrot.slane %v3596_v7, 1  ;;  %v3710_v42 = vsel %vm472_vm2, %v3708_v47, %v3709_v15  ;;  %v3858_v2 = vrot.slane %v11066_v30, 2  ;;  %v11109_v51 = vsel %vm154_vm0, %v11079_v21, %v11081_v48 }
 0x3c2   :  { %3999 = vrot.lane.b32.xlu0 %v3705_v57, %s8320_s14  ;;  %v3273_v57 = vmax.f32 %v10765_v61, 0.0  ;;  %v6761_v61 = vld [vmem:[%s13986_s4 + $0x18] sm:$0xf]  ;;  %v3275_v32 = vmax.f32 %v10773_v13, 0.0  ;;  %v3597_v9 = vsel %vm154_vm0, %v10948_v4, 0.0  ;;  %v3276_v25 = vmax.f32 %v10777_v0, 0.0 }
 0x3c3   :  { %v3712_v55 = vsel %vm472_vm2, %v3709_v15, %v3711_v19  ;;  %v11127_v15 = vrot.slane %v3271_v56, 7  ;;  %v11129_v19 = vrot.slane %v3272_v27, 7  ;;  %v11133_v13 = vrot.slane %v3274_v44, 7 }
 0x3c4   :  { %v11131_v47 = vrot.slane %v3273_v57, 7  ;;  %v7973_v30 = vpack.c.bf16 %v6761_v61, %v6760_v59  ;;  %v11139_v4 = vsel %vm154_vm0, %v11098_v10, %v11100_v46  ;;  %v3714_v0 = vrot.slane %v10975_v62, 1 }
 0x3c5   :  { %4181 = vrot.lane.b32.xlu1 %v3857_v33, %s8319_s13  ;;  %v3859_v33 = vrot.slane %v10956_v26, 2  ;;  %v3277_v27 = vmax.f32 %v10781_v29, 0.0  ;;  %v3278_v57 = vmax.f32 %v10785_v41, 0.0  ;;  %v11148_v44 = vrot.slane %v3275_v32, 7 }
 0x3c6   :  { %4179 = vrot.lane.b32.xlu0 %v3855_v53, %s8319_s13  ;;  %v3861_v53 = vrot.slane %v3596_v7, 2  ;;  %v11120_v7 = vsel %vm154_vm0, 0.0, %v10946_v37  ;;  %7975 = vmatprep.subr.msk.bf16.mxu1 %vm8563_vm5, %v7973_v30  ;;  %v3598_v59 = vsel %vm154_vm0, %v10963_v1, 0.0  ;;  %v3864_v61 = vrot.slane %v10975_v62, 2  ;;  %v14291_v62 = vld [vmem:[#allocation10_spill] sm:$0xff] }
 0x3c7   :  { %14286 = vst [vmem:[#allocation34_spill] sm:$0xff] %v11120_v7  ;;  %v3713_v56 = vrot.slane %v11120_v7, 1  ;;  %v3866_v29 = vrot.slane %v3597_v9, 2  ;;  %7978 = vmatpush3.bf16.msk.msra.mxu1 %vm8563_vm5, %v7973_v30  ;;  %v3280_v1 = vmax.f32 %v10793_v43, 0.0  ;;  %v11180_v30 = vrot.slane %v3277_v27, 7 }
 0x3c8   :  { %v3862_v37 = vsel %vm625_vm1, %v3859_v33, %v3861_v53  ;;  %v3286_v26 = vmax.f32 %v14291_v62, 0.0  ;;  %v14293_v62 = vld [vmem:[#allocation14_spill] sm:$0xff] }
 0x3c9   :  { %4005 = vrot.lane.b32.xlu1 %v3712_v55, %s8320_s14  ;;  %v3716_v55 = vrot.slane %v3597_v9, 1  ;;  %v3715_v32 = vsel %vm472_vm2, %v3713_v56, %v3714_v0  ;;  %v11176_v9 = vsel %vm154_vm0, 0.0, %v10961_v17  ;;  %v3282_v56 = vmax.f32 %v10801_v39, 0.0 }
 0x3ca   :  { %4003 = vrot.lane.b32.xlu0 %v3710_v42, %s8320_s14  ;;  %v3860_v42 = vsel %vm625_vm1, %v3858_v2, %v3859_v33  ;;  %v11155_v2 = vsel %vm154_vm0, %v11127_v15, %v11129_v19  ;;  %v11157_v33 = vrot.slane %v3276_v25, 7  ;;  %v11170_v25 = vsel %vm154_vm0, %v11131_v47, %v11133_v13  ;;  %14288 = vst [vmem:[#allocation2_spill] sm:$0xff] %v11176_v9 }
 0x3cb   :  { %v3717_v41 = vsel %vm472_vm2, %v3714_v0, %v3716_v55  ;;  %v11182_v0 = vrot.slane %v3278_v57, 7  ;;  %v3281_v55 = vmax.f32 %v10797_v5, 0.0  ;;  %v3867_v43 = vsel %vm625_vm1, %v3864_v61, %v3866_v29 }
 0x3cc   :  { %v3718_v27 = vrot.slane %v11176_v9, 1  ;;  %v3283_v5 = vmax.f32 %v10805_v35, 0.0  ;;  %v3284_v39 = vmax.f32 %v10809_v31, 0.0  ;;  %v3285_v29 = vmax.f32 %v10813_v23, 0.0 }
 0x3cd   :  { %4185 = vrot.lane.b32.xlu1 %v3862_v37, %s8319_s13  ;;  %v3863_v37 = vrot.slane %v11120_v7, 2  ;;  %v3721_v7 = vrot.slane %v3598_v59, 1  ;;  %v3871_v35 = vrot.slane %v3598_v59, 2  ;;  %v3868_v31 = vrot.slane %v11176_v9, 2 }
 0x3ce   :  { %4183 = vrot.lane.b32.xlu0 %v3860_v42, %s8319_s13  ;;  %v3279_v42 = vmax.f32 %v10789_v54, 0.0  ;;  %v11189_v54 = vsel %vm154_vm0, %v11148_v44, %v11157_v33  ;;  %v3599_v23 = vsel %vm154_vm0, %v10979_v3, 0.0  ;;  %v11231_v59 = vrot.slane %v3283_v5, 7 }
 0x3cf   :  { %v3865_v17 = vsel %vm625_vm1, %v3863_v37, %v3864_v61  ;;  %v11206_v61 = vsel %vm154_vm0, %v11180_v30, %v11182_v0  ;;  %v11209_v37 = vrot.slane %v3281_v55, 7  ;;  %v11233_v55 = vrot.slane %v3284_v39, 7 }
 0x3d0   :  { %v11195_v57 = vrot.slane %v3279_v42, 7  ;;  %14289 = vst [vmem:[#allocation35_spill] sm:$0xff] %v11206_v61  ;;  %v11211_v42 = vrot.slane %v3282_v56, 7  ;;  %v11220_v61 = vsel %vm154_vm0, 0.0, %v10977_v34  ;;  %v3287_v56 = vmax.f32 %v14293_v62, 0.0  ;;  %v14294_v34 = vld [vmem:[#allocation12_spill] sm:$0xff] }
 0x3d1   :  { %4009 = vrot.lane.b32.xlu1 %v3717_v41, %s8320_s14  ;;  %v3719_v41 = vrot.slane %v10992_v8, 1  ;;  %14290 = vst [vmem:[#allocation36_spill] sm:$0xff] %v11209_v37  ;;  %14292 = vst [vmem:[#allocation10_spill] sm:$0xff] %v11220_v61  ;;  %v3726_v9 = vrot.slane %v3599_v23, 1  ;;  %v3723_v5 = vrot.slane %v11220_v61, 1  ;;  %v11246_v39 = vrot.slane %v3285_v29, 7 }
 0x3d2   :  { %4007 = vrot.lane.b32.xlu0 %v3715_v32, %s8320_s14  ;;  %v11197_v32 = vrot.slane %v3280_v1, 7  ;;  %v3869_v1 = vrot.slane %v10992_v8, 2  ;;  %v11241_v3 = vsel %vm154_vm0, %v11209_v37, %v11211_v42  ;;  %v11248_v8 = vrot.slane %v3286_v26, 7 }
 0x3d3   :  { %14295 = vst [vmem:[#allocation14_spill] sm:$0xff] %v11241_v3  ;;  %v3289_v62 = vmax.f32 %v10829_v52, 0.0  ;;  %v3600_v26 = vsel %vm154_vm0, %v10997_v6, 0.0  ;;  %v3874_v29 = vrot.slane %v11006_v49, 2  ;;  %v3291_v3 = vmax.f32 %v10837_v28, 0.0 }
 0x3d4   :  { %v11280_v6 = vsel %vm154_vm0, %v11246_v39, %v11248_v8 }
 0x3d5   :  { %4189 = vrot.lane.b32.xlu1 %v3867_v43, %s8319_s13  ;;  %v3722_v43 = vsel %vm472_vm2, %v3719_v41, %v3721_v7  ;;  %v11229_v7 = vsel %vm154_vm0, %v11195_v57, %v11197_v32  ;;  %v11284_v28 = vrot.slane %v3289_v62, 7 }
 0x3d6   :  { %4187 = vrot.lane.b32.xlu0 %v3865_v17, %s8319_s13  ;;  %v3720_v17 = vsel %vm472_vm2, %v3718_v27, %v3719_v41  ;;  %v3288_v41 = vmax.f32 %v14294_v34, 0.0  ;;  %v3724_v27 = vrot.slane %v11006_v49, 1  ;;  %v14296_v34 = vld [vmem:[#allocation15_spill] sm:$0xff] }
 0x3d7   :  { %v3290_v37 = vmax.f32 %v14296_v34, 0.0  ;;  %v3873_v34 = vrot.slane %v11220_v61, 2  ;;  %14299 = vst [vmem:[#allocation37_spill] sm:$0xff] %v11284_v28  ;;  %v3881_v61 = vrot.slane %v3600_v26, 2 }
 0x3d8   :  { %v3725_v52 = vsel %vm472_vm2, %v3723_v5, %v3724_v27 }
 0x3d9   :  { %4013 = vrot.lane.b32.xlu1 %v3722_v43, %s8320_s14  ;;  %v3872_v43 = vsel %vm625_vm1, %v3869_v1, %v3871_v35  ;;  %v11257_v35 = vsel %vm154_vm0, %v11231_v59, %v11233_v55  ;;  %v3875_v5 = vsel %vm625_vm1, %v3873_v34, %v3874_v29  ;;  %v3879_v34 = vrot.slane %v11026_v14, 2 }
 0x3da   :  { %4011 = vrot.lane.b32.xlu0 %v3720_v17, %s8320_s14  ;;  %v3870_v17 = vsel %vm625_vm1, %v3868_v31, %v3869_v1  ;;  %14297 = vst [vmem:[#allocation12_spill] sm:$0xff] %v11257_v35  ;;  %v11259_v1 = vrot.slane %v3287_v56, 7  ;;  %v11261_v31 = vrot.slane %v3288_v41, 7  ;;  %v3292_v35 = vmax.f32 %v10841_v16, 0.0 }
 0x3db   :  { %v11273_v56 = vsel %vm154_vm0, 0.0, %v10995_v36  ;;  %v11286_v16 = vrot.slane %v3290_v37, 7  ;;  %v3729_v36 = vrot.slane %v11026_v14, 1  ;;  %v3731_v41 = vrot.slane %v3600_v26, 1  ;;  %v14301_v37 = vld [vmem:[#allocation16_spill] sm:$0xff] }
 0x3dc   :  { %14298 = vst [vmem:[#allocation15_spill] sm:$0xff] %v11273_v56  ;;  %v3295_v62 = vmax.f32 %v14301_v37, 0.0  ;;  %v3878_v37 = vrot.slane %v11273_v56, 2  ;;  %v3601_v26 = vsel %vm154_vm0, %v11013_v24, 0.0  ;;  %v14306_v24 = vld [vmem:[#allocation13_spill] sm:$0xff] }
 0x3dd   :  { %4193 = vrot.lane.b32.xlu1 %v3872_v43, %s8319_s13  ;;  %v3727_v43 = vsel %vm472_vm2, %v3724_v27, %v3726_v9  ;;  %v3293_v9 = vmax.f32 %v10845_v50, 0.0  ;;  %v11297_v50 = vrot.slane %v3291_v3, 7  ;;  %v11311_v3 = vsel %vm154_vm0, %v11284_v28, %v11286_v16 }
 0x3de   :  { %4191 = vrot.lane.b32.xlu0 %v3870_v17, %s8319_s13  ;;  %v3876_v17 = vrot.slane %v3599_v23, 2  ;;  %v3294_v23 = vmax.f32 %v10849_v18, 0.0  ;;  %v11299_v18 = vrot.slane %v3292_v35, 7  ;;  %14302 = vst [vmem:[#allocation16_spill] sm:$0xff] %v11311_v3  ;;  %v11333_v3 = vrot.slane %v3295_v62, 7  ;;  %v14309_v62 = vld [vmem:[#allocation19_spill] sm:$0xff] }
 0x3df   :  { %14300 = vst [vmem:[#allocation38_spill] sm:$0xff] %v11297_v50  ;;  %v3882_v28 = vsel %vm625_vm1, %v3879_v34, %v3881_v61 }
 0x3e0   :  { %v3877_v27 = vsel %vm625_vm1, %v3874_v29, %v3876_v17  ;;  %v3296_v17 = vmax.f32 %v10857_v60, 0.0  ;;  %v11305_v29 = vrot.slane %v3293_v9, 7  ;;  %v11313_v35 = vrot.slane %v3294_v23, 7  ;;  %v14304_v23 = vld [vmem:[#allocation17_spill] sm:$0xff] }
 0x3e1   :  { %4017 = vrot.lane.b32.xlu1 %v3727_v43, %s8320_s14  ;;  %v3728_v43 = vrot.slane %v11273_v56, 1  ;;  %v11320_v60 = vsel %vm154_vm0, 0.0, %v11011_v22  ;;  %v11329_v9 = vsel %vm154_vm0, %v11297_v50, %v11299_v18  ;;  %v3734_v56 = vrot.slane %v14306_v24, 1 }
 0x3e2   :  { %4015 = vrot.lane.b32.xlu0 %v3725_v52, %s8320_s14  ;;  %v11295_v52 = vsel %vm154_vm0, %v11259_v1, %v11261_v31  ;;  %14303 = vst [vmem:[#allocation39_spill] sm:$0xff] %v11329_v9  ;;  %v11335_v22 = vrot.slane %v3296_v17, 7  ;;  %v3733_v14 = vrot.slane %v11320_v60, 1  ;;  %v11344_v9 = vsel %vm154_vm0, %v11305_v29, %v11313_v35 }
 0x3e3   :  { %14307 = vst [vmem:[#allocation17_spill] sm:$0xff] %v11344_v9  ;;  %v3300_v50 = vmax.f32 %v14309_v62, 0.0  ;;  %v3886_v62 = vrot.slane %v3601_v26, 2 }
 0x3e4   :  { %v11360_v9 = vsel %vm154_vm0, %v11333_v3, %v11335_v22 }
 0x3e5   :  { %4197 = vrot.lane.b32.xlu1 %v3877_v27, %s8319_s13  ;;  %v3732_v27 = vsel %vm472_vm2, %v3729_v36, %v3731_v41  ;;  %v14305_v41 = vld [vmem:[#allocation18_spill] sm:$0xff] }
 0x3e6   :  { %4195 = vrot.lane.b32.xlu0 %v3875_v5, %s8319_s13  ;;  %v3730_v5 = vsel %vm472_vm2, %v3728_v43, %v3729_v36  ;;  %v3297_v36 = vmax.f32 %v14304_v23, 0.0  ;;  %v3298_v43 = vmax.f32 %v14305_v41, 0.0  ;;  %v14308_v23 = vld [vmem:[#allocation21_spill] sm:$0xff] }
 0x3e7   :  { %v3299_v41 = vmax.f32 %v14308_v23, 0.0 }
 0x3e8   :  { %v11350_v61 = vrot.slane %v3297_v36, 7  ;;  %v11352_v17 = vrot.slane %v3298_v43, 7  ;;  %v3883_v36 = vrot.slane %v11320_v60, 2  ;;  %v11367_v43 = vrot.slane %v3300_v50, 7 }
 0x3e9   :  { %4021 = vrot.lane.b32.xlu1 %v3732_v27, %s8320_s14  ;;  %v3880_v27 = vsel %vm625_vm1, %v3878_v37, %v3879_v34  ;;  %v3602_v34 = vsel %vm154_vm0, %v11031_v45, 0.0  ;;  %v3884_v37 = vrot.slane %v14306_v24, 2  ;;  %v11371_v45 = vsel %vm154_vm0, 0.0, %v11028_v38 }
 0x3ea   :  { %4019 = vrot.lane.b32.xlu0 %v3730_v5, %s8320_s14  ;;  %v3736_v5 = vrot.slane %v3601_v26, 1  ;;  %14310 = vst [vmem:[#allocation18_spill] sm:$0xff] %v11350_v61  ;;  %14311 = vst [vmem:[#allocation13_spill] sm:$0xff] %v11352_v17  ;;  %v3739_v50 = vrot.slane %v11058_v20, 1 }
 0x3eb   :  { %14313 = vst [vmem:[#allocation19_spill] sm:$0xff] %v11367_v43  ;;  %v3885_v26 = vsel %vm625_vm1, %v3883_v36, %v3884_v37  ;;  %v3888_v36 = vrot.slane %v11371_v45, 2 }
 0x3ec   :  { %v3737_v23 = vsel %vm472_vm2, %v3734_v56, %v3736_v5  ;;  %v11378_v5 = vsel %vm154_vm0, %v11350_v61, %v11352_v17 }
 0x3ed   :  { %4201 = vrot.lane.b32.xlu1 %v3882_v28, %s8319_s13  ;;  %v3735_v28 = vsel %vm472_vm2, %v3733_v14, %v3734_v56  ;;  %14314 = vst [vmem:[#allocation40_spill] sm:$0xff] %v11378_v5  ;;  %v3741_v14 = vrot.slane %v3602_v34, 1  ;;  %v3887_v56 = vsel %vm625_vm1, %v3884_v37, %v3886_v62  ;;  %v3891_v37 = vrot.slane %v3602_v34, 2 }
 0x3ee   :  { %4199 = vrot.lane.b32.xlu0 %v3880_v27, %s8319_s13  ;;  %v11365_v27 = vrot.slane %v3299_v41, 7  ;;  %v3738_v41 = vrot.slane %v11371_v45, 1  ;;  %v11397_v5 = vsel %vm154_vm0, 0.0, %v11045_v40  ;;  %v3894_v40 = vrot.slane %v11076_v12, 2 }
 0x3f0   :  { %14312 = vst [vmem:[#allocation21_spill] sm:$0xff] %v11365_v27  ;;  %v11389_v38 = vsel %vm154_vm0, %v11365_v27, %v11367_v43  ;;  %v3740_v62 = vsel %vm472_vm2, %v3738_v41, %v3739_v50  ;;  %v3743_v41 = vrot.slane %v11397_v5, 1  ;;  %v14317_v43 = vld [vmem:[#allocation8_spill] sm:$0xff] }
 0x3f1   :  { %4025 = vrot.lane.b32.xlu1 %v3737_v23, %s8320_s14  ;;  %14315 = vst [vmem:[#allocation41_spill] sm:$0xff] %v11389_v38  ;;  %v3889_v23 = vrot.slane %v11058_v20, 2  ;;  %v3893_v38 = vrot.slane %v11397_v5, 2 }
 0x3f2   :  { %4023 = vrot.lane.b32.xlu0 %v3735_v28, %s8320_s14  ;;  %v3742_v28 = vsel %vm472_vm2, %v3739_v50, %v3741_v14 }
 0x3f3   :  { %v3892_v14 = vsel %vm625_vm1, %v3889_v23, %v3891_v37  ;;  %v3890_v50 = vsel %vm625_vm1, %v3888_v36, %v3889_v23  ;;  %v11415_v37 = vsel %vm154_vm0, 0.0, %v11060_v63  ;;  %v3604_v23 = vsel %vm154_vm0, %v11062_v11, 0.0  ;;  %v14316_v36 = vld [vmem:[#allocation33_spill] sm:$0xff] }
 0x3f4   :  { %v3899_v11 = vrot.slane %v14316_v36, 2 }
 0x3f5   :  { %4205 = vrot.lane.b32.xlu1 %v3887_v56, %s8319_s13  ;;  %v3603_v56 = vsel %vm154_vm0, %v11047_v58, 0.0 }
 0x3f6   :  { %4203 = vrot.lane.b32.xlu0 %v3885_v26, %s8319_s13  ;;  %v3744_v26 = vrot.slane %v11076_v12, 1  ;;  %v3746_v34 = vrot.slane %v3603_v56, 1 }
 0x3f8   :  { %v3747_v58 = vsel %vm472_vm2, %v3744_v26, %v3746_v34 }
 0x3f9   :  { %4029 = vrot.lane.b32.xlu1 %v3742_v28, %s8320_s14  ;;  %v3745_v28 = vsel %vm472_vm2, %v3743_v41, %v3744_v26  ;;  %v3751_v26 = vrot.slane %v3604_v23, 1  ;;  %v3748_v41 = vrot.slane %v11415_v37, 1 }
 0x3fa   :  { %4027 = vrot.lane.b32.xlu0 %v3740_v62, %s8320_s14  ;;  %v3896_v62 = vrot.slane %v3603_v56, 2  ;;  %v3895_v56 = vsel %vm625_vm1, %v3893_v38, %v3894_v40  ;;  %v3898_v38 = vrot.slane %v11415_v37, 2 }
 0x3fc   :  { %v3897_v34 = vsel %vm625_vm1, %v3894_v40, %v3896_v62  ;;  %v11435_v40 = vsel %vm154_vm0, 0.0, %v11079_v21  ;;  %v3900_v21 = vsel %vm625_vm1, %v3898_v38, %v3899_v11  ;;  %v3606_v38 = vsel %vm154_vm0, %v11100_v46, 0.0  ;;  %v4464_v46 = vld [vmem:[%s13986_s4 + $0x8] sm:$0xf] }
 0x3fd   :  { %4209 = vrot.lane.b32.xlu1 %v3892_v14, %s8319_s13  ;;  %v3749_v14 = vrot.slane %v14316_v36, 1  ;;  %v3753_v61 = vrot.slane %v11435_v40, 1 }
 0x3fe   :  { %4207 = vrot.lane.b32.xlu0 %v3890_v50, %s8319_s13 }
 0x3ff   :  { %v3752_v27 = vsel %vm472_vm2, %v3749_v14, %v3751_v26  ;;  %v3750_v62 = vsel %vm472_vm2, %v3748_v41, %v3749_v14  ;;  %v14318_v14 = vld [vmem:[#allocation23_spill] sm:$0xff] }
 0x401   :  { %4033 = vrot.lane.b32.xlu1 %v3747_v58, %s8320_s14  ;;  %v3901_v58 = vrot.slane %v3604_v23, 2 }
 0x402   :  { %4031 = vrot.lane.b32.xlu0 %v3745_v28, %s8320_s14  ;;  %v3605_v28 = vsel %vm154_vm0, %v11081_v48, 0.0 }
 0x403   :  { %v3902_v23 = vsel %vm625_vm1, %v3899_v11, %v3901_v58  ;;  %v3756_v48 = vrot.slane %v3605_v28, 1  ;;  %v11465_v58 = vsel %vm154_vm0, 0.0, %v11098_v10  ;;  %v4463_v10 = vld [vmem:[%s13986_s4] sm:$0xff] }
 0x405   :  { %4213 = vrot.lane.b32.xlu1 %v3897_v34, %s8319_s13 }
 0x406   :  { %4211 = vrot.lane.b32.xlu0 %v3895_v56, %s8319_s13  ;;  %v3754_v56 = vrot.slane %v11109_v51, 1 }
 0x408   :  { %v3755_v11 = vsel %vm472_vm2, %v3753_v61, %v3754_v56  ;;  %v4472_v61 = vrot.slane %v3606_v38, 1 }
 0x409   :  { %v3986_v50 = vpop.permute.xlu1 %3985  ;;  %4037 = vrot.lane.b32.xlu1 %v3752_v27, %s8320_s14 }
 0x40a   :  { %4035 = vrot.lane.b32.xlu0 %v3750_v62, %s8320_s14  ;;  %v4344_v26 = vsel %vm1144_vm6, %v14317_v43, %v3986_v50  ;;  %v3904_v43 = vrot.slane %v11109_v51, 2  ;;  %v3906_v50 = vrot.slane %v3605_v28, 2 }
 0x40c   :  { %v3907_v28 = vsel %vm625_vm1, %v3904_v43, %v3906_v50  ;;  %v4479_v50 = vrot.slane %v11465_v58, 2 }
 0x40d   :  { %4217 = vrot.lane.b32.xlu1 %v3902_v23, %s8319_s13  ;;  %v4470_v23 = vrot.slane %v11139_v4, 1 }
 0x40e   :  { %4215 = vrot.lane.b32.xlu0 %v3900_v21, %s8319_s13 }
 0x412   :  { %4039 = vrot.lane.b32.xlu0 %v3755_v11, %s8320_s14 }
 0x414   :  { %v3984_v63 = vpop.permute.xlu0 %3983 }
 0x415   :  { %v4166_v34 = vpop.permute.xlu1 %4165  ;;  %v4343_v41 = vsel %vm1144_vm6, %v14318_v14, %v3984_v63  ;;  %v3757_v63 = vsel %vm472_vm2, %v3754_v56, %v3756_v48  ;;  %v4469_v56 = vrot.slane %v11465_v58, 1  ;;  %v7979_v48 = vpack.c.bf16 %v4464_v46, %v4463_v10  ;;  %v14320_v46 = vld [vmem:[#allocation22_spill] sm:$0xff] }
 0x416   :  { %v11448_v27 = vsel %vm1206_vm7, %v4344_v26, %v4166_v34  ;;  %4041 = vrot.lane.b32.xlu1 %v3757_v63, %s8320_s14  ;;  %v3607_v26 = vsel %vm154_vm0, %v11129_v19, 0.0  ;;  %v4480_v14 = vrot.slane %v11139_v4, 2  ;;  %v11495_v63 = vsel %vm154_vm0, 0.0, %v11127_v15 }
 0x417   :  { %7981 = vmatprep.subr.msk.bf16.mxu1 %vm8563_vm5, %v7979_v48  ;;  %v4471_v21 = vsel %vm472_vm2, %v4469_v56, %v4470_v23  ;;  %v3608_v15 = vsel %vm154_vm0, %v11133_v13, 0.0  ;;  %v14319_v56 = vld [vmem:[#allocation25_spill] sm:$0xff] }
 0x418   :  { %v4164_v17 = vpop.permute.xlu0 %4163 }
 0x419   :  { %v11451_v62 = vsel %vm1206_vm7, %v4343_v41, %v4164_v17  ;;  %v3903_v17 = vrot.slane %v11435_v40, 2  ;;  %v4473_v41 = vsel %vm472_vm2, %v4470_v23, %v4472_v61  ;;  %v3758_v23 = vrot.slane %v11495_v63, 1 }
 0x41a   :  { %7659 = vmatprep.mubr.msk.f32.mxu1 %vm1329_vm8, %v11451_v62  ;;  %4221 = vrot.lane.b32.xlu1 %v3907_v28, %s8319_s13  ;;  %v3909_v61 = vrot.slane %v11155_v2, 2 }
 0x41b   :  { %7660 = vmatmul.mubr.msk.f32.vlgmr.msra.gmra.mrb[0].mxu1 %vm1329_vm8, %v11448_v27  ;;  %v3905_v34 = vsel %vm625_vm1, %v3903_v17, %v3904_v43  ;;  %v4482_v43 = vrot.slane %v3606_v38, 2  ;;  %v3990_v19 = vpop.permute.xlu1 %3989  ;;  %v3761_v17 = vrot.slane %v3607_v26, 1  ;;  %v4481_v38 = vsel %vm625_vm1, %v4479_v50, %v4480_v14 }
 0x41c   :  { %4219 = vrot.lane.b32.xlu0 %v3905_v34, %s8319_s13  ;;  %7984 = vmatpush3.bf16.msk.msra.mxu1 %vm8563_vm5, %v7979_v48  ;;  %v3988_v11 = vpop.permute.xlu0 %3987  ;;  %v3759_v34 = vrot.slane %v11155_v2, 1  ;;  %v4346_v10 = vsel %vm1144_vm6, %v14319_v56, %v3990_v19  ;;  %v11523_v19 = vsel %vm154_vm0, 0.0, %v11131_v47  ;;  %v3766_v56 = vrot.slane %v3608_v15, 1 }
 0x41d   :  { %v4483_v28 = vsel %vm625_vm1, %v4480_v14, %v4482_v43  ;;  %v4345_v48 = vsel %vm1144_vm6, %v14320_v46, %v3988_v11  ;;  %v3908_v43 = vrot.slane %v11495_v63, 2  ;;  %v3914_v46 = vrot.slane %v11170_v25, 2 }
 0x41e   :  { %4491 = vrot.lane.b32.xlu1 %v4473_v41, %s8320_s14  ;;  %v3762_v13 = vsel %vm472_vm2, %v3759_v34, %v3761_v17  ;;  %v3764_v17 = vrot.slane %v11170_v25, 1 }
 0x41f   :  { %v4170_v14 = vpop.permute.xlu1 %4169  ;;  %v3910_v47 = vsel %vm625_vm1, %v3908_v43, %v3909_v61  ;;  %v3916_v43 = vrot.slane %v3608_v15, 2 }
 0x420   :  { %4489 = vrot.lane.b32.xlu0 %v4471_v21, %s8320_s14  ;;  %v4168_v41 = vpop.permute.xlu0 %4167  ;;  %v3911_v21 = vrot.slane %v3607_v26, 2  ;;  %v11514_v50 = vsel %vm1206_vm7, %v4346_v10, %v4170_v14  ;;  %v3609_v10 = vsel %vm154_vm0, %v11157_v33, 0.0 }
 0x421   :  { %14321 = vst [vmem:[#allocation33_spill] sm:$0xff] %v11514_v50 }
 0x422   :  { %4503 = vrot.lane.b32.xlu1 %v4483_v28, %s8319_s13  ;;  %v11517_v28 = vsel %vm1206_vm7, %v4345_v48, %v4168_v41  ;;  %v14322_v48 = vld [vmem:[#allocation27_spill] sm:$0xff]  ;;  %v14323_v41 = vld [vmem:[#allocation24_spill] sm:$0xff] }
 0x423   :  { %7662 = vmatprep.mubr.msk.f32.mxu1 %vm1329_vm8, %v11517_v28  ;;  %v3994_v26 = vpop.permute.xlu1 %3993 }
 0x424   :  { %4501 = vrot.lane.b32.xlu0 %v4481_v38, %s8319_s13  ;;  %v3760_v38 = vsel %vm472_vm2, %v3758_v23, %v3759_v34  ;;  %7663 = vmatmul.mubr.msk.f32.gmra.mrb[2].mxu1 %vm1329_vm8, %v11514_v50  ;;  %v3992_v11 = vpop.permute.xlu0 %3991  ;;  %v3912_v34 = vsel %vm625_vm1, %v3909_v61, %v3911_v21  ;;  %v3763_v23 = vrot.slane %v11523_v19, 1  ;;  %v4348_v14 = vsel %vm1144_vm6, %v14322_v48, %v3994_v26 }
 0x425   :  { %v3767_v61 = vsel %vm472_vm2, %v3764_v17, %v3766_v56  ;;  %v3913_v50 = vrot.slane %v11523_v19, 2  ;;  %v11555_v26 = vsel %vm154_vm0, 0.0, %v11148_v44  ;;  %v3771_v56 = vrot.slane %v3609_v10, 1 }
 0x426   :  { %4045 = vrot.lane.b32.xlu1 %v3762_v13, %s8320_s14  ;;  %v4347_v13 = vsel %vm1144_vm6, %v14323_v41, %v3992_v11  ;;  %v3765_v33 = vsel %vm472_vm2, %v3763_v23, %v3764_v17  ;;  %v3769_v17 = vrot.slane %v11189_v54, 1  ;;  %v3917_v23 = vsel %vm625_vm1, %v3914_v46, %v3916_v43  ;;  %v14325_v41 = vld [vmem:[#allocation26_spill] sm:$0xff] }
 0x427   :  { %v4174_v21 = vpop.permute.xlu1 %4173  ;;  %v3915_v44 = vsel %vm625_vm1, %v3913_v50, %v3914_v46  ;;  %v3768_v48 = vrot.slane %v11555_v26, 1 }
 0x428   :  { %4043 = vrot.lane.b32.xlu0 %v3760_v38, %s8320_s14  ;;  %v4172_v38 = vpop.permute.xlu0 %4171  ;;  %v3772_v43 = vsel %vm472_vm2, %v3769_v17, %v3771_v56 }
 0x42a   :  { %4225 = vrot.lane.b32.xlu1 %v3912_v34, %s8319_s13  ;;  %v11546_v34 = vsel %vm1206_vm7, %v4348_v14, %v4174_v21  ;;  %v3919_v14 = vrot.slane %v11189_v54, 2  ;;  %v14326_v21 = vld [vmem:[#allocation7_spill] sm:$0xff] }
 0x42b   :  { %14324 = vst [vmem:[#allocation8_spill] sm:$0xff] %v11546_v34  ;;  %v3998_v15 = vpop.permute.xlu1 %3997 }
 0x42c   :  { %4223 = vrot.lane.b32.xlu0 %v3910_v47, %s8319_s13  ;;  %v11549_v47 = vsel %vm1206_vm7, %v4347_v13, %v4172_v38  ;;  %v3996_v11 = vpop.permute.xlu0 %3995  ;;  %v4350_v13 = vsel %vm1144_vm6, %v14325_v41, %v3998_v15  ;;  %v11585_v15 = vsel %vm154_vm0, 0.0, %v11180_v30 }
 0x42d   :  { %7665 = vmatprep.mubr.msk.f32.mxu1 %vm1329_vm8, %v11549_v47  ;;  %v4349_v38 = vsel %vm1144_vm6, %v14326_v21, %v3996_v11  ;;  %v3610_v11 = vsel %vm154_vm0, %v11182_v0, 0.0  ;;  %v3773_v0 = vrot.slane %v11585_v15, 1  ;;  %v3611_v21 = vsel %vm154_vm0, %v11197_v32, 0.0 }
 0x42e   :  { %4049 = vrot.lane.b32.xlu1 %v3767_v61, %s8320_s14  ;;  %7666 = vmatmul.mubr.msk.f32.gmra.mrb[4].mxu1 %vm1329_vm8, %v11546_v34  ;;  %v3921_v34 = vrot.slane %v3609_v10, 2 }
 0x42f   :  { %v4178_v61 = vpop.permute.xlu1 %4177 }
 0x430   :  { %4047 = vrot.lane.b32.xlu0 %v3765_v33, %s8320_s14  ;;  %v4176_v33 = vpop.permute.xlu0 %4175  ;;  %v11576_v50 = vsel %vm1206_vm7, %v4350_v13, %v4178_v61  ;;  %v3922_v56 = vsel %vm625_vm1, %v3919_v14, %v3921_v34  ;;  %v3776_v13 = vrot.slane %v3610_v11, 1  ;;  %v14330_v61 = vld [vmem:[#allocation5_spill] sm:$0xff]  ;;  %v14331_v34 = vld [vmem:[#allocation6_spill] sm:$0xff] }
 0x431   :  { %14327 = vst [vmem:[#allocation23_spill] sm:$0xff] %v11576_v50  ;;  %v11579_v46 = vsel %vm1206_vm7, %v4349_v38, %v4176_v33 }
 0x432   :  { %4229 = vrot.lane.b32.xlu1 %v3917_v23, %s8319_s13  ;;  %14328 = vst [vmem:[#allocation25_spill] sm:$0xff] %v11579_v46  ;;  %v3770_v23 = vsel %vm472_vm2, %v3768_v48, %v3769_v17  ;;  %7668 = vmatprep.mubr.msk.f32.mxu1 %vm1329_vm8, %v11579_v46  ;;  %v14329_v48 = vld [vmem:[#allocation35_spill] sm:$0xff] }
 0x433   :  { %7669 = vmatmul.mubr.msk.f32.gmra.mrb[6].mxu1 %vm1329_vm8, %v11576_v50  ;;  %v4002_v10 = vpop.permute.xlu1 %4001  ;;  %v3774_v41 = vrot.slane %v14329_v48, 1  ;;  %v3924_v38 = vrot.slane %v14329_v48, 2  ;;  %v3923_v50 = vrot.slane %v11585_v15, 2 }
 0x434   :  { %4227 = vrot.lane.b32.xlu0 %v3915_v44, %s8319_s13  ;;  %v3918_v44 = vrot.slane %v11555_v26, 2  ;;  %v4000_v17 = vpop.permute.xlu0 %3999  ;;  %v4352_v33 = vsel %vm1144_vm6, %v14330_v61, %v4002_v10  ;;  %v11619_v10 = vsel %vm154_vm0, 0.0, %v11195_v57  ;;  %v3781_v61 = vrot.slane %v3611_v21, 1 }
 0x435   :  { %v3777_v32 = vsel %vm472_vm2, %v3774_v41, %v3776_v13  ;;  %v3775_v46 = vsel %vm472_vm2, %v3773_v0, %v3774_v41  ;;  %v3925_v41 = vsel %vm625_vm1, %v3923_v50, %v3924_v38  ;;  %v3779_v57 = vrot.slane %v11229_v7, 1 }
 0x436   :  { %4053 = vrot.lane.b32.xlu1 %v3772_v43, %s8320_s14  ;;  %v3920_v30 = vsel %vm625_vm1, %v3918_v44, %v3919_v14  ;;  %v4351_v14 = vsel %vm1144_vm6, %v14331_v34, %v4000_v17  ;;  %v3926_v44 = vrot.slane %v3610_v11, 2  ;;  %v3778_v0 = vrot.slane %v11619_v10, 1  ;;  %v14334_v34 = vld [vmem:[#allocation3_spill] sm:$0xff] }
 0x437   :  { %v4182_v43 = vpop.permute.xlu1 %4181 }
 0x438   :  { %4051 = vrot.lane.b32.xlu0 %v3770_v23, %s8320_s14  ;;  %v4180_v23 = vpop.permute.xlu0 %4179  ;;  %v3927_v13 = vsel %vm625_vm1, %v3924_v38, %v3926_v44  ;;  %v3931_v44 = vrot.slane %v3611_v21, 2 }
 0x439   :  { %v14376_v53 = vld [vmem:[#allocation25_spill] sm:$0xff] }
 0x43a   :  { %4233 = vrot.lane.b32.xlu1 %v3922_v56, %s8319_s13  ;;  %v11610_v56 = vsel %vm1206_vm7, %v4352_v33, %v4182_v43  ;;  %v3929_v33 = vrot.slane %v11229_v7, 2  ;;  %v14335_v43 = vld [vmem:[#allocation32_spill] sm:$0xff] }
 0x43b   :  { %14332 = vst [vmem:[#allocation22_spill] sm:$0xff] %v11610_v56  ;;  %v4006_v11 = vpop.permute.xlu1 %4005 }
 0x43c   :  { %4231 = vrot.lane.b32.xlu0 %v3920_v30, %s8319_s13  ;;  %v11613_v30 = vsel %vm1206_vm7, %v4351_v14, %v4180_v23  ;;  %v4004_v17 = vpop.permute.xlu0 %4003  ;;  %v4354_v14 = vsel %vm1144_vm6, %v14334_v34, %v4006_v11  ;;  %v14339_v34 = vld [vmem:[#allocation14_spill] sm:$0xff] }
 0x43d   :  { %14333 = vst [vmem:[#allocation27_spill] sm:$0xff] %v11613_v30  ;;  %7671 = vmatprep.mubr.msk.f32.mxu1 %vm1329_vm8, %v11613_v30  ;;  %v4353_v23 = vsel %vm1144_vm6, %v14335_v43, %v4004_v17  ;;  %v14338_v30 = vld [vmem:[#allocation36_spill] sm:$0xff]  ;;  %v3934_v43 = vrot.slane %v14339_v34, 2 }
 0x43e   :  { %4057 = vrot.lane.b32.xlu1 %v3777_v32, %s8320_s14  ;;  %7672 = vmatmul.mubr.msk.f32.gmra.mrb[8].mxu1 %vm1329_vm8, %v11610_v56  ;;  %v3928_v32 = vrot.slane %v11619_v10, 2  ;;  %v3780_v56 = vsel %vm472_vm2, %v3778_v0, %v3779_v57  ;;  %v11651_v11 = vsel %vm154_vm0, 0.0, %v14338_v30 }
 0x43f   :  { %v4186_v50 = vpop.permute.xlu1 %4185  ;;  %v3783_v0 = vrot.slane %v11651_v11, 1 }
 0x440   :  { %4055 = vrot.lane.b32.xlu0 %v3775_v46, %s8320_s14  ;;  %v3612_v46 = vsel %vm154_vm0, %v11211_v42, 0.0  ;;  %v4184_v38 = vpop.permute.xlu0 %4183  ;;  %v3782_v42 = vsel %vm472_vm2, %v3779_v57, %v3781_v61  ;;  %v3784_v61 = vrot.slane %v14339_v34, 1  ;;  %v3932_v57 = vsel %vm625_vm1, %v3929_v33, %v3931_v44 }
 0x441   :  { %v3930_v30 = vsel %vm625_vm1, %v3928_v32, %v3929_v33  ;;  %v3936_v32 = vrot.slane %v3612_v46, 2 }
 0x442   :  { %4237 = vrot.lane.b32.xlu1 %v3927_v13, %s8319_s13  ;;  %v11642_v13 = vsel %vm1206_vm7, %v4354_v14, %v4186_v50  ;;  %v3786_v14 = vrot.slane %v3612_v46, 1 }
 0x443   :  { %14336 = vst [vmem:[#allocation24_spill] sm:$0xff] %v11642_v13  ;;  %v4010_v21 = vpop.permute.xlu1 %4009 }
 0x444   :  { %4235 = vrot.lane.b32.xlu0 %v3925_v41, %s8319_s13  ;;  %v11645_v41 = vsel %vm1206_vm7, %v4353_v23, %v4184_v38  ;;  %v4008_v17 = vpop.permute.xlu0 %4007  ;;  %v14340_v23 = vld [vmem:[#allocation4_spill] sm:$0xff]  ;;  %v14341_v38 = vld [vmem:[#allocation34_spill] sm:$0xff]  ;;  %v3787_v33 = vsel %vm472_vm2, %v3784_v61, %v3786_v14 }
 0x445   :  { %14337 = vst [vmem:[#allocation26_spill] sm:$0xff] %v11645_v41  ;;  %7674 = vmatprep.mubr.msk.f32.mxu1 %vm1329_vm8, %v11645_v41  ;;  %v4356_v50 = vsel %vm1144_vm6, %v14340_v23, %v4010_v21  ;;  %v3933_v41 = vrot.slane %v11651_v11, 2  ;;  %v11683_v21 = vsel %vm154_vm0, 0.0, %v11231_v59 }
 0x446   :  { %4061 = vrot.lane.b32.xlu1 %v3782_v42, %s8320_s14  ;;  %7675 = vmatmul.mubr.msk.f32.gmra.mrb[10].mxu1 %vm1329_vm8, %v11642_v13  ;;  %v4355_v42 = vsel %vm1144_vm6, %v14341_v38, %v4008_v17  ;;  %v14344_v17 = vld [vmem:[#allocation12_spill] sm:$0xff]  ;;  %v3788_v23 = vrot.slane %v11683_v21, 1 }
 0x447   :  { %v4190_v44 = vpop.permute.xlu1 %4189  ;;  %v3935_v59 = vsel %vm625_vm1, %v3933_v41, %v3934_v43  ;;  %v3939_v38 = vrot.slane %v14344_v17, 2 }
 0x448   :  { %4059 = vrot.lane.b32.xlu0 %v3780_v56, %s8320_s14  ;;  %v3613_v56 = vsel %vm154_vm0, %v11233_v55, 0.0  ;;  %v4188_v13 = vpop.permute.xlu0 %4187  ;;  %v3785_v55 = vsel %vm472_vm2, %v3783_v0, %v3784_v61  ;;  %v3789_v61 = vrot.slane %v14344_v17, 1  ;;  %v3937_v0 = vsel %vm625_vm1, %v3934_v43, %v3936_v32 }
 0x449   :  { %v3791_v14 = vrot.slane %v3613_v56, 1  ;;  %v3941_v43 = vrot.slane %v3613_v56, 2 }
 0x44a   :  { %4241 = vrot.lane.b32.xlu1 %v3932_v57, %s8319_s13  ;;  %v11674_v57 = vsel %vm1206_vm7, %v4356_v50, %v4190_v44  ;;  %v3614_v50 = vsel %vm154_vm0, %v11248_v8, 0.0  ;;  %v3790_v8 = vsel %vm472_vm2, %v3788_v23, %v3789_v61 }
 0x44b   :  { %14342 = vst [vmem:[#allocation7_spill] sm:$0xff] %v11674_v57  ;;  %v4014_v46 = vpop.permute.xlu1 %4013  ;;  %v3792_v41 = vsel %vm472_vm2, %v3789_v61, %v3791_v14  ;;  %v3796_v61 = vrot.slane %v3614_v50, 1  ;;  %v3942_v14 = vsel %vm625_vm1, %v3939_v38, %v3941_v43 }
 0x44c   :  { %4239 = vrot.lane.b32.xlu0 %v3930_v30, %s8319_s13  ;;  %v11677_v30 = vsel %vm1206_vm7, %v4355_v42, %v4188_v13  ;;  %v4012_v13 = vpop.permute.xlu0 %4011  ;;  %v14345_v42 = vld [vmem:[#allocation9_spill] sm:$0xff] }
 0x44d   :  { %14343 = vst [vmem:[#allocation35_spill] sm:$0xff] %v11677_v30  ;;  %7677 = vmatprep.mubr.msk.f32.mxu1 %vm1329_vm8, %v11677_v30  ;;  %v4358_v44 = vsel %vm1144_vm6, %v14345_v42, %v4014_v46  ;;  %v3938_v30 = vrot.slane %v11683_v21, 2  ;;  %v11715_v46 = vsel %vm154_vm0, 0.0, %v11246_v39  ;;  %v3615_v42 = vsel %vm154_vm0, %v11261_v31, 0.0 }
 0x44e   :  { %4065 = vrot.lane.b32.xlu1 %v3787_v33, %s8320_s14  ;;  %7678 = vmatmul.mubr.msk.f32.gmra.mrb[12].mxu1 %vm1329_vm8, %v11674_v57  ;;  %v14346_v33 = vld [vmem:[#allocation2_spill] sm:$0xff]  ;;  %v3793_v23 = vrot.slane %v11715_v46, 1 }
 0x44f   :  { %v4194_v32 = vpop.permute.xlu1 %4193  ;;  %v3940_v39 = vsel %vm625_vm1, %v3938_v30, %v3939_v38  ;;  %v3946_v38 = vrot.slane %v3614_v50, 2 }
 0x450   :  { %4063 = vrot.lane.b32.xlu0 %v3785_v55, %s8320_s14  ;;  %v4357_v55 = vsel %vm1144_vm6, %v14346_v33, %v4012_v13  ;;  %v4192_v57 = vpop.permute.xlu0 %4191  ;;  %v3794_v13 = vrot.slane %v11280_v6, 1 }
 0x452   :  { %4245 = vrot.lane.b32.xlu1 %v3937_v0, %s8319_s13  ;;  %v11706_v0 = vsel %vm1206_vm7, %v4358_v44, %v4194_v32  ;;  %v3944_v44 = vrot.slane %v11280_v6, 2  ;;  %v3797_v30 = vsel %vm472_vm2, %v3794_v13, %v3796_v61  ;;  %v3795_v31 = vsel %vm472_vm2, %v3793_v23, %v3794_v13 }
 0x453   :  { %v4018_v56 = vpop.permute.xlu1 %4017 }
 0x454   :  { %4243 = vrot.lane.b32.xlu0 %v3935_v59, %s8319_s13  ;;  %v11709_v59 = vsel %vm1206_vm7, %v4357_v55, %v4192_v57  ;;  %v4016_v57 = vpop.permute.xlu0 %4015  ;;  %v4360_v33 = vsel %vm1144_vm6, %v11006_v49, %v4018_v56  ;;  %v14347_v55 = vld [vmem:[#allocation10_spill] sm:$0xff]  ;;  %v11747_v49 = vsel %vm154_vm0, 0.0, %v11259_v1  ;;  %v3947_v13 = vsel %vm625_vm1, %v3944_v44, %v3946_v38 }
 0x455   :  { %7680 = vmatprep.mubr.msk.f32.mxu1 %vm1329_vm8, %v11709_v59  ;;  %v4359_v32 = vsel %vm1144_vm6, %v14347_v55, %v4016_v57  ;;  %v3801_v57 = vrot.slane %v3615_v42, 1  ;;  %v3799_v1 = vrot.slane %v11295_v52, 1  ;;  %v3798_v23 = vrot.slane %v11747_v49, 1 }
 0x456   :  { %4069 = vrot.lane.b32.xlu1 %v3792_v41, %s8320_s14  ;;  %7681 = vmatmul.mubr.msk.f32.gmra.mrb[14].mxu1 %vm1329_vm8, %v11706_v0  ;;  %v3949_v55 = vrot.slane %v11295_v52, 2 }
 0x457   :  { %v4198_v41 = vpop.permute.xlu1 %4197 }
 0x458   :  { %4067 = vrot.lane.b32.xlu0 %v3790_v8, %s8320_s14  ;;  %v4196_v43 = vpop.permute.xlu0 %4195  ;;  %v11738_v8 = vsel %vm1206_vm7, %v4360_v33, %v4198_v41  ;;  %v3616_v33 = vsel %vm154_vm0, %v11286_v16, 0.0  ;;  %v3802_v16 = vsel %vm472_vm2, %v3799_v1, %v3801_v57 }
 0x459   :  { %14348 = vst [vmem:[#allocation5_spill] sm:$0xff] %v11738_v8 }
 0x45a   :  { %4249 = vrot.lane.b32.xlu1 %v3942_v14, %s8319_s13  ;;  %v11741_v14 = vsel %vm1206_vm7, %v4359_v32, %v4196_v43  ;;  %v14350_v32 = vld [vmem:[#allocation11_spill] sm:$0xff] }
 0x45b   :  { %14349 = vst [vmem:[#allocation6_spill] sm:$0xff] %v11741_v14  ;;  %7683 = vmatprep.mubr.msk.f32.mxu1 %vm1329_vm8, %v11741_v14  ;;  %v4022_v50 = vpop.permute.xlu1 %4021  ;;  %v14351_v43 = vld [vmem:[#allocation15_spill] sm:$0xff]  ;;  %v14353_v14 = vld [vmem:[#allocation37_spill] sm:$0xff] }
 0x45c   :  { %4247 = vrot.lane.b32.xlu0 %v3940_v39, %s8319_s13  ;;  %v3943_v39 = vrot.slane %v11715_v46, 2  ;;  %7684 = vmatmul.mubr.msk.f32.gmra.mrb[16].mxu1 %vm1329_vm8, %v11738_v8  ;;  %v4020_v56 = vpop.permute.xlu0 %4019  ;;  %v4362_v41 = vsel %vm1144_vm6, %v14350_v32, %v4022_v50  ;;  %v3800_v8 = vsel %vm472_vm2, %v3798_v23, %v3799_v1  ;;  %v11779_v50 = vsel %vm154_vm0, 0.0, %v14353_v14  ;;  %v14354_v23 = vld [vmem:[#allocation16_spill] sm:$0xff] }
 0x45d   :  { %v3806_v32 = vrot.slane %v3616_v33, 1  ;;  %v3804_v14 = vrot.slane %v14354_v23, 1 }
 0x45e   :  { %4073 = vrot.lane.b32.xlu1 %v3797_v30, %s8320_s14  ;;  %v3945_v61 = vsel %vm625_vm1, %v3943_v39, %v3944_v44  ;;  %v4361_v30 = vsel %vm1144_vm6, %v14351_v43, %v4020_v56  ;;  %v3948_v39 = vrot.slane %v11747_v49, 2  ;;  %v3954_v43 = vrot.slane %v14354_v23, 2 }
 0x45f   :  { %v4202_v44 = vpop.permute.xlu1 %4201 }
 0x460   :  { %4071 = vrot.lane.b32.xlu0 %v3795_v31, %s8320_s14  ;;  %v4200_v38 = vpop.permute.xlu0 %4199  ;;  %v3951_v31 = vrot.slane %v3615_v42, 2  ;;  %v3950_v1 = vsel %vm625_vm1, %v3948_v39, %v3949_v55  ;;  %v3953_v39 = vrot.slane %v11779_v50, 2 }
 0x462   :  { %4253 = vrot.lane.b32.xlu1 %v3947_v13, %s8319_s13  ;;  %v11770_v13 = vsel %vm1206_vm7, %v4362_v41, %v4202_v44  ;;  %v3952_v57 = vsel %vm625_vm1, %v3949_v55, %v3951_v31  ;;  %v3803_v41 = vrot.slane %v11779_v50, 1  ;;  %v3956_v31 = vrot.slane %v3616_v33, 2 }
 0x463   :  { %14352 = vst [vmem:[#allocation3_spill] sm:$0xff] %v11770_v13  ;;  %v4026_v42 = vpop.permute.xlu1 %4025 }
 0x464   :  { %4251 = vrot.lane.b32.xlu0 %v3945_v61, %s8319_s13  ;;  %v11773_v61 = vsel %vm1206_vm7, %v4361_v30, %v4200_v38  ;;  %v4024_v56 = vpop.permute.xlu0 %4023  ;;  %v4364_v30 = vsel %vm1144_vm6, %v14306_v24, %v4026_v42  ;;  %v14356_v42 = vld [vmem:[#allocation39_spill] sm:$0xff] }
 0x465   :  { %7686 = vmatprep.mubr.msk.f32.mxu1 %vm1329_vm8, %v11773_v61  ;;  %v4363_v44 = vsel %vm1144_vm6, %v11320_v60, %v4024_v56  ;;  %v3809_v56 = vrot.slane %v14356_v42, 1 }
 0x466   :  { %4077 = vrot.lane.b32.xlu1 %v3802_v16, %s8320_s14  ;;  %7687 = vmatmul.mubr.msk.f32.gmra.mrb[18].mxu1 %vm1329_vm8, %v11770_v13  ;;  %v14355_v13 = vld [vmem:[#allocation38_spill] sm:$0xff] }
 0x467   :  { %v4206_v55 = vpop.permute.xlu1 %4205  ;;  %v11811_v24 = vsel %vm154_vm0, 0.0, %v14355_v13  ;;  %v3955_v13 = vsel %vm625_vm1, %v3953_v39, %v3954_v43 }
 0x468   :  { %4075 = vrot.lane.b32.xlu0 %v3800_v8, %s8320_s14  ;;  %v3617_v8 = vsel %vm154_vm0, %v11299_v18, 0.0  ;;  %v4204_v38 = vpop.permute.xlu0 %4203  ;;  %v11802_v16 = vsel %vm1206_vm7, %v4364_v30, %v4206_v55  ;;  %v3807_v18 = vsel %vm472_vm2, %v3804_v14, %v3806_v32  ;;  %v3618_v30 = vsel %vm154_vm0, %v11313_v35, 0.0 }
 0x469   :  { %v3811_v32 = vrot.slane %v3617_v8, 1  ;;  %v3961_v39 = vrot.slane %v3617_v8, 2 }
 0x46a   :  { %4257 = vrot.lane.b32.xlu1 %v3952_v57, %s8319_s13  ;;  %v11805_v57 = vsel %vm1206_vm7, %v4363_v44, %v4204_v38  ;;  %v3959_v44 = vrot.slane %v14356_v42, 2 }
 0x46b   :  { %7689 = vmatprep.mubr.msk.f32.mxu1 %vm1329_vm8, %v11805_v57  ;;  %v4030_v60 = vpop.permute.xlu1 %4029 }
 0x46c   :  { %4255 = vrot.lane.b32.xlu0 %v3950_v1, %s8319_s13  ;;  %v3805_v1 = vsel %vm472_vm2, %v3803_v41, %v3804_v14  ;;  %7690 = vmatmul.mubr.msk.f32.gmra.mrb[20].mxu1 %vm1329_vm8, %v11802_v16  ;;  %v4028_v33 = vpop.permute.xlu0 %4027  ;;  %v3957_v14 = vsel %vm625_vm1, %v3954_v43, %v3956_v31  ;;  %v3808_v41 = vrot.slane %v11811_v24, 1  ;;  %v4366_v55 = vsel %vm1144_vm6, %v11058_v20, %v4030_v60  ;;  %v14357_v60 = vld [vmem:[#allocation17_spill] sm:$0xff] }
 0x46d   :  { %v4365_v38 = vsel %vm1144_vm6, %v11371_v45, %v4028_v33  ;;  %v3812_v43 = vsel %vm472_vm2, %v3809_v56, %v3811_v32  ;;  %v11843_v20 = vsel %vm154_vm0, 0.0, %v11305_v29  ;;  %v3814_v33 = vrot.slane %v14357_v60, 1 }
 0x46e   :  { %4081 = vrot.lane.b32.xlu1 %v3807_v18, %s8320_s14  ;;  %v3810_v35 = vsel %vm472_vm2, %v3808_v41, %v3809_v56  ;;  %v3816_v56 = vrot.slane %v3618_v30, 1  ;;  %v3962_v32 = vsel %vm625_vm1, %v3959_v44, %v3961_v39  ;;  %v3813_v41 = vrot.slane %v11843_v20, 1 }
 0x46f   :  { %v4210_v31 = vpop.permute.xlu1 %4209 }
 0x470   :  { %4079 = vrot.lane.b32.xlu0 %v3805_v1, %s8320_s14  ;;  %v4208_v18 = vpop.permute.xlu0 %4207  ;;  %v11834_v1 = vsel %vm1206_vm7, %v4366_v55, %v4210_v31  ;;  %v3619_v55 = vsel %vm154_vm0, %v11335_v22, 0.0  ;;  %v3815_v22 = vsel %vm472_vm2, %v3813_v41, %v3814_v33  ;;  %v3969_v41 = vrot.slane %v11360_v9, 2 }
 0x472   :  { %4261 = vrot.lane.b32.xlu1 %v3957_v14, %s8319_s13  ;;  %v11837_v14 = vsel %vm1206_vm7, %v4365_v38, %v4208_v18  ;;  %v3964_v38 = vrot.slane %v14357_v60, 2 }
 0x473   :  { %7692 = vmatprep.mubr.msk.f32.mxu1 %vm1329_vm8, %v11837_v14  ;;  %v4034_v45 = vpop.permute.xlu1 %4033 }
 0x474   :  { %4259 = vrot.lane.b32.xlu0 %v3955_v13, %s8319_s13  ;;  %v3958_v13 = vrot.slane %v11811_v24, 2  ;;  %7693 = vmatmul.mubr.msk.f32.gmra.mrb[22].mxu1 %vm1329_vm8, %v11834_v1  ;;  %v4032_v8 = vpop.permute.xlu0 %4031  ;;  %v4368_v31 = vsel %vm1144_vm6, %v11076_v12, %v4034_v45  ;;  %v11875_v12 = vsel %vm154_vm0, 0.0, %v11333_v3  ;;  %v3819_v45 = vrot.slane %v11360_v9, 1 }
 0x475   :  { %v4367_v18 = vsel %vm1144_vm6, %v11397_v5, %v4032_v8  ;;  %v3821_v8 = vrot.slane %v3619_v55, 1 }
 0x476   :  { %4085 = vrot.lane.b32.xlu1 %v3812_v43, %s8320_s14  ;;  %v3960_v29 = vsel %vm625_vm1, %v3958_v13, %v3959_v44  ;;  %v3817_v44 = vsel %vm472_vm2, %v3814_v33, %v3816_v56  ;;  %v3818_v56 = vrot.slane %v11875_v12, 1 }
 0x477   :  { %v4214_v43 = vpop.permute.xlu1 %4213 }
 0x478   :  { %4083 = vrot.lane.b32.xlu0 %v3810_v35, %s8320_s14  ;;  %v4212_v39 = vpop.permute.xlu0 %4211  ;;  %v3966_v35 = vrot.slane %v3618_v30, 2  ;;  %v11866_v13 = vsel %vm1206_vm7, %v4368_v31, %v4214_v43 }
 0x479   :  { %14358 = vst [vmem:[#allocation32_spill] sm:$0xff] %v11866_v13 }
 0x47a   :  { %4265 = vrot.lane.b32.xlu1 %v3962_v32, %s8319_s13  ;;  %v11869_v32 = vsel %vm1206_vm7, %v4367_v18, %v4212_v39  ;;  %v3967_v33 = vsel %vm625_vm1, %v3964_v38, %v3966_v35  ;;  %v3971_v35 = vrot.slane %v3619_v55, 2 }
 0x47b   :  { %7695 = vmatprep.mubr.msk.f32.mxu1 %vm1329_vm8, %v11869_v32  ;;  %v4038_v5 = vpop.permute.xlu1 %4037 }
 0x47c   :  { %4263 = vrot.lane.b32.xlu0 %v3960_v29, %s8319_s13  ;;  %v3963_v29 = vrot.slane %v11843_v20, 2  ;;  %7696 = vmatmul.mubr.msk.f32.gmra.mrb[24].mxu1 %vm1329_vm8, %v11866_v13  ;;  %v4036_v30 = vpop.permute.xlu0 %4035  ;;  %v4370_v31 = vsel %vm1144_vm6, %v14316_v36, %v4038_v5  ;;  %v14367_v13 = vld [vmem:[#allocation21_spill] sm:$0xff] }
 0x47d   :  { %v4369_v18 = vsel %vm1144_vm6, %v11415_v37, %v4036_v30  ;;  %v14362_v37 = vld [vmem:[#allocation13_spill] sm:$0xff] }
 0x47e   :  { %4089 = vrot.lane.b32.xlu1 %v3817_v44, %s8320_s14  ;;  %v3965_v3 = vsel %vm625_vm1, %v3963_v29, %v3964_v38  ;;  %v3822_v44 = vsel %vm472_vm2, %v3819_v45, %v3821_v8  ;;  %v3820_v29 = vsel %vm472_vm2, %v3818_v56, %v3819_v45  ;;  %v3620_v5 = vsel %vm154_vm0, %v14362_v37, 0.0  ;;  %v14363_v56 = vld [vmem:[#allocation40_spill] sm:$0xff] }
 0x47f   :  { %v4218_v43 = vpop.permute.xlu1 %4217  ;;  %v3972_v45 = vsel %vm625_vm1, %v3969_v41, %v3971_v35  ;;  %v3976_v37 = vrot.slane %v3620_v5, 2 }
 0x480   :  { %4087 = vrot.lane.b32.xlu0 %v3815_v22, %s8320_s14  ;;  %v4216_v39 = vpop.permute.xlu0 %4215  ;;  %v11896_v38 = vsel %vm1206_vm7, %v4370_v31, %v4218_v43  ;;  %v3824_v31 = vrot.slane %v14363_v56, 1 }
 0x481   :  { %14359 = vst [vmem:[#allocation36_spill] sm:$0xff] %v11896_v38  ;;  %v11899_v22 = vsel %vm1206_vm7, %v4369_v18, %v4216_v39  ;;  %v3826_v18 = vrot.slane %v3620_v5, 1  ;;  %v14364_v39 = vld [vmem:[#allocation19_spill] sm:$0xff] }
 0x482   :  { %4269 = vrot.lane.b32.xlu1 %v3967_v33, %s8319_s13  ;;  %14360 = vst [vmem:[#allocation14_spill] sm:$0xff] %v11899_v22  ;;  %v3968_v33 = vrot.slane %v11875_v12, 2  ;;  %7698 = vmatprep.mubr.msk.f32.mxu1 %vm1329_vm8, %v11899_v22 }
 0x483   :  { %7699 = vmatmul.mubr.msk.f32.gmra.mrb[26].mxu1 %vm1329_vm8, %v11896_v38 }
 0x484   :  { %4267 = vrot.lane.b32.xlu0 %v3965_v3, %s8319_s13  ;;  %v14361_v3 = vld [vmem:[#allocation18_spill] sm:$0xff]  ;;  %v4040_v30 = vpop.permute.xlu0 %4039  ;;  %v3970_v8 = vsel %vm625_vm1, %v3968_v33, %v3969_v41 }
 0x485   :  { %v11905_v36 = vsel %vm154_vm0, 0.0, %v14361_v3  ;;  %v4371_v41 = vsel %vm1144_vm6, %v11435_v40, %v4040_v30 }
 0x486   :  { %4093 = vrot.lane.b32.xlu1 %v3822_v44, %s8320_s14  ;;  %v3823_v43 = vrot.slane %v11905_v36, 1  ;;  %v3621_v44 = vsel %vm154_vm0, %v14364_v39, 0.0  ;;  %v3973_v38 = vrot.slane %v11905_v36, 2  ;;  %v3827_v39 = vsel %vm472_vm2, %v3824_v31, %v3826_v18  ;;  %v14368_v18 = vld [vmem:[#allocation41_spill] sm:$0xff] }
 0x488   :  { %4091 = vrot.lane.b32.xlu0 %v3820_v29, %s8320_s14  ;;  %v4042_v55 = vpop.permute.xlu1 %4041  ;;  %v3974_v29 = vrot.slane %v14363_v56, 2  ;;  %v3825_v22 = vsel %vm472_vm2, %v3823_v43, %v3824_v31 }
 0x489   :  { %v4372_v3 = vsel %vm1144_vm6, %v11109_v51, %v4042_v55  ;;  %v11939_v51 = vsel %vm154_vm0, 0.0, %v14367_v13  ;;  %v3831_v55 = vrot.slane %v3621_v44, 1  ;;  %v3829_v13 = vrot.slane %v14368_v18, 1 }
 0x48a   :  { %4273 = vrot.lane.b32.xlu1 %v3972_v45, %s8319_s13  ;;  %v3977_v30 = vsel %vm625_vm1, %v3974_v29, %v3976_v37  ;;  %v3975_v31 = vsel %vm625_vm1, %v3973_v38, %v3974_v29  ;;  %v3828_v43 = vrot.slane %v11939_v51, 1  ;;  %v3981_v37 = vrot.slane %v3621_v44, 2 }
 0x48c   :  { %4271 = vrot.lane.b32.xlu0 %v3970_v8, %s8319_s13  ;;  %v4222_v35 = vpop.permute.xlu1 %4221 }
 0x48d   :  { %v11930_v45 = vsel %vm1206_vm7, %v4372_v3, %v4222_v35 }
 0x48e   :  { %v4220_v33 = vpop.permute.xlu0 %4219  ;;  %14365 = vst [vmem:[#allocation4_spill] sm:$0xff] %v11930_v45  ;;  %4097 = vrot.lane.b32.xlu1 %v3827_v39, %s8320_s14  ;;  %v3978_v39 = vrot.slane %v11939_v51, 2 }
 0x48f   :  { %v11933_v8 = vsel %vm1206_vm7, %v4371_v41, %v4220_v33  ;;  %v3979_v41 = vrot.slane %v14368_v18, 2 }
 0x490   :  { %14366 = vst [vmem:[#allocation34_spill] sm:$0xff] %v11933_v8  ;;  %4095 = vrot.lane.b32.xlu0 %v3825_v22, %s8320_s14  ;;  %7701 = vmatprep.mubr.msk.f32.mxu1 %vm1329_vm8, %v11933_v8  ;;  %v4492_v40 = vpop.permute.xlu1 %4491  ;;  %v14369_v22 = vld [vmem:[#allocation30_spill] sm:$0xff]  ;;  %v14371_v8 = vld [vmem:[#allocation29_spill] sm:$0xff] }
 0x491   :  { %7702 = vmatmul.mubr.msk.f32.gmra.mrb[28].mxu1 %vm1329_vm8, %v11930_v45  ;;  %v3622_v3 = vsel %vm154_vm0, %v14369_v22, 0.0  ;;  %v4514_v35 = vsel %vm1144_vm6, %v11139_v4, %v4492_v40  ;;  %v3832_v22 = vsel %vm472_vm2, %v3829_v13, %v3831_v55  ;;  %v3830_v45 = vsel %vm472_vm2, %v3828_v43, %v3829_v13  ;;  %v14372_v40 = vld [vmem:[#allocation31_spill] sm:$0xff] }
 0x492   :  { %v4490_v5 = vpop.permute.xlu0 %4489  ;;  %4277 = vrot.lane.b32.xlu1 %v3977_v30, %s8319_s13  ;;  %v11971_v4 = vsel %vm154_vm0, 0.0, %v14371_v8  ;;  %v4477_v55 = vrot.slane %v3622_v3, 1  ;;  %v6892_v8 = vld [vmem:[%s13986_s4 + $0x20] sm:$0xff]  ;;  %v6893_v13 = vld [vmem:[%s13986_s4 + $0x28] sm:$0xf]  ;;  %v3980_v43 = vsel %vm625_vm1, %v3978_v39, %v3979_v41 }
 0x493   :  { %v4513_v33 = vsel %vm1144_vm6, %v11465_v58, %v4490_v5  ;;  %v4475_v5 = vrot.slane %v14372_v40, 1 }
 0x494   :  { %4275 = vrot.lane.b32.xlu0 %v3975_v31, %s8319_s13  ;;  %v4504_v38 = vpop.permute.xlu1 %4503 }
 0x495   :  { %v11962_v30 = vsel %vm1206_vm7, %v4514_v35, %v4504_v38  ;;  %v4474_v35 = vrot.slane %v11971_v4, 1  ;;  %v4485_v38 = vrot.slane %v14372_v40, 2 }
 0x496   :  { %v4502_v29 = vpop.permute.xlu0 %4501  ;;  %14370 = vst [vmem:[#allocation12_spill] sm:$0xff] %v11962_v30  ;;  %4101 = vrot.lane.b32.xlu1 %v3832_v22, %s8320_s14  ;;  %v4478_v22 = vsel %vm472_vm2, %v4475_v5, %v4477_v55 }
 0x497   :  { %v11965_v31 = vsel %vm1206_vm7, %v4513_v33, %v4502_v29  ;;  %v11989_v33 = vpack.c.bf16 %v6893_v13, %v6892_v8  ;;  %v4487_v8 = vrot.slane %v3622_v3, 2 }
 0x498   :  { %4099 = vrot.lane.b32.xlu0 %v3830_v45, %s8320_s14  ;;  %7704 = vmatprep.mubr.msk.f32.mxu1 %vm1329_vm8, %v11965_v31  ;;  %v4046_v58 = vpop.permute.xlu1 %4045  ;;  %v3982_v45 = vsel %vm625_vm1, %v3979_v41, %v3981_v37 }
 0x499   :  { %7705 = vmatmul.mubr.msk.f32.gmra.mrb[30].mxu1 %vm1329_vm8, %v11962_v30  ;;  %7987 = vmatprep.subr.msk.bf16.mxu1 %vm8563_vm5, %v11989_v33  ;;  %v4374_v29 = vsel %vm1144_vm6, %v11155_v2, %v4046_v58  ;;  %v4484_v30 = vrot.slane %v11971_v4, 2  ;;  %v4488_v3 = vsel %vm625_vm1, %v4485_v38, %v4487_v8 }
 0x49a   :  { %v4044_v44 = vpop.permute.xlu0 %4043  ;;  %4281 = vrot.lane.b32.xlu1 %v3982_v45, %s8319_s13 }
 0x49b   :  { %v4373_v41 = vsel %vm1144_vm6, %v11495_v63, %v4044_v44  ;;  %v4486_v58 = vsel %vm625_vm1, %v4484_v30, %v4485_v38 }
 0x49c   :  { %4279 = vrot.lane.b32.xlu0 %v3980_v43, %s8319_s13  ;;  %v4226_v37 = vpop.permute.xlu1 %4225  ;;  %v4476_v43 = vsel %vm472_vm2, %v4474_v35, %v4475_v5 }
 0x49d   :  { %v12003_v13 = vsel %vm1206_vm7, %v4374_v29, %v4226_v37 }
 0x49e   :  { %v4224_v39 = vpop.permute.xlu0 %4223  ;;  %4495 = vrot.lane.b32.xlu1 %v4478_v22, %s8320_s14 }
 0x49f   :  { %v12006_v45 = vsel %vm1206_vm7, %v4373_v41, %v4224_v39 }
 0x4a0   :  { %4493 = vrot.lane.b32.xlu0 %v4476_v43, %s8320_s14  ;;  %7707 = vmatprep.mubr.msk.f32.mxu1 %vm1329_vm8, %v12006_v45  ;;  %v4050_v2 = vpop.permute.xlu1 %4049 }
 0x4a1   :  { %7708 = vmatmul.mubr.msk.f32.gmra.mrb[32].mxu1 %vm1329_vm8, %v12003_v13  ;;  %v4376_v44 = vsel %vm1144_vm6, %v11170_v25, %v4050_v2 }
 0x4a2   :  { %v4048_v63 = vpop.permute.xlu0 %4047  ;;  %4507 = vrot.lane.b32.xlu1 %v4488_v3, %s8319_s13 }
 0x4a3   :  { %v4375_v5 = vsel %vm1144_vm6, %v11523_v19, %v4048_v63 }
 0x4a4   :  { %4505 = vrot.lane.b32.xlu0 %v4486_v58, %s8319_s13  ;;  %v4230_v55 = vpop.permute.xlu1 %4229 }
 0x4a5   :  { %v12025_v29 = vsel %vm1206_vm7, %v4376_v44, %v4230_v55 }
 0x4a6   :  { %v4228_v35 = vpop.permute.xlu0 %4227 }
 0x4a7   :  { %v12028_v41 = vsel %vm1206_vm7, %v4375_v5, %v4228_v35 }
 0x4a8   :  { %7710 = vmatprep.mubr.msk.f32.mxu1 %vm1329_vm8, %v12028_v41  ;;  %v4054_v30 = vpop.permute.xlu1 %4053 }
 0x4a9   :  { %7711 = vmatmul.mubr.msk.f32.gmra.mrb[34].mxu1 %vm1329_vm8, %v12025_v29  ;;  %v4378_v25 = vsel %vm1144_vm6, %v11189_v54, %v4054_v30 }
 0x4aa   :  { %v4052_v38 = vpop.permute.xlu0 %4051 }
 0x4ab   :  { %v4377_v19 = vsel %vm1144_vm6, %v11555_v26, %v4052_v38 }
 0x4ac   :  { %v4234_v37 = vpop.permute.xlu1 %4233 }
 0x4ad   :  { %v12039_v22 = vsel %vm1206_vm7, %v4378_v25, %v4234_v37 }
 0x4ae   :  { %v4232_v39 = vpop.permute.xlu0 %4231 }
 0x4af   :  { %v12042_v8 = vsel %vm1206_vm7, %v4377_v19, %v4232_v39 }
 0x4b0   :  { %7713 = vmatprep.mubr.msk.f32.mxu1 %vm1329_vm8, %v12042_v8  ;;  %v4058_v43 = vpop.permute.xlu1 %4057 }
 0x4b1   :  { %7714 = vmatmul.mubr.msk.f32.gmra.mrb[36].mxu1 %vm1329_vm8, %v12039_v22  ;;  %v4380_v54 = vsel %vm1144_vm6, %v14329_v48, %v4058_v43 }
 0x4b2   :  { %v4056_v2 = vpop.permute.xlu0 %4055 }
 0x4b3   :  { %v4379_v26 = vsel %vm1144_vm6, %v11585_v15, %v4056_v2 }
 0x4b4   :  { %v4238_v63 = vpop.permute.xlu1 %4237 }
 0x4b5   :  { %v12053_v58 = vsel %vm1206_vm7, %v4380_v54, %v4238_v63 }
 0x4b6   :  { %v4236_v3 = vpop.permute.xlu0 %4235 }
 0x4b7   :  { %v12056_v44 = vsel %vm1206_vm7, %v4379_v26, %v4236_v3 }
 0x4b8   :  { %7716 = vmatprep.mubr.msk.f32.mxu1 %vm1329_vm8, %v12056_v44  ;;  %v4062_v5 = vpop.permute.xlu1 %4061 }
 0x4b9   :  { %7717 = vmatmul.mubr.msk.f32.gmra.mrb[38].mxu1 %vm1329_vm8, %v12053_v58  ;;  %v4382_v48 = vsel %vm1144_vm6, %v11229_v7, %v4062_v5 }
 0x4ba   :  { %v4060_v55 = vpop.permute.xlu0 %4059 }
 0x4bb   :  { %v4381_v15 = vsel %vm1144_vm6, %v11619_v10, %v4060_v55 }
 0x4bc   :  { %v4242_v35 = vpop.permute.xlu1 %4241 }
 0x4bd   :  { %v12067_v38 = vsel %vm1206_vm7, %v4382_v48, %v4242_v35 }
 0x4be   :  { %v4240_v30 = vpop.permute.xlu0 %4239 }
 0x4bf   :  { %v12070_v25 = vsel %vm1206_vm7, %v4381_v15, %v4240_v30 }
 0x4c0   :  { %7719 = vmatprep.mubr.msk.f32.mxu1 %vm1329_vm8, %v12070_v25  ;;  %v4066_v19 = vpop.permute.xlu1 %4065 }
 0x4c1   :  { %7720 = vmatmul.mubr.msk.f32.gmra.mrb[40].mxu1 %vm1329_vm8, %v12067_v38  ;;  %v4384_v7 = vsel %vm1144_vm6, %v14339_v34, %v4066_v19 }
 0x4c2   :  { %v4064_v37 = vpop.permute.xlu0 %4063 }
 0x4c3   :  { %v4383_v10 = vsel %vm1144_vm6, %v11651_v11, %v4064_v37 }
 0x4c4   :  { %v4246_v39 = vpop.permute.xlu1 %4245 }
 0x4c5   :  { %v12081_v2 = vsel %vm1206_vm7, %v4384_v7, %v4246_v39 }
 0x4c6   :  { %v4244_v43 = vpop.permute.xlu0 %4243 }
 0x4c7   :  { %v12084_v54 = vsel %vm1206_vm7, %v4383_v10, %v4244_v43 }
 0x4c8   :  { %7722 = vmatprep.mubr.msk.f32.mxu1 %vm1329_vm8, %v12084_v54  ;;  %v4070_v26 = vpop.permute.xlu1 %4069 }
 0x4c9   :  { %7723 = vmatmul.mubr.msk.f32.gmra.mrb[42].mxu1 %vm1329_vm8, %v12081_v2  ;;  %v4386_v34 = vsel %vm1144_vm6, %v14344_v17, %v4070_v26 }
 0x4ca   :  { %v4068_v63 = vpop.permute.xlu0 %4067 }
 0x4cb   :  { %v4385_v11 = vsel %vm1144_vm6, %v11683_v21, %v4068_v63 }
 0x4cc   :  { %v4250_v3 = vpop.permute.xlu1 %4249 }
 0x4cd   :  { %v12095_v55 = vsel %vm1206_vm7, %v4386_v34, %v4250_v3 }
 0x4ce   :  { %v4248_v5 = vpop.permute.xlu0 %4247 }
 0x4cf   :  { %v12098_v48 = vsel %vm1206_vm7, %v4385_v11, %v4248_v5 }
 0x4d0   :  { %7725 = vmatprep.mubr.msk.f32.mxu1 %vm1329_vm8, %v12098_v48  ;;  %v4074_v15 = vpop.permute.xlu1 %4073 }
 0x4d1   :  { %7726 = vmatmul.mubr.msk.f32.gmra.mrb[44].mxu1 %vm1329_vm8, %v12095_v55  ;;  %v4388_v17 = vsel %vm1144_vm6, %v11280_v6, %v4074_v15 }
 0x4d2   :  { %v4072_v35 = vpop.permute.xlu0 %4071 }
 0x4d3   :  { %v4387_v21 = vsel %vm1144_vm6, %v11715_v46, %v4072_v35 }
 0x4d4   :  { %v4254_v30 = vpop.permute.xlu1 %4253 }
 0x4d5   :  { %v12109_v37 = vsel %vm1206_vm7, %v4388_v17, %v4254_v30 }
 0x4d6   :  { %v4252_v19 = vpop.permute.xlu0 %4251 }
 0x4d7   :  { %v12112_v7 = vsel %vm1206_vm7, %v4387_v21, %v4252_v19 }
 0x4d8   :  { %7728 = vmatprep.mubr.msk.f32.mxu1 %vm1329_vm8, %v12112_v7  ;;  %v4078_v10 = vpop.permute.xlu1 %4077 }
 0x4d9   :  { %7729 = vmatmul.mubr.msk.f32.gmra.mrb[46].mxu1 %vm1329_vm8, %v12109_v37  ;;  %v4390_v6 = vsel %vm1144_vm6, %v11295_v52, %v4078_v10 }
 0x4da   :  { %v4076_v39 = vpop.permute.xlu0 %4075 }
 0x4db   :  { %v4389_v46 = vsel %vm1144_vm6, %v11747_v49, %v4076_v39 }
 0x4dc   :  { %v4258_v43 = vpop.permute.xlu1 %4257 }
 0x4dd   :  { %v12123_v63 = vsel %vm1206_vm7, %v4390_v6, %v4258_v43 }
 0x4de   :  { %v4256_v26 = vpop.permute.xlu0 %4255 }
 0x4df   :  { %v12126_v34 = vsel %vm1206_vm7, %v4389_v46, %v4256_v26 }
 0x4e0   :  { %7731 = vmatprep.mubr.msk.f32.mxu1 %vm1329_vm8, %v12126_v34  ;;  %v4082_v11 = vpop.permute.xlu1 %4081 }
 0x4e1   :  { %7732 = vmatmul.mubr.msk.f32.gmra.mrb[48].mxu1 %vm1329_vm8, %v12123_v63  ;;  %v4392_v52 = vsel %vm1144_vm6, %v14354_v23, %v4082_v11 }
 0x4e2   :  { %v4080_v3 = vpop.permute.xlu0 %4079 }
 0x4e3   :  { %v4391_v49 = vsel %vm1144_vm6, %v11779_v50, %v4080_v3 }
 0x4e4   :  { %v4262_v5 = vpop.permute.xlu1 %4261 }
 0x4e5   :  { %v12137_v35 = vsel %vm1206_vm7, %v4392_v52, %v4262_v5 }
 0x4e6   :  { %v4260_v15 = vpop.permute.xlu0 %4259 }
 0x4e7   :  { %v12140_v17 = vsel %vm1206_vm7, %v4391_v49, %v4260_v15 }
 0x4e8   :  { %7734 = vmatprep.mubr.msk.f32.mxu1 %vm1329_vm8, %v12140_v17  ;;  %v4086_v21 = vpop.permute.xlu1 %4085 }
 0x4e9   :  { %7735 = vmatmul.mubr.msk.f32.gmra.mrb[50].mxu1 %vm1329_vm8, %v12137_v35  ;;  %v4394_v23 = vsel %vm1144_vm6, %v14356_v42, %v4086_v21 }
 0x4ea   :  { %v4084_v30 = vpop.permute.xlu0 %4083 }
 0x4eb   :  { %v4393_v50 = vsel %vm1144_vm6, %v11811_v24, %v4084_v30 }
 0x4ec   :  { %v4266_v19 = vpop.permute.xlu1 %4265 }
 0x4ed   :  { %v12151_v39 = vsel %vm1206_vm7, %v4394_v23, %v4266_v19 }
 0x4ee   :  { %v4264_v10 = vpop.permute.xlu0 %4263 }
 0x4ef   :  { %v12154_v6 = vsel %vm1206_vm7, %v4393_v50, %v4264_v10 }
 0x4f0   :  { %7737 = vmatprep.mubr.msk.f32.mxu1 %vm1329_vm8, %v12154_v6  ;;  %v4090_v46 = vpop.permute.xlu1 %4089 }
 0x4f1   :  { %7738 = vmatmul.mubr.msk.f32.gmra.mrb[52].mxu1 %vm1329_vm8, %v12151_v39  ;;  %v4396_v42 = vsel %vm1144_vm6, %v14357_v60, %v4090_v46 }
 0x4f2   :  { %v4088_v43 = vpop.permute.xlu0 %4087 }
 0x4f3   :  { %v4395_v24 = vsel %vm1144_vm6, %v11843_v20, %v4088_v43 }
 0x4f4   :  { %v4270_v26 = vpop.permute.xlu1 %4269 }
 0x4f5   :  { %v12165_v3 = vsel %vm1206_vm7, %v4396_v42, %v4270_v26 }
 0x4f6   :  { %v4268_v11 = vpop.permute.xlu0 %4267 }
 0x4f7   :  { %v12168_v52 = vsel %vm1206_vm7, %v4395_v24, %v4268_v11 }
 0x4f8   :  { %7740 = vmatprep.mubr.msk.f32.mxu1 %vm1329_vm8, %v12168_v52  ;;  %v4094_v49 = vpop.permute.xlu1 %4093 }
 0x4f9   :  { %7741 = vmatmul.mubr.msk.f32.gmra.mrb[54].mxu1 %vm1329_vm8, %v12165_v3  ;;  %v4398_v60 = vsel %vm1144_vm6, %v11360_v9, %v4094_v49 }
 0x4fa   :  { %v4092_v5 = vpop.permute.xlu0 %4091 }
 0x4fb   :  { %v4397_v20 = vsel %vm1144_vm6, %v11875_v12, %v4092_v5 }
 0x4fc   :  { %v4274_v15 = vpop.permute.xlu1 %4273 }
 0x4fd   :  { %v12179_v30 = vsel %vm1206_vm7, %v4398_v60, %v4274_v15 }
 0x4fe   :  { %v4272_v21 = vpop.permute.xlu0 %4271 }
 0x4ff   :  { %v12182_v23 = vsel %vm1206_vm7, %v4397_v20, %v4272_v21 }
 0x500   :  { %7743 = vmatprep.mubr.msk.f32.mxu1 %vm1329_vm8, %v12182_v23  ;;  %v4098_v50 = vpop.permute.xlu1 %4097 }
 0x501   :  { %7744 = vmatmul.mubr.msk.f32.gmra.mrb[56].mxu1 %vm1329_vm8, %v12179_v30  ;;  %v4400_v9 = vsel %vm1144_vm6, %v14363_v56, %v4098_v50 }
 0x502   :  { %v4096_v19 = vpop.permute.xlu0 %4095 }
 0x503   :  { %v4399_v12 = vsel %vm1144_vm6, %v11905_v36, %v4096_v19 }
 0x504   :  { %v4278_v10 = vpop.permute.xlu1 %4277 }
 0x505   :  { %v12193_v43 = vsel %vm1206_vm7, %v4400_v9, %v4278_v10  ;;  %v14380_v10 = vld [vmem:[#allocation26_spill] sm:$0xff] }
 0x506   :  { %v4276_v46 = vpop.permute.xlu0 %4275 }
 0x507   :  { %v12196_v42 = vsel %vm1206_vm7, %v4399_v12, %v4276_v46  ;;  %v14373_v12 = vld [vmem:[#allocation20_spill] sm:$0xff] }
 0x508   :  { %7746 = vmatprep.mubr.msk.f32.mxu1 %vm1329_vm8, %v12196_v42  ;;  %v4102_v24 = vpop.permute.xlu1 %4101  ;;  %v14381_v46 = vld [vmem:[#allocation24_spill] sm:$0xff] }
 0x509   :  { %7747 = vmatmul.mubr.msk.f32.gmra.mrb[58].mxu1 %vm1329_vm8, %v12193_v43  ;;  %v4402_v56 = vsel %vm1144_vm6, %v14368_v18, %v4102_v24  ;;  %v14382_v24 = vld [vmem:[#allocation35_spill] sm:$0xff] }
 0x50a   :  { %v4100_v26 = vpop.permute.xlu0 %4099 }
 0x50b   :  { %v4401_v36 = vsel %vm1144_vm6, %v11939_v51, %v4100_v26  ;;  %v14383_v26 = vld [vmem:[#allocation7_spill] sm:$0xff] }
 0x50c   :  { %v4282_v11 = vpop.permute.xlu1 %4281 }
 0x50d   :  { %v12207_v5 = vsel %vm1206_vm7, %v4402_v56, %v4282_v11  ;;  %v14384_v56 = vld [vmem:[#allocation6_spill] sm:$0xff]  ;;  %v14386_v11 = vld [vmem:[#allocation3_spill] sm:$0xff] }
 0x50e   :  { %v4280_v49 = vpop.permute.xlu0 %4279 }
 0x50f   :  { %v12210_v60 = vsel %vm1206_vm7, %v4401_v36, %v4280_v49  ;;  %v14385_v36 = vld [vmem:[#allocation5_spill] sm:$0xff]  ;;  %v14387_v49 = vld [vmem:[#allocation32_spill] sm:$0xff] }
 0x510   :  { %7749 = vmatprep.mubr.msk.f32.mxu1 %vm1329_vm8, %v12210_v60  ;;  %v4496_v20 = vpop.permute.xlu1 %4495 }
 0x511   :  { %7750 = vmatmul.mubr.msk.f32.gmra.mrb[60].mxu1 %vm1329_vm8, %v12207_v5  ;;  %v4516_v18 = vsel %vm1144_vm6, %v14372_v40, %v4496_v20  ;;  %v14375_v40 = vld [vmem:[#allocation8_spill] sm:$0xff]  ;;  %v14388_v20 = vld [vmem:[#allocation14_spill] sm:$0xff] }
 0x512   :  { %v4494_v15 = vpop.permute.xlu0 %4493 }
 0x513   :  { %v4515_v51 = vsel %vm1144_vm6, %v11971_v4, %v4494_v15  ;;  %v14374_v4 = vld [vmem:[#allocation33_spill] sm:$0xff]  ;;  %v14389_v15 = vld [vmem:[#allocation36_spill] sm:$0xff] }
 0x514   :  { %v4508_v21 = vpop.permute.xlu1 %4507 }
 0x515   :  { %v12221_v19 = vsel %vm1206_vm7, %v4516_v18, %v4508_v21  ;;  %v14390_v18 = vld [vmem:[#allocation34_spill] sm:$0xff] }
 0x516   :  { %v4506_v50 = vpop.permute.xlu0 %4505 }
 0x517   :  { %v12224_v9 = vsel %vm1206_vm7, %v4515_v51, %v4506_v50  ;;  %v14391_v51 = vld [vmem:[#allocation4_spill] sm:$0xff] }
 0x518   :  { %7752 = vmatprep.mubr.msk.f32.mxu1 %vm1329_vm8, %v12224_v9 }
 0x519   :  { %7753 = vmatmul.mubr.msk.f32.gmra.mrb[62].mxu1 %vm1329_vm8, %v12221_v19 }
 0x51a   :  { %7759 = vmatprep.mubr.msk.f32.mxu1 %vm1329_vm8, %v14373_v12 }
 0x51d   :  { %7760 = vmatmul.mubr.msk.f32.vlgmr.msra.gmra.mrb[0].mxu1 %vm1329_vm8, %v14373_v12 }
 0x51e   :  { %7990 = vmatpush3.bf16.msk.msra.mxu1 %vm8563_vm5, %v11989_v33  ;;  %7762 = vmatprep.mubr.msk.f32.mxu1 %vm1329_vm8, %v11451_v62  ;;  %v14377_v33 = vld [vmem:[#allocation23_spill] sm:$0xff] }
 0x51f   :  { %v14378_v62 = vld [vmem:[#allocation27_spill] sm:$0xff] }
 0x521   :  { %7763 = vmatmul.mubr.msk.f32.gmra.mrb[2].mxu1 %vm1329_vm8, %v11448_v27  ;;  %v14379_v27 = vld [vmem:[#allocation22_spill] sm:$0xff] }
 0x522   :  { %7765 = vmatprep.mubr.msk.f32.mxu1 %vm1329_vm8, %v11517_v28 }
 0x525   :  { %7766 = vmatmul.mubr.msk.f32.gmra.mrb[4].mxu1 %vm1329_vm8, %v14374_v4 }
 0x526   :  { %7768 = vmatprep.mubr.msk.f32.mxu1 %vm1329_vm8, %v11549_v47 }
 0x529   :  { %7769 = vmatmul.mubr.msk.f32.gmra.mrb[6].mxu1 %vm1329_vm8, %v14375_v40 }
 0x52a   :  { %7771 = vmatprep.mubr.msk.f32.mxu1 %vm1329_vm8, %v14376_v53 }
 0x52d   :  { %7772 = vmatmul.mubr.msk.f32.gmra.mrb[8].mxu1 %vm1329_vm8, %v14377_v33 }
 0x52e   :  { %7774 = vmatprep.mubr.msk.f32.mxu1 %vm1329_vm8, %v14378_v62 }
 0x531   :  { %7775 = vmatmul.mubr.msk.f32.gmra.mrb[10].mxu1 %vm1329_vm8, %v14379_v27 }
 0x532   :  { %7777 = vmatprep.mubr.msk.f32.mxu1 %vm1329_vm8, %v14380_v10 }
 0x535   :  { %7778 = vmatmul.mubr.msk.f32.gmra.mrb[12].mxu1 %vm1329_vm8, %v14381_v46 }
 0x536   :  { %7780 = vmatprep.mubr.msk.f32.mxu1 %vm1329_vm8, %v14382_v24 }
 0x539   :  { %7781 = vmatmul.mubr.msk.f32.gmra.mrb[14].mxu1 %vm1329_vm8, %v14383_v26 }
 0x53a   :  { %7783 = vmatprep.mubr.msk.f32.mxu1 %vm1329_vm8, %v11709_v59 }
 0x53d   :  { %7784 = vmatmul.mubr.msk.f32.gmra.mrb[16].mxu1 %vm1329_vm8, %v11706_v0 }
 0x53e   :  { %7786 = vmatprep.mubr.msk.f32.mxu1 %vm1329_vm8, %v14384_v56 }
 0x541   :  { %7787 = vmatmul.mubr.msk.f32.gmra.mrb[18].mxu1 %vm1329_vm8, %v14385_v36 }
 0x542   :  { %7789 = vmatprep.mubr.msk.f32.mxu1 %vm1329_vm8, %v11773_v61 }
 0x545   :  { %7790 = vmatmul.mubr.msk.f32.gmra.mrb[20].mxu1 %vm1329_vm8, %v14386_v11 }
 0x546   :  { %7792 = vmatprep.mubr.msk.f32.mxu1 %vm1329_vm8, %v11805_v57 }
 0x549   :  { %7793 = vmatmul.mubr.msk.f32.gmra.mrb[22].mxu1 %vm1329_vm8, %v11802_v16 }
 0x54a   :  { %7795 = vmatprep.mubr.msk.f32.mxu1 %vm1329_vm8, %v11837_v14 }
 0x54d   :  { %7796 = vmatmul.mubr.msk.f32.gmra.mrb[24].mxu1 %vm1329_vm8, %v11834_v1 }
 0x54e   :  { %7798 = vmatprep.mubr.msk.f32.mxu1 %vm1329_vm8, %v11869_v32 }
 0x551   :  { %7799 = vmatmul.mubr.msk.f32.gmra.mrb[26].mxu1 %vm1329_vm8, %v14387_v49 }
 0x552   :  { %7801 = vmatprep.mubr.msk.f32.mxu1 %vm1329_vm8, %v14388_v20 }
 0x555   :  { %7802 = vmatmul.mubr.msk.f32.gmra.mrb[28].mxu1 %vm1329_vm8, %v14389_v15 }
 0x556   :  { %7804 = vmatprep.mubr.msk.f32.mxu1 %vm1329_vm8, %v14390_v18 }
 0x559   :  { %7805 = vmatmul.mubr.msk.f32.gmra.mrb[30].mxu1 %vm1329_vm8, %v14391_v51 }
 0x55a   :  { %7807 = vmatprep.mubr.msk.f32.mxu1 %vm1329_vm8, %v14373_v12 }
 0x55d   :  { %7808 = vmatmul.mubr.msk.f32.gmra.mrb[32].mxu1 %vm1329_vm8, %v14373_v12 }
 0x55e   :  { %7810 = vmatprep.mubr.msk.f32.mxu1 %vm1329_vm8, %v12006_v45 }
 0x561   :  { %7811 = vmatmul.mubr.msk.f32.gmra.mrb[34].mxu1 %vm1329_vm8, %v12003_v13 }
 0x562   :  { %7813 = vmatprep.mubr.msk.f32.mxu1 %vm1329_vm8, %v12028_v41 }
 0x565   :  { %7814 = vmatmul.mubr.msk.f32.gmra.mrb[36].mxu1 %vm1329_vm8, %v12025_v29 }
 0x566   :  { %7816 = vmatprep.mubr.msk.f32.mxu1 %vm1329_vm8, %v12042_v8 }
 0x569   :  { %7817 = vmatmul.mubr.msk.f32.gmra.mrb[38].mxu1 %vm1329_vm8, %v12039_v22 }
 0x56a   :  { %7819 = vmatprep.mubr.msk.f32.mxu1 %vm1329_vm8, %v12056_v44 }
 0x56d   :  { %7820 = vmatmul.mubr.msk.f32.gmra.mrb[40].mxu1 %vm1329_vm8, %v12053_v58 }
 0x56e   :  { %7822 = vmatprep.mubr.msk.f32.mxu1 %vm1329_vm8, %v12070_v25 }
 0x571   :  { %7823 = vmatmul.mubr.msk.f32.gmra.mrb[42].mxu1 %vm1329_vm8, %v12067_v38 }
 0x572   :  { %7825 = vmatprep.mubr.msk.f32.mxu1 %vm1329_vm8, %v12084_v54 }
 0x575   :  { %7826 = vmatmul.mubr.msk.f32.gmra.mrb[44].mxu1 %vm1329_vm8, %v12081_v2 }
 0x576   :  { %7828 = vmatprep.mubr.msk.f32.mxu1 %vm1329_vm8, %v12098_v48 }
 0x579   :  { %7829 = vmatmul.mubr.msk.f32.gmra.mrb[46].mxu1 %vm1329_vm8, %v12095_v55 }
 0x57a   :  { %7831 = vmatprep.mubr.msk.f32.mxu1 %vm1329_vm8, %v12112_v7 }
 0x57d   :  { %7832 = vmatmul.mubr.msk.f32.gmra.mrb[48].mxu1 %vm1329_vm8, %v12109_v37 }
 0x57e   :  { %7834 = vmatprep.mubr.msk.f32.mxu1 %vm1329_vm8, %v12126_v34 }
 0x581   :  { %7835 = vmatmul.mubr.msk.f32.gmra.mrb[50].mxu1 %vm1329_vm8, %v12123_v63 }
 0x582   :  { %7837 = vmatprep.mubr.msk.f32.mxu1 %vm1329_vm8, %v12140_v17 }
 0x585   :  { %7838 = vmatmul.mubr.msk.f32.gmra.mrb[52].mxu1 %vm1329_vm8, %v12137_v35 }
 0x586   :  { %7840 = vmatprep.mubr.msk.f32.mxu1 %vm1329_vm8, %v12154_v6 }
 0x589   :  { %7841 = vmatmul.mubr.msk.f32.gmra.mrb[54].mxu1 %vm1329_vm8, %v12151_v39 }
 0x58a   :  { %7843 = vmatprep.mubr.msk.f32.mxu1 %vm1329_vm8, %v12168_v52 }
 0x58d   :  { %7844 = vmatmul.mubr.msk.f32.gmra.mrb[56].mxu1 %vm1329_vm8, %v12165_v3 }
 0x58e   :  { %7846 = vmatprep.mubr.msk.f32.mxu1 %vm1329_vm8, %v12182_v23 }
 0x591   :  { %7847 = vmatmul.mubr.msk.f32.gmra.mrb[58].mxu1 %vm1329_vm8, %v12179_v30 }
 0x592   :  { %7849 = vmatprep.mubr.msk.f32.mxu1 %vm1329_vm8, %v12196_v42 }
 0x595   :  { %7850 = vmatmul.mubr.msk.f32.gmra.mrb[60].mxu1 %vm1329_vm8, %v12193_v43 }
 0x596   :  { %7852 = vmatprep.mubr.msk.f32.mxu1 %vm1329_vm8, %v12210_v60 }
 0x599   :  { %7853 = vmatmul.mubr.msk.f32.gmra.mrb[62].mxu1 %vm1329_vm8, %v12207_v5 }
 0x59a   :  { %7859 = vmatprep.mubr.msk.f32.mxu1 %vm1329_vm8, %v11517_v28  ;;  %v14392_v28 = vld [vmem:[#allocation12_spill] sm:$0xff] }
 0x59d   :  { %7860 = vmatmul.mubr.msk.f32.vlgmr.msra.gmra.mrb[0].mxu1 %vm1329_vm8, %v14374_v4 }
 0x59e   :  { %7862 = vmatprep.mubr.msk.f32.mxu1 %vm1329_vm8, %v11549_v47 }
 0x5a1   :  { %7863 = vmatmul.mubr.msk.f32.gmra.mrb[2].mxu1 %vm1329_vm8, %v14375_v40 }
 0x5a2   :  { %7865 = vmatprep.mubr.msk.f32.mxu1 %vm1329_vm8, %v14376_v53 }
 0x5a5   :  { %7866 = vmatmul.mubr.msk.f32.gmra.mrb[4].mxu1 %vm1329_vm8, %v14377_v33 }
 0x5a6   :  { %7868 = vmatprep.mubr.msk.f32.mxu1 %vm1329_vm8, %v14378_v62 }
 0x5a9   :  { %7869 = vmatmul.mubr.msk.f32.gmra.mrb[6].mxu1 %vm1329_vm8, %v14379_v27 }
 0x5aa   :  { %7871 = vmatprep.mubr.msk.f32.mxu1 %vm1329_vm8, %v14380_v10 }
 0x5ad   :  { %7872 = vmatmul.mubr.msk.f32.gmra.mrb[8].mxu1 %vm1329_vm8, %v14381_v46 }
 0x5ae   :  { %7874 = vmatprep.mubr.msk.f32.mxu1 %vm1329_vm8, %v14382_v24 }
 0x5b1   :  { %7875 = vmatmul.mubr.msk.f32.gmra.mrb[10].mxu1 %vm1329_vm8, %v14383_v26 }
 0x5b2   :  { %7877 = vmatprep.mubr.msk.f32.mxu1 %vm1329_vm8, %v11709_v59 }
 0x5b5   :  { %7878 = vmatmul.mubr.msk.f32.gmra.mrb[12].mxu1 %vm1329_vm8, %v11706_v0 }
 0x5b6   :  { %7880 = vmatprep.mubr.msk.f32.mxu1 %vm1329_vm8, %v14384_v56 }
 0x5b9   :  { %7881 = vmatmul.mubr.msk.f32.gmra.mrb[14].mxu1 %vm1329_vm8, %v14385_v36 }
 0x5ba   :  { %7883 = vmatprep.mubr.msk.f32.mxu1 %vm1329_vm8, %v11773_v61 }
 0x5bd   :  { %7884 = vmatmul.mubr.msk.f32.gmra.mrb[16].mxu1 %vm1329_vm8, %v14386_v11 }
 0x5be   :  { %7886 = vmatprep.mubr.msk.f32.mxu1 %vm1329_vm8, %v11805_v57 }
 0x5c1   :  { %7887 = vmatmul.mubr.msk.f32.gmra.mrb[18].mxu1 %vm1329_vm8, %v11802_v16 }
 0x5c2   :  { %7889 = vmatprep.mubr.msk.f32.mxu1 %vm1329_vm8, %v11837_v14 }
 0x5c5   :  { %7890 = vmatmul.mubr.msk.f32.gmra.mrb[20].mxu1 %vm1329_vm8, %v11834_v1 }
 0x5c6   :  { %7892 = vmatprep.mubr.msk.f32.mxu1 %vm1329_vm8, %v11869_v32 }
 0x5c9   :  { %7893 = vmatmul.mubr.msk.f32.gmra.mrb[22].mxu1 %vm1329_vm8, %v14387_v49 }
 0x5ca   :  { %7895 = vmatprep.mubr.msk.f32.mxu1 %vm1329_vm8, %v14388_v20 }
 0x5cd   :  { %7896 = vmatmul.mubr.msk.f32.gmra.mrb[24].mxu1 %vm1329_vm8, %v14389_v15 }
 0x5ce   :  { %7898 = vmatprep.mubr.msk.f32.mxu1 %vm1329_vm8, %v14390_v18 }
 0x5d1   :  { %7899 = vmatmul.mubr.msk.f32.gmra.mrb[26].mxu1 %vm1329_vm8, %v14391_v51 }
 0x5d2   :  { %7901 = vmatprep.mubr.msk.f32.mxu1 %vm1329_vm8, %v11965_v31 }
 0x5d5   :  { %7902 = vmatmul.mubr.msk.f32.gmra.mrb[28].mxu1 %vm1329_vm8, %v14392_v28 }
 0x5d6   :  { %7904 = vmatprep.mubr.msk.f32.mxu1 %vm1329_vm8, %v14373_v12 }
 0x5d9   :  { %7905 = vmatmul.mubr.msk.f32.gmra.mrb[30].mxu1 %vm1329_vm8, %v14373_v12 }
 0x5da   :  { %7907 = vmatprep.mubr.msk.f32.mxu1 %vm1329_vm8, %v12028_v41 }
 0x5dd   :  { %7908 = vmatmul.mubr.msk.f32.gmra.mrb[32].mxu1 %vm1329_vm8, %v12025_v29 }
 0x5de   :  { %7910 = vmatprep.mubr.msk.f32.mxu1 %vm1329_vm8, %v12042_v8 }
 0x5e1   :  { %7911 = vmatmul.mubr.msk.f32.gmra.mrb[34].mxu1 %vm1329_vm8, %v12039_v22 }
 0x5e2   :  { %7913 = vmatprep.mubr.msk.f32.mxu1 %vm1329_vm8, %v12056_v44 }
 0x5e5   :  { %7914 = vmatmul.mubr.msk.f32.gmra.mrb[36].mxu1 %vm1329_vm8, %v12053_v58 }
 0x5e6   :  { %7916 = vmatprep.mubr.msk.f32.mxu1 %vm1329_vm8, %v12070_v25 }
 0x5e9   :  { %7917 = vmatmul.mubr.msk.f32.gmra.mrb[38].mxu1 %vm1329_vm8, %v12067_v38 }
 0x5ea   :  { %7919 = vmatprep.mubr.msk.f32.mxu1 %vm1329_vm8, %v12084_v54 }
 0x5ed   :  { %7920 = vmatmul.mubr.msk.f32.gmra.mrb[40].mxu1 %vm1329_vm8, %v12081_v2 }
 0x5ee   :  { %7922 = vmatprep.mubr.msk.f32.mxu1 %vm1329_vm8, %v12098_v48 }
 0x5f1   :  { %7923 = vmatmul.mubr.msk.f32.gmra.mrb[42].mxu1 %vm1329_vm8, %v12095_v55 }
 0x5f2   :  { %7925 = vmatprep.mubr.msk.f32.mxu1 %vm1329_vm8, %v12112_v7 }
 0x5f5   :  { %7926 = vmatmul.mubr.msk.f32.gmra.mrb[44].mxu1 %vm1329_vm8, %v12109_v37 }
 0x5f6   :  { %7928 = vmatprep.mubr.msk.f32.mxu1 %vm1329_vm8, %v12126_v34 }
 0x5f9   :  { %7929 = vmatmul.mubr.msk.f32.gmra.mrb[46].mxu1 %vm1329_vm8, %v12123_v63 }
 0x5fa   :  { %7931 = vmatprep.mubr.msk.f32.mxu1 %vm1329_vm8, %v12140_v17 }
 0x5fd   :  { %7932 = vmatmul.mubr.msk.f32.gmra.mrb[48].mxu1 %vm1329_vm8, %v12137_v35 }
 0x5fe   :  { %7934 = vmatprep.mubr.msk.f32.mxu1 %vm1329_vm8, %v12154_v6 }
 0x601   :  { %7935 = vmatmul.mubr.msk.f32.gmra.mrb[50].mxu1 %vm1329_vm8, %v12151_v39 }
 0x602   :  { %7937 = vmatprep.mubr.msk.f32.mxu1 %vm1329_vm8, %v12168_v52 }
 0x605   :  { %7938 = vmatmul.mubr.msk.f32.gmra.mrb[52].mxu1 %vm1329_vm8, %v12165_v3 }
 0x606   :  { %7940 = vmatprep.mubr.msk.f32.mxu1 %vm1329_vm8, %v12182_v23 }
 0x609   :  { %7941 = vmatmul.mubr.msk.f32.gmra.mrb[54].mxu1 %vm1329_vm8, %v12179_v30 }
 0x60a   :  { %7943 = vmatprep.mubr.msk.f32.mxu1 %vm1329_vm8, %v12196_v42 }
 0x60d   :  { %7944 = vmatmul.mubr.msk.f32.gmra.mrb[56].mxu1 %vm1329_vm8, %v12193_v43 }
 0x60e   :  { %7946 = vmatprep.mubr.msk.f32.mxu1 %vm1329_vm8, %v12210_v60 }
 0x611   :  { %7947 = vmatmul.mubr.msk.f32.gmra.mrb[58].mxu1 %vm1329_vm8, %v12207_v5 }
 0x612   :  { %7949 = vmatprep.mubr.msk.f32.mxu1 %vm1329_vm8, %v12224_v9 }
 0x615   :  { %7950 = vmatmul.mubr.msk.f32.gmra.mrb[60].mxu1 %vm1329_vm8, %v12221_v19 }
 0x616   :  { %7952 = vmatprep.mubr.msk.f32.mxu1 %vm1329_vm8, %v14373_v12 }
 0x619   :  { %7953 = vmatmul.mubr.msk.f32.gmra.mrb[62].mxu1 %vm1329_vm8, %v14373_v12 }
 0x670   :  { %v12489_v47 = vpop.f32.mrb[0].mxu1 }
 0x671   :  { %v5948_v0 = vsel %vm1144_vm6, %v12489_v47, 0.0  ;;  %v6081_v59 = vmul.f32 %v12489_v47, %v12489_v47  ;;  %v12495_v61 = vpop.f32.mrb[1].mxu1 }
 0x672   :  { %v5947_v16 = vsel %vm1144_vm6, %v12495_v61, 0.0  ;;  %v6080_v57 = vmul.f32 %v12495_v61, %v12495_v61 }
 0x673   :  { %v6145_v1 = vsel %vm1144_vm6, %v6081_v59, 0.0  ;;  %v5949_v14 = vadd.f32 %v5948_v0, %v5947_v16 }
 0x674   :  { %v6144_v32 = vsel %vm1144_vm6, %v6080_v57, 0.0  ;;  %v12503_v31 = vpop.f32.mrb[2].mxu1 }
 0x675   :  { %v6146_v13 = vadd.f32 %v6145_v1, %v6144_v32  ;;  %v12505_v45 = vpop.f32.mrb[3].mxu1  ;;  %v6083_v29 = vmul.f32 %v12503_v31, %v12503_v31  ;;  %v5952_v58 = vsel %vm1144_vm6, %v12503_v31, 0.0 }
 0x676   :  { %v5950_v41 = vsel %vm1144_vm6, %v12505_v45, 0.0  ;;  %v6082_v22 = vmul.f32 %v12505_v45, %v12505_v45 }
 0x677   :  { %v5951_v8 = vadd.f32 %v5950_v41, %v5949_v14  ;;  %v6149_v55 = vsel %vm1144_vm6, %v6083_v29, 0.0 }
 0x678   :  { %v6147_v44 = vsel %vm1144_vm6, %v6082_v22, 0.0  ;;  %v12516_v38 = vpop.f32.mrb[4].mxu1 }
 0x679   :  { %v5953_v25 = vadd.f32 %v5952_v58, %v5951_v8  ;;  %v6148_v2 = vadd.f32 %v6147_v44, %v6146_v13  ;;  %v12518_v54 = vpop.f32.mrb[5].mxu1  ;;  %v6085_v48 = vmul.f32 %v12516_v38, %v12516_v38  ;;  %v5956_v35 = vsel %vm1144_vm6, %v12516_v38, 0.0 }
 0x67a   :  { %v5954_v37 = vsel %vm1144_vm6, %v12518_v54, 0.0  ;;  %v6084_v7 = vmul.f32 %v12518_v54, %v12518_v54 }
 0x67b   :  { %v6150_v63 = vadd.f32 %v6149_v55, %v6148_v2  ;;  %v5955_v34 = vadd.f32 %v5954_v37, %v5953_v25  ;;  %v6153_v30 = vsel %vm1144_vm6, %v6085_v48, 0.0 }
 0x67c   :  { %v6151_v17 = vsel %vm1144_vm6, %v6084_v7, 0.0  ;;  %v12530_v39 = vpop.f32.mrb[6].mxu1 }
 0x67d   :  { %v6152_v6 = vadd.f32 %v6151_v17, %v6150_v63  ;;  %v12532_v3 = vpop.f32.mrb[7].mxu1  ;;  %v5957_v52 = vadd.f32 %v5956_v35, %v5955_v34  ;;  %v6087_v23 = vmul.f32 %v12530_v39, %v12530_v39  ;;  %v5960_v21 = vsel %vm1144_vm6, %v12530_v39, 0.0 }
 0x67e   :  { %v5958_v43 = vsel %vm1144_vm6, %v12532_v3, 0.0  ;;  %v6086_v42 = vmul.f32 %v12532_v3, %v12532_v3 }
 0x67f   :  { %v5959_v5 = vadd.f32 %v5958_v43, %v5957_v52  ;;  %v6154_v60 = vadd.f32 %v6153_v30, %v6152_v6  ;;  %v6157_v40 = vsel %vm1144_vm6, %v6087_v23, 0.0 }
 0x680   :  { %v6155_v50 = vsel %vm1144_vm6, %v6086_v42, 0.0  ;;  %v12544_v19 = vpop.f32.mrb[8].mxu1 }
 0x681   :  { %v6156_v9 = vadd.f32 %v6155_v50, %v6154_v60  ;;  %v12546_v12 = vpop.f32.mrb[9].mxu1  ;;  %v5961_v4 = vadd.f32 %v5960_v21, %v5959_v5  ;;  %v6089_v53 = vmul.f32 %v12544_v19, %v12544_v19  ;;  %v5964_v46 = vsel %vm1144_vm6, %v12544_v19, 0.0 }
 0x682   :  { %v5962_v33 = vsel %vm1144_vm6, %v12546_v12, 0.0  ;;  %v6088_v62 = vmul.f32 %v12546_v12, %v12546_v12 }
 0x683   :  { %v5963_v27 = vadd.f32 %v5962_v33, %v5961_v4  ;;  %v6158_v10 = vadd.f32 %v6157_v40, %v6156_v9  ;;  %v6161_v49 = vsel %vm1144_vm6, %v6089_v53, 0.0 }
 0x684   :  { %v6159_v24 = vsel %vm1144_vm6, %v6088_v62, 0.0  ;;  %v12558_v26 = vpop.f32.mrb[10].mxu1 }
 0x685   :  { %v6160_v56 = vadd.f32 %v6159_v24, %v6158_v10  ;;  %v12560_v36 = vpop.f32.mrb[11].mxu1  ;;  %v5965_v11 = vadd.f32 %v5964_v46, %v5963_v27  ;;  %v6091_v20 = vmul.f32 %v12558_v26, %v12558_v26  ;;  %v5968_v0 = vsel %vm1144_vm6, %v12558_v26, 0.0 }
 0x686   :  { %v5966_v15 = vsel %vm1144_vm6, %v12560_v36, 0.0  ;;  %v6090_v18 = vmul.f32 %v12560_v36, %v12560_v36 }
 0x687   :  { %v5967_v51 = vadd.f32 %v5966_v15, %v5965_v11  ;;  %v6162_v28 = vadd.f32 %v6161_v49, %v6160_v56  ;;  %v6165_v32 = vsel %vm1144_vm6, %v6091_v20, 0.0 }
 0x688   :  { %v6163_v59 = vsel %vm1144_vm6, %v6090_v18, 0.0  ;;  %v12572_v16 = vpop.f32.mrb[12].mxu1 }
 0x689   :  { %v6164_v57 = vadd.f32 %v6163_v59, %v6162_v28  ;;  %v12574_v1 = vpop.f32.mrb[13].mxu1  ;;  %v5969_v14 = vadd.f32 %v5968_v0, %v5967_v51  ;;  %v6093_v13 = vmul.f32 %v12572_v16, %v12572_v16  ;;  %v5972_v58 = vsel %vm1144_vm6, %v12572_v16, 0.0 }
 0x68a   :  { %v5970_v29 = vsel %vm1144_vm6, %v12574_v1, 0.0  ;;  %v6092_v41 = vmul.f32 %v12574_v1, %v12574_v1 }
 0x68b   :  { %v5971_v22 = vadd.f32 %v5970_v29, %v5969_v14  ;;  %v6166_v8 = vadd.f32 %v6165_v32, %v6164_v57  ;;  %v6169_v37 = vsel %vm1144_vm6, %v6093_v13, 0.0 }
 0x68c   :  { %v6167_v44 = vsel %vm1144_vm6, %v6092_v41, 0.0  ;;  %v12586_v25 = vpop.f32.mrb[14].mxu1 }
 0x68d   :  { %v6168_v2 = vadd.f32 %v6167_v44, %v6166_v8  ;;  %v12588_v55 = vpop.f32.mrb[15].mxu1  ;;  %v5973_v48 = vadd.f32 %v5972_v58, %v5971_v22  ;;  %v6095_v7 = vmul.f32 %v12586_v25, %v12586_v25  ;;  %v5976_v6 = vsel %vm1144_vm6, %v12586_v25, 0.0 }
 0x68e   :  { %v5974_v63 = vsel %vm1144_vm6, %v12588_v55, 0.0  ;;  %v6094_v34 = vmul.f32 %v12588_v55, %v12588_v55 }
 0x68f   :  { %v5975_v35 = vadd.f32 %v5974_v63, %v5973_v48  ;;  %v6170_v17 = vadd.f32 %v6169_v37, %v6168_v2  ;;  %v6173_v5 = vsel %vm1144_vm6, %v6095_v7, 0.0 }
 0x690   :  { %v6171_v52 = vsel %vm1144_vm6, %v6094_v34, 0.0  ;;  %v12600_v30 = vpop.f32.mrb[16].mxu1 }
 0x691   :  { %v6172_v23 = vadd.f32 %v6171_v52, %v6170_v17  ;;  %v12602_v43 = vpop.f32.mrb[17].mxu1  ;;  %v5977_v42 = vadd.f32 %v5976_v6, %v5975_v35  ;;  %v6097_v60 = vmul.f32 %v12600_v30, %v12600_v30  ;;  %v5980_v40 = vsel %vm1144_vm6, %v12600_v30, 0.0 }
 0x692   :  { %v5978_v21 = vsel %vm1144_vm6, %v12602_v43, 0.0  ;;  %v6096_v50 = vmul.f32 %v12602_v43, %v12602_v43 }
 0x693   :  { %v5979_v9 = vadd.f32 %v5978_v21, %v5977_v42  ;;  %v6174_v4 = vadd.f32 %v6173_v5, %v6172_v23  ;;  %v6177_v46 = vsel %vm1144_vm6, %v6097_v60, 0.0 }
 0x694   :  { %v6175_v53 = vsel %vm1144_vm6, %v6096_v50, 0.0  ;;  %v12614_v33 = vpop.f32.mrb[18].mxu1 }
 0x695   :  { %v6176_v62 = vadd.f32 %v6175_v53, %v6174_v4  ;;  %v12616_v27 = vpop.f32.mrb[19].mxu1  ;;  %v5981_v10 = vadd.f32 %v5980_v40, %v5979_v9  ;;  %v6099_v24 = vmul.f32 %v12614_v33, %v12614_v33  ;;  %v5984_v15 = vsel %vm1144_vm6, %v12614_v33, 0.0 }
 0x696   :  { %v5982_v56 = vsel %vm1144_vm6, %v12616_v27, 0.0  ;;  %v6098_v11 = vmul.f32 %v12616_v27, %v12616_v27 }
 0x697   :  { %v5983_v49 = vadd.f32 %v5982_v56, %v5981_v10  ;;  %v6178_v20 = vadd.f32 %v6177_v46, %v6176_v62  ;;  %v6181_v57 = vsel %vm1144_vm6, %v6099_v24, 0.0 }
 0x698   :  { %v6179_v18 = vsel %vm1144_vm6, %v6098_v11, 0.0  ;;  %v12628_v51 = vpop.f32.mrb[20].mxu1 }
 0x699   :  { %v6180_v28 = vadd.f32 %v6179_v18, %v6178_v20  ;;  %v12630_v0 = vpop.f32.mrb[21].mxu1  ;;  %v5985_v59 = vadd.f32 %v5984_v15, %v5983_v49  ;;  %v6101_v14 = vmul.f32 %v12628_v51, %v12628_v51  ;;  %v5988_v22 = vsel %vm1144_vm6, %v12628_v51, 0.0 }
 0x69a   :  { %v5986_v32 = vsel %vm1144_vm6, %v12630_v0, 0.0  ;;  %v6100_v13 = vmul.f32 %v12630_v0, %v12630_v0 }
 0x69b   :  { %v5987_v29 = vadd.f32 %v5986_v32, %v5985_v59  ;;  %v6182_v41 = vadd.f32 %v6181_v57, %v6180_v28  ;;  %v6185_v37 = vsel %vm1144_vm6, %v6101_v14, 0.0 }
 0x69c   :  { %v6183_v8 = vsel %vm1144_vm6, %v6100_v13, 0.0  ;;  %v12642_v58 = vpop.f32.mrb[22].mxu1 }
 0x69d   :  { %v6184_v44 = vadd.f32 %v6183_v8, %v6182_v41  ;;  %v12644_v2 = vpop.f32.mrb[23].mxu1  ;;  %v5989_v48 = vadd.f32 %v5988_v22, %v5987_v29  ;;  %v6103_v7 = vmul.f32 %v12642_v58, %v12642_v58  ;;  %v5992_v6 = vsel %vm1144_vm6, %v12642_v58, 0.0 }
 0x69e   :  { %v5990_v63 = vsel %vm1144_vm6, %v12644_v2, 0.0  ;;  %v6102_v34 = vmul.f32 %v12644_v2, %v12644_v2 }
 0x69f   :  { %v5991_v35 = vadd.f32 %v5990_v63, %v5989_v48  ;;  %v6186_v17 = vadd.f32 %v6185_v37, %v6184_v44  ;;  %v6189_v21 = vsel %vm1144_vm6, %v6103_v7, 0.0 }
 0x6a0   :  { %v6187_v52 = vsel %vm1144_vm6, %v6102_v34, 0.0  ;;  %v12656_v23 = vpop.f32.mrb[24].mxu1 }
 0x6a1   :  { %v6188_v42 = vadd.f32 %v6187_v52, %v6186_v17  ;;  %v12658_v5 = vpop.f32.mrb[25].mxu1  ;;  %v5993_v60 = vadd.f32 %v5992_v6, %v5991_v35  ;;  %v6105_v50 = vmul.f32 %v12656_v23, %v12656_v23  ;;  %v5996_v62 = vsel %vm1144_vm6, %v12656_v23, 0.0 }
 0x6a2   :  { %v5994_v9 = vsel %vm1144_vm6, %v12658_v5, 0.0  ;;  %v6104_v4 = vmul.f32 %v12658_v5, %v12658_v5 }
 0x6a3   :  { %v5995_v40 = vadd.f32 %v5994_v9, %v5993_v60  ;;  %v6190_v53 = vadd.f32 %v6189_v21, %v6188_v42  ;;  %v6193_v49 = vsel %vm1144_vm6, %v6105_v50, 0.0 }
 0x6a4   :  { %v6191_v10 = vsel %vm1144_vm6, %v6104_v4, 0.0  ;;  %v12670_v46 = vpop.f32.mrb[26].mxu1 }
 0x6a5   :  { %v6192_v24 = vadd.f32 %v6191_v10, %v6190_v53  ;;  %v12672_v56 = vpop.f32.mrb[27].mxu1  ;;  %v5997_v11 = vadd.f32 %v5996_v62, %v5995_v40  ;;  %v6107_v20 = vmul.f32 %v12670_v46, %v12670_v46  ;;  %v6000_v57 = vsel %vm1144_vm6, %v12670_v46, 0.0 }
 0x6a6   :  { %v5998_v15 = vsel %vm1144_vm6, %v12672_v56, 0.0  ;;  %v6106_v18 = vmul.f32 %v12672_v56, %v12672_v56 }
 0x6a7   :  { %v5999_v28 = vadd.f32 %v5998_v15, %v5997_v11  ;;  %v6194_v59 = vadd.f32 %v6193_v49, %v6192_v24  ;;  %v6197_v22 = vsel %vm1144_vm6, %v6107_v20, 0.0 }
 0x6a8   :  { %v6195_v14 = vsel %vm1144_vm6, %v6106_v18, 0.0  ;;  %v12684_v32 = vpop.f32.mrb[28].mxu1 }
 0x6a9   :  { %v6196_v13 = vadd.f32 %v6195_v14, %v6194_v59  ;;  %v12686_v29 = vpop.f32.mrb[29].mxu1  ;;  %v6001_v41 = vadd.f32 %v6000_v57, %v5999_v28  ;;  %v6109_v8 = vmul.f32 %v12684_v32, %v12684_v32  ;;  %v6004_v63 = vsel %vm1144_vm6, %v12684_v32, 0.0 }
 0x6aa   :  { %v6002_v44 = vsel %vm1144_vm6, %v12686_v29, 0.0  ;;  %v6108_v48 = vmul.f32 %v12686_v29, %v12686_v29 }
 0x6ab   :  { %v6003_v37 = vadd.f32 %v6002_v44, %v6001_v41  ;;  %v6198_v7 = vadd.f32 %v6197_v22, %v6196_v13  ;;  %v6201_v42 = vsel %vm1144_vm6, %v6109_v8, 0.0 }
 0x6ac   :  { %v6199_v34 = vsel %vm1144_vm6, %v6108_v48, 0.0  ;;  %v12698_v35 = vpop.f32.mrb[30].mxu1 }
 0x6ad   :  { %v6200_v17 = vadd.f32 %v6199_v34, %v6198_v7  ;;  %v12700_v6 = vpop.f32.mrb[31].mxu1  ;;  %v6005_v52 = vadd.f32 %v6004_v63, %v6003_v37  ;;  %v6111_v60 = vmul.f32 %v12698_v35, %v12698_v35  ;;  %v6008_v40 = vsel %vm1144_vm6, %v12698_v35, 0.0 }
 0x6ae   :  { %v6006_v21 = vsel %vm1144_vm6, %v12700_v6, 0.0  ;;  %v6110_v50 = vmul.f32 %v12700_v6, %v12700_v6 }
 0x6af   :  { %v6007_v9 = vadd.f32 %v6006_v21, %v6005_v52  ;;  %v6202_v4 = vadd.f32 %v6201_v42, %v6200_v17  ;;  %v6205_v49 = vsel %vm1144_vm6, %v6111_v60, 0.0 }
 0x6b0   :  { %v6203_v53 = vsel %vm1144_vm6, %v6110_v50, 0.0  ;;  %v12712_v62 = vpop.f32.mrb[32].mxu1 }
 0x6b1   :  { %v6204_v10 = vadd.f32 %v6203_v53, %v6202_v4  ;;  %v12714_v24 = vpop.f32.mrb[33].mxu1  ;;  %v6009_v11 = vadd.f32 %v6008_v40, %v6007_v9  ;;  %v6113_v20 = vmul.f32 %v12712_v62, %v12712_v62  ;;  %v6012_v57 = vsel %vm1144_vm6, %v12712_v62, 0.0 }
 0x6b2   :  { %v6010_v15 = vsel %vm1144_vm6, %v12714_v24, 0.0  ;;  %v6112_v18 = vmul.f32 %v12714_v24, %v12714_v24 }
 0x6b3   :  { %v6011_v28 = vadd.f32 %v6010_v15, %v6009_v11  ;;  %v6206_v59 = vadd.f32 %v6205_v49, %v6204_v10  ;;  %v6209_v44 = vsel %vm1144_vm6, %v6113_v20, 0.0 }
 0x6b4   :  { %v6207_v14 = vsel %vm1144_vm6, %v6112_v18, 0.0  ;;  %v12726_v13 = vpop.f32.mrb[34].mxu1 }
 0x6b5   :  { %v6208_v41 = vadd.f32 %v6207_v14, %v6206_v59  ;;  %v12728_v22 = vpop.f32.mrb[35].mxu1  ;;  %v6013_v8 = vadd.f32 %v6012_v57, %v6011_v28  ;;  %v6115_v48 = vmul.f32 %v12726_v13, %v12726_v13  ;;  %v6016_v17 = vsel %vm1144_vm6, %v12726_v13, 0.0 }
 0x6b6   :  { %v6014_v37 = vsel %vm1144_vm6, %v12728_v22, 0.0  ;;  %v6114_v7 = vmul.f32 %v12728_v22, %v12728_v22 }
 0x6b7   :  { %v6015_v63 = vadd.f32 %v6014_v37, %v6013_v8  ;;  %v6210_v34 = vadd.f32 %v6209_v44, %v6208_v41  ;;  %v6213_v9 = vsel %vm1144_vm6, %v6115_v48, 0.0 }
 0x6b8   :  { %v6211_v52 = vsel %vm1144_vm6, %v6114_v7, 0.0  ;;  %v12740_v42 = vpop.f32.mrb[36].mxu1 }
 0x6b9   :  { %v6212_v60 = vadd.f32 %v6211_v52, %v6210_v34  ;;  %v12742_v21 = vpop.f32.mrb[37].mxu1  ;;  %v6017_v50 = vadd.f32 %v6016_v17, %v6015_v63  ;;  %v6117_v4 = vmul.f32 %v12740_v42, %v12740_v42  ;;  %v6020_v49 = vsel %vm1144_vm6, %v12740_v42, 0.0 }
 0x6ba   :  { %v6018_v40 = vsel %vm1144_vm6, %v12742_v21, 0.0  ;;  %v6116_v53 = vmul.f32 %v12742_v21, %v12742_v21 }
 0x6bb   :  { %v6019_v10 = vadd.f32 %v6018_v40, %v6017_v50  ;;  %v6214_v11 = vadd.f32 %v6213_v9, %v6212_v60  ;;  %v6217_v57 = vsel %vm1144_vm6, %v6117_v4, 0.0 }
 0x6bc   :  { %v6215_v20 = vsel %vm1144_vm6, %v6116_v53, 0.0  ;;  %v12754_v15 = vpop.f32.mrb[38].mxu1 }
 0x6bd   :  { %v6216_v18 = vadd.f32 %v6215_v20, %v6214_v11  ;;  %v12756_v28 = vpop.f32.mrb[39].mxu1  ;;  %v6021_v59 = vadd.f32 %v6020_v49, %v6019_v10  ;;  %v6119_v14 = vmul.f32 %v12754_v15, %v12754_v15  ;;  %v6024_v37 = vsel %vm1144_vm6, %v12754_v15, 0.0 }
 0x6be   :  { %v6022_v41 = vsel %vm1144_vm6, %v12756_v28, 0.0  ;;  %v6118_v8 = vmul.f32 %v12756_v28, %v12756_v28 }
 0x6bf   :  { %v6023_v44 = vadd.f32 %v6022_v41, %v6021_v59  ;;  %v6218_v48 = vadd.f32 %v6217_v57, %v6216_v18  ;;  %v6221_v60 = vsel %vm1144_vm6, %v6119_v14, 0.0 }
 0x6c0   :  { %v6219_v7 = vsel %vm1144_vm6, %v6118_v8, 0.0  ;;  %v12768_v63 = vpop.f32.mrb[40].mxu1 }
 0x6c1   :  { %14393 = vst [vmem:[#allocation9_spill] sm:$0xff] %v12768_v63  ;;  %v6220_v34 = vadd.f32 %v6219_v7, %v6218_v48  ;;  %v12770_v17 = vpop.f32.mrb[41].mxu1  ;;  %v6025_v52 = vadd.f32 %v6024_v37, %v6023_v44  ;;  %v6121_v50 = vmul.f32 %v12768_v63, %v12768_v63  ;;  %v6028_v10 = vsel %vm1144_vm6, %v12768_v63, 0.0 }
 0x6c2   :  { %14394 = vst [vmem:[#allocation2_spill] sm:$0xff] %v12770_v17  ;;  %v6026_v9 = vsel %vm1144_vm6, %v12770_v17, 0.0  ;;  %v6120_v4 = vmul.f32 %v12770_v17, %v12770_v17 }
 0x6c3   :  { %v6027_v40 = vadd.f32 %v6026_v9, %v6025_v52  ;;  %v6222_v53 = vadd.f32 %v6221_v60, %v6220_v34  ;;  %v6225_v57 = vsel %vm1144_vm6, %v6121_v50, 0.0 }
 0x6c4   :  { %v6223_v11 = vsel %vm1144_vm6, %v6120_v4, 0.0  ;;  %v12782_v49 = vpop.f32.mrb[42].mxu1 }
 0x6c5   :  { %14395 = vst [vmem:[#allocation10_spill] sm:$0xff] %v12782_v49  ;;  %v6224_v20 = vadd.f32 %v6223_v11, %v6222_v53  ;;  %v12784_v18 = vpop.f32.mrb[43].mxu1  ;;  %v6029_v59 = vadd.f32 %v6028_v10, %v6027_v40  ;;  %v6123_v14 = vmul.f32 %v12782_v49, %v12782_v49  ;;  %v6032_v37 = vsel %vm1144_vm6, %v12782_v49, 0.0 }
 0x6c6   :  { %14396 = vst [vmem:[#allocation11_spill] sm:$0xff] %v12784_v18  ;;  %v6030_v41 = vsel %vm1144_vm6, %v12784_v18, 0.0  ;;  %v6122_v8 = vmul.f32 %v12784_v18, %v12784_v18 }
 0x6c7   :  { %v6031_v44 = vadd.f32 %v6030_v41, %v6029_v59  ;;  %v6226_v48 = vadd.f32 %v6225_v57, %v6224_v20  ;;  %v6229_v9 = vsel %vm1144_vm6, %v6123_v14, 0.0 }
 0x6c8   :  { %v6227_v7 = vsel %vm1144_vm6, %v6122_v8, 0.0  ;;  %v12796_v34 = vpop.f32.mrb[44].mxu1 }
 0x6c9   :  { %14397 = vst [vmem:[#allocation15_spill] sm:$0xff] %v12796_v34  ;;  %v6228_v52 = vadd.f32 %v6227_v7, %v6226_v48  ;;  %v12798_v60 = vpop.f32.mrb[45].mxu1  ;;  %v6033_v50 = vadd.f32 %v6032_v37, %v6031_v44  ;;  %v6125_v4 = vmul.f32 %v12796_v34, %v12796_v34  ;;  %v6036_v20 = vsel %vm1144_vm6, %v12796_v34, 0.0 }
 0x6ca   :  { %14398 = vst [vmem:[#allocation37_spill] sm:$0xff] %v12798_v60  ;;  %v6034_v40 = vsel %vm1144_vm6, %v12798_v60, 0.0  ;;  %v6124_v53 = vmul.f32 %v12798_v60, %v12798_v60 }
 0x6cb   :  { %v6035_v10 = vadd.f32 %v6034_v40, %v6033_v50  ;;  %v6230_v11 = vadd.f32 %v6229_v9, %v6228_v52  ;;  %v6233_v44 = vsel %vm1144_vm6, %v6125_v4, 0.0 }
 0x6cc   :  { %v6231_v59 = vsel %vm1144_vm6, %v6124_v53, 0.0  ;;  %v12810_v57 = vpop.f32.mrb[46].mxu1 }
 0x6cd   :  { %14399 = vst [vmem:[#allocation16_spill] sm:$0xff] %v12810_v57  ;;  %v6232_v41 = vadd.f32 %v6231_v59, %v6230_v11  ;;  %v12812_v14 = vpop.f32.mrb[47].mxu1  ;;  %v6037_v8 = vadd.f32 %v6036_v20, %v6035_v10  ;;  %v6127_v48 = vmul.f32 %v12810_v57, %v12810_v57  ;;  %v6040_v9 = vsel %vm1144_vm6, %v12810_v57, 0.0 }
 0x6ce   :  { %14400 = vst [vmem:[#allocation38_spill] sm:$0xff] %v12812_v14  ;;  %v6038_v37 = vsel %vm1144_vm6, %v12812_v14, 0.0  ;;  %v6126_v7 = vmul.f32 %v12812_v14, %v12812_v14 }
 0x6cf   :  { %v6039_v52 = vadd.f32 %v6038_v37, %v6037_v8  ;;  %v6234_v50 = vadd.f32 %v6233_v44, %v6232_v41  ;;  %v6237_v20 = vsel %vm1144_vm6, %v6127_v48, 0.0 }
 0x6d0   :  { %v6235_v40 = vsel %vm1144_vm6, %v6126_v7, 0.0  ;;  %v12824_v53 = vpop.f32.mrb[48].mxu1 }
 0x6d1   :  { %14401 = vst [vmem:[#allocation39_spill] sm:$0xff] %v12824_v53  ;;  %v6236_v10 = vadd.f32 %v6235_v40, %v6234_v50  ;;  %v12826_v4 = vpop.f32.mrb[49].mxu1  ;;  %v6041_v11 = vadd.f32 %v6040_v9, %v6039_v52  ;;  %v6129_v59 = vmul.f32 %v12824_v53, %v12824_v53  ;;  %v6044_v7 = vsel %vm1144_vm6, %v12824_v53, 0.0 }
 0x6d2   :  { %14402 = vst [vmem:[#allocation17_spill] sm:$0xff] %v12826_v4  ;;  %v6042_v8 = vsel %vm1144_vm6, %v12826_v4, 0.0  ;;  %v6128_v41 = vmul.f32 %v12826_v4, %v12826_v4 }
 0x6d3   :  { %v6043_v44 = vadd.f32 %v6042_v8, %v6041_v11  ;;  %v6238_v37 = vadd.f32 %v6237_v20, %v6236_v10  ;;  %v6241_v57 = vsel %vm1144_vm6, %v6129_v59, 0.0 }
 0x6d4   :  { %v6239_v50 = vsel %vm1144_vm6, %v6128_v41, 0.0  ;;  %v12838_v40 = vpop.f32.mrb[50].mxu1 }
 0x6d5   :  { %14403 = vst [vmem:[#allocation18_spill] sm:$0xff] %v12838_v40  ;;  %v6240_v52 = vadd.f32 %v6239_v50, %v6238_v37  ;;  %v12840_v48 = vpop.f32.mrb[51].mxu1  ;;  %v6045_v9 = vadd.f32 %v6044_v7, %v6043_v44  ;;  %v6131_v14 = vmul.f32 %v12838_v40, %v12838_v40  ;;  %v6048_v41 = vsel %vm1144_vm6, %v12838_v40, 0.0 }
 0x6d6   :  { %14404 = vst [vmem:[#allocation13_spill] sm:$0xff] %v12840_v48  ;;  %v6046_v11 = vsel %vm1144_vm6, %v12840_v48, 0.0  ;;  %v6130_v10 = vmul.f32 %v12840_v48, %v12840_v48 }
 0x6d7   :  { %v6047_v20 = vadd.f32 %v6046_v11, %v6045_v9  ;;  %v6242_v8 = vadd.f32 %v6241_v57, %v6240_v52  ;;  %v6245_v53 = vsel %vm1144_vm6, %v6131_v14, 0.0 }
 0x6d8   :  { %v6243_v37 = vsel %vm1144_vm6, %v6130_v10, 0.0  ;;  %v12852_v50 = vpop.f32.mrb[52].mxu1 }
 0x6d9   :  { %14405 = vst [vmem:[#allocation40_spill] sm:$0xff] %v12852_v50  ;;  %v6244_v44 = vadd.f32 %v6243_v37, %v6242_v8  ;;  %v12854_v59 = vpop.f32.mrb[53].mxu1  ;;  %v6049_v7 = vadd.f32 %v6048_v41, %v6047_v20  ;;  %v6133_v4 = vmul.f32 %v12852_v50, %v12852_v50  ;;  %v6052_v10 = vsel %vm1144_vm6, %v12852_v50, 0.0 }
 0x6da   :  { %14406 = vst [vmem:[#allocation19_spill] sm:$0xff] %v12854_v59  ;;  %v6050_v9 = vsel %vm1144_vm6, %v12854_v59, 0.0  ;;  %v6132_v57 = vmul.f32 %v12854_v59, %v12854_v59 }
 0x6db   :  { %v6051_v52 = vadd.f32 %v6050_v9, %v6049_v7  ;;  %v6246_v11 = vadd.f32 %v6245_v53, %v6244_v44  ;;  %v6249_v40 = vsel %vm1144_vm6, %v6133_v4, 0.0 }
 0x6dc   :  { %v6247_v8 = vsel %vm1144_vm6, %v6132_v57, 0.0  ;;  %v12866_v37 = vpop.f32.mrb[54].mxu1 }
 0x6dd   :  { %14407 = vst [vmem:[#allocation21_spill] sm:$0xff] %v12866_v37  ;;  %v6248_v20 = vadd.f32 %v6247_v8, %v6246_v11  ;;  %v12868_v14 = vpop.f32.mrb[55].mxu1  ;;  %v6053_v41 = vadd.f32 %v6052_v10, %v6051_v52  ;;  %v6135_v48 = vmul.f32 %v12866_v37, %v12866_v37  ;;  %v6056_v57 = vsel %vm1144_vm6, %v12866_v37, 0.0 }
 0x6de   :  { %14408 = vst [vmem:[#allocation41_spill] sm:$0xff] %v12868_v14  ;;  %v6054_v7 = vsel %vm1144_vm6, %v12868_v14, 0.0  ;;  %v6134_v53 = vmul.f32 %v12868_v14, %v12868_v14 }
 0x6df   :  { %v6055_v44 = vadd.f32 %v6054_v7, %v6053_v41  ;;  %v6250_v9 = vadd.f32 %v6249_v40, %v6248_v20  ;;  %v6253_v50 = vsel %vm1144_vm6, %v6135_v48, 0.0 }
 0x6e0   :  { %v6251_v11 = vsel %vm1144_vm6, %v6134_v53, 0.0  ;;  %v12880_v8 = vpop.f32.mrb[56].mxu1 }
 0x6e1   :  { %14409 = vst [vmem:[#allocation30_spill] sm:$0xff] %v12880_v8  ;;  %v6252_v52 = vadd.f32 %v6251_v11, %v6250_v9  ;;  %v12882_v4 = vpop.f32.mrb[57].mxu1  ;;  %v6057_v10 = vadd.f32 %v6056_v57, %v6055_v44  ;;  %v6137_v59 = vmul.f32 %v12880_v8, %v12880_v8  ;;  %v6060_v53 = vsel %vm1144_vm6, %v12880_v8, 0.0 }
 0x6e2   :  { %14410 = vst [vmem:[#allocation29_spill] sm:$0xff] %v12882_v4  ;;  %v6058_v41 = vsel %vm1144_vm6, %v12882_v4, 0.0  ;;  %v6136_v40 = vmul.f32 %v12882_v4, %v12882_v4 }
 0x6e3   :  { %v6059_v20 = vadd.f32 %v6058_v41, %v6057_v10  ;;  %v6254_v7 = vadd.f32 %v6253_v50, %v6252_v52  ;;  %v6257_v37 = vsel %vm1144_vm6, %v6137_v59, 0.0 }
 0x6e4   :  { %v6255_v9 = vsel %vm1144_vm6, %v6136_v40, 0.0  ;;  %v12894_v11 = vpop.f32.mrb[58].mxu1 }
 0x6e5   :  { %14411 = vst [vmem:[#allocation31_spill] sm:$0xff] %v12894_v11  ;;  %v6256_v44 = vadd.f32 %v6255_v9, %v6254_v7  ;;  %v12896_v48 = vpop.f32.mrb[59].mxu1  ;;  %v6061_v57 = vadd.f32 %v6060_v53, %v6059_v20  ;;  %v6139_v14 = vmul.f32 %v12894_v11, %v12894_v11  ;;  %v6064_v40 = vsel %vm1144_vm6, %v12894_v11, 0.0 }
 0x6e6   :  { %14412 = vst [vmem:[#allocation20_spill] sm:$0xff] %v12896_v48  ;;  %v6062_v10 = vsel %vm1144_vm6, %v12896_v48, 0.0  ;;  %v6138_v50 = vmul.f32 %v12896_v48, %v12896_v48 }
 0x6e7   :  { %v6063_v52 = vadd.f32 %v6062_v10, %v6061_v57  ;;  %v6258_v41 = vadd.f32 %v6257_v37, %v6256_v44  ;;  %v6261_v8 = vsel %vm1144_vm6, %v6139_v14, 0.0 }
 0x6e8   :  { %v6259_v7 = vsel %vm1144_vm6, %v6138_v50, 0.0  ;;  %v12908_v9 = vpop.f32.mrb[60].mxu1 }
 0x6e9   :  { %14413 = vst [vmem:[#allocation33_spill] sm:$0xff] %v12908_v9  ;;  %v6260_v20 = vadd.f32 %v6259_v7, %v6258_v41  ;;  %v12910_v59 = vpop.f32.mrb[61].mxu1  ;;  %v6065_v53 = vadd.f32 %v6064_v40, %v6063_v52  ;;  %v6141_v4 = vmul.f32 %v12908_v9, %v12908_v9  ;;  %v6068_v50 = vsel %vm1144_vm6, %v12908_v9, 0.0 }
 0x6ea   :  { %14414 = vst [vmem:[#allocation8_spill] sm:$0xff] %v12910_v59  ;;  %v6066_v57 = vsel %vm1144_vm6, %v12910_v59, 0.0  ;;  %v6140_v37 = vmul.f32 %v12910_v59, %v12910_v59 }
 0x6eb   :  { %v6067_v44 = vadd.f32 %v6066_v57, %v6065_v53  ;;  %v6262_v10 = vadd.f32 %v6261_v8, %v6260_v20  ;;  %v6265_v11 = vsel %vm1144_vm6, %v6141_v4, 0.0 }
 0x6ec   :  { %v6263_v41 = vsel %vm1144_vm6, %v6140_v37, 0.0  ;;  %v12922_v7 = vpop.f32.mrb[62].mxu1 }
 0x6ed   :  { %14415 = vst [vmem:[#allocation25_spill] sm:$0xff] %v12922_v7  ;;  %v6264_v52 = vadd.f32 %v6263_v41, %v6262_v10  ;;  %v12924_v14 = vpop.f32.mrb[63].mxu1  ;;  %v6069_v40 = vadd.f32 %v6068_v50, %v6067_v44  ;;  %v6143_v48 = vmul.f32 %v12922_v7, %v12922_v7  ;;  %v6072_v37 = vsel %vm1144_vm6, %v12922_v7, 0.0 }
 0x6ee   :  { %14416 = vst [vmem:[#allocation23_spill] sm:$0xff] %v12924_v14  ;;  %v6070_v53 = vsel %vm1144_vm6, %v12924_v14, 0.0  ;;  %v6142_v8 = vmul.f32 %v12924_v14, %v12924_v14 }
 0x6ef   :  { %v6071_v20 = vadd.f32 %v6070_v53, %v6069_v40  ;;  %v6266_v57 = vadd.f32 %v6265_v11, %v6264_v52  ;;  %v6269_v4 = vsel %vm1144_vm6, %v6143_v48, 0.0  ;;  %v6282_v48 = vld [vmem:[%s13987_s5] sm:$0x1] }
 0x6f0   :  { %v6267_v10 = vsel %vm1144_vm6, %v6142_v8, 0.0 }
 0x6f1   :  { %v6073_v41 = vadd.f32 %v6072_v37, %v6071_v20  ;;  %v6268_v44 = vadd.f32 %v6267_v10, %v6266_v57 }
 0x6f3   :  { %v6074_v50 = vrot.slane %v6073_v41, 4  ;;  %v6270_v9 = vadd.f32 %v6269_v4, %v6268_v44  ;;  %v14418_v44 = vld [vmem:[#allocation2_spill] sm:$0xff]  ;;  %v14419_v4 = vld [vmem:[#allocation9_spill] sm:$0xff] }
 0x6f5   :  { %v6075_v59 = vadd.f32 %v6074_v50, %v6073_v41  ;;  %v6271_v34 = vrot.slane %v6270_v9, 4  ;;  %v14420_v50 = vld [vmem:[#allocation11_spill] sm:$0xff] }
 0x6f7   :  { %v6076_v60 = vrot.slane %v6075_v59, 2  ;;  %v6272_v49 = vadd.f32 %v6271_v34, %v6270_v9 }
 0x6f9   :  { %v6077_v18 = vadd.f32 %v6076_v60, %v6075_v59  ;;  %v6273_v63 = vrot.slane %v6272_v49, 2 }
 0x6fb   :  { %v6078_v14 = vrot.slane %v6077_v18, 1  ;;  %v6274_v40 = vadd.f32 %v6273_v63, %v6272_v49  ;;  %v12943_v63 = vld [vmem:[%s13988_s6] sm:$0x1] }
 0x6fd   :  { %v6079_v11 = vadd.f32 %v6078_v14, %v6077_v18  ;;  %v6275_v52 = vrot.slane %v6274_v40, 1  ;;  %v14417_v18 = vld [vmem:[#allocation28_spill] sm:$0xff] }
 0x6ff   :  { %v6276_v53 = vadd.f32 %v6275_v52, %v6274_v40  ;;  %v6277_v7 = vmul.f32 0.001953125, %v6079_v11  ;;  %v14421_v40 = vld [vmem:[#allocation10_spill] sm:$0xff]  ;;  %v14422_v11 = vld [vmem:[#allocation37_spill] sm:$0xff]  ;;  %v14423_v52 = vld [vmem:[#allocation15_spill] sm:$0xff] }
 0x701   :  { %v6278_v17 = vmul.f32 0.001953125, %v6276_v53  ;;  %v6279_v8 = vmul.f32 %v6277_v7, %v6277_v7 }
 0x703   :  { %v6280_v20 = vsub.f32 %v6278_v17, %v6279_v8  ;;  %v14424_v8 = vld [vmem:[#allocation38_spill] sm:$0xff]  ;;  %v14437_v17 = vld [vmem:[#allocation41_spill] sm:$0xff] }
 0x705   :  { %v6281_v57 = vmax.f32 %v6280_v20, 0.0 }
 0x707   :  { %v6283_v37 = vadd.f32 1e-05, %v6281_v57  ;;  %v14425_v57 = vld [vmem:[#allocation16_spill] sm:$0xff] }
 0x709   :  { %8253 = vrsqrt.f32 %v6283_v37 }
 0x713   :  { %v8254_v10 = vpop.eup %8253 }
 0x714   :  { %v6285_v34 = vmul.f32 %v8254_v10, %v6282_v48  ;;  %v14426_v48 = vld [vmem:[#allocation17_spill] sm:$0xff] }
 0x716   :  { %v12945_v49 = vmul.f32 %v6285_v34, %v6277_v7  ;;  %v12948_v60 = vrot.slane %v6285_v34, %v14417_v18  ;;  %v14427_v34 = vld [vmem:[#allocation39_spill] sm:$0xff] }
 0x718   :  { %v12954_v9 = vmul.f32 %v12948_v60, %v12495_v61  ;;  %v12958_v59 = vmul.f32 %v12489_v47, %v12948_v60  ;;  %v12962_v14 = vmul.f32 %v12948_v60, %v12505_v45  ;;  %v12966_v7 = vmul.f32 %v12503_v31, %v12948_v60 }
 0x719   :  { %v12970_v41 = vmul.f32 %v12948_v60, %v12518_v54  ;;  %v12974_v61 = vmul.f32 %v12516_v38, %v12948_v60  ;;  %v12978_v47 = vmul.f32 %v12948_v60, %v12532_v3  ;;  %v12982_v45 = vmul.f32 %v12530_v39, %v12948_v60 }
 0x71a   :  { %v12986_v31 = vmul.f32 %v12948_v60, %v12546_v12  ;;  %v12990_v54 = vmul.f32 %v12544_v19, %v12948_v60  ;;  %v12994_v38 = vmul.f32 %v12948_v60, %v12560_v36  ;;  %v12998_v3 = vmul.f32 %v12558_v26, %v12948_v60 }
 0x71b   :  { %v13002_v39 = vmul.f32 %v12948_v60, %v12574_v1  ;;  %v13006_v12 = vmul.f32 %v12572_v16, %v12948_v60  ;;  %v13010_v19 = vmul.f32 %v12948_v60, %v12588_v55  ;;  %v13014_v36 = vmul.f32 %v12586_v25, %v12948_v60 }
 0x71c   :  { %v13018_v26 = vmul.f32 %v12948_v60, %v12602_v43  ;;  %v13022_v1 = vmul.f32 %v12600_v30, %v12948_v60  ;;  %v13026_v16 = vmul.f32 %v12948_v60, %v12616_v27  ;;  %v13030_v55 = vmul.f32 %v12614_v33, %v12948_v60 }
 0x71d   :  { %v13034_v25 = vmul.f32 %v12948_v60, %v12630_v0  ;;  %v13038_v43 = vmul.f32 %v12628_v51, %v12948_v60  ;;  %v13042_v30 = vmul.f32 %v12948_v60, %v12644_v2  ;;  %v13046_v27 = vmul.f32 %v12642_v58, %v12948_v60 }
 0x71e   :  { %v13050_v33 = vmul.f32 %v12948_v60, %v12658_v5  ;;  %v13054_v0 = vmul.f32 %v12656_v23, %v12948_v60  ;;  %v13058_v51 = vmul.f32 %v12948_v60, %v12672_v56  ;;  %v13062_v2 = vmul.f32 %v12670_v46, %v12948_v60 }
 0x71f   :  { %v13066_v58 = vmul.f32 %v12948_v60, %v12686_v29  ;;  %v13070_v5 = vmul.f32 %v12684_v32, %v12948_v60  ;;  %v13074_v23 = vmul.f32 %v12948_v60, %v12700_v6  ;;  %v13078_v56 = vmul.f32 %v12698_v35, %v12948_v60 }
 0x720   :  { %v13082_v46 = vmul.f32 %v12948_v60, %v12714_v24  ;;  %v13086_v29 = vmul.f32 %v12712_v62, %v12948_v60  ;;  %v13090_v32 = vmul.f32 %v12948_v60, %v12728_v22  ;;  %v13094_v6 = vmul.f32 %v12726_v13, %v12948_v60 }
 0x721   :  { %v13098_v35 = vmul.f32 %v12948_v60, %v12742_v21  ;;  %v13102_v24 = vmul.f32 %v12740_v42, %v12948_v60  ;;  %v13106_v62 = vmul.f32 %v12948_v60, %v12756_v28  ;;  %v13110_v22 = vmul.f32 %v12754_v15, %v12948_v60 }
 0x722   :  { %v13114_v13 = vmul.f32 %v12948_v60, %v14418_v44  ;;  %v13118_v21 = vmul.f32 %v14419_v4, %v12948_v60  ;;  %v13122_v42 = vmul.f32 %v12948_v60, %v14420_v50  ;;  %v13126_v28 = vmul.f32 %v14421_v40, %v12948_v60  ;;  %v14429_v4 = vld [vmem:[#allocation13_spill] sm:$0xff]  ;;  %v14431_v40 = vld [vmem:[#allocation18_spill] sm:$0xff] }
 0x723   :  { %v13130_v15 = vmul.f32 %v12948_v60, %v14422_v11  ;;  %v13134_v53 = vmul.f32 %v14423_v52, %v12948_v60  ;;  %v13138_v20 = vmul.f32 %v12948_v60, %v14424_v8  ;;  %v13142_v37 = vmul.f32 %v14425_v57, %v12948_v60  ;;  %v14433_v52 = vld [vmem:[#allocation19_spill] sm:$0xff]  ;;  %v14435_v57 = vld [vmem:[#allocation40_spill] sm:$0xff] }
 0x724   :  { %v13146_v10 = vmul.f32 %v12948_v60, %v14426_v48  ;;  %v13150_v44 = vmul.f32 %v14427_v34, %v12948_v60  ;;  %v13154_v50 = vmul.f32 %v12948_v60, %v14429_v4  ;;  %v13158_v11 = vmul.f32 %v14431_v40, %v12948_v60 }
 0x725   :  { %v13162_v8 = vmul.f32 %v12948_v60, %v14433_v52  ;;  %v13166_v48 = vmul.f32 %v14435_v57, %v12948_v60  ;;  %v13170_v34 = vmul.f32 %v12948_v60, %v14437_v17 }
 0x726   :  { %14428 = vst [vmem:[#allocation27_spill] sm:$0xff] %v13150_v44  ;;  %14430 = vst [vmem:[#allocation22_spill] sm:$0xff] %v13154_v50  ;;  %v14439_v44 = vld [vmem:[#allocation21_spill] sm:$0xff] }
 0x727   :  { %14432 = vst [vmem:[#allocation26_spill] sm:$0xff] %v13158_v11  ;;  %14434 = vst [vmem:[#allocation24_spill] sm:$0xff] %v13162_v8  ;;  %v13174_v4 = vmul.f32 %v14439_v44, %v12948_v60  ;;  %v14441_v50 = vld [vmem:[#allocation29_spill] sm:$0xff]  ;;  %v14443_v11 = vld [vmem:[#allocation30_spill] sm:$0xff] }
 0x728   :  { %14436 = vst [vmem:[#allocation35_spill] sm:$0xff] %v13166_v48  ;;  %14438 = vst [vmem:[#allocation7_spill] sm:$0xff] %v13170_v34  ;;  %v13178_v40 = vmul.f32 %v12948_v60, %v14441_v50  ;;  %v13182_v52 = vmul.f32 %v14443_v11, %v12948_v60  ;;  %v14445_v8 = vld [vmem:[#allocation20_spill] sm:$0xff]  ;;  %v14446_v48 = vld [vmem:[#allocation31_spill] sm:$0xff] }
 0x729   :  { %14440 = vst [vmem:[#allocation6_spill] sm:$0xff] %v13174_v4  ;;  %v13186_v57 = vmul.f32 %v12948_v60, %v14445_v8  ;;  %v13190_v17 = vmul.f32 %v14446_v48, %v12948_v60  ;;  %v14448_v34 = vld [vmem:[#allocation8_spill] sm:$0xff]  ;;  %v14449_v4 = vld [vmem:[#allocation33_spill] sm:$0xff]  ;;  %v14452_v48 = vsub.f32 %v12943_v63, %v12945_v49 }
 0x72a   :  { %14442 = vst [vmem:[#allocation5_spill] sm:$0xff] %v13178_v40  ;;  %14444 = vst [vmem:[#allocation3_spill] sm:$0xff] %v13182_v52  ;;  %v13194_v44 = vmul.f32 %v12948_v60, %v14448_v34  ;;  %v13198_v50 = vmul.f32 %v14449_v4, %v12948_v60  ;;  %v14450_v40 = vld [vmem:[#allocation23_spill] sm:$0xff]  ;;  %v14451_v52 = vld [vmem:[#allocation25_spill] sm:$0xff] }
 0x72b   :  { %14447 = vst [vmem:[#allocation32_spill] sm:$0xff] %v13190_v17  ;;  %v13202_v11 = vmul.f32 %v12948_v60, %v14450_v40  ;;  %v13206_v8 = vmul.f32 %v14451_v52, %v12948_v60  ;;  %v13212_v17 = vrot.slane %v14452_v48, %v14417_v18 }
 0x72d   :  { %v13216_v34 = vadd.f32 %v13212_v17, %v12954_v9  ;;  %v13220_v4 = vadd.f32 %v13212_v17, %v12958_v59  ;;  %v13224_v40 = vadd.f32 %v13212_v17, %v12962_v14  ;;  %v13228_v60 = vadd.f32 %v13212_v17, %v12966_v7 }
 0x72e   :  { %v13232_v63 = vadd.f32 %v13212_v17, %v12970_v41  ;;  %v13236_v49 = vadd.f32 %v13212_v17, %v12974_v61  ;;  %v13240_v18 = vadd.f32 %v13212_v17, %v12978_v47  ;;  %v13244_v9 = vadd.f32 %v13212_v17, %v12982_v45  ;;  %v14459_v52 = vld [vmem:[#allocation26_spill] sm:$0xff]  ;;  %v14461_v48 = vld [vmem:[#allocation24_spill] sm:$0xff] }
 0x72f   :  { %v13248_v59 = vadd.f32 %v13212_v17, %v12986_v31  ;;  %v13252_v14 = vadd.f32 %v13212_v17, %v12990_v54  ;;  %v13256_v7 = vadd.f32 %v13212_v17, %v12994_v38  ;;  %v13260_v41 = vadd.f32 %v13212_v17, %v12998_v3 }
 0x730   :  { %v13264_v61 = vadd.f32 %v13212_v17, %v13002_v39  ;;  %v13268_v47 = vadd.f32 %v13212_v17, %v13006_v12  ;;  %v13272_v45 = vadd.f32 %v13212_v17, %v13010_v19  ;;  %v13276_v31 = vadd.f32 %v13212_v17, %v13014_v36 }
 0x731   :  { %v13280_v54 = vadd.f32 %v13212_v17, %v13018_v26  ;;  %v13284_v38 = vadd.f32 %v13212_v17, %v13022_v1  ;;  %v13288_v3 = vadd.f32 %v13212_v17, %v13026_v16  ;;  %v13292_v39 = vadd.f32 %v13212_v17, %v13030_v55 }
 0x732   :  { %v13296_v12 = vadd.f32 %v13212_v17, %v13034_v25  ;;  %v13300_v19 = vadd.f32 %v13212_v17, %v13038_v43  ;;  %v13304_v36 = vadd.f32 %v13212_v17, %v13042_v30  ;;  %v13308_v26 = vadd.f32 %v13212_v17, %v13046_v27 }
 0x733   :  { %v13312_v1 = vadd.f32 %v13212_v17, %v13050_v33  ;;  %v13316_v16 = vadd.f32 %v13212_v17, %v13054_v0  ;;  %v13320_v55 = vadd.f32 %v13212_v17, %v13058_v51  ;;  %v13324_v25 = vadd.f32 %v13212_v17, %v13062_v2 }
 0x734   :  { %v13328_v43 = vadd.f32 %v13212_v17, %v13066_v58  ;;  %v13332_v30 = vadd.f32 %v13212_v17, %v13070_v5  ;;  %v13336_v27 = vadd.f32 %v13212_v17, %v13074_v23  ;;  %v13340_v33 = vadd.f32 %v13212_v17, %v13078_v56 }
 0x735   :  { %v13344_v0 = vadd.f32 %v13212_v17, %v13082_v46  ;;  %v13348_v51 = vadd.f32 %v13212_v17, %v13086_v29  ;;  %v13352_v2 = vadd.f32 %v13212_v17, %v13090_v32  ;;  %v13356_v58 = vadd.f32 %v13212_v17, %v13094_v6 }
 0x736   :  { %v13360_v5 = vadd.f32 %v13212_v17, %v13098_v35  ;;  %v13364_v23 = vadd.f32 %v13212_v17, %v13102_v24  ;;  %v13368_v56 = vadd.f32 %v13212_v17, %v13106_v62  ;;  %v13372_v46 = vadd.f32 %v13212_v17, %v13110_v22 }
 0x737   :  { %v13376_v29 = vadd.f32 %v13212_v17, %v13114_v13  ;;  %v13380_v32 = vadd.f32 %v13212_v17, %v13118_v21  ;;  %v13384_v6 = vadd.f32 %v13212_v17, %v13122_v42  ;;  %v13388_v35 = vadd.f32 %v13212_v17, %v13126_v28  ;;  %v14455_v42 = vld [vmem:[#allocation27_spill] sm:$0xff] }
 0x738   :  { %v13392_v24 = vadd.f32 %v13212_v17, %v13130_v15  ;;  %v13396_v62 = vadd.f32 %v13212_v17, %v13134_v53  ;;  %v13400_v22 = vadd.f32 %v13212_v17, %v13138_v20  ;;  %v13404_v13 = vadd.f32 %v13212_v17, %v13142_v37  ;;  %v14457_v15 = vld [vmem:[#allocation22_spill] sm:$0xff] }
 0x739   :  { %v13408_v21 = vadd.f32 %v13212_v17, %v13146_v10  ;;  %v13412_v28 = vadd.f32 %v13212_v17, %v14455_v42  ;;  %v13416_v53 = vadd.f32 %v13212_v17, %v14457_v15  ;;  %v13420_v20 = vadd.f32 %v13212_v17, %v14459_v52 }
 0x73a   :  { %14453 = vst [vmem:[#allocation14_spill] sm:$0xff] %v13404_v13  ;;  %v13424_v37 = vadd.f32 %v13212_v17, %v14461_v48  ;;  %v14462_v13 = vld [vmem:[#allocation35_spill] sm:$0xff] }
 0x73b   :  { %14454 = vst [vmem:[#allocation36_spill] sm:$0xff] %v13408_v21  ;;  %14456 = vst [vmem:[#allocation34_spill] sm:$0xff] %v13412_v28  ;;  %v13428_v10 = vadd.f32 %v13212_v17, %v14462_v13  ;;  %v14464_v21 = vld [vmem:[#allocation7_spill] sm:$0xff]  ;;  %v14465_v28 = vld [vmem:[#allocation6_spill] sm:$0xff]  ;;  %v13448_v13 = vadd.f32 %v13212_v17, %v13186_v57  ;;  %v13468_v57 = vadd.f32 %v13212_v17, %v13206_v8 }
 0x73c   :  { %14458 = vst [vmem:[#allocation4_spill] sm:$0xff] %v13416_v53  ;;  %14460 = vst [vmem:[#allocation12_spill] sm:$0xff] %v13420_v20  ;;  %v13432_v42 = vadd.f32 %v13212_v17, %v14464_v21  ;;  %v13436_v15 = vadd.f32 %v13212_v17, %v14465_v28  ;;  %v14466_v53 = vld [vmem:[#allocation5_spill] sm:$0xff]  ;;  %v14467_v20 = vld [vmem:[#allocation3_spill] sm:$0xff]  ;;  %v13456_v28 = vadd.f32 %v13212_v17, %v13194_v44 }
 0x73d   :  { %14463 = vst [vmem:[#allocation28_spill] sm:$0xff] %v13428_v10  ;;  %v13440_v52 = vadd.f32 %v13212_v17, %v14466_v53  ;;  %v13444_v48 = vadd.f32 %v13212_v17, %v14467_v20  ;;  %v14468_v10 = vld [vmem:[#allocation32_spill] sm:$0xff]  ;;  %v13460_v53 = vadd.f32 %v13212_v17, %v13198_v50  ;;  %v13464_v20 = vadd.f32 %v13212_v17, %v13202_v11  ;;  %v8256_v44 = vld [vmem:[%s13982_s0 + $0x8] sm:$0xff] }
 0x73e   :  { %v13452_v21 = vadd.f32 %v13212_v17, %v14468_v10  ;;  %v8255_v10 = vld [vmem:[%s13982_s0] sm:$0xff]  ;;  %v6430_v50 = vadd.f32 %v8256_v44, %v13220_v4  ;;  %v8257_v11 = vld [vmem:[%s13982_s0 + $0x10] sm:$0xff]  ;;  %v8258_v17 = vld [vmem:[%s13982_s0 + $0x18] sm:$0xff] }
 0x73f   :  { %14470 = vst [vmem:[#allocation9_spill] sm:$0xff] %v13464_v20  ;;  %v6431_v20 = vadd.f32 %v8257_v11, %v13224_v40  ;;  %v6432_v8 = vadd.f32 %v8258_v17, %v13228_v60  ;;  %v8260_v4 = vld [vmem:[%s13982_s0 + $0x28] sm:$0xff]  ;;  %v8261_v40 = vld [vmem:[%s13982_s0 + $0x30] sm:$0xff]  ;;  %v8262_v60 = vld [vmem:[%s13982_s0 + $0x38] sm:$0xff] }
 0x740   :  { %14469 = vst [vmem:[#allocation2_spill] sm:$0xff] %v13452_v21  ;;  %v6429_v21 = vadd.f32 %v8255_v10, %v13216_v34  ;;  %v8259_v34 = vld [vmem:[%s13982_s0 + $0x20] sm:$0xff]  ;;  %v6434_v44 = vadd.f32 %v8260_v4, %v13236_v49  ;;  %v6435_v11 = vadd.f32 %v8261_v40, %v13240_v18  ;;  %v6436_v17 = vadd.f32 %v8262_v60, %v13244_v9  ;;  %v8264_v49 = vld [vmem:[%s13982_s0 + $0x48] sm:$0xff]  ;;  %v8265_v18 = vld [vmem:[%s13982_s0 + $0x50] sm:$0xff] }
 0x741   :  { %v6433_v10 = vadd.f32 %v8259_v34, %v13232_v63  ;;  %v8263_v63 = vld [vmem:[%s13982_s0 + $0x40] sm:$0xff]  ;;  %v6438_v4 = vadd.f32 %v8264_v49, %v13252_v14  ;;  %v6439_v40 = vadd.f32 %v8265_v18, %v13256_v7  ;;  %v8266_v9 = vld [vmem:[%s13982_s0 + $0x58] sm:$0xff]  ;;  %6494 = vst.msk [vmem:[%s13989_s7 + $0x8] sm:$0xff] %vm1144_vm6, %v6430_v50  ;;  %6495 = vst.msk [vmem:[%s13989_s7 + $0x10] sm:$0xff] %vm1144_vm6, %v6431_v20 }
 0x742   :  { %v6437_v34 = vadd.f32 %v8263_v63, %v13248_v59  ;;  %v6440_v60 = vadd.f32 %v8266_v9, %v13260_v41  ;;  %6493 = vst.msk [vmem:[%s13989_s7] sm:$0xff] %vm1144_vm6, %v6429_v21  ;;  %6496 = vst.msk [vmem:[%s13989_s7 + $0x18] sm:$0xff] %vm1144_vm6, %v6432_v8  ;;  %v8267_v59 = vld [vmem:[%s13982_s0 + $0x60] sm:$0xff]  ;;  %v8268_v7 = vld [vmem:[%s13982_s0 + $0x68] sm:$0xff] }
 0x743   :  { %v6441_v14 = vadd.f32 %v8267_v59, %v13264_v61  ;;  %v6442_v41 = vadd.f32 %v8268_v7, %v13268_v47  ;;  %v8269_v21 = vld [vmem:[%s13982_s0 + $0x70] sm:$0xff]  ;;  %v8270_v50 = vld [vmem:[%s13982_s0 + $0x78] sm:$0xff]  ;;  %6497 = vst.msk [vmem:[%s13989_s7 + $0x20] sm:$0xff] %vm1144_vm6, %v6433_v10  ;;  %6498 = vst.msk [vmem:[%s13989_s7 + $0x28] sm:$0xff] %vm1144_vm6, %v6434_v44 }
 0x744   :  { %v6443_v20 = vadd.f32 %v8269_v21, %v13272_v45  ;;  %v6444_v8 = vadd.f32 %v8270_v50, %v13276_v31  ;;  %6499 = vst.msk [vmem:[%s13989_s7 + $0x30] sm:$0xff] %vm1144_vm6, %v6435_v11  ;;  %6500 = vst.msk [vmem:[%s13989_s7 + $0x38] sm:$0xff] %vm1144_vm6, %v6436_v17  ;;  %v8271_v61 = vld [vmem:[%s13982_s0 + $0x80] sm:$0xff]  ;;  %v8272_v45 = vld [vmem:[%s13982_s0 + $0x88] sm:$0xff] }
 0x745   :  { %v6445_v47 = vadd.f32 %v8271_v61, %v13280_v54  ;;  %v6446_v31 = vadd.f32 %v8272_v45, %v13284_v38  ;;  %v8273_v10 = vld [vmem:[%s13982_s0 + $0x90] sm:$0xff]  ;;  %v8274_v11 = vld [vmem:[%s13982_s0 + $0x98] sm:$0xff]  ;;  %6501 = vst.msk [vmem:[%s13989_s7 + $0x40] sm:$0xff] %vm1144_vm6, %v6437_v34  ;;  %6502 = vst.msk [vmem:[%s13989_s7 + $0x48] sm:$0xff] %vm1144_vm6, %v6438_v4 }
 0x746   :  { %v6447_v44 = vadd.f32 %v8273_v10, %v13288_v3  ;;  %v6448_v17 = vadd.f32 %v8274_v11, %v13292_v39  ;;  %6503 = vst.msk [vmem:[%s13989_s7 + $0x50] sm:$0xff] %vm1144_vm6, %v6439_v40  ;;  %6504 = vst.msk [vmem:[%s13989_s7 + $0x58] sm:$0xff] %vm1144_vm6, %v6440_v60  ;;  %v8275_v54 = vld [vmem:[%s13982_s0 + $0xa0] sm:$0xff]  ;;  %v8276_v3 = vld [vmem:[%s13982_s0 + $0xa8] sm:$0xff] }
 0x747   :  { %v6449_v38 = vadd.f32 %v8275_v54, %v13296_v12  ;;  %v6450_v39 = vadd.f32 %v8276_v3, %v13300_v19  ;;  %v8277_v63 = vld [vmem:[%s13982_s0 + $0xb0] sm:$0xff]  ;;  %v8278_v49 = vld [vmem:[%s13982_s0 + $0xb8] sm:$0xff]  ;;  %6505 = vst.msk [vmem:[%s13989_s7 + $0x60] sm:$0xff] %vm1144_vm6, %v6441_v14  ;;  %6506 = vst.msk [vmem:[%s13989_s7 + $0x68] sm:$0xff] %vm1144_vm6, %v6442_v41 }
 0x748   :  { %v6451_v34 = vadd.f32 %v8277_v63, %v13304_v36  ;;  %v6452_v4 = vadd.f32 %v8278_v49, %v13308_v26  ;;  %6507 = vst.msk [vmem:[%s13989_s7 + $0x70] sm:$0xff] %vm1144_vm6, %v6443_v20  ;;  %6508 = vst.msk [vmem:[%s13989_s7 + $0x78] sm:$0xff] %vm1144_vm6, %v6444_v8  ;;  %v8279_v12 = vld [vmem:[%s13982_s0 + $0xc0] sm:$0xff]  ;;  %v8280_v36 = vld [vmem:[%s13982_s0 + $0xc8] sm:$0xff] }
 0x749   :  { %v6453_v19 = vadd.f32 %v8279_v12, %v13312_v1  ;;  %v6454_v26 = vadd.f32 %v8280_v36, %v13316_v16  ;;  %v8281_v18 = vld [vmem:[%s13982_s0 + $0xd0] sm:$0xff]  ;;  %v8282_v9 = vld [vmem:[%s13982_s0 + $0xd8] sm:$0xff]  ;;  %6509 = vst.msk [vmem:[%s13989_s7 + $0x80] sm:$0xff] %vm1144_vm6, %v6445_v47  ;;  %6510 = vst.msk [vmem:[%s13989_s7 + $0x88] sm:$0xff] %vm1144_vm6, %v6446_v31 }
 0x74a   :  { %v6455_v40 = vadd.f32 %v8281_v18, %v13320_v55  ;;  %v6456_v60 = vadd.f32 %v8282_v9, %v13324_v25  ;;  %6511 = vst.msk [vmem:[%s13989_s7 + $0x90] sm:$0xff] %vm1144_vm6, %v6447_v44  ;;  %6512 = vst.msk [vmem:[%s13989_s7 + $0x98] sm:$0xff] %vm1144_vm6, %v6448_v17  ;;  %v8283_v1 = vld [vmem:[%s13982_s0 + $0xe0] sm:$0xff]  ;;  %v8284_v55 = vld [vmem:[%s13982_s0 + $0xe8] sm:$0xff] }
 0x74b   :  { %v6457_v16 = vadd.f32 %v8283_v1, %v13328_v43  ;;  %v6458_v25 = vadd.f32 %v8284_v55, %v13332_v30  ;;  %v8285_v59 = vld [vmem:[%s13982_s0 + $0xf0] sm:$0xff]  ;;  %v8286_v7 = vld [vmem:[%s13982_s0 + $0xf8] sm:$0xff]  ;;  %6513 = vst.msk [vmem:[%s13989_s7 + $0xa0] sm:$0xff] %vm1144_vm6, %v6449_v38  ;;  %6514 = vst.msk [vmem:[%s13989_s7 + $0xa8] sm:$0xff] %vm1144_vm6, %v6450_v39 }
 0x74c   :  { %v6459_v14 = vadd.f32 %v8285_v59, %v13336_v27  ;;  %v6460_v41 = vadd.f32 %v8286_v7, %v13340_v33  ;;  %6515 = vst.msk [vmem:[%s13989_s7 + $0xb0] sm:$0xff] %vm1144_vm6, %v6451_v34  ;;  %6516 = vst.msk [vmem:[%s13989_s7 + $0xb8] sm:$0xff] %vm1144_vm6, %v6452_v4  ;;  %v8287_v43 = vld [vmem:[%s13982_s0 + $0x100] sm:$0xff]  ;;  %v8288_v27 = vld [vmem:[%s13982_s0 + $0x108] sm:$0xff] }
 0x74d   :  { %v6461_v30 = vadd.f32 %v8287_v43, %v13344_v0  ;;  %v6462_v33 = vadd.f32 %v8288_v27, %v13348_v51  ;;  %v8289_v21 = vld [vmem:[%s13982_s0 + $0x110] sm:$0xff]  ;;  %v8290_v50 = vld [vmem:[%s13982_s0 + $0x118] sm:$0xff]  ;;  %6517 = vst.msk [vmem:[%s13989_s7 + $0xc0] sm:$0xff] %vm1144_vm6, %v6453_v19  ;;  %6518 = vst.msk [vmem:[%s13989_s7 + $0xc8] sm:$0xff] %vm1144_vm6, %v6454_v26 }
 0x74e   :  { %v6463_v20 = vadd.f32 %v8289_v21, %v13352_v2  ;;  %v6464_v8 = vadd.f32 %v8290_v50, %v13356_v58  ;;  %6519 = vst.msk [vmem:[%s13989_s7 + $0xd0] sm:$0xff] %vm1144_vm6, %v6455_v40  ;;  %6520 = vst.msk [vmem:[%s13989_s7 + $0xd8] sm:$0xff] %vm1144_vm6, %v6456_v60  ;;  %v8291_v0 = vld [vmem:[%s13982_s0 + $0x120] sm:$0xff]  ;;  %v8292_v2 = vld [vmem:[%s13982_s0 + $0x128] sm:$0xff] }
 0x74f   :  { %v6465_v51 = vadd.f32 %v8291_v0, %v13360_v5  ;;  %v6466_v58 = vadd.f32 %v8292_v2, %v13364_v23  ;;  %v8293_v61 = vld [vmem:[%s13982_s0 + $0x130] sm:$0xff]  ;;  %v8294_v45 = vld [vmem:[%s13982_s0 + $0x138] sm:$0xff]  ;;  %6521 = vst.msk [vmem:[%s13989_s7 + $0xe0] sm:$0xff] %vm1144_vm6, %v6457_v16  ;;  %6522 = vst.msk [vmem:[%s13989_s7 + $0xe8] sm:$0xff] %vm1144_vm6, %v6458_v25 }
 0x750   :  { %v6467_v47 = vadd.f32 %v8293_v61, %v13368_v56  ;;  %v6468_v31 = vadd.f32 %v8294_v45, %v13372_v46  ;;  %6523 = vst.msk [vmem:[%s13989_s7 + $0xf0] sm:$0xff] %vm1144_vm6, %v6459_v14  ;;  %6524 = vst.msk [vmem:[%s13989_s7 + $0xf8] sm:$0xff] %vm1144_vm6, %v6460_v41  ;;  %v8295_v5 = vld [vmem:[%s13982_s0 + $0x140] sm:$0xff]  ;;  %v8296_v56 = vld [vmem:[%s13982_s0 + $0x148] sm:$0xff] }
 0x751   :  { %v6469_v23 = vadd.f32 %v8295_v5, %v13376_v29  ;;  %v6470_v46 = vadd.f32 %v8296_v56, %v13380_v32  ;;  %v8297_v10 = vld [vmem:[%s13982_s0 + $0x150] sm:$0xff]  ;;  %v8298_v11 = vld [vmem:[%s13982_s0 + $0x158] sm:$0xff]  ;;  %6525 = vst.msk [vmem:[%s13989_s7 + $0x100] sm:$0xff] %vm1144_vm6, %v6461_v30  ;;  %6526 = vst.msk [vmem:[%s13989_s7 + $0x108] sm:$0xff] %vm1144_vm6, %v6462_v33 }
 0x752   :  { %v6471_v44 = vadd.f32 %v8297_v10, %v13384_v6  ;;  %v6472_v17 = vadd.f32 %v8298_v11, %v13388_v35  ;;  %6527 = vst.msk [vmem:[%s13989_s7 + $0x110] sm:$0xff] %vm1144_vm6, %v6463_v20  ;;  %6528 = vst.msk [vmem:[%s13989_s7 + $0x118] sm:$0xff] %vm1144_vm6, %v6464_v8  ;;  %v8299_v29 = vld [vmem:[%s13982_s0 + $0x160] sm:$0xff]  ;;  %v8300_v6 = vld [vmem:[%s13982_s0 + $0x168] sm:$0xff] }
 0x753   :  { %v6473_v32 = vadd.f32 %v8299_v29, %v13392_v24  ;;  %v6474_v35 = vadd.f32 %v8300_v6, %v13396_v62  ;;  %v8301_v54 = vld [vmem:[%s13982_s0 + $0x170] sm:$0xff]  ;;  %v8302_v3 = vld [vmem:[%s13982_s0 + $0x178] sm:$0xff]  ;;  %v14471_v39 = vld [vmem:[#allocation14_spill] sm:$0xff]  ;;  %6529 = vst.msk [vmem:[%s13989_s7 + $0x120] sm:$0xff] %vm1144_vm6, %v6465_v51 }
 0x754   :  { %v6475_v38 = vadd.f32 %v8301_v54, %v13400_v22  ;;  %v6476_v63 = vadd.f32 %v8302_v3, %v14471_v39  ;;  %6530 = vst.msk [vmem:[%s13989_s7 + $0x128] sm:$0xff] %vm1144_vm6, %v6466_v58  ;;  %6531 = vst.msk [vmem:[%s13989_s7 + $0x130] sm:$0xff] %vm1144_vm6, %v6467_v47  ;;  %v8303_v24 = vld [vmem:[%s13982_s0 + $0x180] sm:$0xff]  ;;  %v14472_v62 = vld [vmem:[#allocation36_spill] sm:$0xff] }
 0x755   :  { %6532 = vst.msk [vmem:[%s13989_s7 + $0x138] sm:$0xff] %vm1144_vm6, %v6468_v31  ;;  %v6477_v22 = vadd.f32 %v8303_v24, %v14472_v62  ;;  %v8304_v34 = vld [vmem:[%s13982_s0 + $0x188] sm:$0xff]  ;;  %v14473_v49 = vld [vmem:[#allocation34_spill] sm:$0xff]  ;;  %v8305_v12 = vld [vmem:[%s13982_s0 + $0x190] sm:$0xff] }
 0x756   :  { %v6478_v4 = vadd.f32 %v8304_v34, %v14473_v49  ;;  %v14474_v19 = vld [vmem:[#allocation4_spill] sm:$0xff]  ;;  %v8306_v26 = vld [vmem:[%s13982_s0 + $0x198] sm:$0xff]  ;;  %6533 = vst.msk [vmem:[%s13989_s7 + $0x140] sm:$0xff] %vm1144_vm6, %v6469_v23  ;;  %6534 = vst.msk [vmem:[%s13989_s7 + $0x148] sm:$0xff] %vm1144_vm6, %v6470_v46 }
 0x757   :  { %v6479_v36 = vadd.f32 %v8305_v12, %v14474_v19  ;;  %v14475_v18 = vld [vmem:[#allocation12_spill] sm:$0xff]  ;;  %6535 = vst.msk [vmem:[%s13989_s7 + $0x150] sm:$0xff] %vm1144_vm6, %v6471_v44  ;;  %6536 = vst.msk [vmem:[%s13989_s7 + $0x158] sm:$0xff] %vm1144_vm6, %v6472_v17  ;;  %v8307_v9 = vld [vmem:[%s13982_s0 + $0x1a0] sm:$0xff] }
 0x758   :  { %v6480_v40 = vadd.f32 %v8306_v26, %v14475_v18  ;;  %v6481_v60 = vadd.f32 %v8307_v9, %v13424_v37  ;;  %v8308_v1 = vld [vmem:[%s13982_s0 + $0x1a8] sm:$0xff]  ;;  %v14476_v16 = vld [vmem:[#allocation28_spill] sm:$0xff]  ;;  %v8310_v14 = vld [vmem:[%s13982_s0 + $0x1b8] sm:$0xff]  ;;  %6537 = vst.msk [vmem:[%s13989_s7 + $0x160] sm:$0xff] %vm1144_vm6, %v6473_v32 }
 0x759   :  { %v6482_v55 = vadd.f32 %v8308_v1, %v14476_v16  ;;  %v8309_v25 = vld [vmem:[%s13982_s0 + $0x1b0] sm:$0xff]  ;;  %v6484_v7 = vadd.f32 %v8310_v14, %v13436_v15  ;;  %6538 = vst.msk [vmem:[%s13989_s7 + $0x168] sm:$0xff] %vm1144_vm6, %v6474_v35  ;;  %6539 = vst.msk [vmem:[%s13989_s7 + $0x170] sm:$0xff] %vm1144_vm6, %v6475_v38  ;;  %v8311_v37 = vld [vmem:[%s13982_s0 + $0x1c0] sm:$0xff] }
 0x75a   :  { %v6483_v59 = vadd.f32 %v8309_v25, %v13432_v42  ;;  %6540 = vst.msk [vmem:[%s13989_s7 + $0x178] sm:$0xff] %vm1144_vm6, %v6476_v63  ;;  %v6485_v42 = vadd.f32 %v8311_v37, %v13440_v52  ;;  %v8312_v15 = vld [vmem:[%s13982_s0 + $0x1c8] sm:$0xff]  ;;  %v8313_v43 = vld [vmem:[%s13982_s0 + $0x1d0] sm:$0xff]  ;;  %v8314_v27 = vld [vmem:[%s13982_s0 + $0x1d8] sm:$0xff] }
 0x75b   :  { %v6486_v41 = vadd.f32 %v8312_v15, %v13444_v48  ;;  %v6487_v30 = vadd.f32 %v8313_v43, %v13448_v13  ;;  %v14477_v33 = vld [vmem:[#allocation2_spill] sm:$0xff]  ;;  %6541 = vst.msk [vmem:[%s13989_s7 + $0x180] sm:$0xff] %vm1144_vm6, %v6477_v22  ;;  %6542 = vst.msk [vmem:[%s13989_s7 + $0x188] sm:$0xff] %vm1144_vm6, %v6478_v4  ;;  %v8316_v13 = vld [vmem:[%s13982_s0 + $0x1e8] sm:$0xff] }
 0x75c   :  { %v6488_v21 = vadd.f32 %v8314_v27, %v14477_v33  ;;  %6543 = vst.msk [vmem:[%s13989_s7 + $0x190] sm:$0xff] %vm1144_vm6, %v6479_v36  ;;  %6544 = vst.msk [vmem:[%s13989_s7 + $0x198] sm:$0xff] %vm1144_vm6, %v6480_v40  ;;  %v8315_v52 = vld [vmem:[%s13982_s0 + $0x1e0] sm:$0xff]  ;;  %v6490_v20 = vadd.f32 %v8316_v13, %v13460_v53  ;;  %v8317_v50 = vld [vmem:[%s13982_s0 + $0x1f0] sm:$0xff] }
 0x75d   :  { %v6489_v48 = vadd.f32 %v8315_v52, %v13456_v28  ;;  %v14478_v8 = vld [vmem:[#allocation9_spill] sm:$0xff]  ;;  %6545 = vst.msk [vmem:[%s13989_s7 + $0x1a0] sm:$0xff] %vm1144_vm6, %v6481_v60  ;;  %6546 = vst.msk [vmem:[%s13989_s7 + $0x1a8] sm:$0xff] %vm1144_vm6, %v6482_v55 }
 0x75e   :  { %v6491_v0 = vadd.f32 %v8317_v50, %v14478_v8  ;;  %v8318_v51 = vld [vmem:[%s13982_s0 + $0x1f8] sm:$0xff]  ;;  %6547 = vst.msk [vmem:[%s13989_s7 + $0x1b0] sm:$0xff] %vm1144_vm6, %v6483_v59  ;;  %6548 = vst.msk [vmem:[%s13989_s7 + $0x1b8] sm:$0xff] %vm1144_vm6, %v6484_v7 }
 0x75f   :  { %v6492_v2 = vadd.f32 %v8318_v51, %v13468_v57  ;;  %6549 = vst.msk [vmem:[%s13989_s7 + $0x1c0] sm:$0xff] %vm1144_vm6, %v6485_v42  ;;  %6550 = vst.msk [vmem:[%s13989_s7 + $0x1c8] sm:$0xff] %vm1144_vm6, %v6486_v41 }
 0x760   :  { %6551 = vst.msk [vmem:[%s13989_s7 + $0x1d0] sm:$0xff] %vm1144_vm6, %v6487_v30  ;;  %6552 = vst.msk [vmem:[%s13989_s7 + $0x1d8] sm:$0xff] %vm1144_vm6, %v6488_v21 }
 0x761   :  { %6553 = vst.msk [vmem:[%s13989_s7 + $0x1e0] sm:$0xff] %vm1144_vm6, %v6489_v48  ;;  %6554 = vst.msk [vmem:[%s13989_s7 + $0x1e8] sm:$0xff] %vm1144_vm6, %v6490_v20 }
 0x762   :  { %6555 = vst.msk [vmem:[%s13989_s7 + $0x1f0] sm:$0xff] %vm1144_vm6, %v6491_v0  ;;  %6556 = vst.msk [vmem:[%s13989_s7 + $0x1f8] sm:$0xff] %vm1144_vm6, %v6492_v2 }

</bundles_post_ra>
